<compile_context>
chip_gen: v5e
topology: v5e:2x2
jax: 0.10.0
libtpu: 0.0.40
codegen_flags: <defaults>
</compile_context>

<pallas_src>
import functools

import jax
import jax.numpy as jnp
from jax.experimental import pallas as pl
from jax.experimental.pallas import tpu as pltpu

_BN_EPS = 1e-5
# Tiny per-stage working sets (<2 MiB); 32 MiB scoped VMEM is safe on v5e/v6e/v7x.
_CP = pltpu.CompilerParams(vmem_limit_bytes=32 * 1024 * 1024)


def _nbytes(*arrs):
    return sum(int(a.size) * a.dtype.itemsize for a in arrs)


def _cost(flops, transcendentals, nbytes):
    return pl.CostEstimate(flops=int(flops), transcendentals=int(transcendentals),
                           bytes_accessed=int(nbytes))


# ---------------------------------------------------------------------------
# In-kernel helpers
# ---------------------------------------------------------------------------
def _bn_rows(y, g, b, eps):
    # y: (C, M) f32 ; g, b: (C, 1) f32.  Training-mode batch stats over axis=-1
    # (biased variance), single pass (var = E[y^2] - mean^2, clamped >= 0),
    # scale/shift folded into a single affine.
    inv_m = 1.0 / y.shape[-1]
    mean = jnp.sum(y, axis=-1, keepdims=True) * inv_m
    ex2 = jnp.sum(y * y, axis=-1, keepdims=True) * inv_m
    var = jnp.maximum(ex2 - mean * mean, 0.0)
    scale = jax.lax.rsqrt(var + eps) * g
    return y * scale + (b - mean * scale)


def _head_from_y(y, pool_ref, lw_ref, lb_ref, o_ref):
    # y: (C, M) block output; pool: (M, N) averaging matrix; lw: (ncls, C); lb: (ncls, 1).
    pooled = jnp.dot(y, pool_ref[...], preferred_element_type=jnp.float32)       # (C, N)
    logits = jnp.dot(lw_ref[...], pooled, preferred_element_type=jnp.float32) + lb_ref[...]
    o_ref[...] = jax.nn.sigmoid(logits)                                          # (ncls, N)


# ---------------------------------------------------------------------------
# Pallas kernels (each stage fully fused, single VMEM block, channel-major)
# ---------------------------------------------------------------------------
def _conv_bn_relu_kernel(p_ref, w_ref, g_ref, b_ref, o_ref, *, eps):
    y = jnp.dot(w_ref[...], p_ref[...], preferred_element_type=jnp.float32)
    o_ref[...] = jnp.maximum(_bn_rows(y, g_ref[...], b_ref[...], eps), 0.0)


def _conv_bn_relu_noise_kernel(p_ref, w_ref, g_ref, b_ref, n_ref, o_ref, *, eps):
    y = jnp.dot(w_ref[...], p_ref[...], preferred_element_type=jnp.float32)
    o_ref[...] = jnp.maximum(_bn_rows(y, g_ref[...], b_ref[...], eps), 0.0) + n_ref[...]


def _conv_bn_add_relu_kernel(p_ref, w_ref, g_ref, b_ref, r_ref, o_ref, *, eps):
    y = _bn_rows(jnp.dot(w_ref[...], p_ref[...], preferred_element_type=jnp.float32),
                 g_ref[...], b_ref[...], eps)
    o_ref[...] = jnp.maximum(y + r_ref[...], 0.0)


def _conv_bn_sc_add_relu_kernel(p_ref, w_ref, g_ref, b_ref,
                                sp_ref, sw_ref, sg_ref, sb_ref, o_ref, *, eps):
    y = _bn_rows(jnp.dot(w_ref[...], p_ref[...], preferred_element_type=jnp.float32),
                 g_ref[...], b_ref[...], eps)
    s = _bn_rows(jnp.dot(sw_ref[...], sp_ref[...], preferred_element_type=jnp.float32),
                 sg_ref[...], sb_ref[...], eps)
    o_ref[...] = jnp.maximum(y + s, 0.0)


def _conv_bn_add_relu_head_kernel(p_ref, w_ref, g_ref, b_ref, r_ref,
                                  pool_ref, lw_ref, lb_ref, o_ref, *, eps):
    y = _bn_rows(jnp.dot(w_ref[...], p_ref[...], preferred_element_type=jnp.float32),
                 g_ref[...], b_ref[...], eps)
    _head_from_y(jnp.maximum(y + r_ref[...], 0.0), pool_ref, lw_ref, lb_ref, o_ref)


def _conv_bn_sc_add_relu_head_kernel(p_ref, w_ref, g_ref, b_ref,
                                     sp_ref, sw_ref, sg_ref, sb_ref,
                                     pool_ref, lw_ref, lb_ref, o_ref, *, eps):
    y = _bn_rows(jnp.dot(w_ref[...], p_ref[...], preferred_element_type=jnp.float32),
                 g_ref[...], b_ref[...], eps)
    s = _bn_rows(jnp.dot(sw_ref[...], sp_ref[...], preferred_element_type=jnp.float32),
                 sg_ref[...], sb_ref[...], eps)
    _head_from_y(jnp.maximum(y + s, 0.0), pool_ref, lw_ref, lb_ref, o_ref)


def _max9_kernel(*refs):
    o_ref = refs[-1]
    y = refs[0][...]
    for r in refs[1:-1]:
        y = jnp.maximum(y, r[...])
    o_ref[...] = y


# ---------------------------------------------------------------------------
# Host-side glue (channel-major transposed im2col + pallas_call wrappers)
# ---------------------------------------------------------------------------
def _patches_t(x_t, kh, kw, stride, pad, pad_value=0.0):
    """x_t: (C, N, H, W) -> ((kh*kw*C, N*Ho*Wo) bf16 transposed im2col, (N, Ho, Wo))."""
    if pad:
        x_t = jnp.pad(x_t, ((0, 0), (0, 0), (pad, pad), (pad, pad)),
                      constant_values=pad_value)
    c, n, hp, wp = x_t.shape
    ho = (hp - kh) // stride + 1
    wo = (wp - kw) // stride + 1
    taps = [x_t[:, :, i:i + stride * ho:stride, j:j + stride * wo:stride]
            for i in range(kh) for j in range(kw)]
    p = jnp.stack(taps, axis=0).reshape(kh * kw * c, n * ho * wo)
    return p.astype(jnp.bfloat16), (n, ho, wo)


def _w2d(w):
    # weight stored (Cout, kh, kw, Cin) -> (Cout, kh*kw*Cin), matching patch row order.
    return w.reshape(w.shape[0], -1).astype(jnp.bfloat16)


def _pool_matrix(n, s):
    # (n*s, n) averaging matrix: column n averages that image's s spatial positions.
    return jnp.repeat(jnp.eye(n, dtype=jnp.float32) / float(s), s, axis=0)


def conv_bn_relu(x_t, w, g, b, *, stride, pad, eps=_BN_EPS):
    cout = w.shape[0]
    p, (n, ho, wo) = _patches_t(x_t, w.shape[1], w.shape[2], stride, pad)
    k, m = p.shape
    w2 = _w2d(w)
    out = pl.pallas_call(
        functools.partial(_conv_bn_relu_kernel, eps=eps),
        out_shape=jax.ShapeDtypeStruct((cout, m), jnp.float32),
        compiler_params=_CP,
        cost_estimate=_cost(2 * cout * k * m + 7 * cout * m, cout,
                            _nbytes(p, w2, g, b) + 4 * cout * m),
    )(p, w2, g, b)
    return out.reshape(cout, n, ho, wo)


def maxpool_3x3_s2_p1(x_t):
    c, n, h, w = x_t.shape
    xp = jnp.pad(x_t, ((0, 0), (0, 0), (1, 1), (1, 1)), constant_values=-jnp.inf)
    ho = (h + 2 - 3) // 2 + 1
    wo = (w + 2 - 3) // 2 + 1
    m = n * ho * wo
    taps = [xp[:, :, i:i + 2 * ho:2, j:j + 2 * wo:2].reshape(c, m)
            for i in range(3) for j in range(3)]
    out = pl.pallas_call(
        _max9_kernel,
        out_shape=jax.ShapeDtypeStruct((c, m), jnp.float32),
        compiler_params=_CP,
        cost_estimate=_cost(8 * c * m, 0, 10 * 4 * c * m),
    )(*taps)
    return out.reshape(c, n, ho, wo)


def noise_basic_block(x_t, p, noise_key, level, head=None, eps=_BN_EPS):
    stride = p['stride']
    planes = p['conv1_w'].shape[0]

    # --- conv1 3x3/s + BN + ReLU + additive uniform noise : one fused kernel ---
    p1, (n, ho, wo) = _patches_t(x_t, 3, 3, stride, 1)
    m = n * ho * wo
    # TODO(synk): on-chip pltpu PRNG has no interpret/CPU lowering; noise is drawn
    #   host-side (uniform in [-level, level]), applied after ReLU, unconditionally.
    noise = jax.random.uniform(noise_key, (planes, m), jnp.float32, -level, level)
    w1 = _w2d(p['conv1_w'])
    y1 = pl.pallas_call(
        functools.partial(_conv_bn_relu_noise_kernel, eps=eps),
        out_shape=jax.ShapeDtypeStruct((planes, m), jnp.float32),
        compiler_params=_CP,
        cost_estimate=_cost(2 * planes * p1.shape[0] * m + 8 * planes * m, planes,
                            _nbytes(p1, w1, noise) + 8 * planes * m),
    )(p1, w1, p['bn1_g'], p['bn1_b'], noise)

    # --- conv2 3x3/s1 + BN + (1x1 shortcut conv + BN | identity) + add + ReLU
    #     (+ fused avgpool + linear + sigmoid head for the final block) ---
    p2, _ = _patches_t(y1.reshape(planes, n, ho, wo), 3, 3, 1, 1)
    w2 = _w2d(p['conv2_w'])
    gemm_flops = 2 * planes * p2.shape[0] * m

    if 'sc_w' in p:
        sp, _ = _patches_t(x_t, 1, 1, stride, 0)
        sw = _w2d(p['sc_w'])
        args = (p2, w2, p['bn2_g'], p['bn2_b'], sp, sw, p['sc_g'], p['sc_b'])
        kern, kern_head = _conv_bn_sc_add_relu_kernel, _conv_bn_sc_add_relu_head_kernel
        flops = gemm_flops + 2 * planes * sp.shape[0] * m + 12 * planes * m
        nbytes = _nbytes(p2, w2, sp, sw) + 4 * planes * m
        trans = 2 * planes
    else:
        res = x_t.reshape(planes, m)   # stride == 1 and in_planes == planes here
        args = (p2, w2, p['bn2_g'], p['bn2_b'], res)
        kern, kern_head = _conv_bn_add_relu_kernel, _conv_bn_add_relu_head_kernel
        flops = gemm_flops + 8 * planes * m
        nbytes = _nbytes(p2, w2, res) + 4 * planes * m
        trans = planes

    if head is None:
        out = pl.pallas_call(
            functools.partial(kern, eps=eps),
            out_shape=jax.ShapeDtypeStruct((planes, m), jnp.float32),
            compiler_params=_CP,
            cost_estimate=_cost(flops, trans, nbytes),
        )(*args)
        return out.reshape(planes, n, ho, wo)

    # Final block: fuse global avgpool + linear + sigmoid; only (nclasses, N) leaves.
    # TODO(synk): equivalent to nn.AvgPool2d(pool) only when pool == spatial size (true here).
    lin_w, lin_b = head
    pool = _pool_matrix(n, ho * wo)
    out = pl.pallas_call(
        functools.partial(kern_head, eps=eps),
        out_shape=jax.ShapeDtypeStruct((lin_w.shape[0], n), jnp.float32),
        compiler_params=_CP,
        cost_estimate=_cost(flops + 2 * planes * m + 2 * planes * n, trans + n,
                            nbytes + _nbytes(pool, lin_w, lin_b)),
    )(*args, pool, lin_w, lin_b)
    return out


def noise_resnet_forward(x_nchw, params, level, noise_key):
    # NCHW -> channel-major (C, N, H, W); activations stay channel-major so the big
    # N*H*W dim sits on TPU lanes (lane-dense stores, full MXU result columns).
    x_t = jnp.transpose(x_nchw, (1, 0, 2, 3)).astype(jnp.float32)

    # pre_layers: conv7x7/s2 + BN + ReLU (fused) ; maxpool 3x3/s2/p1 (9-tap max kernel)
    y_t = conv_bn_relu(x_t, params['pre_conv_w'], params['pre_bn_g'],
                       params['pre_bn_b'], stride=2, pad=3)
    y_t = maxpool_3x3_s2_p1(y_t)

    # layer1..layer4 : 2 fused kernels per block; head fused into the last block.
    blocks = [blk for layer in params['layers'] for blk in layer]
    keys = jax.random.split(noise_key, len(blocks))
    for i, blk in enumerate(blocks[:-1]):
        y_t = noise_basic_block(y_t, blk, keys[i], level)
    out = noise_basic_block(y_t, blocks[-1], keys[-1], level,
                            head=(params['lin_w'], params['lin_b']))
    # x9 = sigmoid(x8.view(batch)) ; requires nclasses == 1.
    return out.reshape(-1)


# ---------------------------------------------------------------------------
# Deterministic parameter init (conv weights stored as (Cout, kh, kw, Cin))
# ---------------------------------------------------------------------------
def _conv_init(key, cout, kh, kw, cin):
    fan_in = kh * kw * cin
    return jax.random.normal(key, (cout, kh, kw, cin), jnp.float32) * jnp.sqrt(2.0 / fan_in)


def init_params(key, nchannels, nfilters, nblocks, nclasses):
    keys = iter(jax.random.split(key, 256))
    params = {
        'pre_conv_w': _conv_init(next(keys), nfilters, 7, 7, nchannels),
        'pre_bn_g': jnp.ones((nfilters, 1), jnp.float32),
        'pre_bn_b': jnp.zeros((nfilters, 1), jnp.float32),
    }
    in_planes = nfilters
    layers = []
    for li, (mult, nb) in enumerate(zip((1, 2, 4, 8), nblocks)):
        planes = mult * nfilters
        blocks = []
        for bi in range(nb):
            stride = (2 if li > 0 else 1) if bi == 0 else 1
            blk = {
                'stride': stride,
                'conv1_w': _conv_init(next(keys), planes, 3, 3, in_planes),
                'bn1_g': jnp.ones((planes, 1), jnp.float32),
                'bn1_b': jnp.zeros((planes, 1), jnp.float32),
                'conv2_w': _conv_init(next(keys), planes, 3, 3, planes),
                'bn2_g': jnp.ones((planes, 1), jnp.float32),
                'bn2_b': jnp.zeros((planes, 1), jnp.float32),
            }
            if stride != 1 or in_planes != planes:  # block.expansion == 1
                blk['sc_w'] = _conv_init(next(keys), planes, 1, 1, in_planes)
                blk['sc_g'] = jnp.ones((planes, 1), jnp.float32)
                blk['sc_b'] = jnp.zeros((planes, 1), jnp.float32)
            in_planes = planes
            blocks.append(blk)
        layers.append(blocks)
    params['layers'] = layers
    lin_in = 8 * nfilters  # 8 * nfilters * block.expansion
    kw_, kb_ = jax.random.split(next(keys))
    bound = 1.0 / float(lin_in) ** 0.5
    params['lin_w'] = jax.random.uniform(kw_, (nclasses, lin_in), jnp.float32, -bound, bound)
    params['lin_b'] = jax.random.uniform(kb_, (nclasses, 1), jnp.float32, -bound, bound)
    return params


# ---------------------------------------------------------------------------
if __name__ == "__main__":
    # NoiseResNet(block=NoiseBasicBlock, nblocks=[1,1,1,1], nchannels=3,
    #             nfilters=8, nclasses=1, pool=2, level=0.1), input 64x64.
    nchannels, nfilters, nclasses, level = 3, 8, 1, 0.1
    nblocks = (1, 1, 1, 1)

    params = init_params(jax.random.PRNGKey(7), nchannels, nfilters, nblocks, nclasses)
    x = jax.random.normal(jax.random.PRNGKey(0), (2, nchannels, 64, 64), jnp.float32)

    fwd = jax.jit(lambda inp: noise_resnet_forward(inp, params, level,
                                                   jax.random.PRNGKey(42)))
    out = fwd(x)
    jax.block_until_ready(out)

    assert out.shape == (2,), out.shape
    assert bool(jnp.all(jnp.isfinite(out)))
    assert bool(jnp.all((out > 0.0) & (out < 1.0)))  # sigmoid output
    print("KERNEL_OK")
</pallas_src>

<mosaic_0001>
module attributes {stable_mosaic.version = 11 : i64} {
  func.func @_conv_bn_relu_kernel(%arg0: memref<147x2048xbf16, #tpu.memory_space<vmem>>, %arg1: memref<8x147xbf16, #tpu.memory_space<vmem>>, %arg2: memref<8x1xf32, #tpu.memory_space<vmem>>, %arg3: memref<8x1xf32, #tpu.memory_space<vmem>>, %arg4: memref<8x2048xf32, #tpu.memory_space<vmem>>) attributes {dimension_semantics = [], scalar_prefetch = 0 : i64, scratch_operands = 0 : i64, tpu.core_type = #tpu.core_type<tc>} {
    %c0 = arith.constant 0 : index
    %c0_0 = arith.constant 0 : index
    %0 = vector.load %arg1[%c0, %c0_0] : memref<8x147xbf16, #tpu.memory_space<vmem>>, vector<8x147xbf16>
    %c0_1 = arith.constant 0 : index
    %c0_2 = arith.constant 0 : index
    %1 = vector.load %arg0[%c0_1, %c0_2] : memref<147x2048xbf16, #tpu.memory_space<vmem>>, vector<147x2048xbf16>
    %cst = arith.constant dense<0.000000e+00> : vector<8x2048xf32>
    %2 = tpu.matmul %0, %1, %cst {dimension_numbers = #tpu.dot_dimension_numbers<[1], [0], [0], [1], [0, 0, 1, 1], [], []>} : vector<8x147xbf16>, vector<147x2048xbf16>, vector<8x2048xf32> -> vector<8x2048xf32>
    %c0_3 = arith.constant 0 : index
    %c0_4 = arith.constant 0 : index
    %3 = vector.load %arg2[%c0_3, %c0_4] : memref<8x1xf32, #tpu.memory_space<vmem>>, vector<8x1xf32>
    %c0_5 = arith.constant 0 : index
    %c0_6 = arith.constant 0 : index
    %4 = vector.load %arg3[%c0_5, %c0_6] : memref<8x1xf32, #tpu.memory_space<vmem>>, vector<8x1xf32>
    %cst_7 = arith.constant dense<0.000000e+00> : vector<8xf32>
    %5 = vector.multi_reduction <add>, %2, %cst_7 [1] : vector<8x2048xf32> to vector<8xf32>
    %6 = vector.shape_cast %5 : vector<8xf32> to vector<8x1xf32>
    %cst_8 = arith.constant 4.8828125E-4 : f32
    %7 = vector.broadcast %cst_8 : f32 to vector<8x1xf32>
    %8 = arith.mulf %6, %7 : vector<8x1xf32>
    %9 = arith.mulf %2, %2 : vector<8x2048xf32>
    %cst_9 = arith.constant dense<0.000000e+00> : vector<8xf32>
    %10 = vector.multi_reduction <add>, %9, %cst_9 [1] : vector<8x2048xf32> to vector<8xf32>
    %11 = vector.shape_cast %10 : vector<8xf32> to vector<8x1xf32>
    %cst_10 = arith.constant 4.8828125E-4 : f32
    %12 = vector.broadcast %cst_10 : f32 to vector<8x1xf32>
    %13 = arith.mulf %11, %12 : vector<8x1xf32>
    %14 = arith.mulf %8, %8 : vector<8x1xf32>
    %15 = arith.subf %13, %14 : vector<8x1xf32>
    %cst_11 = arith.constant 0.000000e+00 : f32
    %16 = vector.broadcast %cst_11 : f32 to vector<8x1xf32>
    %17 = arith.maximumf %15, %16 : vector<8x1xf32>
    %cst_12 = arith.constant 9.99999974E-6 : f32
    %18 = vector.broadcast %cst_12 : f32 to vector<8x1xf32>
    %19 = arith.addf %17, %18 : vector<8x1xf32>
    %20 = math.rsqrt %19 : vector<8x1xf32>
    %21 = arith.mulf %20, %3 : vector<8x1xf32>
    %22 = vector.broadcast %21 : vector<8x1xf32> to vector<8x2048xf32>
    %23 = arith.mulf %2, %22 : vector<8x2048xf32>
    %24 = arith.mulf %8, %21 : vector<8x1xf32>
    %25 = arith.subf %4, %24 : vector<8x1xf32>
    %26 = vector.broadcast %25 : vector<8x1xf32> to vector<8x2048xf32>
    %27 = arith.addf %23, %26 : vector<8x2048xf32>
    %cst_13 = arith.constant 0.000000e+00 : f32
    %28 = vector.broadcast %cst_13 : f32 to vector<8x2048xf32>
    %29 = arith.maximumf %27, %28 : vector<8x2048xf32>
    %c0_14 = arith.constant 0 : index
    %c0_15 = arith.constant 0 : index
    %30 = vector.load %arg4[%c0_14, %c0_15] : memref<8x2048xf32, #tpu.memory_space<vmem>>, vector<8x2048xf32>
    tpu.vector_store %arg4[%c0_14, %c0_15], %29 {strides = array<i32>} : memref<8x2048xf32, #tpu.memory_space<vmem>>, vector<8x2048xf32>,
    return
  }
}

module attributes {stable_mosaic.version = 11 : i64} {
  func.func @_max9_kernel(%arg0: memref<8x512xf32, #tpu.memory_space<vmem>>, %arg1: memref<8x512xf32, #tpu.memory_space<vmem>>, %arg2: memref<8x512xf32, #tpu.memory_space<vmem>>, %arg3: memref<8x512xf32, #tpu.memory_space<vmem>>, %arg4: memref<8x512xf32, #tpu.memory_space<vmem>>, %arg5: memref<8x512xf32, #tpu.memory_space<vmem>>, %arg6: memref<8x512xf32, #tpu.memory_space<vmem>>, %arg7: memref<8x512xf32, #tpu.memory_space<vmem>>, %arg8: memref<8x512xf32, #tpu.memory_space<vmem>>, %arg9: memref<8x512xf32, #tpu.memory_space<vmem>>) attributes {dimension_semantics = [], scalar_prefetch = 0 : i64, scratch_operands = 0 : i64, tpu.core_type = #tpu.core_type<tc>} {
    %c0 = arith.constant 0 : index
    %c0_0 = arith.constant 0 : index
    %0 = vector.load %arg0[%c0, %c0_0] : memref<8x512xf32, #tpu.memory_space<vmem>>, vector<8x512xf32>
    %c0_1 = arith.constant 0 : index
    %c0_2 = arith.constant 0 : index
    %1 = vector.load %arg1[%c0_1, %c0_2] : memref<8x512xf32, #tpu.memory_space<vmem>>, vector<8x512xf32>
    %2 = arith.maximumf %0, %1 : vector<8x512xf32>
    %c0_3 = arith.constant 0 : index
    %c0_4 = arith.constant 0 : index
    %3 = vector.load %arg2[%c0_3, %c0_4] : memref<8x512xf32, #tpu.memory_space<vmem>>, vector<8x512xf32>
    %4 = arith.maximumf %2, %3 : vector<8x512xf32>
    %c0_5 = arith.constant 0 : index
    %c0_6 = arith.constant 0 : index
    %5 = vector.load %arg3[%c0_5, %c0_6] : memref<8x512xf32, #tpu.memory_space<vmem>>, vector<8x512xf32>
    %6 = arith.maximumf %4, %5 : vector<8x512xf32>
    %c0_7 = arith.constant 0 : index
    %c0_8 = arith.constant 0 : index
    %7 = vector.load %arg4[%c0_7, %c0_8] : memref<8x512xf32, #tpu.memory_space<vmem>>, vector<8x512xf32>
    %8 = arith.maximumf %6, %7 : vector<8x512xf32>
    %c0_9 = arith.constant 0 : index
    %c0_10 = arith.constant 0 : index
    %9 = vector.load %arg5[%c0_9, %c0_10] : memref<8x512xf32, #tpu.memory_space<vmem>>, vector<8x512xf32>
    %10 = arith.maximumf %8, %9 : vector<8x512xf32>
    %c0_11 = arith.constant 0 : index
    %c0_12 = arith.constant 0 : index
    %11 = vector.load %arg6[%c0_11, %c0_12] : memref<8x512xf32, #tpu.memory_space<vmem>>, vector<8x512xf32>
    %12 = arith.maximumf %10, %11 : vector<8x512xf32>
    %c0_13 = arith.constant 0 : index
    %c0_14 = arith.constant 0 : index
    %13 = vector.load %arg7[%c0_13, %c0_14] : memref<8x512xf32, #tpu.memory_space<vmem>>, vector<8x512xf32>
    %14 = arith.maximumf %12, %13 : vector<8x512xf32>
    %c0_15 = arith.constant 0 : index
    %c0_16 = arith.constant 0 : index
    %15 = vector.load %arg8[%c0_15, %c0_16] : memref<8x512xf32, #tpu.memory_space<vmem>>, vector<8x512xf32>
    %16 = arith.maximumf %14, %15 : vector<8x512xf32>
    %c0_17 = arith.constant 0 : index
    %c0_18 = arith.constant 0 : index
    %17 = vector.load %arg9[%c0_17, %c0_18] : memref<8x512xf32, #tpu.memory_space<vmem>>, vector<8x512xf32>
    tpu.vector_store %arg9[%c0_17, %c0_18], %16 {strides = array<i32>} : memref<8x512xf32, #tpu.memory_space<vmem>>, vector<8x512xf32>,
    return
  }
}

module attributes {stable_mosaic.version = 11 : i64} {
  func.func @_conv_bn_relu_noise_kernel(%arg0: memref<72x512xbf16, #tpu.memory_space<vmem>>, %arg1: memref<8x72xbf16, #tpu.memory_space<vmem>>, %arg2: memref<8x1xf32, #tpu.memory_space<vmem>>, %arg3: memref<8x1xf32, #tpu.memory_space<vmem>>, %arg4: memref<8x512xf32, #tpu.memory_space<vmem>>, %arg5: memref<8x512xf32, #tpu.memory_space<vmem>>) attributes {dimension_semantics = [], scalar_prefetch = 0 : i64, scratch_operands = 0 : i64, tpu.core_type = #tpu.core_type<tc>} {
    %c0 = arith.constant 0 : index
    %c0_0 = arith.constant 0 : index
    %0 = vector.load %arg1[%c0, %c0_0] : memref<8x72xbf16, #tpu.memory_space<vmem>>, vector<8x72xbf16>
    %c0_1 = arith.constant 0 : index
    %c0_2 = arith.constant 0 : index
    %1 = vector.load %arg0[%c0_1, %c0_2] : memref<72x512xbf16, #tpu.memory_space<vmem>>, vector<72x512xbf16>
    %cst = arith.constant dense<0.000000e+00> : vector<8x512xf32>
    %2 = tpu.matmul %0, %1, %cst {dimension_numbers = #tpu.dot_dimension_numbers<[1], [0], [0], [1], [0, 0, 1, 1], [], []>} : vector<8x72xbf16>, vector<72x512xbf16>, vector<8x512xf32> -> vector<8x512xf32>
    %c0_3 = arith.constant 0 : index
    %c0_4 = arith.constant 0 : index
    %3 = vector.load %arg2[%c0_3, %c0_4] : memref<8x1xf32, #tpu.memory_space<vmem>>, vector<8x1xf32>
    %c0_5 = arith.constant 0 : index
    %c0_6 = arith.constant 0 : index
    %4 = vector.load %arg3[%c0_5, %c0_6] : memref<8x1xf32, #tpu.memory_space<vmem>>, vector<8x1xf32>
    %cst_7 = arith.constant dense<0.000000e+00> : vector<8xf32>
    %5 = vector.multi_reduction <add>, %2, %cst_7 [1] : vector<8x512xf32> to vector<8xf32>
    %6 = vector.shape_cast %5 : vector<8xf32> to vector<8x1xf32>
    %cst_8 = arith.constant 0.001953125 : f32
    %7 = vector.broadcast %cst_8 : f32 to vector<8x1xf32>
    %8 = arith.mulf %6, %7 : vector<8x1xf32>
    %9 = arith.mulf %2, %2 : vector<8x512xf32>
    %cst_9 = arith.constant dense<0.000000e+00> : vector<8xf32>
    %10 = vector.multi_reduction <add>, %9, %cst_9 [1] : vector<8x512xf32> to vector<8xf32>
    %11 = vector.shape_cast %10 : vector<8xf32> to vector<8x1xf32>
    %cst_10 = arith.constant 0.001953125 : f32
    %12 = vector.broadcast %cst_10 : f32 to vector<8x1xf32>
    %13 = arith.mulf %11, %12 : vector<8x1xf32>
    %14 = arith.mulf %8, %8 : vector<8x1xf32>
    %15 = arith.subf %13, %14 : vector<8x1xf32>
    %cst_11 = arith.constant 0.000000e+00 : f32
    %16 = vector.broadcast %cst_11 : f32 to vector<8x1xf32>
    %17 = arith.maximumf %15, %16 : vector<8x1xf32>
    %cst_12 = arith.constant 9.99999974E-6 : f32
    %18 = vector.broadcast %cst_12 : f32 to vector<8x1xf32>
    %19 = arith.addf %17, %18 : vector<8x1xf32>
    %20 = math.rsqrt %19 : vector<8x1xf32>
    %21 = arith.mulf %20, %3 : vector<8x1xf32>
    %22 = vector.broadcast %21 : vector<8x1xf32> to vector<8x512xf32>
    %23 = arith.mulf %2, %22 : vector<8x512xf32>
    %24 = arith.mulf %8, %21 : vector<8x1xf32>
    %25 = arith.subf %4, %24 : vector<8x1xf32>
    %26 = vector.broadcast %25 : vector<8x1xf32> to vector<8x512xf32>
    %27 = arith.addf %23, %26 : vector<8x512xf32>
    %cst_13 = arith.constant 0.000000e+00 : f32
    %28 = vector.broadcast %cst_13 : f32 to vector<8x512xf32>
    %29 = arith.maximumf %27, %28 : vector<8x512xf32>
    %c0_14 = arith.constant 0 : index
    %c0_15 = arith.constant 0 : index
    %30 = vector.load %arg4[%c0_14, %c0_15] : memref<8x512xf32, #tpu.memory_space<vmem>>, vector<8x512xf32>
    %31 = arith.addf %29, %30 : vector<8x512xf32>
    %c0_16 = arith.constant 0 : index
    %c0_17 = arith.constant 0 : index
    %32 = vector.load %arg5[%c0_16, %c0_17] : memref<8x512xf32, #tpu.memory_space<vmem>>, vector<8x512xf32>
    tpu.vector_store %arg5[%c0_16, %c0_17], %31 {strides = array<i32>} : memref<8x512xf32, #tpu.memory_space<vmem>>, vector<8x512xf32>,
    return
  }
}

module attributes {stable_mosaic.version = 11 : i64} {
  func.func @_conv_bn_add_relu_kernel(%arg0: memref<72x512xbf16, #tpu.memory_space<vmem>>, %arg1: memref<8x72xbf16, #tpu.memory_space<vmem>>, %arg2: memref<8x1xf32, #tpu.memory_space<vmem>>, %arg3: memref<8x1xf32, #tpu.memory_space<vmem>>, %arg4: memref<8x512xf32, #tpu.memory_space<vmem>>, %arg5: memref<8x512xf32, #tpu.memory_space<vmem>>) attributes {dimension_semantics = [], scalar_prefetch = 0 : i64, scratch_operands = 0 : i64, tpu.core_type = #tpu.core_type<tc>} {
    %c0 = arith.constant 0 : index
    %c0_0 = arith.constant 0 : index
    %0 = vector.load %arg1[%c0, %c0_0] : memref<8x72xbf16, #tpu.memory_space<vmem>>, vector<8x72xbf16>
    %c0_1 = arith.constant 0 : index
    %c0_2 = arith.constant 0 : index
    %1 = vector.load %arg0[%c0_1, %c0_2] : memref<72x512xbf16, #tpu.memory_space<vmem>>, vector<72x512xbf16>
    %cst = arith.constant dense<0.000000e+00> : vector<8x512xf32>
    %2 = tpu.matmul %0, %1, %cst {dimension_numbers = #tpu.dot_dimension_numbers<[1], [0], [0], [1], [0, 0, 1, 1], [], []>} : vector<8x72xbf16>, vector<72x512xbf16>, vector<8x512xf32> -> vector<8x512xf32>
    %c0_3 = arith.constant 0 : index
    %c0_4 = arith.constant 0 : index
    %3 = vector.load %arg2[%c0_3, %c0_4] : memref<8x1xf32, #tpu.memory_space<vmem>>, vector<8x1xf32>
    %c0_5 = arith.constant 0 : index
    %c0_6 = arith.constant 0 : index
    %4 = vector.load %arg3[%c0_5, %c0_6] : memref<8x1xf32, #tpu.memory_space<vmem>>, vector<8x1xf32>
    %cst_7 = arith.constant dense<0.000000e+00> : vector<8xf32>
    %5 = vector.multi_reduction <add>, %2, %cst_7 [1] : vector<8x512xf32> to vector<8xf32>
    %6 = vector.shape_cast %5 : vector<8xf32> to vector<8x1xf32>
    %cst_8 = arith.constant 0.001953125 : f32
    %7 = vector.broadcast %cst_8 : f32 to vector<8x1xf32>
    %8 = arith.mulf %6, %7 : vector<8x1xf32>
    %9 = arith.mulf %2, %2 : vector<8x512xf32>
    %cst_9 = arith.constant dense<0.000000e+00> : vector<8xf32>
    %10 = vector.multi_reduction <add>, %9, %cst_9 [1] : vector<8x512xf32> to vector<8xf32>
    %11 = vector.shape_cast %10 : vector<8xf32> to vector<8x1xf32>
    %cst_10 = arith.constant 0.001953125 : f32
    %12 = vector.broadcast %cst_10 : f32 to vector<8x1xf32>
    %13 = arith.mulf %11, %12 : vector<8x1xf32>
    %14 = arith.mulf %8, %8 : vector<8x1xf32>
    %15 = arith.subf %13, %14 : vector<8x1xf32>
    %cst_11 = arith.constant 0.000000e+00 : f32
    %16 = vector.broadcast %cst_11 : f32 to vector<8x1xf32>
    %17 = arith.maximumf %15, %16 : vector<8x1xf32>
    %cst_12 = arith.constant 9.99999974E-6 : f32
    %18 = vector.broadcast %cst_12 : f32 to vector<8x1xf32>
    %19 = arith.addf %17, %18 : vector<8x1xf32>
    %20 = math.rsqrt %19 : vector<8x1xf32>
    %21 = arith.mulf %20, %3 : vector<8x1xf32>
    %22 = vector.broadcast %21 : vector<8x1xf32> to vector<8x512xf32>
    %23 = arith.mulf %2, %22 : vector<8x512xf32>
    %24 = arith.mulf %8, %21 : vector<8x1xf32>
    %25 = arith.subf %4, %24 : vector<8x1xf32>
    %26 = vector.broadcast %25 : vector<8x1xf32> to vector<8x512xf32>
    %27 = arith.addf %23, %26 : vector<8x512xf32>
    %c0_13 = arith.constant 0 : index
    %c0_14 = arith.constant 0 : index
    %28 = vector.load %arg4[%c0_13, %c0_14] : memref<8x512xf32, #tpu.memory_space<vmem>>, vector<8x512xf32>
    %29 = arith.addf %27, %28 : vector<8x512xf32>
    %cst_15 = arith.constant 0.000000e+00 : f32
    %30 = vector.broadcast %cst_15 : f32 to vector<8x512xf32>
    %31 = arith.maximumf %29, %30 : vector<8x512xf32>
    %c0_16 = arith.constant 0 : index
    %c0_17 = arith.constant 0 : index
    %32 = vector.load %arg5[%c0_16, %c0_17] : memref<8x512xf32, #tpu.memory_space<vmem>>, vector<8x512xf32>
    tpu.vector_store %arg5[%c0_16, %c0_17], %31 {strides = array<i32>} : memref<8x512xf32, #tpu.memory_space<vmem>>, vector<8x512xf32>,
    return
  }
}

module attributes {stable_mosaic.version = 11 : i64} {
  func.func @_conv_bn_relu_noise_kernel(%arg0: memref<72x128xbf16, #tpu.memory_space<vmem>>, %arg1: memref<16x72xbf16, #tpu.memory_space<vmem>>, %arg2: memref<16x1xf32, #tpu.memory_space<vmem>>, %arg3: memref<16x1xf32, #tpu.memory_space<vmem>>, %arg4: memref<16x128xf32, #tpu.memory_space<vmem>>, %arg5: memref<16x128xf32, #tpu.memory_space<vmem>>) attributes {dimension_semantics = [], scalar_prefetch = 0 : i64, scratch_operands = 0 : i64, tpu.core_type = #tpu.core_type<tc>} {
    %c0 = arith.constant 0 : index
    %c0_0 = arith.constant 0 : index
    %0 = vector.load %arg1[%c0, %c0_0] : memref<16x72xbf16, #tpu.memory_space<vmem>>, vector<16x72xbf16>
    %c0_1 = arith.constant 0 : index
    %c0_2 = arith.constant 0 : index
    %1 = vector.load %arg0[%c0_1, %c0_2] : memref<72x128xbf16, #tpu.memory_space<vmem>>, vector<72x128xbf16>
    %cst = arith.constant dense<0.000000e+00> : vector<16x128xf32>
    %2 = tpu.matmul %0, %1, %cst {dimension_numbers = #tpu.dot_dimension_numbers<[1], [0], [0], [1], [0, 0, 1, 1], [], []>} : vector<16x72xbf16>, vector<72x128xbf16>, vector<16x128xf32> -> vector<16x128xf32>
    %c0_3 = arith.constant 0 : index
    %c0_4 = arith.constant 0 : index
    %3 = vector.load %arg2[%c0_3, %c0_4] : memref<16x1xf32, #tpu.memory_space<vmem>>, vector<16x1xf32>
    %c0_5 = arith.constant 0 : index
    %c0_6 = arith.constant 0 : index
    %4 = vector.load %arg3[%c0_5, %c0_6] : memref<16x1xf32, #tpu.memory_space<vmem>>, vector<16x1xf32>
    %cst_7 = arith.constant dense<0.000000e+00> : vector<16xf32>
    %5 = vector.multi_reduction <add>, %2, %cst_7 [1] : vector<16x128xf32> to vector<16xf32>
    %6 = vector.shape_cast %5 : vector<16xf32> to vector<16x1xf32>
    %cst_8 = arith.constant 7.812500e-03 : f32
    %7 = vector.broadcast %cst_8 : f32 to vector<16x1xf32>
    %8 = arith.mulf %6, %7 : vector<16x1xf32>
    %9 = arith.mulf %2, %2 : vector<16x128xf32>
    %cst_9 = arith.constant dense<0.000000e+00> : vector<16xf32>
    %10 = vector.multi_reduction <add>, %9, %cst_9 [1] : vector<16x128xf32> to vector<16xf32>
    %11 = vector.shape_cast %10 : vector<16xf32> to vector<16x1xf32>
    %cst_10 = arith.constant 7.812500e-03 : f32
    %12 = vector.broadcast %cst_10 : f32 to vector<16x1xf32>
    %13 = arith.mulf %11, %12 : vector<16x1xf32>
    %14 = arith.mulf %8, %8 : vector<16x1xf32>
    %15 = arith.subf %13, %14 : vector<16x1xf32>
    %cst_11 = arith.constant 0.000000e+00 : f32
    %16 = vector.broadcast %cst_11 : f32 to vector<16x1xf32>
    %17 = arith.maximumf %15, %16 : vector<16x1xf32>
    %cst_12 = arith.constant 9.99999974E-6 : f32
    %18 = vector.broadcast %cst_12 : f32 to vector<16x1xf32>
    %19 = arith.addf %17, %18 : vector<16x1xf32>
    %20 = math.rsqrt %19 : vector<16x1xf32>
    %21 = arith.mulf %20, %3 : vector<16x1xf32>
    %22 = vector.broadcast %21 : vector<16x1xf32> to vector<16x128xf32>
    %23 = arith.mulf %2, %22 : vector<16x128xf32>
    %24 = arith.mulf %8, %21 : vector<16x1xf32>
    %25 = arith.subf %4, %24 : vector<16x1xf32>
    %26 = vector.broadcast %25 : vector<16x1xf32> to vector<16x128xf32>
    %27 = arith.addf %23, %26 : vector<16x128xf32>
    %cst_13 = arith.constant 0.000000e+00 : f32
    %28 = vector.broadcast %cst_13 : f32 to vector<16x128xf32>
    %29 = arith.maximumf %27, %28 : vector<16x128xf32>
    %c0_14 = arith.constant 0 : index
    %c0_15 = arith.constant 0 : index
    %30 = vector.load %arg4[%c0_14, %c0_15] : memref<16x128xf32, #tpu.memory_space<vmem>>, vector<16x128xf32>
    %31 = arith.addf %29, %30 : vector<16x128xf32>
    %c0_16 = arith.constant 0 : index
    %c0_17 = arith.constant 0 : index
    %32 = vector.load %arg5[%c0_16, %c0_17] : memref<16x128xf32, #tpu.memory_space<vmem>>, vector<16x128xf32>
    tpu.vector_store %arg5[%c0_16, %c0_17], %31 {strides = array<i32>} : memref<16x128xf32, #tpu.memory_space<vmem>>, vector<16x128xf32>,
    return
  }
}

module attributes {stable_mosaic.version = 11 : i64} {
  func.func @_conv_bn_sc_add_relu_kernel(%arg0: memref<144x128xbf16, #tpu.memory_space<vmem>>, %arg1: memref<16x144xbf16, #tpu.memory_space<vmem>>, %arg2: memref<16x1xf32, #tpu.memory_space<vmem>>, %arg3: memref<16x1xf32, #tpu.memory_space<vmem>>, %arg4: memref<8x128xbf16, #tpu.memory_space<vmem>>, %arg5: memref<16x8xbf16, #tpu.memory_space<vmem>>, %arg6: memref<16x1xf32, #tpu.memory_space<vmem>>, %arg7: memref<16x1xf32, #tpu.memory_space<vmem>>, %arg8: memref<16x128xf32, #tpu.memory_space<vmem>>) attributes {dimension_semantics = [], scalar_prefetch = 0 : i64, scratch_operands = 0 : i64, tpu.core_type = #tpu.core_type<tc>} {
    %c0 = arith.constant 0 : index
    %c0_0 = arith.constant 0 : index
    %0 = vector.load %arg1[%c0, %c0_0] : memref<16x144xbf16, #tpu.memory_space<vmem>>, vector<16x144xbf16>
    %c0_1 = arith.constant 0 : index
    %c0_2 = arith.constant 0 : index
    %1 = vector.load %arg0[%c0_1, %c0_2] : memref<144x128xbf16, #tpu.memory_space<vmem>>, vector<144x128xbf16>
    %cst = arith.constant dense<0.000000e+00> : vector<16x128xf32>
    %2 = tpu.matmul %0, %1, %cst {dimension_numbers = #tpu.dot_dimension_numbers<[1], [0], [0], [1], [0, 0, 1, 1], [], []>} : vector<16x144xbf16>, vector<144x128xbf16>, vector<16x128xf32> -> vector<16x128xf32>
    %c0_3 = arith.constant 0 : index
    %c0_4 = arith.constant 0 : index
    %3 = vector.load %arg2[%c0_3, %c0_4] : memref<16x1xf32, #tpu.memory_space<vmem>>, vector<16x1xf32>
    %c0_5 = arith.constant 0 : index
    %c0_6 = arith.constant 0 : index
    %4 = vector.load %arg3[%c0_5, %c0_6] : memref<16x1xf32, #tpu.memory_space<vmem>>, vector<16x1xf32>
    %cst_7 = arith.constant dense<0.000000e+00> : vector<16xf32>
    %5 = vector.multi_reduction <add>, %2, %cst_7 [1] : vector<16x128xf32> to vector<16xf32>
    %6 = vector.shape_cast %5 : vector<16xf32> to vector<16x1xf32>
    %cst_8 = arith.constant 7.812500e-03 : f32
    %7 = vector.broadcast %cst_8 : f32 to vector<16x1xf32>
    %8 = arith.mulf %6, %7 : vector<16x1xf32>
    %9 = arith.mulf %2, %2 : vector<16x128xf32>
    %cst_9 = arith.constant dense<0.000000e+00> : vector<16xf32>
    %10 = vector.multi_reduction <add>, %9, %cst_9 [1] : vector<16x128xf32> to vector<16xf32>
    %11 = vector.shape_cast %10 : vector<16xf32> to vector<16x1xf32>
    %cst_10 = arith.constant 7.812500e-03 : f32
    %12 = vector.broadcast %cst_10 : f32 to vector<16x1xf32>
    %13 = arith.mulf %11, %12 : vector<16x1xf32>
    %14 = arith.mulf %8, %8 : vector<16x1xf32>
    %15 = arith.subf %13, %14 : vector<16x1xf32>
    %cst_11 = arith.constant 0.000000e+00 : f32
    %16 = vector.broadcast %cst_11 : f32 to vector<16x1xf32>
    %17 = arith.maximumf %15, %16 : vector<16x1xf32>
    %cst_12 = arith.constant 9.99999974E-6 : f32
    %18 = vector.broadcast %cst_12 : f32 to vector<16x1xf32>
    %19 = arith.addf %17, %18 : vector<16x1xf32>
    %20 = math.rsqrt %19 : vector<16x1xf32>
    %21 = arith.mulf %20, %3 : vector<16x1xf32>
    %22 = vector.broadcast %21 : vector<16x1xf32> to vector<16x128xf32>
    %23 = arith.mulf %2, %22 : vector<16x128xf32>
    %24 = arith.mulf %8, %21 : vector<16x1xf32>
    %25 = arith.subf %4, %24 : vector<16x1xf32>
    %26 = vector.broadcast %25 : vector<16x1xf32> to vector<16x128xf32>
    %27 = arith.addf %23, %26 : vector<16x128xf32>
    %c0_13 = arith.constant 0 : index
    %c0_14 = arith.constant 0 : index
    %28 = vector.load %arg5[%c0_13, %c0_14] : memref<16x8xbf16, #tpu.memory_space<vmem>>, vector<16x8xbf16>
    %c0_15 = arith.constant 0 : index
    %c0_16 = arith.constant 0 : index
    %29 = vector.load %arg4[%c0_15, %c0_16] : memref<8x128xbf16, #tpu.memory_space<vmem>>, vector<8x128xbf16>
    %cst_17 = arith.constant dense<0.000000e+00> : vector<16x128xf32>
    %30 = tpu.matmul %28, %29, %cst_17 {dimension_numbers = #tpu.dot_dimension_numbers<[1], [0], [0], [1], [0, 0, 1, 1], [], []>} : vector<16x8xbf16>, vector<8x128xbf16>, vector<16x128xf32> -> vector<16x128xf32>
    %c0_18 = arith.constant 0 : index
    %c0_19 = arith.constant 0 : index
    %31 = vector.load %arg6[%c0_18, %c0_19] : memref<16x1xf32, #tpu.memory_space<vmem>>, vector<16x1xf32>
    %c0_20 = arith.constant 0 : index
    %c0_21 = arith.constant 0 : index
    %32 = vector.load %arg7[%c0_20, %c0_21] : memref<16x1xf32, #tpu.memory_space<vmem>>, vector<16x1xf32>
    %cst_22 = arith.constant dense<0.000000e+00> : vector<16xf32>
    %33 = vector.multi_reduction <add>, %30, %cst_22 [1] : vector<16x128xf32> to vector<16xf32>
    %34 = vector.shape_cast %33 : vector<16xf32> to vector<16x1xf32>
    %cst_23 = arith.constant 7.812500e-03 : f32
    %35 = vector.broadcast %cst_23 : f32 to vector<16x1xf32>
    %36 = arith.mulf %34, %35 : vector<16x1xf32>
    %37 = arith.mulf %30, %30 : vector<16x128xf32>
    %cst_24 = arith.constant dense<0.000000e+00> : vector<16xf32>
    %38 = vector.multi_reduction <add>, %37, %cst_24 [1] : vector<16x128xf32> to vector<16xf32>
    %39 = vector.shape_cast %38 : vector<16xf32> to vector<16x1xf32>
    %cst_25 = arith.constant 7.812500e-03 : f32
    %40 = vector.broadcast %cst_25 : f32 to vector<16x1xf32>
    %41 = arith.mulf %39, %40 : vector<16x1xf32>
    %42 = arith.mulf %36, %36 : vector<16x1xf32>
    %43 = arith.subf %41, %42 : vector<16x1xf32>
    %cst_26 = arith.constant 0.000000e+00 : f32
    %44 = vector.broadcast %cst_26 : f32 to vector<16x1xf32>
    %45 = arith.maximumf %43, %44 : vector<16x1xf32>
    %cst_27 = arith.constant 9.99999974E-6 : f32
    %46 = vector.broadcast %cst_27 : f32 to vector<16x1xf32>
    %47 = arith.addf %45, %46 : vector<16x1xf32>
    %48 = math.rsqrt %47 : vector<16x1xf32>
    %49 = arith.mulf %48, %31 : vector<16x1xf32>
    %50 = vector.broadcast %49 : vector<16x1xf32> to vector<16x128xf32>
    %51 = arith.mulf %30, %50 : vector<16x128xf32>
    %52 = arith.mulf %36, %49 : vector<16x1xf32>
    %53 = arith.subf %32, %52 : vector<16x1xf32>
    %54 = vector.broadcast %53 : vector<16x1xf32> to vector<16x128xf32>
    %55 = arith.addf %51, %54 : vector<16x128xf32>
    %56 = arith.addf %27, %55 : vector<16x128xf32>
    %cst_28 = arith.constant 0.000000e+00 : f32
    %57 = vector.broadcast %cst_28 : f32 to vector<16x128xf32>
    %58 = arith.maximumf %56, %57 : vector<16x128xf32>
    %c0_29 = arith.constant 0 : index
    %c0_30 = arith.constant 0 : index
    %59 = vector.load %arg8[%c0_29, %c0_30] : memref<16x128xf32, #tpu.memory_space<vmem>>, vector<16x128xf32>
    tpu.vector_store %arg8[%c0_29, %c0_30], %58 {strides = array<i32>} : memref<16x128xf32, #tpu.memory_space<vmem>>, vector<16x128xf32>,
    return
  }
}

module attributes {stable_mosaic.version = 11 : i64} {
  func.func @_conv_bn_relu_noise_kernel(%arg0: memref<144x32xbf16, #tpu.memory_space<vmem>>, %arg1: memref<32x144xbf16, #tpu.memory_space<vmem>>, %arg2: memref<32x1xf32, #tpu.memory_space<vmem>>, %arg3: memref<32x1xf32, #tpu.memory_space<vmem>>, %arg4: memref<32x32xf32, #tpu.memory_space<vmem>>, %arg5: memref<32x32xf32, #tpu.memory_space<vmem>>) attributes {dimension_semantics = [], scalar_prefetch = 0 : i64, scratch_operands = 0 : i64, tpu.core_type = #tpu.core_type<tc>} {
    %c0 = arith.constant 0 : index
    %c0_0 = arith.constant 0 : index
    %0 = vector.load %arg1[%c0, %c0_0] : memref<32x144xbf16, #tpu.memory_space<vmem>>, vector<32x144xbf16>
    %c0_1 = arith.constant 0 : index
    %c0_2 = arith.constant 0 : index
    %1 = vector.load %arg0[%c0_1, %c0_2] : memref<144x32xbf16, #tpu.memory_space<vmem>>, vector<144x32xbf16>
    %cst = arith.constant dense<0.000000e+00> : vector<32x32xf32>
    %2 = tpu.matmul %0, %1, %cst {dimension_numbers = #tpu.dot_dimension_numbers<[1], [0], [0], [1], [0, 0, 1, 1], [], []>} : vector<32x144xbf16>, vector<144x32xbf16>, vector<32x32xf32> -> vector<32x32xf32>
    %c0_3 = arith.constant 0 : index
    %c0_4 = arith.constant 0 : index
    %3 = vector.load %arg2[%c0_3, %c0_4] : memref<32x1xf32, #tpu.memory_space<vmem>>, vector<32x1xf32>
    %c0_5 = arith.constant 0 : index
    %c0_6 = arith.constant 0 : index
    %4 = vector.load %arg3[%c0_5, %c0_6] : memref<32x1xf32, #tpu.memory_space<vmem>>, vector<32x1xf32>
    %cst_7 = arith.constant dense<0.000000e+00> : vector<32xf32>
    %5 = vector.multi_reduction <add>, %2, %cst_7 [1] : vector<32x32xf32> to vector<32xf32>
    %6 = vector.shape_cast %5 : vector<32xf32> to vector<32x1xf32>
    %cst_8 = arith.constant 3.125000e-02 : f32
    %7 = vector.broadcast %cst_8 : f32 to vector<32x1xf32>
    %8 = arith.mulf %6, %7 : vector<32x1xf32>
    %9 = arith.mulf %2, %2 : vector<32x32xf32>
    %cst_9 = arith.constant dense<0.000000e+00> : vector<32xf32>
    %10 = vector.multi_reduction <add>, %9, %cst_9 [1] : vector<32x32xf32> to vector<32xf32>
    %11 = vector.shape_cast %10 : vector<32xf32> to vector<32x1xf32>
    %cst_10 = arith.constant 3.125000e-02 : f32
    %12 = vector.broadcast %cst_10 : f32 to vector<32x1xf32>
    %13 = arith.mulf %11, %12 : vector<32x1xf32>
    %14 = arith.mulf %8, %8 : vector<32x1xf32>
    %15 = arith.subf %13, %14 : vector<32x1xf32>
    %cst_11 = arith.constant 0.000000e+00 : f32
    %16 = vector.broadcast %cst_11 : f32 to vector<32x1xf32>
    %17 = arith.maximumf %15, %16 : vector<32x1xf32>
    %cst_12 = arith.constant 9.99999974E-6 : f32
    %18 = vector.broadcast %cst_12 : f32 to vector<32x1xf32>
    %19 = arith.addf %17, %18 : vector<32x1xf32>
    %20 = math.rsqrt %19 : vector<32x1xf32>
    %21 = arith.mulf %20, %3 : vector<32x1xf32>
    %22 = vector.broadcast %21 : vector<32x1xf32> to vector<32x32xf32>
    %23 = arith.mulf %2, %22 : vector<32x32xf32>
    %24 = arith.mulf %8, %21 : vector<32x1xf32>
    %25 = arith.subf %4, %24 : vector<32x1xf32>
    %26 = vector.broadcast %25 : vector<32x1xf32> to vector<32x32xf32>
    %27 = arith.addf %23, %26 : vector<32x32xf32>
    %cst_13 = arith.constant 0.000000e+00 : f32
    %28 = vector.broadcast %cst_13 : f32 to vector<32x32xf32>
    %29 = arith.maximumf %27, %28 : vector<32x32xf32>
    %c0_14 = arith.constant 0 : index
    %c0_15 = arith.constant 0 : index
    %30 = vector.load %arg4[%c0_14, %c0_15] : memref<32x32xf32, #tpu.memory_space<vmem>>, vector<32x32xf32>
    %31 = arith.addf %29, %30 : vector<32x32xf32>
    %c0_16 = arith.constant 0 : index
    %c0_17 = arith.constant 0 : index
    %32 = vector.load %arg5[%c0_16, %c0_17] : memref<32x32xf32, #tpu.memory_space<vmem>>, vector<32x32xf32>
    tpu.vector_store %arg5[%c0_16, %c0_17], %31 {strides = array<i32>} : memref<32x32xf32, #tpu.memory_space<vmem>>, vector<32x32xf32>,
    return
  }
}

module attributes {stable_mosaic.version = 11 : i64} {
  func.func @_conv_bn_sc_add_relu_kernel(%arg0: memref<288x32xbf16, #tpu.memory_space<vmem>>, %arg1: memref<32x288xbf16, #tpu.memory_space<vmem>>, %arg2: memref<32x1xf32, #tpu.memory_space<vmem>>, %arg3: memref<32x1xf32, #tpu.memory_space<vmem>>, %arg4: memref<16x32xbf16, #tpu.memory_space<vmem>>, %arg5: memref<32x16xbf16, #tpu.memory_space<vmem>>, %arg6: memref<32x1xf32, #tpu.memory_space<vmem>>, %arg7: memref<32x1xf32, #tpu.memory_space<vmem>>, %arg8: memref<32x32xf32, #tpu.memory_space<vmem>>) attributes {dimension_semantics = [], scalar_prefetch = 0 : i64, scratch_operands = 0 : i64, tpu.core_type = #tpu.core_type<tc>} {
    %c0 = arith.constant 0 : index
    %c0_0 = arith.constant 0 : index
    %0 = vector.load %arg1[%c0, %c0_0] : memref<32x288xbf16, #tpu.memory_space<vmem>>, vector<32x288xbf16>
    %c0_1 = arith.constant 0 : index
    %c0_2 = arith.constant 0 : index
    %1 = vector.load %arg0[%c0_1, %c0_2] : memref<288x32xbf16, #tpu.memory_space<vmem>>, vector<288x32xbf16>
    %cst = arith.constant dense<0.000000e+00> : vector<32x32xf32>
    %2 = tpu.matmul %0, %1, %cst {dimension_numbers = #tpu.dot_dimension_numbers<[1], [0], [0], [1], [0, 0, 1, 1], [], []>} : vector<32x288xbf16>, vector<288x32xbf16>, vector<32x32xf32> -> vector<32x32xf32>
    %c0_3 = arith.constant 0 : index
    %c0_4 = arith.constant 0 : index
    %3 = vector.load %arg2[%c0_3, %c0_4] : memref<32x1xf32, #tpu.memory_space<vmem>>, vector<32x1xf32>
    %c0_5 = arith.constant 0 : index
    %c0_6 = arith.constant 0 : index
    %4 = vector.load %arg3[%c0_5, %c0_6] : memref<32x1xf32, #tpu.memory_space<vmem>>, vector<32x1xf32>
    %cst_7 = arith.constant dense<0.000000e+00> : vector<32xf32>
    %5 = vector.multi_reduction <add>, %2, %cst_7 [1] : vector<32x32xf32> to vector<32xf32>
    %6 = vector.shape_cast %5 : vector<32xf32> to vector<32x1xf32>
    %cst_8 = arith.constant 3.125000e-02 : f32
    %7 = vector.broadcast %cst_8 : f32 to vector<32x1xf32>
    %8 = arith.mulf %6, %7 : vector<32x1xf32>
    %9 = arith.mulf %2, %2 : vector<32x32xf32>
    %cst_9 = arith.constant dense<0.000000e+00> : vector<32xf32>
    %10 = vector.multi_reduction <add>, %9, %cst_9 [1] : vector<32x32xf32> to vector<32xf32>
    %11 = vector.shape_cast %10 : vector<32xf32> to vector<32x1xf32>
    %cst_10 = arith.constant 3.125000e-02 : f32
    %12 = vector.broadcast %cst_10 : f32 to vector<32x1xf32>
    %13 = arith.mulf %11, %12 : vector<32x1xf32>
    %14 = arith.mulf %8, %8 : vector<32x1xf32>
    %15 = arith.subf %13, %14 : vector<32x1xf32>
    %cst_11 = arith.constant 0.000000e+00 : f32
    %16 = vector.broadcast %cst_11 : f32 to vector<32x1xf32>
    %17 = arith.maximumf %15, %16 : vector<32x1xf32>
    %cst_12 = arith.constant 9.99999974E-6 : f32
    %18 = vector.broadcast %cst_12 : f32 to vector<32x1xf32>
    %19 = arith.addf %17, %18 : vector<32x1xf32>
    %20 = math.rsqrt %19 : vector<32x1xf32>
    %21 = arith.mulf %20, %3 : vector<32x1xf32>
    %22 = vector.broadcast %21 : vector<32x1xf32> to vector<32x32xf32>
    %23 = arith.mulf %2, %22 : vector<32x32xf32>
    %24 = arith.mulf %8, %21 : vector<32x1xf32>
    %25 = arith.subf %4, %24 : vector<32x1xf32>
    %26 = vector.broadcast %25 : vector<32x1xf32> to vector<32x32xf32>
    %27 = arith.addf %23, %26 : vector<32x32xf32>
    %c0_13 = arith.constant 0 : index
    %c0_14 = arith.constant 0 : index
    %28 = vector.load %arg5[%c0_13, %c0_14] : memref<32x16xbf16, #tpu.memory_space<vmem>>, vector<32x16xbf16>
    %c0_15 = arith.constant 0 : index
    %c0_16 = arith.constant 0 : index
    %29 = vector.load %arg4[%c0_15, %c0_16] : memref<16x32xbf16, #tpu.memory_space<vmem>>, vector<16x32xbf16>
    %cst_17 = arith.constant dense<0.000000e+00> : vector<32x32xf32>
    %30 = tpu.matmul %28, %29, %cst_17 {dimension_numbers = #tpu.dot_dimension_numbers<[1], [0], [0], [1], [0, 0, 1, 1], [], []>} : vector<32x16xbf16>, vector<16x32xbf16>, vector<32x32xf32> -> vector<32x32xf32>
    %c0_18 = arith.constant 0 : index
    %c0_19 = arith.constant 0 : index
    %31 = vector.load %arg6[%c0_18, %c0_19] : memref<32x1xf32, #tpu.memory_space<vmem>>, vector<32x1xf32>
    %c0_20 = arith.constant 0 : index
    %c0_21 = arith.constant 0 : index
    %32 = vector.load %arg7[%c0_20, %c0_21] : memref<32x1xf32, #tpu.memory_space<vmem>>, vector<32x1xf32>
    %cst_22 = arith.constant dense<0.000000e+00> : vector<32xf32>
    %33 = vector.multi_reduction <add>, %30, %cst_22 [1] : vector<32x32xf32> to vector<32xf32>
    %34 = vector.shape_cast %33 : vector<32xf32> to vector<32x1xf32>
    %cst_23 = arith.constant 3.125000e-02 : f32
    %35 = vector.broadcast %cst_23 : f32 to vector<32x1xf32>
    %36 = arith.mulf %34, %35 : vector<32x1xf32>
    %37 = arith.mulf %30, %30 : vector<32x32xf32>
    %cst_24 = arith.constant dense<0.000000e+00> : vector<32xf32>
    %38 = vector.multi_reduction <add>, %37, %cst_24 [1] : vector<32x32xf32> to vector<32xf32>
    %39 = vector.shape_cast %38 : vector<32xf32> to vector<32x1xf32>
    %cst_25 = arith.constant 3.125000e-02 : f32
    %40 = vector.broadcast %cst_25 : f32 to vector<32x1xf32>
    %41 = arith.mulf %39, %40 : vector<32x1xf32>
    %42 = arith.mulf %36, %36 : vector<32x1xf32>
    %43 = arith.subf %41, %42 : vector<32x1xf32>
    %cst_26 = arith.constant 0.000000e+00 : f32
    %44 = vector.broadcast %cst_26 : f32 to vector<32x1xf32>
    %45 = arith.maximumf %43, %44 : vector<32x1xf32>
    %cst_27 = arith.constant 9.99999974E-6 : f32
    %46 = vector.broadcast %cst_27 : f32 to vector<32x1xf32>
    %47 = arith.addf %45, %46 : vector<32x1xf32>
    %48 = math.rsqrt %47 : vector<32x1xf32>
    %49 = arith.mulf %48, %31 : vector<32x1xf32>
    %50 = vector.broadcast %49 : vector<32x1xf32> to vector<32x32xf32>
    %51 = arith.mulf %30, %50 : vector<32x32xf32>
    %52 = arith.mulf %36, %49 : vector<32x1xf32>
    %53 = arith.subf %32, %52 : vector<32x1xf32>
    %54 = vector.broadcast %53 : vector<32x1xf32> to vector<32x32xf32>
    %55 = arith.addf %51, %54 : vector<32x32xf32>
    %56 = arith.addf %27, %55 : vector<32x32xf32>
    %cst_28 = arith.constant 0.000000e+00 : f32
    %57 = vector.broadcast %cst_28 : f32 to vector<32x32xf32>
    %58 = arith.maximumf %56, %57 : vector<32x32xf32>
    %c0_29 = arith.constant 0 : index
    %c0_30 = arith.constant 0 : index
    %59 = vector.load %arg8[%c0_29, %c0_30] : memref<32x32xf32, #tpu.memory_space<vmem>>, vector<32x32xf32>
    tpu.vector_store %arg8[%c0_29, %c0_30], %58 {strides = array<i32>} : memref<32x32xf32, #tpu.memory_space<vmem>>, vector<32x32xf32>,
    return
  }
}

module attributes {stable_mosaic.version = 11 : i64} {
  func.func @_conv_bn_relu_noise_kernel(%arg0: memref<288x8xbf16, #tpu.memory_space<vmem>>, %arg1: memref<64x288xbf16, #tpu.memory_space<vmem>>, %arg2: memref<64x1xf32, #tpu.memory_space<vmem>>, %arg3: memref<64x1xf32, #tpu.memory_space<vmem>>, %arg4: memref<64x8xf32, #tpu.memory_space<vmem>>, %arg5: memref<64x8xf32, #tpu.memory_space<vmem>>) attributes {dimension_semantics = [], scalar_prefetch = 0 : i64, scratch_operands = 0 : i64, tpu.core_type = #tpu.core_type<tc>} {
    %c0 = arith.constant 0 : index
    %c0_0 = arith.constant 0 : index
    %0 = vector.load %arg1[%c0, %c0_0] : memref<64x288xbf16, #tpu.memory_space<vmem>>, vector<64x288xbf16>
    %c0_1 = arith.constant 0 : index
    %c0_2 = arith.constant 0 : index
    %1 = vector.load %arg0[%c0_1, %c0_2] : memref<288x8xbf16, #tpu.memory_space<vmem>>, vector<288x8xbf16>
    %cst = arith.constant dense<0.000000e+00> : vector<64x8xf32>
    %2 = tpu.matmul %0, %1, %cst {dimension_numbers = #tpu.dot_dimension_numbers<[1], [0], [0], [1], [0, 0, 1, 1], [], []>} : vector<64x288xbf16>, vector<288x8xbf16>, vector<64x8xf32> -> vector<64x8xf32>
    %c0_3 = arith.constant 0 : index
    %c0_4 = arith.constant 0 : index
    %3 = vector.load %arg2[%c0_3, %c0_4] : memref<64x1xf32, #tpu.memory_space<vmem>>, vector<64x1xf32>
    %c0_5 = arith.constant 0 : index
    %c0_6 = arith.constant 0 : index
    %4 = vector.load %arg3[%c0_5, %c0_6] : memref<64x1xf32, #tpu.memory_space<vmem>>, vector<64x1xf32>
    %cst_7 = arith.constant dense<0.000000e+00> : vector<64xf32>
    %5 = vector.multi_reduction <add>, %2, %cst_7 [1] : vector<64x8xf32> to vector<64xf32>
    %6 = vector.shape_cast %5 : vector<64xf32> to vector<64x1xf32>
    %cst_8 = arith.constant 1.250000e-01 : f32
    %7 = vector.broadcast %cst_8 : f32 to vector<64x1xf32>
    %8 = arith.mulf %6, %7 : vector<64x1xf32>
    %9 = arith.mulf %2, %2 : vector<64x8xf32>
    %cst_9 = arith.constant dense<0.000000e+00> : vector<64xf32>
    %10 = vector.multi_reduction <add>, %9, %cst_9 [1] : vector<64x8xf32> to vector<64xf32>
    %11 = vector.shape_cast %10 : vector<64xf32> to vector<64x1xf32>
    %cst_10 = arith.constant 1.250000e-01 : f32
    %12 = vector.broadcast %cst_10 : f32 to vector<64x1xf32>
    %13 = arith.mulf %11, %12 : vector<64x1xf32>
    %14 = arith.mulf %8, %8 : vector<64x1xf32>
    %15 = arith.subf %13, %14 : vector<64x1xf32>
    %cst_11 = arith.constant 0.000000e+00 : f32
    %16 = vector.broadcast %cst_11 : f32 to vector<64x1xf32>
    %17 = arith.maximumf %15, %16 : vector<64x1xf32>
    %cst_12 = arith.constant 9.99999974E-6 : f32
    %18 = vector.broadcast %cst_12 : f32 to vector<64x1xf32>
    %19 = arith.addf %17, %18 : vector<64x1xf32>
    %20 = math.rsqrt %19 : vector<64x1xf32>
    %21 = arith.mulf %20, %3 : vector<64x1xf32>
    %22 = vector.broadcast %21 : vector<64x1xf32> to vector<64x8xf32>
    %23 = arith.mulf %2, %22 : vector<64x8xf32>
    %24 = arith.mulf %8, %21 : vector<64x1xf32>
    %25 = arith.subf %4, %24 : vector<64x1xf32>
    %26 = vector.broadcast %25 : vector<64x1xf32> to vector<64x8xf32>
    %27 = arith.addf %23, %26 : vector<64x8xf32>
    %cst_13 = arith.constant 0.000000e+00 : f32
    %28 = vector.broadcast %cst_13 : f32 to vector<64x8xf32>
    %29 = arith.maximumf %27, %28 : vector<64x8xf32>
    %c0_14 = arith.constant 0 : index
    %c0_15 = arith.constant 0 : index
    %30 = vector.load %arg4[%c0_14, %c0_15] : memref<64x8xf32, #tpu.memory_space<vmem>>, vector<64x8xf32>
    %31 = arith.addf %29, %30 : vector<64x8xf32>
    %c0_16 = arith.constant 0 : index
    %c0_17 = arith.constant 0 : index
    %32 = vector.load %arg5[%c0_16, %c0_17] : memref<64x8xf32, #tpu.memory_space<vmem>>, vector<64x8xf32>
    tpu.vector_store %arg5[%c0_16, %c0_17], %31 {strides = array<i32>} : memref<64x8xf32, #tpu.memory_space<vmem>>, vector<64x8xf32>,
    return
  }
}

module attributes {stable_mosaic.version = 11 : i64} {
  func.func @_conv_bn_sc_add_relu_head_kernel(%arg0: memref<576x8xbf16, #tpu.memory_space<vmem>>, %arg1: memref<64x576xbf16, #tpu.memory_space<vmem>>, %arg2: memref<64x1xf32, #tpu.memory_space<vmem>>, %arg3: memref<64x1xf32, #tpu.memory_space<vmem>>, %arg4: memref<32x8xbf16, #tpu.memory_space<vmem>>, %arg5: memref<64x32xbf16, #tpu.memory_space<vmem>>, %arg6: memref<64x1xf32, #tpu.memory_space<vmem>>, %arg7: memref<64x1xf32, #tpu.memory_space<vmem>>, %arg8: memref<8x2xf32, #tpu.memory_space<vmem>>, %arg9: memref<1x64xf32, #tpu.memory_space<vmem>>, %arg10: memref<1x1xf32, #tpu.memory_space<vmem>>, %arg11: memref<1x2xf32, #tpu.memory_space<vmem>>) attributes {dimension_semantics = [], scalar_prefetch = 0 : i64, scratch_operands = 0 : i64, tpu.core_type = #tpu.core_type<tc>} {
    %c0 = arith.constant 0 : index
    %c0_0 = arith.constant 0 : index
    %0 = vector.load %arg1[%c0, %c0_0] : memref<64x576xbf16, #tpu.memory_space<vmem>>, vector<64x576xbf16>
    %c0_1 = arith.constant 0 : index
    %c0_2 = arith.constant 0 : index
    %1 = vector.load %arg0[%c0_1, %c0_2] : memref<576x8xbf16, #tpu.memory_space<vmem>>, vector<576x8xbf16>
    %cst = arith.constant dense<0.000000e+00> : vector<64x8xf32>
    %2 = tpu.matmul %0, %1, %cst {dimension_numbers = #tpu.dot_dimension_numbers<[1], [0], [0], [1], [0, 0, 1, 1], [], []>} : vector<64x576xbf16>, vector<576x8xbf16>, vector<64x8xf32> -> vector<64x8xf32>
    %c0_3 = arith.constant 0 : index
    %c0_4 = arith.constant 0 : index
    %3 = vector.load %arg2[%c0_3, %c0_4] : memref<64x1xf32, #tpu.memory_space<vmem>>, vector<64x1xf32>
    %c0_5 = arith.constant 0 : index
    %c0_6 = arith.constant 0 : index
    %4 = vector.load %arg3[%c0_5, %c0_6] : memref<64x1xf32, #tpu.memory_space<vmem>>, vector<64x1xf32>
    %cst_7 = arith.constant dense<0.000000e+00> : vector<64xf32>
    %5 = vector.multi_reduction <add>, %2, %cst_7 [1] : vector<64x8xf32> to vector<64xf32>
    %6 = vector.shape_cast %5 : vector<64xf32> to vector<64x1xf32>
    %cst_8 = arith.constant 1.250000e-01 : f32
    %7 = vector.broadcast %cst_8 : f32 to vector<64x1xf32>
    %8 = arith.mulf %6, %7 : vector<64x1xf32>
    %9 = arith.mulf %2, %2 : vector<64x8xf32>
    %cst_9 = arith.constant dense<0.000000e+00> : vector<64xf32>
    %10 = vector.multi_reduction <add>, %9, %cst_9 [1] : vector<64x8xf32> to vector<64xf32>
    %11 = vector.shape_cast %10 : vector<64xf32> to vector<64x1xf32>
    %cst_10 = arith.constant 1.250000e-01 : f32
    %12 = vector.broadcast %cst_10 : f32 to vector<64x1xf32>
    %13 = arith.mulf %11, %12 : vector<64x1xf32>
    %14 = arith.mulf %8, %8 : vector<64x1xf32>
    %15 = arith.subf %13, %14 : vector<64x1xf32>
    %cst_11 = arith.constant 0.000000e+00 : f32
    %16 = vector.broadcast %cst_11 : f32 to vector<64x1xf32>
    %17 = arith.maximumf %15, %16 : vector<64x1xf32>
    %cst_12 = arith.constant 9.99999974E-6 : f32
    %18 = vector.broadcast %cst_12 : f32 to vector<64x1xf32>
    %19 = arith.addf %17, %18 : vector<64x1xf32>
    %20 = math.rsqrt %19 : vector<64x1xf32>
    %21 = arith.mulf %20, %3 : vector<64x1xf32>
    %22 = vector.broadcast %21 : vector<64x1xf32> to vector<64x8xf32>
    %23 = arith.mulf %2, %22 : vector<64x8xf32>
    %24 = arith.mulf %8, %21 : vector<64x1xf32>
    %25 = arith.subf %4, %24 : vector<64x1xf32>
    %26 = vector.broadcast %25 : vector<64x1xf32> to vector<64x8xf32>
    %27 = arith.addf %23, %26 : vector<64x8xf32>
    %c0_13 = arith.constant 0 : index
    %c0_14 = arith.constant 0 : index
    %28 = vector.load %arg5[%c0_13, %c0_14] : memref<64x32xbf16, #tpu.memory_space<vmem>>, vector<64x32xbf16>
    %c0_15 = arith.constant 0 : index
    %c0_16 = arith.constant 0 : index
    %29 = vector.load %arg4[%c0_15, %c0_16] : memref<32x8xbf16, #tpu.memory_space<vmem>>, vector<32x8xbf16>
    %cst_17 = arith.constant dense<0.000000e+00> : vector<64x8xf32>
    %30 = tpu.matmul %28, %29, %cst_17 {dimension_numbers = #tpu.dot_dimension_numbers<[1], [0], [0], [1], [0, 0, 1, 1], [], []>} : vector<64x32xbf16>, vector<32x8xbf16>, vector<64x8xf32> -> vector<64x8xf32>
    %c0_18 = arith.constant 0 : index
    %c0_19 = arith.constant 0 : index
    %31 = vector.load %arg6[%c0_18, %c0_19] : memref<64x1xf32, #tpu.memory_space<vmem>>, vector<64x1xf32>
    %c0_20 = arith.constant 0 : index
    %c0_21 = arith.constant 0 : index
    %32 = vector.load %arg7[%c0_20, %c0_21] : memref<64x1xf32, #tpu.memory_space<vmem>>, vector<64x1xf32>
    %cst_22 = arith.constant dense<0.000000e+00> : vector<64xf32>
    %33 = vector.multi_reduction <add>, %30, %cst_22 [1] : vector<64x8xf32> to vector<64xf32>
    %34 = vector.shape_cast %33 : vector<64xf32> to vector<64x1xf32>
    %cst_23 = arith.constant 1.250000e-01 : f32
    %35 = vector.broadcast %cst_23 : f32 to vector<64x1xf32>
    %36 = arith.mulf %34, %35 : vector<64x1xf32>
    %37 = arith.mulf %30, %30 : vector<64x8xf32>
    %cst_24 = arith.constant dense<0.000000e+00> : vector<64xf32>
    %38 = vector.multi_reduction <add>, %37, %cst_24 [1] : vector<64x8xf32> to vector<64xf32>
    %39 = vector.shape_cast %38 : vector<64xf32> to vector<64x1xf32>
    %cst_25 = arith.constant 1.250000e-01 : f32
    %40 = vector.broadcast %cst_25 : f32 to vector<64x1xf32>
    %41 = arith.mulf %39, %40 : vector<64x1xf32>
    %42 = arith.mulf %36, %36 : vector<64x1xf32>
    %43 = arith.subf %41, %42 : vector<64x1xf32>
    %cst_26 = arith.constant 0.000000e+00 : f32
    %44 = vector.broadcast %cst_26 : f32 to vector<64x1xf32>
    %45 = arith.maximumf %43, %44 : vector<64x1xf32>
    %cst_27 = arith.constant 9.99999974E-6 : f32
    %46 = vector.broadcast %cst_27 : f32 to vector<64x1xf32>
    %47 = arith.addf %45, %46 : vector<64x1xf32>
    %48 = math.rsqrt %47 : vector<64x1xf32>
    %49 = arith.mulf %48, %31 : vector<64x1xf32>
    %50 = vector.broadcast %49 : vector<64x1xf32> to vector<64x8xf32>
    %51 = arith.mulf %30, %50 : vector<64x8xf32>
    %52 = arith.mulf %36, %49 : vector<64x1xf32>
    %53 = arith.subf %32, %52 : vector<64x1xf32>
    %54 = vector.broadcast %53 : vector<64x1xf32> to vector<64x8xf32>
    %55 = arith.addf %51, %54 : vector<64x8xf32>
    %56 = arith.addf %27, %55 : vector<64x8xf32>
    %cst_28 = arith.constant 0.000000e+00 : f32
    %57 = vector.broadcast %cst_28 : f32 to vector<64x8xf32>
    %58 = arith.maximumf %56, %57 : vector<64x8xf32>
    %c0_29 = arith.constant 0 : index
    %c0_30 = arith.constant 0 : index
    %59 = vector.load %arg8[%c0_29, %c0_30] : memref<8x2xf32, #tpu.memory_space<vmem>>, vector<8x2xf32>
    %cst_31 = arith.constant dense<0.000000e+00> : vector<64x2xf32>
    %60 = tpu.matmul %58, %59, %cst_31 {dimension_numbers = #tpu.dot_dimension_numbers<[1], [0], [0], [1], [0, 0, 1, 1], [], []>} : vector<64x8xf32>, vector<8x2xf32>, vector<64x2xf32> -> vector<64x2xf32>
    %c0_32 = arith.constant 0 : index
    %c0_33 = arith.constant 0 : index
    %61 = vector.load %arg9[%c0_32, %c0_33] : memref<1x64xf32, #tpu.memory_space<vmem>>, vector<1x64xf32>
    %cst_34 = arith.constant dense<0.000000e+00> : vector<1x2xf32>
    %62 = tpu.matmul %61, %60, %cst_34 {dimension_numbers = #tpu.dot_dimension_numbers<[1], [0], [0], [1], [0, 0, 1, 1], [], []>} : vector<1x64xf32>, vector<64x2xf32>, vector<1x2xf32> -> vector<1x2xf32>
    %c0_35 = arith.constant 0 : index
    %c0_36 = arith.constant 0 : index
    %63 = vector.load %arg10[%c0_35, %c0_36] : memref<1x1xf32, #tpu.memory_space<vmem>>, vector<1x1xf32>
    %64 = vector.broadcast %63 : vector<1x1xf32> to vector<1x2xf32>
    %65 = arith.addf %62, %64 : vector<1x2xf32>
    %66 = arith.negf %65 : vector<1x2xf32>
    %67 = math.exp %66 : vector<1x2xf32>
    %cst_37 = arith.constant 1.000000e+00 : f32
    %68 = vector.broadcast %cst_37 : f32 to vector<1x2xf32>
    %69 = arith.addf %68, %67 : vector<1x2xf32>
    %70 = arith.divf %68, %69 : vector<1x2xf32>
    %c0_38 = arith.constant 0 : index
    %c0_39 = arith.constant 0 : index
    %71 = vector.load %arg11[%c0_38, %c0_39] : memref<1x2xf32, #tpu.memory_space<vmem>>, vector<1x2xf32>
    tpu.vector_store %arg11[%c0_38, %c0_39], %70 {strides = array<i32>} : memref<1x2xf32, #tpu.memory_space<vmem>>, vector<1x2xf32>,
    return
  }
}

</mosaic_0001>

<bundles_post_ra>
// kernel: _lambda_.10
= control target key start
LH: loop header
LB: loop body
LE: loop exit
PB: predicated region body
PF: predicated region fallthrough
CT: control target
= control target key end

     0   :  { %vm941_vm0 = vcmask 1040384   ;;  %vm942_vm1 = vcmask 1041408   ;;  %v2300_v5 = vmov 65535   ;;  %vm937_vm2 = vcmask 154624   ;;  %s3454_s0 = inlined_call_operand.vmem [shape: bf16[147,2048], index: 0, kind: input, shape index: {}]   ;;  %s3455_s1 = inlined_call_operand.vmem [shape: bf16[8,147], index: 1, kind: input, shape index: {}]   ;;  %s3456_s2 = inlined_call_operand.vmem [shape: f32[8,1], index: 2, kind: input, shape index: {}]   ;;  %s3457_s3 = inlined_call_operand.vmem [shape: f32[8,1], index: 3, kind: input, shape index: {}]   ;;  %s3458_s4 = inlined_call_operand.vmem [shape: f32[8,2048], index: 4, kind: output, shape index: {}]  }
   0x1   :  { %v2008_v0 = vld [vmem:[%s3454_s0 + $0x380] sm:$0xf]  ;;  %v943_v6 = vsel %vm941_vm0, 4294967295, %v2300_v5  ;;  %v2016_v8 = vld [vmem:[%s3454_s0 + $0x388] sm:$0xf] }
   0x2   :  { %v2270_v1 = vld [vmem:[%s3454_s0 + $0x3bc] sm:$0xf0]  ;;  %v2271_v9 = vld [vmem:[%s3454_s0 + $0x3c4] sm:$0xf0]  ;;  %v2342_v10 = vsel %vm942_vm1, %v943_v6, 0 }
   0x3   :  { %v163_v2 = vld [vmem:[%s3454_s0 + $0x480] sm:$0x33]  ;;  %v2009_v3 = vor.u32 %v2270_v1, %v2008_v0  ;;  %v2017_v11 = vor.u32 %v2271_v9, %v2016_v8  ;;  %v2378_v26 = vld [vmem:[%s3454_s0 + $0x488] sm:$0x33] }
   0x4   :  { %v617_v4 = vunpack.c.l.b16 %v163_v2  ;;  %v618_v7 = vunpack.c.h.b16 %v163_v2  ;;  %v1944_v12 = vld [vmem:[%s3454_s0 + $0x300] sm:$0xf]  ;;  %v2278_v19 = vld [vmem:[%s3454_s0 + $0x404] sm:$0xf]  ;;  %v1952_v27 = vld [vmem:[%s3454_s0 + $0x308] sm:$0xf]  ;;  %v619_v29 = vunpack.c.l.b16 %v2378_v26 }
   0x5   :  { %v2254_v13 = vld [vmem:[%s3454_s0 + $0x33c] sm:$0xf0]  ;;  %993 = vmatpush.bf16.msra.mxu0 %v2009_v3  ;;  %1045 = vmatpush.bf16.msra.mxu1 %v2017_v11  ;;  %v2074_v21 = vld [vmem:[%s3454_s0 + $0x440] sm:$0xf0]  ;;  %v2255_v28 = vld [vmem:[%s3454_s0 + $0x344] sm:$0xf0] }
   0x6   :  { %v2353_v14 = vld [vmem:[%s3455_s1] sm:$0xff]  ;;  %v777_v15 = vpack.c.b16 %v617_v4, %v617_v4  ;;  %v778_v16 = vpack.c.b16 %v618_v7, %v618_v7  ;;  %v1945_v20 = vor.u32 %v2254_v13, %v1944_v12  ;;  %v1953_v30 = vor.u32 %v2255_v28, %v1952_v27  ;;  %v2080_v40 = vld [vmem:[%s3454_s0 + $0x408] sm:$0xf]  ;;  %v2263_v44 = vld [vmem:[%s3454_s0 + $0x38c] sm:$0xf] }
   0x7   :  { %v2072_v17 = vld [vmem:[%s3454_s0 + $0x400] sm:$0xf]  ;;  %v2262_v22 = vld [vmem:[%s3454_s0 + $0x384] sm:$0xf]  ;;  %v173_v33 = vunpack.c.h.b16 %v2353_v14  ;;  %v2077_v35 = vor.u32 %v2278_v19, %v2074_v21  ;;  %v779_v38 = vpack.c.b16 %v619_v29, %v619_v29  ;;  %v1888_v41 = vld [vmem:[%s3454_s0 + $0x288] sm:$0xf]  ;;  %v620_v28 = vunpack.c.h.b16 %v2378_v26 }
   0x8   :  { %v2286_v18 = vld [vmem:[%s3454_s0 + $0x43c] sm:$0xf0]  ;;  %v2010_v23 = vld [vmem:[%s3454_s0 + $0x3c0] sm:$0xf0]  ;;  %v946_v24 = vand.u32 %v2342_v10, %v777_v15  ;;  %v949_v25 = vand.u32 %v2342_v10, %v778_v16  ;;  %v2287_v43 = vld [vmem:[%s3454_s0 + $0x444] sm:$0xf0] }
   0x9   :  { %v1880_v31 = vld [vmem:[%s3454_s0 + $0x280] sm:$0xf]  ;;  %v2073_v34 = vor.u32 %v2286_v18, %v2072_v17  ;;  %v2246_v36 = vld [vmem:[%s3454_s0 + $0x304] sm:$0xf]  ;;  %994 = vmatpush.bf16.msra.mxu0 %v1945_v20  ;;  %v2013_v37 = vor.u32 %v2262_v22, %v2010_v23  ;;  %1046 = vmatpush.bf16.msra.mxu1 %v1953_v30  ;;  %v2239_v45 = vld [vmem:[%s3454_s0 + $0x2c4] sm:$0xf0]  ;;  %v952_v46 = vand.u32 %v2342_v10, %v779_v38 }
   0xa   :  { %v2238_v32 = vld [vmem:[%s3454_s0 + $0x2bc] sm:$0xf0]  ;;  %1012 = vmatpush.bf16.msra.mxu2 %v946_v24  ;;  %1038 = vmatpush.bf16.msra.mxu3 %v949_v25  ;;  %v1946_v39 = vld [vmem:[%s3454_s0 + $0x340] sm:$0xf0]  ;;  %v2416_v47 = vpack.c.b16 %v173_v33, %v173_v33  ;;  %v2018_v48 = vld [vmem:[%s3454_s0 + $0x3c8] sm:$0xf0]  ;;  %v1889_v49 = vor.u32 %v2239_v45, %v1888_v41  ;;  %v2081_v55 = vor.u32 %v2287_v43, %v2080_v40 }
   0xb   :  { %v1881_v42 = vor.u32 %v2238_v32, %v1880_v31  ;;  %v1816_v50 = vld [vmem:[%s3454_s0 + $0x200] sm:$0xf]  ;;  %v1824_v52 = vld [vmem:[%s3454_s0 + $0x208] sm:$0xf]  ;;  %v1949_v54 = vor.u32 %v2246_v36, %v1946_v39  ;;  %v2021_v56 = vor.u32 %v2263_v44, %v2018_v48  ;;  %v2230_v58 = vld [vmem:[%s3454_s0 + $0x284] sm:$0xf]  ;;  %v780_v40 = vpack.c.b16 %v620_v28, %v620_v28 }
   0xc   :  { %v2222_v51 = vld [vmem:[%s3454_s0 + $0x23c] sm:$0xf0]  ;;  %v2223_v53 = vld [vmem:[%s3454_s0 + $0x244] sm:$0xf0]  ;;  %v1882_v59 = vld [vmem:[%s3454_s0 + $0x2c0] sm:$0xf0]  ;;  %v172_v44 = vunpack.c.l.b16 %v2353_v14 }
   0xd   :  { %995 = vmatpush.bf16.msra.mxu0 %v1881_v42  ;;  %1047 = vmatpush.bf16.msra.mxu1 %v1889_v49  ;;  %v1817_v57 = vor.u32 %v2222_v51, %v1816_v50  ;;  %v2247_v60 = vld [vmem:[%s3454_s0 + $0x30c] sm:$0xf]  ;;  %v1825_v62 = vor.u32 %v2223_v53, %v1824_v52  ;;  %v1752_v63 = vld [vmem:[%s3454_s0 + $0x180] sm:$0xf]  ;;  %v1760_v1 = vld [vmem:[%s3454_s0 + $0x188] sm:$0xf]  ;;  %v1885_v3 = vor.u32 %v2230_v58, %v1882_v59 }
   0xe   :  { %1013 = vmatpush.bf16.msra.mxu2 %v2073_v34  ;;  %1039 = vmatpush.bf16.msra.mxu3 %v2077_v35  ;;  %v1954_v61 = vld [vmem:[%s3454_s0 + $0x348] sm:$0xf0]  ;;  %v2206_v0 = vld [vmem:[%s3454_s0 + $0x1bc] sm:$0xf0]  ;;  %v2207_v2 = vld [vmem:[%s3454_s0 + $0x1c4] sm:$0xf0]  ;;  %v955_v14 = vand.u32 %v2342_v10, %v780_v40 }
   0xf   :  { %v1957_v4 = vor.u32 %v2247_v60, %v1954_v61  ;;  %v1753_v5 = vor.u32 %v2206_v0, %v1752_v63  ;;  %v2214_v6 = vld [vmem:[%s3454_s0 + $0x204] sm:$0xf]  ;;  %v2231_v8 = vld [vmem:[%s3454_s0 + $0x28c] sm:$0xf]  ;;  %v1761_v11 = vor.u32 %v2207_v2, %v1760_v1  ;;  %v1688_v12 = vld [vmem:[%s3454_s0 + $0x100] sm:$0xf]  ;;  %v2562_v61 = vpack.c.b16 %v172_v44, %v172_v44 }
  0x10   :  { %v1818_v7 = vld [vmem:[%s3454_s0 + $0x240] sm:$0xf0]  ;;  %v1890_v9 = vld [vmem:[%s3454_s0 + $0x2c8] sm:$0xf0]  ;;  %v2190_v13 = vld [vmem:[%s3454_s0 + $0x13c] sm:$0xf0] }
  0x11   :  { %2135 = vmatmul.msk.bf16.vlgmr.msra.gmra.mxu3 %vm937_vm2, %v2416_v47  ;;  %2134 = vmatmul.msk.bf16.vlgmr.msra.gmra.mxu2 %vm937_vm2, %v2416_v47  ;;  %v1696_v15 = vld [vmem:[%s3454_s0 + $0x108] sm:$0xf]  ;;  %v1821_v17 = vor.u32 %v2214_v6, %v1818_v7  ;;  %v1893_v18 = vor.u32 %v2231_v8, %v1890_v9  ;;  %v1689_v19 = vor.u32 %v2190_v13, %v1688_v12  ;;  %v2198_v20 = vld [vmem:[%s3454_s0 + $0x184] sm:$0xf]  ;;  %v2215_v22 = vld [vmem:[%s3454_s0 + $0x20c] sm:$0xf] }
  0x12   :  { %1019 = vmatpush.bf16.msrb.mxu2 %v2013_v37  ;;  %1064 = vmatpush.bf16.msrb.mxu3 %v952_v46  ;;  %v2191_v16 = vld [vmem:[%s3454_s0 + $0x144] sm:$0xf0]  ;;  %v1754_v21 = vld [vmem:[%s3454_s0 + $0x1c0] sm:$0xf0]  ;;  %v1826_v23 = vld [vmem:[%s3454_s0 + $0x248] sm:$0xf0] }
  0x13   :  { %996 = vmatpush.bf16.msra.mxu0 %v1817_v57  ;;  %1048 = vmatpush.bf16.msra.mxu1 %v1825_v62  ;;  %v1697_v24 = vor.u32 %v2191_v16, %v1696_v15  ;;  %v1624_v25 = vld [vmem:[%s3454_s0 + $0x80] sm:$0xf]  ;;  %v1632_v29 = vld [vmem:[%s3454_s0 + $0x88] sm:$0xf]  ;;  %v1757_v31 = vor.u32 %v2198_v20, %v1754_v21  ;;  %v1829_v32 = vor.u32 %v2215_v22, %v1826_v23  ;;  %v2182_v34 = vld [vmem:[%s3454_s0 + $0x104] sm:$0xf] }
  0x14   :  { %v2174_v27 = vld [vmem:[%s3454_s0 + $0xbc] sm:$0xf0]  ;;  %v2175_v30 = vld [vmem:[%s3454_s0 + $0xc4] sm:$0xf0]  ;;  %v1690_v26 = vld [vmem:[%s3454_s0 + $0x140] sm:$0xf0] }
  0x15   :  { %v1625_v33 = vor.u32 %v2174_v27, %v1624_v25  ;;  %v2199_v35 = vld [vmem:[%s3454_s0 + $0x18c] sm:$0xf]  ;;  %v1633_v37 = vor.u32 %v2175_v30, %v1632_v29  ;;  %v1560_v38 = vld [vmem:[%s3454_s0] sm:$0xf]  ;;  %v1568_v41 = vld [vmem:[%s3454_s0 + $0x8] sm:$0xf]  ;;  %v1693_v43 = vor.u32 %v2182_v34, %v1690_v26 }
  0x16   :  { %1020 = vmatpush.bf16.msrb.mxu2 %v1949_v54  ;;  %1065 = vmatpush.bf16.msrb.mxu3 %v2081_v55  ;;  %v1762_v36 = vld [vmem:[%s3454_s0 + $0x1c8] sm:$0xf0]  ;;  %v2158_v39 = vld [vmem:[%s3454_s0 + $0x3c] sm:$0xf0]  ;;  %v2159_v42 = vld [vmem:[%s3454_s0 + $0x44] sm:$0xf0] }
  0x17   :  { %997 = vmatpush.bf16.msra.mxu0 %v1753_v5  ;;  %1049 = vmatpush.bf16.msra.mxu1 %v1761_v11  ;;  %v165_v45 = vld [vmem:[%s3454_s0 + $0x490] sm:$0x33]  ;;  %v1765_v46 = vor.u32 %v2199_v35, %v1762_v36  ;;  %v1561_v48 = vor.u32 %v2158_v39, %v1560_v38  ;;  %v2166_v49 = vld [vmem:[%s3454_s0 + $0x84] sm:$0xf]  ;;  %v2183_v53 = vld [vmem:[%s3454_s0 + $0x10c] sm:$0xf]  ;;  %v1569_v55 = vor.u32 %v2159_v42, %v1568_v41 }
  0x18   :  { %v1626_v50 = vld [vmem:[%s3454_s0 + $0xc0] sm:$0xf0]  ;;  %v621_v51 = vunpack.c.l.b16 %v165_v45  ;;  %v622_v52 = vunpack.c.h.b16 %v165_v45  ;;  %v1698_v54 = vld [vmem:[%s3454_s0 + $0x148] sm:$0xf0]  ;;  %v2264_v58 = vld [vmem:[%s3454_s0 + $0x394] sm:$0xf] }
  0x19   :  { %v2082_v57 = vld [vmem:[%s3454_s0 + $0x448] sm:$0xf0]  ;;  %v1629_v60 = vor.u32 %v2166_v49, %v1626_v50  ;;  %v2026_v62 = vld [vmem:[%s3454_s0 + $0x3d0] sm:$0xf0]  ;;  %v2088_v0 = vld [vmem:[%s3454_s0 + $0x410] sm:$0xf]  ;;  %v1701_v2 = vor.u32 %v2183_v53, %v1698_v54 }
  0x1a   :  { %1071 = vmatpush.bf16.msra.mxu3 %v2021_v56  ;;  %1021 = vmatpush.bf16.msrb.mxu2 %v1885_v3  ;;  %v2279_v56 = vld [vmem:[%s3454_s0 + $0x40c] sm:$0xf]  ;;  %v781_v59 = vpack.c.b16 %v621_v51, %v621_v51  ;;  %v782_v63 = vpack.c.b16 %v622_v52, %v622_v52  ;;  %v2288_v1 = vld [vmem:[%s3454_s0 + $0x44c] sm:$0xf0]  ;;  %v2150_v3 = vld [vmem:[%s3454_s0 + $0x4] sm:$0xf]  ;;  %v2029_v12 = vor.u32 %v2264_v58, %v2026_v62 }
  0x1b   :  { %998 = vmatpush.bf16.msra.mxu0 %v1689_v19  ;;  %1050 = vmatpush.bf16.msra.mxu1 %v1697_v24  ;;  %v2167_v5 = vld [vmem:[%s3454_s0 + $0x8c] sm:$0xf]  ;;  %v2085_v7 = vor.u32 %v2279_v56, %v2082_v57  ;;  %v2024_v9 = vld [vmem:[%s3454_s0 + $0x390] sm:$0xf]  ;;  %v2089_v13 = vor.u32 %v2288_v1, %v2088_v0  ;;  %v2248_v16 = vld [vmem:[%s3454_s0 + $0x314] sm:$0xf] }
  0x1c   :  { %v958_v6 = vand.u32 %v2342_v10, %v781_v59  ;;  %v1634_v8 = vld [vmem:[%s3454_s0 + $0xc8] sm:$0xf0]  ;;  %v2272_v11 = vld [vmem:[%s3454_s0 + $0x3cc] sm:$0xf0]  ;;  %v2280_v22 = vld [vmem:[%s3454_s0 + $0x414] sm:$0xf] }
  0x1d   :  { %v1637_v19 = vor.u32 %v2167_v5, %v1634_v8  ;;  %v2025_v20 = vor.u32 %v2272_v11, %v2024_v9  ;;  %v2151_v21 = vld [vmem:[%s3454_s0 + $0xc] sm:$0xf]  ;;  %v2090_v23 = vld [vmem:[%s3454_s0 + $0x450] sm:$0xf0]  ;;  %v1960_v25 = vld [vmem:[%s3454_s0 + $0x310] sm:$0xf] }
  0x1e   :  { %1072 = vmatpush.bf16.msra.mxu3 %v1957_v4  ;;  %1022 = vmatpush.bf16.msrb.mxu2 %v1821_v17  ;;  %v1562_v4 = vld [vmem:[%s3454_s0 + $0x40] sm:$0xf0]  ;;  %v1962_v17 = vld [vmem:[%s3454_s0 + $0x350] sm:$0xf0]  ;;  %v1570_v24 = vld [vmem:[%s3454_s0 + $0x48] sm:$0xf0] }
  0x1f   :  { %999 = vmatpush.bf16.msra.mxu0 %v1625_v33  ;;  %1051 = vmatpush.bf16.msra.mxu1 %v1633_v37  ;;  %v1565_v15 = vor.u32 %v2150_v3, %v1562_v4  ;;  %v2256_v27 = vld [vmem:[%s3454_s0 + $0x34c] sm:$0xf0]  ;;  %v1965_v28 = vor.u32 %v2248_v16, %v1962_v17  ;;  %v2032_v29 = vld [vmem:[%s3454_s0 + $0x398] sm:$0xf]  ;;  %v2093_v33 = vor.u32 %v2280_v22, %v2090_v23  ;;  %v2216_v41 = vld [vmem:[%s3454_s0 + $0x214] sm:$0xf] }
  0x20   :  { %v2273_v30 = vld [vmem:[%s3454_s0 + $0x3d4] sm:$0xf0]  ;;  %v1573_v34 = vor.u32 %v2151_v21, %v1570_v24  ;;  %v1961_v26 = vor.u32 %v2256_v27, %v1960_v25  ;;  %v1896_v35 = vld [vmem:[%s3454_s0 + $0x290] sm:$0xf]  ;;  %v1834_v42 = vld [vmem:[%s3454_s0 + $0x250] sm:$0xf0] }
  0x21   :  { %2136 = vmatmul.msk.bf16.vlgmr.msrb.gmra.mxu3 %vm937_vm2, %v2416_v47  ;;  %v2240_v36 = vld [vmem:[%s3454_s0 + $0x2cc] sm:$0xf0]  ;;  %v2033_v37 = vor.u32 %v2273_v30, %v2032_v29  ;;  %v1968_v39 = vld [vmem:[%s3454_s0 + $0x318] sm:$0xf]  ;;  %v1837_v49 = vor.u32 %v2216_v41, %v1834_v42  ;;  %v2265_v51 = vld [vmem:[%s3454_s0 + $0x39c] sm:$0xf] }
  0x22   :  { %1073 = vmatpush.bf16.msra.mxu3 %v1893_v18  ;;  %1023 = vmatpush.bf16.msrb.mxu2 %v1757_v31  ;;  %v961_v18 = vand.u32 %v2342_v10, %v782_v63  ;;  %v2232_v31 = vld [vmem:[%s3454_s0 + $0x294] sm:$0xf]  ;;  %v2257_v40 = vld [vmem:[%s3454_s0 + $0x354] sm:$0xf0]  ;;  %v1832_v44 = vld [vmem:[%s3454_s0 + $0x210] sm:$0xf] }
  0x23   :  { %1000 = vmatpush.bf16.msra.mxu0 %v1561_v48  ;;  %1052 = vmatpush.bf16.msra.mxu1 %v1569_v55  ;;  %v2224_v45 = vld [vmem:[%s3454_s0 + $0x24c] sm:$0xf0]  ;;  %v1904_v48 = vld [vmem:[%s3454_s0 + $0x298] sm:$0xf]  ;;  %v2034_v52 = vld [vmem:[%s3454_s0 + $0x3d8] sm:$0xf0] }
  0x24   :  { %v2241_v50 = vld [vmem:[%s3454_s0 + $0x2d4] sm:$0xf0]  ;;  %v1770_v53 = vld [vmem:[%s3454_s0 + $0x1d0] sm:$0xf0]  ;;  %v1833_v54 = vor.u32 %v2224_v45, %v1832_v44  ;;  %v1768_v55 = vld [vmem:[%s3454_s0 + $0x190] sm:$0xf]  ;;  %v2037_v58 = vor.u32 %v2265_v51, %v2034_v52 }
  0x25   :  { %v2208_v56 = vld [vmem:[%s3454_s0 + $0x1cc] sm:$0xf0]  ;;  %v1905_v57 = vor.u32 %v2241_v50, %v1904_v48  ;;  %v1840_v59 = vld [vmem:[%s3454_s0 + $0x218] sm:$0xf]  ;;  %v2249_v63 = vld [vmem:[%s3454_s0 + $0x31c] sm:$0xf] }
  0x26   :  { %1074 = vmatpush.bf16.msra.mxu3 %v1829_v32  ;;  %1024 = vmatpush.bf16.msrb.mxu2 %v1693_v43  ;;  %v1898_v32 = vld [vmem:[%s3454_s0 + $0x2d0] sm:$0xf0]  ;;  %v1897_v43 = vor.u32 %v2240_v36, %v1896_v35  ;;  %v2225_v62 = vld [vmem:[%s3454_s0 + $0x254] sm:$0xf0]  ;;  %v1970_v0 = vld [vmem:[%s3454_s0 + $0x358] sm:$0xf0]  ;;  %v1769_v3 = vor.u32 %v2208_v56, %v1768_v55 }
  0x27   :  { %1090 = vmatpush.bf16.msrb.mxu0 %v955_v14  ;;  %1116 = vmatpush.bf16.msrb.mxu1 %v958_v6  ;;  %v1901_v38 = vor.u32 %v2232_v31, %v1898_v32  ;;  %v2200_v14 = vld [vmem:[%s3454_s0 + $0x194] sm:$0xf]  ;;  %v166_v4 = vld [vmem:[%s3454_s0 + $0x498] sm:$0x33]  ;;  %v1704_v5 = vld [vmem:[%s3454_s0 + $0x110] sm:$0xf]  ;;  %v1973_v8 = vor.u32 %v2249_v63, %v1970_v0 }
  0x28   :  { %1001 = vmatmul.bf16.vlgmr.msra.gmra.mxu0 %v2562_v61  ;;  %1053 = vmatmul.bf16.vlgmr.msra.gmra.mxu1 %v2562_v61  ;;  %v2184_v1 = vld [vmem:[%s3454_s0 + $0x114] sm:$0xf]  ;;  %v2192_v6 = vld [vmem:[%s3454_s0 + $0x14c] sm:$0xf0]  ;;  %v1776_v9 = vld [vmem:[%s3454_s0 + $0x198] sm:$0xf]  ;;  %v623_v25 = vunpack.c.l.b16 %v166_v4 }
  0x29   :  { %v2168_v16 = vld [vmem:[%s3454_s0 + $0x94] sm:$0xf]  ;;  %v2176_v21 = vld [vmem:[%s3454_s0 + $0xcc] sm:$0xf0]  ;;  %v1712_v24 = vld [vmem:[%s3454_s0 + $0x118] sm:$0xf] }
  0x2a   :  { %1075 = vmatpush.bf16.msra.mxu3 %v1765_v46  ;;  %1025 = vmatpush.bf16.msrb.mxu2 %v1629_v60  ;;  %v1969_v46 = vor.u32 %v2257_v40, %v1968_v39  ;;  %v1773_v60 = vor.u32 %v2200_v14, %v1770_v53  ;;  %v1642_v17 = vld [vmem:[%s3454_s0 + $0xd0] sm:$0xf0]  ;;  %v2217_v29 = vld [vmem:[%s3454_s0 + $0x21c] sm:$0xf]  ;;  %v1576_v35 = vld [vmem:[%s3454_s0 + $0x10] sm:$0xf]  ;;  %v783_v39 = vpack.c.b16 %v623_v25, %v623_v25 }
  0x2b   :  { %1091 = vmatpush.bf16.msrb.mxu0 %v2085_v7  ;;  %1117 = vmatpush.bf16.msrb.mxu1 %v2089_v13  ;;  %v1841_v7 = vor.u32 %v2225_v62, %v1840_v59  ;;  %v2233_v13 = vld [vmem:[%s3454_s0 + $0x29c] sm:$0xf]  ;;  %v1645_v27 = vor.u32 %v2168_v16, %v1642_v17  ;;  %v2152_v31 = vld [vmem:[%s3454_s0 + $0x14] sm:$0xf]  ;;  %v2160_v36 = vld [vmem:[%s3454_s0 + $0x4c] sm:$0xf0] }
  0x2c   :  { %v1842_v30 = vld [vmem:[%s3454_s0 + $0x258] sm:$0xf0]  ;;  %v1578_v32 = vld [vmem:[%s3454_s0 + $0x50] sm:$0xf0]  ;;  %v1648_v41 = vld [vmem:[%s3454_s0 + $0x98] sm:$0xf]  ;;  %v1577_v48 = vor.u32 %v2160_v36, %v1576_v35  ;;  %v964_v52 = vand.u32 %v2342_v10, %v783_v39 }
  0x2d   :  { %v1581_v40 = vor.u32 %v2152_v31, %v1578_v32  ;;  %v2177_v42 = vld [vmem:[%s3454_s0 + $0xd4] sm:$0xf0]  ;;  %v2201_v44 = vld [vmem:[%s3454_s0 + $0x19c] sm:$0xf]  ;;  %v2042_v55 = vld [vmem:[%s3454_s0 + $0x3e0] sm:$0xf0] }
  0x2e   :  { %1076 = vmatpush.bf16.msra.mxu3 %v1701_v2  ;;  %1026 = vmatpush.bf16.msrb.mxu2 %v1565_v15  ;;  %v1706_v2 = vld [vmem:[%s3454_s0 + $0x150] sm:$0xf0]  ;;  %v1906_v15 = vld [vmem:[%s3454_s0 + $0x2d8] sm:$0xf0]  ;;  %v1649_v14 = vor.u32 %v2177_v42, %v1648_v41  ;;  %v2289_v53 = vld [vmem:[%s3454_s0 + $0x454] sm:$0xf0] }
  0x2f   :  { %1123 = vmatpush.bf16.msra.mxu0 %v2029_v12  ;;  %1142 = vmatpush.bf16.msra.mxu1 %v961_v18  ;;  %v1709_v11 = vor.u32 %v2184_v1, %v1706_v2  ;;  %v2209_v12 = vld [vmem:[%s3454_s0 + $0x1d4] sm:$0xf0]  ;;  %v624_v18 = vunpack.c.h.b16 %v166_v4  ;;  %v1909_v23 = vor.u32 %v2233_v13, %v1906_v15  ;;  %v1778_v45 = vld [vmem:[%s3454_s0 + $0x1d8] sm:$0xf0]  ;;  %v2274_v62 = vld [vmem:[%s3454_s0 + $0x3dc] sm:$0xf0] }
  0x30   :  { %v1777_v22 = vor.u32 %v2209_v12, %v1776_v9  ;;  %v2281_v50 = vld [vmem:[%s3454_s0 + $0x41c] sm:$0xf]  ;;  %v1781_v56 = vor.u32 %v2201_v44, %v1778_v45  ;;  %v2161_v59 = vld [vmem:[%s3454_s0 + $0x54] sm:$0xf0]  ;;  %v1976_v9 = vld [vmem:[%s3454_s0 + $0x320] sm:$0xf] }
  0x31   :  { %1027 = vmatmul.bf16.vlgmr.msrb.gmra.mxu2 %v2562_v61  ;;  %v2098_v51 = vld [vmem:[%s3454_s0 + $0x458] sm:$0xf0]  ;;  %v2258_v12 = vld [vmem:[%s3454_s0 + $0x35c] sm:$0xf0]  ;;  %v1850_v35 = vld [vmem:[%s3454_s0 + $0x260] sm:$0xf0] }
  0x32   :  { %1077 = vmatpush.bf16.msra.mxu3 %v1637_v19  ;;  %1097 = vmatpush.bf16.msra.mxu2 %v2025_v20  ;;  %v1705_v19 = vor.u32 %v2192_v6, %v1704_v5  ;;  %v1640_v20 = vld [vmem:[%s3454_s0 + $0x90] sm:$0xf]  ;;  %v2185_v63 = vld [vmem:[%s3454_s0 + $0x11c] sm:$0xf]  ;;  %v2250_v5 = vld [vmem:[%s3454_s0 + $0x324] sm:$0xf] }
  0x33   :  { %1124 = vmatpush.bf16.msra.mxu0 %v1965_v28  ;;  %1143 = vmatpush.bf16.msra.mxu1 %v2093_v33  ;;  %v2193_v28 = vld [vmem:[%s3454_s0 + $0x154] sm:$0xf0]  ;;  %v784_v33 = vpack.c.b16 %v624_v18, %v624_v18  ;;  %v1714_v0 = vld [vmem:[%s3454_s0 + $0x158] sm:$0xf0]  ;;  %v1978_v6 = vld [vmem:[%s3454_s0 + $0x360] sm:$0xf0] }
  0x34   :  { %v2169_v13 = vld [vmem:[%s3454_s0 + $0x9c] sm:$0xf]  ;;  %v1981_v17 = vor.u32 %v2250_v5, %v1978_v6  ;;  %v2104_v18 = vld [vmem:[%s3454_s0 + $0x420] sm:$0xf]  ;;  %v1984_v36 = vld [vmem:[%s3454_s0 + $0x328] sm:$0xf] }
  0x35   :  { %v1650_v15 = vld [vmem:[%s3454_s0 + $0xd8] sm:$0xf0]  ;;  %v1848_v41 = vld [vmem:[%s3454_s0 + $0x220] sm:$0xf]  ;;  %v2282_v45 = vld [vmem:[%s3454_s0 + $0x424] sm:$0xf] }
  0x36   :  { %1078 = vmatpush.bf16.msra.mxu3 %v1573_v34  ;;  %1098 = vmatpush.bf16.msra.mxu2 %v1961_v26  ;;  %v1641_v34 = vor.u32 %v2176_v21, %v1640_v20  ;;  %v2757_v26 = vld [vmem:[%s3454_s0 + $0x4a0] sm:$0x33]  ;;  %v1653_v25 = vor.u32 %v2169_v13, %v1650_v15  ;;  %v1586_v31 = vld [vmem:[%s3454_s0 + $0x58] sm:$0xf0]  ;;  %v1792_v13 = vld [vmem:[%s3454_s0 + $0x1a8] sm:$0xf] }
  0x37   :  { %1125 = vmatpush.bf16.msra.mxu0 %v1901_v38  ;;  %v1845_v38 = vor.u32 %v2217_v29, %v1842_v30  ;;  %v626_v16 = vunpack.c.h.b16 %v2757_v26  ;;  %v2234_v20 = vld [vmem:[%s3454_s0 + $0x2a4] sm:$0xf]  ;;  %v2242_v29 = vld [vmem:[%s3454_s0 + $0x2dc] sm:$0xf0]  ;;  %v2153_v30 = vld [vmem:[%s3454_s0 + $0x1c] sm:$0xf] }
  0x38   :  { %2137 = vmatmul.msk.bf16.vlgmr.msrb.gmra.mxu0 %vm937_vm2, %v2416_v47  ;;  %2138 = vmatmul.msk.bf16.vlgmr.msrb.gmra.mxu1 %vm937_vm2, %v2416_v47  ;;  %v1914_v21 = vld [vmem:[%s3454_s0 + $0x2e0] sm:$0xf0]  ;;  %v1589_v39 = vor.u32 %v2153_v30, %v1586_v31  ;;  %v2226_v42 = vld [vmem:[%s3454_s0 + $0x25c] sm:$0xf0]  ;;  %v2211_v15 = vld [vmem:[%s3454_s0 + $0x1e4] sm:$0xf0] }
  0x39   :  { %1079 = vmatmul.bf16.vlgmr.msra.gmra.mxu3 %v2562_v61  ;;  %1175 = vmatpush.bf16.msrb.mxu1 %v2037_v58  ;;  %v1584_v58 = vld [vmem:[%s3454_s0 + $0x18] sm:$0xf]  ;;  %v786_v32 = vpack.c.b16 %v626_v16, %v626_v16  ;;  %v1720_v5 = vld [vmem:[%s3454_s0 + $0x120] sm:$0xf]  ;;  %v2195_v30 = vld [vmem:[%s3454_s0 + $0x164] sm:$0xf0] }
  0x3a   :  { %1149 = vmatpush.bf16.msrb.mxu3 %v2033_v37  ;;  %1099 = vmatpush.bf16.msra.mxu2 %v1897_v43  ;;  %v1713_v37 = vor.u32 %v2193_v28, %v1712_v24  ;;  %v967_v43 = vand.u32 %v2342_v10, %v784_v33  ;;  %v1585_v4 = vor.u32 %v2161_v59, %v1584_v58  ;;  %v2186_v59 = vld [vmem:[%s3454_s0 + $0x124] sm:$0xf]  ;;  %v2194_v6 = vld [vmem:[%s3454_s0 + $0x15c] sm:$0xf0] }
  0x3b   :  { %1126 = vmatpush.bf16.msra.mxu0 %v1837_v49  ;;  %v2096_v49 = vld [vmem:[%s3454_s0 + $0x418] sm:$0xf]  ;;  %v1977_v24 = vor.u32 %v2258_v12, %v1976_v9  ;;  %v1917_v33 = vor.u32 %v2234_v20, %v1914_v21  ;;  %v2170_v9 = vld [vmem:[%s3454_s0 + $0xa4] sm:$0xf]  ;;  %v1656_v20 = vld [vmem:[%s3454_s0 + $0xa0] sm:$0xf] }
  0x3c   :  { %v1658_v12 = vld [vmem:[%s3454_s0 + $0xe0] sm:$0xf0]  ;;  %v2178_v21 = vld [vmem:[%s3454_s0 + $0xdc] sm:$0xf0] }
  0x3d   :  { %1176 = vmatpush.bf16.msrb.mxu1 %v1973_v8  ;;  %v1717_v8 = vor.u32 %v2185_v63, %v1714_v0  ;;  %v1856_v63 = vld [vmem:[%s3454_s0 + $0x228] sm:$0xf] }
  0x3e   :  { %1150 = vmatpush.bf16.msrb.mxu3 %v1969_v46  ;;  %1100 = vmatpush.bf16.msra.mxu2 %v1833_v54  ;;  %v625_v46 = vunpack.c.l.b16 %v2757_v26  ;;  %v2266_v54 = vld [vmem:[%s3454_s0 + $0x3a4] sm:$0xf]  ;;  %v2227_v0 = vld [vmem:[%s3454_s0 + $0x264] sm:$0xf0] }
  0x3f   :  { %1127 = vmatpush.bf16.msra.mxu0 %v1773_v60  ;;  %v2101_v60 = vor.u32 %v2281_v50, %v2098_v51  ;;  %v2045_v2 = vor.u32 %v2266_v54, %v2042_v55  ;;  %v2218_v26 = vld [vmem:[%s3454_s0 + $0x224] sm:$0xf]  ;;  %v1920_v50 = vld [vmem:[%s3454_s0 + $0x2a8] sm:$0xf]  ;;  %v1784_v55 = vld [vmem:[%s3454_s0 + $0x1a0] sm:$0xf] }
  0x40   :  { %v785_v1 = vpack.c.b16 %v625_v46, %v625_v46  ;;  %v2106_v46 = vld [vmem:[%s3454_s0 + $0x460] sm:$0xf0]  ;;  %v2243_v51 = vld [vmem:[%s3454_s0 + $0x2e4] sm:$0xf0] }
  0x41   :  { %1177 = vmatpush.bf16.msrb.mxu1 %v1909_v23  ;;  %v2275_v23 = vld [vmem:[%s3454_s0 + $0x3e4] sm:$0xf0]  ;;  %v2109_v54 = vor.u32 %v2282_v45, %v2106_v46  ;;  %v1921_v58 = vor.u32 %v2243_v51, %v1920_v50  ;;  %v2203_v46 = vld [vmem:[%s3454_s0 + $0x1ac] sm:$0xf] }
  0x42   :  { %1151 = vmatpush.bf16.msrb.mxu3 %v1905_v57  ;;  %1101 = vmatpush.bf16.msra.mxu2 %v1769_v3  ;;  %v2040_v57 = vld [vmem:[%s3454_s0 + $0x3a0] sm:$0xf]  ;;  %v2097_v3 = vor.u32 %v2289_v53, %v2096_v49  ;;  %v1786_v49 = vld [vmem:[%s3454_s0 + $0x1e0] sm:$0xf0]  ;;  %v2050_v53 = vld [vmem:[%s3454_s0 + $0x3e8] sm:$0xf0] }
  0x43   :  { %1128 = vmatpush.bf16.msra.mxu0 %v1709_v11  ;;  %v970_v11 = vand.u32 %v2342_v10, %v785_v1  ;;  %v2291_v51 = vld [vmem:[%s3454_s0 + $0x464] sm:$0xf0] }
  0x45   :  { %1178 = vmatpush.bf16.msrb.mxu1 %v1845_v38 }
  0x46   :  { %1152 = vmatpush.bf16.msrb.mxu3 %v1841_v7  ;;  %1102 = vmatpush.bf16.msra.mxu2 %v1705_v19  ;;  %v2041_v7 = vor.u32 %v2274_v62, %v2040_v57  ;;  %v2290_v19 = vld [vmem:[%s3454_s0 + $0x45c] sm:$0xf0]  ;;  %v1722_v62 = vld [vmem:[%s3454_s0 + $0x160] sm:$0xf0] }
  0x47   :  { %1129 = vmatpush.bf16.msra.mxu0 %v1645_v27  ;;  %v1912_v27 = vld [vmem:[%s3454_s0 + $0x2a0] sm:$0xf]  ;;  %v2105_v28 = vor.u32 %v2290_v19, %v2104_v18  ;;  %v2235_v18 = vld [vmem:[%s3454_s0 + $0x2ac] sm:$0xf] }
  0x48   :  { %2139 = vmatmul.msk.bf16.vlgmr.msra.gmra.mxu1 %vm937_vm2, %v2416_v47  ;;  %v1913_v38 = vor.u32 %v2242_v29, %v1912_v27  ;;  %v1922_v19 = vld [vmem:[%s3454_s0 + $0x2e8] sm:$0xf0]  ;;  %v1728_v29 = vld [vmem:[%s3454_s0 + $0x128] sm:$0xf] }
  0x49   :  { %1179 = vmatpush.bf16.msrb.mxu1 %v1781_v56  ;;  %v2210_v56 = vld [vmem:[%s3454_s0 + $0x1dc] sm:$0xf0]  ;;  %v1925_v27 = vor.u32 %v2235_v18, %v1922_v19 }
  0x4a   :  { %1153 = vmatpush.bf16.msrb.mxu3 %v1777_v22  ;;  %1103 = vmatpush.bf16.msra.mxu2 %v1641_v34  ;;  %v2048_v22 = vld [vmem:[%s3454_s0 + $0x3a8] sm:$0xf]  ;;  %v1785_v1 = vor.u32 %v2210_v56, %v1784_v55  ;;  %v2268_v55 = vld [vmem:[%s3454_s0 + $0x3b4] sm:$0xf] }
  0x4b   :  { %1130 = vmatpush.bf16.msra.mxu0 %v1581_v40  ;;  %v2049_v34 = vor.u32 %v2275_v23, %v2048_v22  ;;  %v973_v40 = vand.u32 %v2342_v10, %v786_v32  ;;  %v1661_v23 = vor.u32 %v2170_v9, %v1658_v12  ;;  %v1657_v32 = vor.u32 %v2178_v21, %v1656_v20  ;;  %v2058_v56 = vld [vmem:[%s3454_s0 + $0x3f0] sm:$0xf0]  ;;  %v2260_v12 = vld [vmem:[%s3454_s0 + $0x36c] sm:$0xf0]  ;;  %v2064_v20 = vld [vmem:[%s3454_s0 + $0x3b8] sm:$0xf] }
  0x4c   :  { %v2277_v21 = vld [vmem:[%s3454_s0 + $0x3f4] sm:$0xf0] }
  0x4d   :  { %1180 = vmatpush.bf16.msrb.mxu1 %v1717_v8  ;;  %v1857_v8 = vor.u32 %v2227_v0, %v1856_v63  ;;  %v2187_v0 = vld [vmem:[%s3454_s0 + $0x12c] sm:$0xf] }
  0x4e   :  { %1154 = vmatpush.bf16.msrb.mxu3 %v1713_v37  ;;  %1104 = vmatpush.bf16.msra.mxu2 %v1577_v48  ;;  %v2259_v37 = vld [vmem:[%s3454_s0 + $0x364] sm:$0xf0]  ;;  %v2202_v48 = vld [vmem:[%s3454_s0 + $0x1a4] sm:$0xf] }
  0x4f   :  { %1194 = vmatpush.bf16.msrb.mxu0 %v967_v43  ;;  %v1853_v43 = vor.u32 %v2218_v26, %v1850_v35  ;;  %v1985_v44 = vor.u32 %v2259_v37, %v1984_v36  ;;  %v1789_v57 = vor.u32 %v2202_v48, %v1786_v49  ;;  %v2999_v26 = vld [vmem:[%s3454_s0 + $0x4b0] sm:$0x33]  ;;  %v1592_v35 = vld [vmem:[%s3454_s0 + $0x20] sm:$0xf]  ;;  %v1794_v48 = vld [vmem:[%s3454_s0 + $0x1e8] sm:$0xf0] }
  0x50   :  { %1131 = vmatmul.bf16.vlgmr.msra.gmra.mxu0 %v2562_v61  ;;  %v2162_v36 = vld [vmem:[%s3454_s0 + $0x5c] sm:$0xf0]  ;;  %v2112_v49 = vld [vmem:[%s3454_s0 + $0x428] sm:$0xf]  ;;  %v630_v18 = vunpack.c.h.b16 %v2999_v26 }
  0x51   :  { %1105 = vmatmul.bf16.vlgmr.msra.gmra.mxu2 %v2562_v61  ;;  %1181 = vmatpush.bf16.msrb.mxu1 %v1653_v25  ;;  %v2154_v25 = vld [vmem:[%s3454_s0 + $0x24] sm:$0xf]  ;;  %v1593_v45 = vor.u32 %v2162_v36, %v1592_v35  ;;  %v2261_v35 = vld [vmem:[%s3454_s0 + $0x374] sm:$0xf0] }
  0x52   :  { %1168 = vmatpush.bf16.msrb.mxu2 %v964_v52  ;;  %1155 = vmatpush.bf16.msrb.mxu3 %v1649_v14  ;;  %v1849_v52 = vor.u32 %v2226_v42, %v1848_v41  ;;  %v2267_v14 = vld [vmem:[%s3454_s0 + $0x3ac] sm:$0xf]  ;;  %v1664_v42 = vld [vmem:[%s3454_s0 + $0xa8] sm:$0xf] }
  0x53   :  { %1195 = vmatpush.bf16.msrb.mxu0 %v2101_v60  ;;  %v2053_v60 = vor.u32 %v2267_v14, %v2050_v53  ;;  %v2114_v14 = vld [vmem:[%s3454_s0 + $0x468] sm:$0xf0] }
  0x55   :  { %1182 = vmatpush.bf16.msrb.mxu1 %v1589_v39  ;;  %v1729_v39 = vor.u32 %v2195_v30, %v1728_v29  ;;  %v2244_v29 = vld [vmem:[%s3454_s0 + $0x2ec] sm:$0xf0]  ;;  %v2065_v30 = vor.u32 %v2277_v21, %v2064_v20 }
  0x56   :  { %1169 = vmatpush.bf16.msrb.mxu2 %v2097_v3  ;;  %1156 = vmatpush.bf16.msrb.mxu3 %v1585_v4  ;;  %v1986_v3 = vld [vmem:[%s3454_s0 + $0x368] sm:$0xf0]  ;;  %v2180_v20 = vld [vmem:[%s3454_s0 + $0xec] sm:$0xf0] }
  0x57   :  { %1227 = vmatpush.bf16.msra.mxu0 %v2045_v2  ;;  %v2251_v2 = vld [vmem:[%s3454_s0 + $0x32c] sm:$0xf] }
  0x58   :  { %1183 = vmatmul.bf16.vlgmr.msrb.gmra.mxu1 %v2562_v61  ;;  %v168_v4 = vld [vmem:[%s3454_s0 + $0x4a8] sm:$0x33] }
  0x59   :  { %1157 = vmatmul.bf16.vlgmr.msrb.gmra.mxu3 %v2562_v61  ;;  %1246 = vmatpush.bf16.msra.mxu1 %v973_v40  ;;  %v628_v16 = vunpack.c.h.b16 %v168_v4  ;;  %v627_v22 = vunpack.c.l.b16 %v168_v4 }
  0x5a   :  { %1201 = vmatpush.bf16.msra.mxu2 %v2041_v7  ;;  %1220 = vmatpush.bf16.msra.mxu3 %v970_v11  ;;  %v1725_v7 = vor.u32 %v2186_v59, %v1722_v62  ;;  %v1989_v11 = vor.u32 %v2251_v2, %v1986_v3  ;;  %v1600_v59 = vld [vmem:[%s3454_s0 + $0x28] sm:$0xf]  ;;  %v2113_v2 = vor.u32 %v2291_v51, %v2112_v49  ;;  %v1936_v49 = vld [vmem:[%s3454_s0 + $0x2b8] sm:$0xf] }
  0x5b   :  { %1228 = vmatpush.bf16.msra.mxu0 %v1981_v17  ;;  %v1721_v17 = vor.u32 %v2194_v6, %v1720_v5  ;;  %v788_v31 = vpack.c.b16 %v628_v16, %v628_v16  ;;  %v787_v37 = vpack.c.b16 %v627_v22, %v627_v22  ;;  %v2061_v3 = vor.u32 %v2268_v55, %v2058_v56  ;;  %v2252_v6 = vld [vmem:[%s3454_s0 + $0x334] sm:$0xf]  ;;  %v2120_v16 = vld [vmem:[%s3454_s0 + $0x430] sm:$0xf] }
  0x5c   :  { %v2212_v55 = vld [vmem:[%s3454_s0 + $0x1ec] sm:$0xf0] }
  0x5d   :  { %1247 = vmatpush.bf16.msra.mxu1 %v2109_v54  ;;  %v979_v41 = vand.u32 %v2342_v10, %v788_v31  ;;  %v976_v50 = vand.u32 %v2342_v10, %v787_v37  ;;  %v2056_v54 = vld [vmem:[%s3454_s0 + $0x3b0] sm:$0xf]  ;;  %v2155_v31 = vld [vmem:[%s3454_s0 + $0x2c] sm:$0xf]  ;;  %v2220_v37 = vld [vmem:[%s3454_s0 + $0x234] sm:$0xf] }
  0x5e   :  { %1202 = vmatpush.bf16.msra.mxu2 %v1977_v24  ;;  %1221 = vmatpush.bf16.msra.mxu3 %v2105_v28  ;;  %v1793_v24 = vor.u32 %v2211_v15, %v1792_v13  ;;  %v1594_v28 = vld [vmem:[%s3454_s0 + $0x60] sm:$0xf0]  ;;  %v2171_v13 = vld [vmem:[%s3454_s0 + $0xac] sm:$0xf] }
  0x5f   :  { %1229 = vmatpush.bf16.msra.mxu0 %v1917_v33  ;;  %v2219_v33 = vld [vmem:[%s3454_s0 + $0x22c] sm:$0xf] }
  0x60   :  { %2141 = vmatmul.msk.bf16.vlgmr.msrb.gmra.mxu0 %vm937_vm2, %v2416_v47  ;;  %v1666_v15 = vld [vmem:[%s3454_s0 + $0xe8] sm:$0xf0] }
  0x61   :  { %2140 = vmatmul.msk.bf16.vlgmr.msrb.gmra.mxu2 %vm937_vm2, %v2416_v47  ;;  %1279 = vmatpush.bf16.msrb.mxu1 %v2053_v60  ;;  %v2163_v60 = vld [vmem:[%s3454_s0 + $0x64] sm:$0xf0] }
  0x62   :  { %1253 = vmatpush.bf16.msrb.mxu3 %v2049_v34  ;;  %1203 = vmatpush.bf16.msra.mxu2 %v1913_v38  ;;  %v1858_v34 = vld [vmem:[%s3454_s0 + $0x268] sm:$0xf0]  ;;  %v1597_v38 = vor.u32 %v2154_v25, %v1594_v28  ;;  %v1601_v5 = vor.u32 %v2163_v60, %v1600_v59  ;;  %v1669_v25 = vor.u32 %v2171_v13, %v1666_v15  ;;  %v1928_v28 = vld [vmem:[%s3454_s0 + $0x2b0] sm:$0xf]  ;;  %v2188_v60 = vld [vmem:[%s3454_s0 + $0x134] sm:$0xf] }
  0x63   :  { %1230 = vmatpush.bf16.msra.mxu0 %v1853_v43  ;;  %v1861_v40 = vor.u32 %v2219_v33, %v1858_v34  ;;  %v2179_v43 = vld [vmem:[%s3454_s0 + $0xe4] sm:$0xf0]  ;;  %v790_v33 = vpack.c.b16 %v630_v18, %v630_v18  ;;  %v1929_v36 = vor.u32 %v2244_v29, %v1928_v28  ;;  %v2213_v13 = vld [vmem:[%s3454_s0 + $0x1f4] sm:$0xf0]  ;;  %v1938_v18 = vld [vmem:[%s3454_s0 + $0x2f8] sm:$0xf0] }
  0x64   :  { %v1665_v53 = vor.u32 %v2179_v43, %v1664_v42  ;;  %v1744_v28 = vld [vmem:[%s3454_s0 + $0x138] sm:$0xf] }
  0x65   :  { %1280 = vmatpush.bf16.msrb.mxu1 %v1989_v11  ;;  %v1992_v11 = vld [vmem:[%s3454_s0 + $0x330] sm:$0xf]  ;;  %v985_v42 = vand.u32 %v2342_v10, %v790_v33  ;;  %v2197_v29 = vld [vmem:[%s3454_s0 + $0x174] sm:$0xf0]  ;;  %v1874_v33 = vld [vmem:[%s3454_s0 + $0x278] sm:$0xf0] }
  0x66   :  { %1254 = vmatpush.bf16.msrb.mxu3 %v1985_v44  ;;  %1204 = vmatpush.bf16.msra.mxu2 %v1849_v52  ;;  %v629_v44 = vunpack.c.l.b16 %v2999_v26  ;;  %v2283_v52 = vld [vmem:[%s3454_s0 + $0x42c] sm:$0xf]  ;;  %v1993_v22 = vor.u32 %v2260_v12, %v1992_v11  ;;  %v2000_v26 = vld [vmem:[%s3454_s0 + $0x338] sm:$0xf]  ;;  %v2172_v11 = vld [vmem:[%s3454_s0 + $0xb4] sm:$0xf] }
  0x67   :  { %1231 = vmatpush.bf16.msra.mxu0 %v1789_v57  ;;  %v1797_v57 = vor.u32 %v2203_v46, %v1794_v48  ;;  %v2117_v63 = vor.u32 %v2283_v52, %v2114_v14  ;;  %v2001_v43 = vor.u32 %v2261_v35, %v2000_v26  ;;  %v2204_v48 = vld [vmem:[%s3454_s0 + $0x1b4] sm:$0xf]  ;;  %v2269_v14 = vld [vmem:[%s3454_s0 + $0x3bc] sm:$0xf]  ;;  %v1808_v12 = vld [vmem:[%s3454_s0 + $0x1b8] sm:$0xf] }
  0x68   :  { %v789_v62 = vpack.c.b16 %v629_v44, %v629_v44  ;;  %2143 = vmatmul.msk.bf16.vlgmr.msra.gmra.mxu1 %vm937_vm2, %v2416_v47  ;;  %v2284_v44 = vld [vmem:[%s3454_s0 + $0x434] sm:$0xf]  ;;  %v2164_v26 = vld [vmem:[%s3454_s0 + $0x6c] sm:$0xf0] }
  0x69   :  { %2142 = vmatmul.msk.bf16.vlgmr.msra.gmra.mxu3 %vm937_vm2, %v2416_v47  ;;  %1281 = vmatpush.bf16.msrb.mxu1 %v1925_v27  ;;  %v1802_v52 = vld [vmem:[%s3454_s0 + $0x1f0] sm:$0xf0] }
  0x6a   :  { %1255 = vmatpush.bf16.msrb.mxu3 %v1921_v58  ;;  %1205 = vmatpush.bf16.msra.mxu2 %v1785_v1  ;;  %v2276_v58 = vld [vmem:[%s3454_s0 + $0x3ec] sm:$0xf0]  ;;  %v1730_v1 = vld [vmem:[%s3454_s0 + $0x168] sm:$0xf0]  ;;  %v982_v9 = vand.u32 %v2342_v10, %v789_v62  ;;  %v1872_v62 = vld [vmem:[%s3454_s0 + $0x238] sm:$0xf] }
  0x6b   :  { %1232 = vmatpush.bf16.msra.mxu0 %v1725_v7  ;;  %v2057_v4 = vor.u32 %v2276_v58, %v2056_v54  ;;  %v1994_v7 = vld [vmem:[%s3454_s0 + $0x370] sm:$0xf0]  ;;  %v1800_v54 = vld [vmem:[%s3454_s0 + $0x1b0] sm:$0xf]  ;;  %v1805_v58 = vor.u32 %v2204_v48, %v1802_v52  ;;  %v2130_v52 = vld [vmem:[%s3454_s0 + $0x478] sm:$0xf0] }
  0x6c   :  { %v1997_v19 = vor.u32 %v2252_v6, %v1994_v7  ;;  %v170_v7 = vld [vmem:[%s3454_s0 + $0x4b8] sm:$0x33] }
  0x6d   :  { %1282 = vmatpush.bf16.msrb.mxu1 %v1861_v40  ;;  %v1864_v40 = vld [vmem:[%s3454_s0 + $0x230] sm:$0xf]  ;;  %v631_v21 = vunpack.c.l.b16 %v170_v7 }
  0x6e   :  { %1256 = vmatpush.bf16.msrb.mxu3 %v1857_v8  ;;  %1206 = vmatpush.bf16.msra.mxu2 %v1721_v17  ;;  %v1733_v8 = vor.u32 %v2187_v0, %v1730_v1  ;;  %v2292_v17 = vld [vmem:[%s3454_s0 + $0x46c] sm:$0xf0]  ;;  %v1801_v0 = vor.u32 %v2212_v55, %v1800_v54  ;;  %v1738_v1 = vld [vmem:[%s3454_s0 + $0x170] sm:$0xf0]  ;;  %v2189_v54 = vld [vmem:[%s3454_s0 + $0x13c] sm:$0xf] }
  0x6f   :  { %1233 = vmatpush.bf16.msra.mxu0 %v1661_v23  ;;  %v2236_v23 = vld [vmem:[%s3454_s0 + $0x2b4] sm:$0xf]  ;;  %v2121_v27 = vor.u32 %v2292_v17, %v2120_v16  ;;  %v2237_v17 = vld [vmem:[%s3454_s0 + $0x2bc] sm:$0xf]  ;;  %v791_v35 = vpack.c.b16 %v631_v21, %v631_v21 }
  0x70   :  { %v1674_v16 = vld [vmem:[%s3454_s0 + $0xf0] sm:$0xf0]  ;;  %v1746_v55 = vld [vmem:[%s3454_s0 + $0x178] sm:$0xf0] }
  0x71   :  { %1283 = vmatpush.bf16.msrb.mxu1 %v1797_v57 }
  0x72   :  { %1257 = vmatpush.bf16.msrb.mxu3 %v1793_v24  ;;  %1207 = vmatpush.bf16.msra.mxu2 %v1657_v32  ;;  %v1930_v24 = vld [vmem:[%s3454_s0 + $0x2f0] sm:$0xf0]  ;;  %v1602_v32 = vld [vmem:[%s3454_s0 + $0x68] sm:$0xf0] }
  0x73   :  { %1234 = vmatpush.bf16.msra.mxu0 %v1597_v38  ;;  %v1933_v34 = vor.u32 %v2236_v23, %v1930_v24  ;;  %v1866_v38 = vld [vmem:[%s3454_s0 + $0x270] sm:$0xf0]  ;;  %v1809_v23 = vor.u32 %v2213_v13, %v1808_v12  ;;  %v1677_v24 = vor.u32 %v2172_v11, %v1674_v16 }
  0x74   :  { %v1869_v46 = vor.u32 %v2220_v37, %v1866_v38  ;;  %v1745_v37 = vor.u32 %v2197_v29, %v1744_v28 }
  0x75   :  { %1284 = vmatpush.bf16.msrb.mxu1 %v1733_v8  ;;  %v1741_v8 = vor.u32 %v2188_v60, %v1738_v1  ;;  %v2173_v60 = vld [vmem:[%s3454_s0 + $0xbc] sm:$0xf] }
  0x76   :  { %1258 = vmatpush.bf16.msrb.mxu3 %v1729_v39  ;;  %1208 = vmatpush.bf16.msra.mxu2 %v1593_v45  ;;  %v1605_v39 = vor.u32 %v2155_v31, %v1602_v32  ;;  %v2122_v45 = vld [vmem:[%s3454_s0 + $0x470] sm:$0xf0]  ;;  %v2221_v32 = vld [vmem:[%s3454_s0 + $0x23c] sm:$0xf] }
  0x77   :  { %1298 = vmatpush.bf16.msrb.mxu0 %v979_v41  ;;  %v2228_v41 = vld [vmem:[%s3454_s0 + $0x26c] sm:$0xf0]  ;;  %v2125_v56 = vor.u32 %v2284_v44, %v2122_v45  ;;  %v1610_v31 = vld [vmem:[%s3454_s0 + $0x70] sm:$0xf0]  ;;  %v1810_v44 = vld [vmem:[%s3454_s0 + $0x1f8] sm:$0xf0]  ;;  %v988_v45 = vand.u32 %v2342_v10, %v791_v35 }
  0x78   :  { %1235 = vmatmul.bf16.vlgmr.msra.gmra.mxu0 %v2562_v61  ;;  %v1865_v51 = vor.u32 %v2228_v41, %v1864_v40  ;;  %v1680_v40 = vld [vmem:[%s3454_s0 + $0xb8] sm:$0xf]  ;;  %v2157_v1 = vld [vmem:[%s3454_s0 + $0x3c] sm:$0xf] }
  0x79   :  { %1209 = vmatmul.bf16.vlgmr.msra.gmra.mxu2 %v2562_v61  ;;  %1285 = vmatpush.bf16.msrb.mxu1 %v1669_v25  ;;  %v1941_v25 = vor.u32 %v2237_v17, %v1938_v18  ;;  %v2181_v41 = vld [vmem:[%s3454_s0 + $0xf4] sm:$0xf0] }
  0x7a   :  { %1272 = vmatpush.bf16.msrb.mxu2 %v976_v50  ;;  %1259 = vmatpush.bf16.msrb.mxu3 %v1665_v53  ;;  %v2245_v50 = vld [vmem:[%s3454_s0 + $0x2f4] sm:$0xf0]  ;;  %v2066_v53 = vld [vmem:[%s3454_s0 + $0x3f8] sm:$0xf0] }
  0x7b   :  { %1299 = vmatpush.bf16.msrb.mxu0 %v2117_v63  ;;  %v1937_v57 = vor.u32 %v2245_v50, %v1936_v49  ;;  %v2069_v59 = vor.u32 %v2269_v14, %v2066_v53  ;;  %v2229_v63 = vld [vmem:[%s3454_s0 + $0x274] sm:$0xf0]  ;;  %v1681_v49 = vor.u32 %v2181_v41, %v1680_v40 }
  0x7c   :  { %v1873_v6 = vor.u32 %v2229_v63, %v1872_v62  ;;  %v2293_v50 = vld [vmem:[%s3454_s0 + $0x474] sm:$0xf0]  ;;  %v1682_v62 = vld [vmem:[%s3454_s0 + $0xf8] sm:$0xf0] }
  0x7d   :  { %1286 = vmatpush.bf16.msrb.mxu1 %v1605_v39  ;;  %v1877_v39 = vor.u32 %v2221_v32, %v1874_v33  ;;  %v2165_v53 = vld [vmem:[%s3454_s0 + $0x74] sm:$0xf0]  ;;  %v1685_v63 = vor.u32 %v2173_v60, %v1682_v62 }
  0x7e   :  { %1273 = vmatpush.bf16.msrb.mxu2 %v2113_v2  ;;  %1260 = vmatpush.bf16.msrb.mxu3 %v1601_v5  ;;  %v2253_v2 = vld [vmem:[%s3454_s0 + $0x33c] sm:$0xf]  ;;  %v2196_v5 = vld [vmem:[%s3454_s0 + $0x16c] sm:$0xf0] }
  0x7f   :  { %1331 = vmatpush.bf16.msra.mxu0 %v2061_v3  ;;  %v2002_v3 = vld [vmem:[%s3454_s0 + $0x378] sm:$0xf0] }
  0x80   :  { %1287 = vmatmul.bf16.vlgmr.msrb.gmra.mxu1 %v2562_v61 }
  0x81   :  { %1261 = vmatmul.bf16.vlgmr.msrb.gmra.mxu3 %v2562_v61  ;;  %1350 = vmatpush.bf16.msra.mxu1 %v985_v42 }
  0x82   :  { %1305 = vmatpush.bf16.msra.mxu2 %v2057_v4  ;;  %1324 = vmatpush.bf16.msra.mxu3 %v982_v9  ;;  %v1736_v4 = vld [vmem:[%s3454_s0 + $0x130] sm:$0xf]  ;;  %v2005_v9 = vor.u32 %v2253_v2, %v2002_v3  ;;  %v1618_v2 = vld [vmem:[%s3454_s0 + $0x78] sm:$0xf0] }
  0x83   :  { %1332 = vmatpush.bf16.msra.mxu0 %v1997_v19  ;;  %v1737_v15 = vor.u32 %v2196_v5, %v1736_v4  ;;  %v1672_v19 = vld [vmem:[%s3454_s0 + $0xb0] sm:$0xf]  ;;  %v1621_v4 = vor.u32 %v2157_v1, %v1618_v2 }
  0x85   :  { %1351 = vmatpush.bf16.msra.mxu1 %v2125_v56 }
  0x86   :  { %1306 = vmatpush.bf16.msra.mxu2 %v1993_v22  ;;  %1325 = vmatpush.bf16.msra.mxu3 %v2121_v27  ;;  %v632_v22 = vunpack.c.h.b16 %v170_v7  ;;  %v2156_v27 = vld [vmem:[%s3454_s0 + $0x34] sm:$0xf] }
  0x87   :  { %1333 = vmatpush.bf16.msra.mxu0 %v1933_v34  ;;  %v1608_v34 = vld [vmem:[%s3454_s0 + $0x30] sm:$0xf]  ;;  %v1613_v38 = vor.u32 %v2156_v27, %v1610_v31 }
  0x88   :  { %2145 = vmatmul.msk.bf16.vlgmr.msrb.gmra.mxu0 %vm937_vm2, %v2416_v47  ;;  %v1609_v42 = vor.u32 %v2164_v26, %v1608_v34 }
  0x89   :  { %2144 = vmatmul.msk.bf16.vlgmr.msrb.gmra.mxu2 %vm937_vm2, %v2416_v47  ;;  %1383 = vmatpush.bf16.msrb.mxu1 %v2069_v59  ;;  %v1749_v59 = vor.u32 %v2189_v54, %v1746_v55 }
  0x8a   :  { %1357 = vmatpush.bf16.msrb.mxu3 %v2065_v30  ;;  %1307 = vmatpush.bf16.msra.mxu2 %v1929_v36  ;;  %v1673_v30 = vor.u32 %v2180_v20, %v1672_v19  ;;  %v792_v36 = vpack.c.b16 %v632_v22, %v632_v22 }
  0x8b   :  { %1334 = vmatpush.bf16.msra.mxu0 %v1869_v46  ;;  %v2128_v46 = vld [vmem:[%s3454_s0 + $0x438] sm:$0xf] }
  0x8c   :  { %v991_v48 = vand.u32 %v2342_v10, %v792_v36  ;;  %v1616_v10 = vld [vmem:[%s3454_s0 + $0x38] sm:$0xf]  ;;  %v2129_v56 = vor.u32 %v2293_v50, %v2128_v46 }
  0x8d   :  { %1384 = vmatpush.bf16.msrb.mxu1 %v2005_v9 }
  0x8e   :  { %1358 = vmatpush.bf16.msrb.mxu3 %v2001_v43  ;;  %1308 = vmatpush.bf16.msra.mxu2 %v1865_v51  ;;  %v2205_v43 = vld [vmem:[%s3454_s0 + $0x1bc] sm:$0xf] }
  0x8f   :  { %1335 = vmatpush.bf16.msra.mxu0 %v1805_v58  ;;  %v2285_v51 = vld [vmem:[%s3454_s0 + $0x43c] sm:$0xf]  ;;  %v1813_v14 = vor.u32 %v2205_v43, %v1810_v44  ;;  %v1617_v58 = vor.u32 %v2165_v53, %v1616_v10 }
  0x90   :  { %2147 = vmatmul.msk.bf16.vlgmr.msra.gmra.mxu1 %vm937_vm2, %v2416_v47 }
  0x91   :  { %2146 = vmatmul.msk.bf16.vlgmr.msra.gmra.mxu3 %vm937_vm2, %v2416_v47  ;;  %1385 = vmatpush.bf16.msrb.mxu1 %v1941_v25 }
  0x92   :  { %1359 = vmatpush.bf16.msrb.mxu3 %v1937_v57  ;;  %1309 = vmatpush.bf16.msra.mxu2 %v1801_v0  ;;  %v2133_v57 = vor.u32 %v2285_v51, %v2130_v52 }
  0x93   :  { %1336 = vmatpush.bf16.msra.mxu0 %v1741_v8 }
  0x94   :  { %v1041_v0 = vpop.f32.mrf.mxu3  ;;  %v1015_v3 = vpop.f32.mrf.mxu2 }
  0x95   :  { %1386 = vmatpush.bf16.msrb.mxu1 %v1877_v39 }
  0x96   :  { %1360 = vmatpush.bf16.msrb.mxu3 %v1873_v6  ;;  %1310 = vmatpush.bf16.msra.mxu2 %v1737_v15 }
  0x97   :  { %1337 = vmatpush.bf16.msra.mxu0 %v1677_v24 }
  0x99   :  { %1387 = vmatpush.bf16.msrb.mxu1 %v1813_v14 }
  0x9a   :  { %1361 = vmatpush.bf16.msrb.mxu3 %v1809_v23  ;;  %1311 = vmatpush.bf16.msra.mxu2 %v1673_v30 }
  0x9b   :  { %1338 = vmatpush.bf16.msra.mxu0 %v1613_v38 }
  0x9c   :  { %v1043_v5 = vpop.f32.mrf.mxu3  ;;  %v1017_v6 = vpop.f32.mrf.mxu2 }
  0x9d   :  { %1388 = vmatpush.bf16.msrb.mxu1 %v1749_v59 }
  0x9e   :  { %1362 = vmatpush.bf16.msrb.mxu3 %v1745_v37  ;;  %1312 = vmatpush.bf16.msra.mxu2 %v1609_v42 }
  0x9f   :  { %1402 = vmatpush.bf16.msrb.mxu0 %v991_v48 }
  0xa0   :  { %1339 = vmatmul.bf16.vlgmr.msra.gmra.mxu0 %v2562_v61 }
  0xa1   :  { %1313 = vmatmul.bf16.vlgmr.msra.gmra.mxu2 %v2562_v61  ;;  %1389 = vmatpush.bf16.msrb.mxu1 %v1685_v63 }
  0xa2   :  { %1376 = vmatpush.bf16.msrb.mxu2 %v988_v45  ;;  %1363 = vmatpush.bf16.msrb.mxu3 %v1681_v49 }
  0xa3   :  { %1403 = vmatpush.bf16.msrb.mxu0 %v2133_v57 }
  0xa4   :  { %v1067_v8 = vpop.f32.mrf.mxu3 }
  0xa5   :  { %1390 = vmatpush.bf16.msrb.mxu1 %v1621_v4  ;;  %v1002_v7 = vpop.f32.mrf.mxu0  ;;  %v1054_v11 = vpop.f32.mrf.mxu1 }
  0xa6   :  { %1377 = vmatpush.bf16.msrb.mxu2 %v2129_v56  ;;  %1364 = vmatpush.bf16.msrb.mxu3 %v1617_v58  ;;  %v3304_v9 = vadd.f32 %v1015_v3, %v1002_v7  ;;  %v3306_v12 = vadd.f32 %v1067_v8, %v1054_v11 }
  0xa8   :  { %1391 = vmatmul.bf16.vlgmr.msrb.gmra.mxu1 %v2562_v61  ;;  %v1429_v55 = vmul.f32 %v3304_v9, %v3304_v9  ;;  %v1431_v60 = vmul.f32 %v3306_v12, %v3306_v12 }
  0xa9   :  { %1365 = vmatmul.bf16.vlgmr.msrb.gmra.mxu3 %v2562_v61 }
  0xac   :  { %v1069_v15 = vpop.f32.mrf.mxu3 }
  0xad   :  { %v1004_v13 = vpop.f32.mrf.mxu0  ;;  %v1056_v16 = vpop.f32.mrf.mxu1 }
  0xb0   :  { %2149 = vmatmul.msk.bf16.vlgmr.msrb.gmra.mxu0 %vm937_vm2, %v2416_v47 }
  0xb1   :  { %2148 = vmatmul.msk.bf16.vlgmr.msrb.gmra.mxu2 %vm937_vm2, %v2416_v47 }
  0xb4   :  { %v1028_v17 = vpop.f32.mrf.mxu2 }
  0xb5   :  { %v3308_v18 = vadd.f32 %v1041_v0, %v1028_v17  ;;  %v1093_v61 = vpop.f32.mrf.mxu0  ;;  %v1119_v19 = vpop.f32.mrf.mxu1 }
  0xb7   :  { %v1411_v14 = vadd.f32 %v3308_v18, %v3304_v9  ;;  %v1430_v53 = vmul.f32 %v3308_v18, %v3308_v18 }
  0xb9   :  { %v1412_v56 = vadd.f32 %v1411_v14, %v3306_v12  ;;  %v1445_v59 = vadd.f32 %v1430_v53, %v1429_v55 }
  0xbb   :  { %v1446_v0 = vadd.f32 %v1445_v59, %v1431_v60 }
  0xbc   :  { %v1080_v20 = vpop.f32.mrf.mxu3  ;;  %v1030_v22 = vpop.f32.mrf.mxu2 }
  0xbd   :  { %v3310_v21 = vadd.f32 %v1093_v61, %v1080_v20  ;;  %v1095_v47 = vpop.f32.mrf.mxu0  ;;  %v1121_v23 = vpop.f32.mrf.mxu1 }
  0xbf   :  { %v1413_v62 = vadd.f32 %v1412_v56, %v3310_v21  ;;  %v1432_v63 = vmul.f32 %v3310_v21, %v3310_v21 }
  0xc1   :  { %v1447_v7 = vadd.f32 %v1446_v0, %v1432_v63 }
  0xc4   :  { %v1082_v24 = vpop.f32.mrf.mxu3 }
  0xc5   :  { %v1145_v25 = vpop.f32.mrf.mxu1 }
  0xcd   :  { %v1132_v27 = vpop.f32.mrf.mxu0  ;;  %v1147_v29 = vpop.f32.mrf.mxu1 }
  0xce   :  { %v3312_v28 = vadd.f32 %v1145_v25, %v1132_v27 }
  0xd0   :  { %v1434_v13 = vmul.f32 %v3312_v28, %v3312_v28 }
  0xd4   :  { %v1106_v30 = vpop.f32.mrf.mxu2 }
  0xd5   :  { %v3314_v31 = vadd.f32 %v1119_v19, %v1106_v30  ;;  %v1134_v32 = vpop.f32.mrf.mxu0  ;;  %v1184_v26 = vpop.f32.mrf.mxu1 }
  0xd7   :  { %v1414_v1 = vadd.f32 %v1413_v62, %v3314_v31  ;;  %v1433_v4 = vmul.f32 %v3314_v31, %v3314_v31 }
  0xd9   :  { %v1415_v8 = vadd.f32 %v1414_v1, %v3312_v28  ;;  %v1448_v15 = vadd.f32 %v1447_v7, %v1433_v4 }
  0xdb   :  { %v1449_v22 = vadd.f32 %v1448_v15, %v1434_v13 }
  0xdc   :  { %v1158_v33 = vpop.f32.mrf.mxu3  ;;  %v1108_v34 = vpop.f32.mrf.mxu2 }
  0xdd   :  { %v1197_v35 = vpop.f32.mrf.mxu0  ;;  %v1186_v38 = vpop.f32.mrf.mxu1 }
  0xde   :  { %v3336_v16 = vadd.f32 %v1197_v35, %v1184_v26 }
  0xe0   :  { %v1436_v25 = vmul.f32 %v3336_v16, %v3336_v16 }
  0xe4   :  { %v1160_v36 = vpop.f32.mrf.mxu3  ;;  %v1171_v37 = vpop.f32.mrf.mxu2 }
  0xe5   :  { %v1199_v39 = vpop.f32.mrf.mxu0  ;;  %v1249_v42 = vpop.f32.mrf.mxu1  ;;  %v3331_v5 = vadd.f32 %v1171_v37, %v1158_v33 }
  0xe7   :  { %v1416_v17 = vadd.f32 %v1415_v8, %v3331_v5  ;;  %v1435_v61 = vmul.f32 %v3331_v5, %v3331_v5  ;;  %v2301_v8 = vmov 0  }
  0xe8   :  { %2296 = vset.pattern.permute.xlu1 %v2301_v8  ;;  %2297 = vset.pattern.permute.xlu0 %v2301_v8 }
  0xe9   :  { %v1417_v47 = vadd.f32 %v1416_v17, %v3336_v16  ;;  %v1450_v27 = vadd.f32 %v1449_v22, %v1435_v61 }
  0xeb   :  { %v1451_v26 = vadd.f32 %v1450_v27, %v1436_v25 }
  0xec   :  { %v1223_v40 = vpop.f32.mrf.mxu3  ;;  %v1173_v41 = vpop.f32.mrf.mxu2 }
  0xed   :  { %v1251_v45 = vpop.f32.mrf.mxu1 }
  0xf4   :  { %v1225_v44 = vpop.f32.mrf.mxu3 }
  0xf5   :  { %v1236_v43 = vpop.f32.mrf.mxu0 }
  0xf6   :  { %v3346_v29 = vadd.f32 %v1249_v42, %v1236_v43 }
  0xf8   :  { %v1438_v37 = vmul.f32 %v3346_v29, %v3346_v29 }
  0xfc   :  { %v1210_v46 = vpop.f32.mrf.mxu2 }
  0xfd   :  { %v1238_v48 = vpop.f32.mrf.mxu0  ;;  %v1288_v51 = vpop.f32.mrf.mxu1  ;;  %v3341_v19 = vadd.f32 %v1223_v40, %v1210_v46 }
  0xff   :  { %v1418_v30 = vadd.f32 %v1417_v47, %v3341_v19  ;;  %v1437_v33 = vmul.f32 %v3341_v19, %v3341_v19 }
 0x101   :  { %v1419_v35 = vadd.f32 %v1418_v30, %v3346_v29  ;;  %v1452_v38 = vadd.f32 %v1451_v26, %v1437_v33 }
 0x103   :  { %v1453_v46 = vadd.f32 %v1452_v38, %v1438_v37  ;;  %v1410_v37 = vld [vmem:[%s3457_s3] sm:$0xff] }
 0x104   :  { %v1262_v49 = vpop.f32.mrf.mxu3  ;;  %v1212_v50 = vpop.f32.mrf.mxu2 }
 0x105   :  { %v1301_v52 = vpop.f32.mrf.mxu0  ;;  %v1290_v57 = vpop.f32.mrf.mxu1 }
 0x106   :  { %v3356_v39 = vadd.f32 %v1301_v52, %v1288_v51 }
 0x10c   :  { %v1264_v10 = vpop.f32.mrf.mxu3  ;;  %v1275_v54 = vpop.f32.mrf.mxu2 }
 0x10d   :  { %v1303_v58 = vpop.f32.mrf.mxu0  ;;  %v1353_v6 = vpop.f32.mrf.mxu1  ;;  %v3351_v34 = vadd.f32 %v1275_v54, %v1262_v49  ;;  %v1440_v49 = vmul.f32 %v3356_v39, %v3356_v39 }
 0x10f   :  { %v1420_v40 = vadd.f32 %v1419_v35, %v3351_v34  ;;  %v1439_v42 = vmul.f32 %v3351_v34, %v3351_v34 }
 0x111   :  { %v1421_v48 = vadd.f32 %v1420_v40, %v3356_v39  ;;  %v1454_v50 = vadd.f32 %v1453_v46, %v1439_v42 }
 0x113   :  { %v1455_v54 = vadd.f32 %v1454_v50, %v1440_v49 }
 0x114   :  { %v1327_v2 = vpop.f32.mrf.mxu3  ;;  %v1277_v3 = vpop.f32.mrf.mxu2 }
 0x115   :  { %v1355_v23 = vpop.f32.mrf.mxu1 }
 0x11c   :  { %v1329_v20 = vpop.f32.mrf.mxu3 }
 0x11d   :  { %v1340_v11 = vpop.f32.mrf.mxu0 }
 0x11e   :  { %v3366_v14 = vadd.f32 %v1353_v6, %v1340_v11 }
 0x120   :  { %v1442_v60 = vmul.f32 %v3366_v14, %v3366_v14 }
 0x124   :  { %v1314_v24 = vpop.f32.mrf.mxu2 }
 0x125   :  { %v1342_v32 = vpop.f32.mrf.mxu0  ;;  %v3361_v43 = vadd.f32 %v1327_v2, %v1314_v24  ;;  %v1392_v44 = vpop.f32.mrf.mxu1 }
 0x126   :  { %v1409_v32 = vld [vmem:[%s3456_s2] sm:$0xff] }
 0x127   :  { %v1422_v51 = vadd.f32 %v1421_v48, %v3361_v43  ;;  %v1441_v10 = vmul.f32 %v3361_v43, %v3361_v43 }
 0x129   :  { %v1423_v59 = vadd.f32 %v1422_v51, %v3366_v14  ;;  %v1456_v62 = vadd.f32 %v1455_v54, %v1441_v10 }
 0x12b   :  { %v1457_v2 = vadd.f32 %v1456_v62, %v1442_v60 }
 0x12c   :  { %v1366_v36 = vpop.f32.mrf.mxu3  ;;  %v1316_v41 = vpop.f32.mrf.mxu2 }
 0x12d   :  { %v1405_v45 = vpop.f32.mrf.mxu0  ;;  %v1394_v57 = vpop.f32.mrf.mxu1 }
 0x12e   :  { %v3371_v55 = vadd.f32 %v1405_v45, %v1392_v44 }
 0x130   :  { %v1444_v4 = vmul.f32 %v3371_v55, %v3371_v55 }
 0x134   :  { %v1368_v52 = vpop.f32.mrf.mxu3  ;;  %v1379_v53 = vpop.f32.mrf.mxu2 }
 0x135   :  { %v3373_v56 = vadd.f32 %v1379_v53, %v1366_v36  ;;  %v1407_v58 = vpop.f32.mrf.mxu0 }
 0x137   :  { %v1424_v63 = vadd.f32 %v1423_v59, %v3373_v56  ;;  %v1443_v0 = vmul.f32 %v3373_v56, %v3373_v56 }
 0x139   :  { %v1425_v1 = vadd.f32 %v1424_v63, %v3371_v55  ;;  %v1458_v6 = vadd.f32 %v1457_v2, %v1443_v0 }
 0x13b   :  { %1426 = vadd.xlane.f32.xlu0 %v1425_v1  ;;  %v1459_v7 = vadd.f32 %v1458_v6, %v1444_v4 }
 0x13c   :  { %v1381_v3 = vpop.f32.mrf.mxu2 }
 0x143   :  { %1460 = vadd.xlane.f32.xlu0 %v1459_v7 }
 0x1ae   :  { %v1427_v11 = vpop.xlane.xlu0 %1426 }
 0x1af   :  { %v1428_v13 = vmul.f32 0.00048828125, %v1427_v11 }
 0x1b1   :  { %v1463_v17 = vmul.f32 %v1428_v13, %v1428_v13 }
 0x1b6   :  { %v1461_v15 = vpop.xlane.xlu0 %1460 }
 0x1b7   :  { %v1462_v61 = vmul.f32 0.00048828125, %v1461_v15 }
 0x1b9   :  { %v1464_v20 = vsub.f32 %v1462_v61, %v1463_v17 }
 0x1bb   :  { %v1465_v22 = vmax.f32 %v1464_v20, 0.0 }
 0x1bd   :  { %v1466_v47 = vadd.f32 1e-05, %v1465_v22 }
 0x1bf   :  { %2298 = vrsqrt.f32 %v1466_v47  ;;  %vm1473_vm4 = vweird.f32 %v1466_v47 }
 0x1c5   :  { %v2299_v23 = vpop.eup %2298 }
 0x1c6   :  { %v1468_v24 = vmul.f32 %v2299_v23, %v1466_v47  ;;  %vm1474_vm3 = vweird.f32 %v2299_v23 }
 0x1c7   :  { %vm1475_vm5 = vmor %vm1473_vm4, %vm1474_vm3 }
 0x1c8   :  { %v1469_v25 = vmul.f32 %v2299_v23, %v1468_v24 }
 0x1ca   :  { %v1470_v27 = vmul.f32 0.5, %v1469_v25 }
 0x1cc   :  { %v1471_v30 = vsub.f32 1.5, %v1470_v27 }
 0x1ce   :  { %v1472_v33 = vmul.f32 %v2299_v23, %v1471_v30 }
 0x1d0   :  { %v1476_v26 = vsel %vm1475_vm5, %v2299_v23, %v1472_v33 }
 0x1d1   :  { %v1477_v35 = vmul.f32 %v1476_v26, %v1409_v32 }
 0x1d3   :  { %1480 = vperm.xlu1 %2296, %v1477_v35   ;;  %v1499_v36 = vmul.f32 %v1477_v35, %v1428_v13 }
 0x1d5   :  { %v1500_v38 = vsub.f32 %v1410_v37, %v1499_v36 }
 0x1db   :  { %1503 = vperm.xlu1 %2296, %v1500_v38  }
 0x245   :  { %v1481_v40 = vpop.permute.xlu1 %1480 }
 0x246   :  { %v1483_v41 = vmul.f32 %v1481_v40, %v3304_v9  ;;  %v1484_v42 = vmul.f32 %v1481_v40, %v3308_v18  ;;  %v1485_v44 = vmul.f32 %v1481_v40, %v3306_v12  ;;  %v1486_v45 = vmul.f32 %v1481_v40, %v3310_v21 }
 0x247   :  { %v1487_v48 = vmul.f32 %v1481_v40, %v3314_v31  ;;  %v1488_v52 = vmul.f32 %v1481_v40, %v3312_v28  ;;  %v1489_v53 = vmul.f32 %v1481_v40, %v3331_v5  ;;  %v1490_v9 = vmul.f32 %v1481_v40, %v3336_v16 }
 0x248   :  { %v1491_v18 = vmul.f32 %v1481_v40, %v3341_v19  ;;  %v1492_v31 = vmul.f32 %v1481_v40, %v3346_v29  ;;  %v1493_v63 = vmul.f32 %v1481_v40, %v3351_v34  ;;  %v1494_v5 = vmul.f32 %v1481_v40, %v3356_v39 }
 0x249   :  { %v1495_v29 = vmul.f32 %v1481_v40, %v3361_v43  ;;  %v1496_v34 = vmul.f32 %v1481_v40, %v3366_v14  ;;  %v1497_v39 = vmul.f32 %v1481_v40, %v3373_v56  ;;  %v1498_v43 = vmul.f32 %v1481_v40, %v3371_v55 }
 0x24d   :  { %v1504_v46 = vpop.permute.xlu1 %1503 }
 0x24e   :  { %v1506_v49 = vadd.f32 %v1504_v46, %v1483_v41  ;;  %v1507_v50 = vadd.f32 %v1504_v46, %v1484_v42  ;;  %v1508_v51 = vadd.f32 %v1504_v46, %v1485_v44  ;;  %v1509_v10 = vadd.f32 %v1504_v46, %v1486_v45 }
 0x24f   :  { %v1510_v54 = vadd.f32 %v1504_v46, %v1487_v48  ;;  %v1511_v57 = vadd.f32 %v1504_v46, %v1488_v52  ;;  %v1512_v12 = vadd.f32 %v1504_v46, %v1489_v53  ;;  %v1513_v60 = vadd.f32 %v1504_v46, %v1490_v9 }
 0x250   :  { %v1522_v58 = vmax.f32 %v1506_v49, 0.0  ;;  %v1523_v21 = vmax.f32 %v1507_v50, 0.0  ;;  %v1524_v59 = vmax.f32 %v1508_v51, 0.0  ;;  %v1525_v62 = vmax.f32 %v1509_v10, 0.0 }
 0x251   :  { %v1514_v28 = vadd.f32 %v1504_v46, %v1491_v18  ;;  %v1526_v0 = vmax.f32 %v1510_v54, 0.0  ;;  %v1515_v16 = vadd.f32 %v1504_v46, %v1492_v31  ;;  %v1527_v19 = vmax.f32 %v1511_v57, 0.0 }
 0x252   :  { %1538 = vst [vmem:[%s3458_s4] sm:$0xff] %v1522_v58  ;;  %v1516_v1 = vadd.f32 %v1504_v46, %v1493_v63  ;;  %v1528_v2 = vmax.f32 %v1512_v12, 0.0  ;;  %v1517_v3 = vadd.f32 %v1504_v46, %v1494_v5  ;;  %v1529_v4 = vmax.f32 %v1513_v60, 0.0 }
 0x253   :  { %1539 = vst [vmem:[%s3458_s4 + $0x8] sm:$0xff] %v1523_v21  ;;  %v1518_v6 = vadd.f32 %v1504_v46, %v1495_v29  ;;  %v1530_v7 = vmax.f32 %v1514_v28, 0.0  ;;  %v1519_v8 = vadd.f32 %v1504_v46, %v1496_v34  ;;  %v1531_v11 = vmax.f32 %v1515_v16, 0.0 }
 0x254   :  { %1540 = vst [vmem:[%s3458_s4 + $0x10] sm:$0xff] %v1524_v59  ;;  %v1520_v14 = vadd.f32 %v1504_v46, %v1497_v39  ;;  %v1532_v13 = vmax.f32 %v1516_v1, 0.0  ;;  %v1521_v56 = vadd.f32 %v1504_v46, %v1498_v43  ;;  %v1533_v15 = vmax.f32 %v1517_v3, 0.0 }
 0x255   :  { %1541 = vst [vmem:[%s3458_s4 + $0x18] sm:$0xff] %v1525_v62  ;;  %v1534_v17 = vmax.f32 %v1518_v6, 0.0  ;;  %v1535_v55 = vmax.f32 %v1519_v8, 0.0 }
 0x256   :  { %1542 = vst [vmem:[%s3458_s4 + $0x20] sm:$0xff] %v1526_v0  ;;  %v1536_v61 = vmax.f32 %v1520_v14, 0.0  ;;  %v1537_v20 = vmax.f32 %v1521_v56, 0.0 }
 0x257   :  { %1543 = vst [vmem:[%s3458_s4 + $0x28] sm:$0xff] %v1527_v19 }
 0x258   :  { %1544 = vst [vmem:[%s3458_s4 + $0x30] sm:$0xff] %v1528_v2 }
 0x259   :  { %1545 = vst [vmem:[%s3458_s4 + $0x38] sm:$0xff] %v1529_v4 }
 0x25a   :  { %1546 = vst [vmem:[%s3458_s4 + $0x40] sm:$0xff] %v1530_v7 }
 0x25b   :  { %1547 = vst [vmem:[%s3458_s4 + $0x48] sm:$0xff] %v1531_v11 }
 0x25c   :  { %1548 = vst [vmem:[%s3458_s4 + $0x50] sm:$0xff] %v1532_v13 }
 0x25d   :  { %1549 = vst [vmem:[%s3458_s4 + $0x58] sm:$0xff] %v1533_v15 }
 0x25e   :  { %1550 = vst [vmem:[%s3458_s4 + $0x60] sm:$0xff] %v1534_v17 }
 0x25f   :  { %1551 = vst [vmem:[%s3458_s4 + $0x68] sm:$0xff] %v1535_v55 }
 0x260   :  { %1552 = vst [vmem:[%s3458_s4 + $0x70] sm:$0xff] %v1536_v61 }
 0x261   :  { %1553 = vst [vmem:[%s3458_s4 + $0x78] sm:$0xff] %v1537_v20 }

// kernel: _lambda_.11
= control target key start
LH: loop header
LB: loop body
LE: loop exit
PB: predicated region body
PF: predicated region fallthrough
CT: control target
= control target key end

     0   :  { %s278_s0 = inlined_call_operand.vmem [shape: f32[8,512], index: 0, kind: input, shape index: {}]   ;;  %s279_s1 = inlined_call_operand.vmem [shape: f32[8,512], index: 1, kind: input, shape index: {}]   ;;  %s280_s2 = inlined_call_operand.vmem [shape: f32[8,512], index: 2, kind: input, shape index: {}]   ;;  %s281_s3 = inlined_call_operand.vmem [shape: f32[8,512], index: 3, kind: input, shape index: {}]   ;;  %s282_s4 = inlined_call_operand.vmem [shape: f32[8,512], index: 4, kind: input, shape index: {}]   ;;  %s283_s5 = inlined_call_operand.vmem [shape: f32[8,512], index: 5, kind: input, shape index: {}]   ;;  %s284_s6 = inlined_call_operand.vmem [shape: f32[8,512], index: 6, kind: input, shape index: {}]   ;;  %s285_s7 = inlined_call_operand.vmem [shape: f32[8,512], index: 7, kind: input, shape index: {}]   ;;  %s286_s8 = inlined_call_operand.vmem [shape: f32[8,512], index: 8, kind: input, shape index: {}]   ;;  %s287_s9 = inlined_call_operand.vmem [shape: f32[8,512], index: 9, kind: output, shape index: {}]  }
   0x1   :  { %v32_v0 = vld [vmem:[%s278_s0] sm:$0xff]  ;;  %v33_v6 = vld [vmem:[%s278_s0 + $0x8] sm:$0xff]  ;;  %v34_v15 = vld [vmem:[%s278_s0 + $0x10] sm:$0xff] }
   0x2   :  { %v36_v1 = vld [vmem:[%s279_s1] sm:$0xff]  ;;  %v37_v7 = vld [vmem:[%s279_s1 + $0x8] sm:$0xff]  ;;  %v38_v16 = vld [vmem:[%s279_s1 + $0x10] sm:$0xff] }
   0x3   :  { %v44_v2 = vld [vmem:[%s280_s2] sm:$0xff]  ;;  %v40_v3 = vmax.f32 %v32_v0, %v36_v1  ;;  %v45_v8 = vld [vmem:[%s280_s2 + $0x8] sm:$0xff]  ;;  %v41_v10 = vmax.f32 %v33_v6, %v37_v7  ;;  %v46_v17 = vld [vmem:[%s280_s2 + $0x10] sm:$0xff]  ;;  %v42_v20 = vmax.f32 %v34_v15, %v38_v16 }
   0x4   :  { %v52_v4 = vld [vmem:[%s281_s3] sm:$0xff]  ;;  %v53_v13 = vld [vmem:[%s281_s3 + $0x8] sm:$0xff]  ;;  %v54_v24 = vld [vmem:[%s281_s3 + $0x10] sm:$0xff] }
   0x5   :  { %v48_v5 = vmax.f32 %v40_v3, %v44_v2  ;;  %v60_v9 = vld [vmem:[%s282_s4] sm:$0xff]  ;;  %v49_v14 = vmax.f32 %v41_v10, %v45_v8  ;;  %v61_v19 = vld [vmem:[%s282_s4 + $0x8] sm:$0xff]  ;;  %v50_v26 = vmax.f32 %v42_v20, %v46_v17  ;;  %v35_v27 = vld [vmem:[%s278_s0 + $0x18] sm:$0xff] }
   0x6   :  { %v68_v12 = vld [vmem:[%s283_s5] sm:$0xff]  ;;  %v69_v23 = vld [vmem:[%s283_s5 + $0x8] sm:$0xff]  ;;  %v39_v28 = vld [vmem:[%s279_s1 + $0x18] sm:$0xff] }
   0x7   :  { %v56_v11 = vmax.f32 %v48_v5, %v52_v4  ;;  %v76_v21 = vld [vmem:[%s284_s6] sm:$0xff]  ;;  %v57_v22 = vmax.f32 %v49_v14, %v53_v13  ;;  %v47_v29 = vld [vmem:[%s280_s2 + $0x18] sm:$0xff]  ;;  %v62_v32 = vld [vmem:[%s282_s4 + $0x10] sm:$0xff]  ;;  %v43_v33 = vmax.f32 %v35_v27, %v39_v28  ;;  %v58_v36 = vmax.f32 %v50_v26, %v54_v24 }
   0x8   :  { %v84_v30 = vld [vmem:[%s285_s7] sm:$0xff]  ;;  %v77_v35 = vld [vmem:[%s284_s6 + $0x8] sm:$0xff]  ;;  %v55_v37 = vld [vmem:[%s281_s3 + $0x18] sm:$0xff] }
   0x9   :  { %v64_v18 = vmax.f32 %v56_v11, %v60_v9  ;;  %v65_v31 = vmax.f32 %v57_v22, %v61_v19  ;;  %v92_v38 = vld [vmem:[%s286_s8] sm:$0xff]  ;;  %v70_v40 = vld [vmem:[%s283_s5 + $0x10] sm:$0xff]  ;;  %v51_v41 = vmax.f32 %v43_v33, %v47_v29  ;;  %v85_v43 = vld [vmem:[%s285_s7 + $0x8] sm:$0xff]  ;;  %v66_v44 = vmax.f32 %v58_v36, %v62_v32 }
   0xa   :  { %v63_v45 = vld [vmem:[%s282_s4 + $0x18] sm:$0xff]  ;;  %v78_v47 = vld [vmem:[%s284_s6 + $0x10] sm:$0xff]  ;;  %v93_v50 = vld [vmem:[%s286_s8 + $0x8] sm:$0xff] }
   0xb   :  { %v72_v25 = vmax.f32 %v64_v18, %v68_v12  ;;  %v73_v39 = vmax.f32 %v65_v31, %v69_v23  ;;  %v59_v48 = vmax.f32 %v51_v41, %v55_v37  ;;  %v74_v51 = vmax.f32 %v66_v44, %v70_v40  ;;  %v71_v52 = vld [vmem:[%s283_s5 + $0x18] sm:$0xff]  ;;  %v86_v54 = vld [vmem:[%s285_s7 + $0x10] sm:$0xff] }
   0xc   :  { %v79_v57 = vld [vmem:[%s284_s6 + $0x18] sm:$0xff]  ;;  %v94_v59 = vld [vmem:[%s286_s8 + $0x10] sm:$0xff] }
   0xd   :  { %v80_v34 = vmax.f32 %v72_v25, %v76_v21  ;;  %v81_v46 = vmax.f32 %v73_v39, %v77_v35  ;;  %v67_v55 = vmax.f32 %v59_v48, %v63_v45  ;;  %v82_v56 = vmax.f32 %v74_v51, %v78_v47  ;;  %v87_v62 = vld [vmem:[%s285_s7 + $0x18] sm:$0xff] }
   0xe   :  { %v95_v1 = vld [vmem:[%s286_s8 + $0x18] sm:$0xff] }
   0xf   :  { %v88_v42 = vmax.f32 %v80_v34, %v84_v30  ;;  %v89_v53 = vmax.f32 %v81_v46, %v85_v43  ;;  %v75_v60 = vmax.f32 %v67_v55, %v71_v52  ;;  %v90_v61 = vmax.f32 %v82_v56, %v86_v54 }
  0x11   :  { %v96_v49 = vmax.f32 %v88_v42, %v92_v38  ;;  %v97_v58 = vmax.f32 %v89_v53, %v93_v50  ;;  %v83_v63 = vmax.f32 %v75_v60, %v79_v57  ;;  %v98_v0 = vmax.f32 %v90_v61, %v94_v59 }
  0x13   :  { %100 = vst [vmem:[%s287_s9] sm:$0xff] %v96_v49  ;;  %v91_v2 = vmax.f32 %v83_v63, %v87_v62 }
  0x14   :  { %101 = vst [vmem:[%s287_s9 + $0x8] sm:$0xff] %v97_v58 }
  0x15   :  { %102 = vst [vmem:[%s287_s9 + $0x10] sm:$0xff] %v98_v0  ;;  %v99_v3 = vmax.f32 %v91_v2, %v95_v1 }
  0x17   :  { %103 = vst [vmem:[%s287_s9 + $0x18] sm:$0xff] %v99_v3 }

// kernel: _lambda_.12
= control target key start
LH: loop header
LB: loop body
LE: loop exit
PB: predicated region body
PF: predicated region fallthrough
CT: control target
= control target key end

     0   :  { %vm134_vm0 = vcmask 1043456   ;;  %vm130_vm1 = vcmask 588800   ;;  %s531_s0 = inlined_call_operand.vmem [shape: bf16[72,512], index: 0, kind: input, shape index: {}]   ;;  %s532_s1 = inlined_call_operand.vmem [shape: bf16[8,72], index: 1, kind: input, shape index: {}]   ;;  %s533_s2 = inlined_call_operand.vmem [shape: f32[8,1], index: 2, kind: input, shape index: {}]   ;;  %s534_s3 = inlined_call_operand.vmem [shape: f32[8,1], index: 3, kind: input, shape index: {}]   ;;  %s535_s4 = inlined_call_operand.vmem [shape: f32[8,512], index: 4, kind: input, shape index: {}]   ;;  %s536_s5 = inlined_call_operand.vmem [shape: f32[8,512], index: 5, kind: output, shape index: {}]  }
   0x1   :  { %v38_v0 = vld [vmem:[%s531_s0 + $0x80] sm:$0xff]  ;;  %v39_v1 = vld [vmem:[%s531_s0 + $0x88] sm:$0xff]  ;;  %v354_v7 = vld [vmem:[%s531_s0 + $0x6c] sm:$0xf0] }
   0x2   :  { %v90_v2 = vunpack.c.l.b16 %v38_v0  ;;  %v91_v3 = vunpack.c.h.b16 %v38_v0  ;;  %v92_v4 = vunpack.c.l.b16 %v39_v1  ;;  %v93_v5 = vunpack.c.h.b16 %v39_v1  ;;  %v322_v6 = vld [vmem:[%s531_s0 + $0x60] sm:$0xf]  ;;  %v352_v12 = vld [vmem:[%s531_s0 + $0x64] sm:$0xf]  ;;  %v324_v13 = vld [vmem:[%s531_s0 + $0x70] sm:$0xf0] }
   0x3   :  { %v330_v14 = vld [vmem:[%s531_s0 + $0x68] sm:$0xf]  ;;  %v355_v15 = vld [vmem:[%s531_s0 + $0x74] sm:$0xf0]  ;;  %v353_v16 = vld [vmem:[%s531_s0 + $0x6c] sm:$0xf]  ;;  %v323_v22 = vor.u32 %v354_v7, %v322_v6  ;;  %v327_v23 = vor.u32 %v352_v12, %v324_v13 }
   0x4   :  { %v110_v8 = vpack.c.b16 %v90_v2, %v90_v2  ;;  %v111_v9 = vpack.c.b16 %v91_v3, %v91_v3  ;;  %v112_v10 = vpack.c.b16 %v92_v4, %v92_v4  ;;  %v113_v11 = vpack.c.b16 %v93_v5, %v93_v5  ;;  %v332_v17 = vld [vmem:[%s531_s0 + $0x78] sm:$0xf0]  ;;  %v306_v24 = vld [vmem:[%s531_s0 + $0x40] sm:$0xf]  ;;  %v350_v25 = vld [vmem:[%s531_s0 + $0x4c] sm:$0xf0] }
   0x5   :  { %v331_v26 = vor.u32 %v355_v15, %v330_v14  ;;  %v335_v27 = vor.u32 %v353_v16, %v332_v17  ;;  %v348_v28 = vld [vmem:[%s531_s0 + $0x44] sm:$0xf]  ;;  %v308_v29 = vld [vmem:[%s531_s0 + $0x50] sm:$0xf0]  ;;  %v314_v30 = vld [vmem:[%s531_s0 + $0x48] sm:$0xf]  ;;  %v307_v34 = vor.u32 %v350_v25, %v306_v24 }
   0x6   :  { %v136_v18 = vsel %vm134_vm0, %v110_v8, 0  ;;  %v139_v19 = vsel %vm134_vm0, %v111_v9, 0  ;;  %v142_v20 = vsel %vm134_vm0, %v112_v10, 0  ;;  %v145_v21 = vsel %vm134_vm0, %v113_v11, 0  ;;  %v351_v31 = vld [vmem:[%s531_s0 + $0x54] sm:$0xf0] }
   0x7   :  { %150 = vmatpush.bf16.msra.mxu0 %v136_v18  ;;  %163 = vmatpush.bf16.msra.mxu1 %v139_v19  ;;  %v349_v32 = vld [vmem:[%s531_s0 + $0x4c] sm:$0xf]  ;;  %v316_v33 = vld [vmem:[%s531_s0 + $0x58] sm:$0xf0]  ;;  %v311_v35 = vor.u32 %v348_v28, %v308_v29  ;;  %v290_v36 = vld [vmem:[%s531_s0 + $0x20] sm:$0xf]  ;;  %v315_v38 = vor.u32 %v351_v31, %v314_v30 }
   0x8   :  { %176 = vmatpush.bf16.msra.mxu2 %v142_v20  ;;  %189 = vmatpush.bf16.msra.mxu3 %v145_v21  ;;  %v346_v37 = vld [vmem:[%s531_s0 + $0x2c] sm:$0xf0]  ;;  %v319_v39 = vor.u32 %v349_v32, %v316_v33  ;;  %v344_v40 = vld [vmem:[%s531_s0 + $0x24] sm:$0xf]  ;;  %v292_v41 = vld [vmem:[%s531_s0 + $0x30] sm:$0xf0] }
   0x9   :  { %v298_v42 = vld [vmem:[%s531_s0 + $0x28] sm:$0xf]  ;;  %v347_v43 = vld [vmem:[%s531_s0 + $0x34] sm:$0xf0]  ;;  %v345_v44 = vld [vmem:[%s531_s0 + $0x2c] sm:$0xf]  ;;  %v291_v46 = vor.u32 %v346_v37, %v290_v36  ;;  %v295_v47 = vor.u32 %v344_v40, %v292_v41 }
   0xa   :  { %v300_v45 = vld [vmem:[%s531_s0 + $0x38] sm:$0xf0]  ;;  %v274_v48 = vld [vmem:[%s531_s0] sm:$0xf]  ;;  %v342_v49 = vld [vmem:[%s531_s0 + $0xc] sm:$0xf0]  ;;  %v299_v50 = vor.u32 %v347_v43, %v298_v42 }
   0xb   :  { %151 = vmatpush.bf16.msra.mxu0 %v323_v22  ;;  %164 = vmatpush.bf16.msra.mxu1 %v327_v23  ;;  %v303_v51 = vor.u32 %v345_v44, %v300_v45  ;;  %v340_v52 = vld [vmem:[%s531_s0 + $0x4] sm:$0xf]  ;;  %v276_v53 = vld [vmem:[%s531_s0 + $0x10] sm:$0xf0]  ;;  %v282_v54 = vld [vmem:[%s531_s0 + $0x8] sm:$0xf]  ;;  %v275_v58 = vor.u32 %v342_v49, %v274_v48 }
   0xc   :  { %177 = vmatpush.bf16.msra.mxu2 %v331_v26  ;;  %190 = vmatpush.bf16.msra.mxu3 %v335_v27  ;;  %v343_v55 = vld [vmem:[%s531_s0 + $0x14] sm:$0xf0]  ;;  %v341_v56 = vld [vmem:[%s531_s0 + $0xc] sm:$0xf]  ;;  %v284_v57 = vld [vmem:[%s531_s0 + $0x18] sm:$0xf0]  ;;  %v279_v59 = vor.u32 %v340_v52, %v276_v53 }
   0xd   :  { %v283_v60 = vor.u32 %v343_v55, %v282_v54  ;;  %v287_v61 = vor.u32 %v341_v56, %v284_v57  ;;  %v21_v62 = vld [vmem:[%s532_s1] sm:$0xf]  ;;  %v361_v17 = vmov 0   ;;  %v257_v49 = vld [vmem:[%s535_s4 + $0x8] sm:$0xff] }
   0xe   :  { %357 = vset.pattern.permute.xlu1 %v361_v17  ;;  %358 = vset.pattern.permute.xlu0 %v361_v17  ;;  %v199_v31 = vld [vmem:[%s533_s2] sm:$0xff] }
   0xf   :  { %152 = vmatpush.bf16.msra.mxu0 %v307_v34  ;;  %165 = vmatpush.bf16.msra.mxu1 %v311_v35  ;;  %v200_v36 = vld [vmem:[%s534_s3] sm:$0xff] }
  0x10   :  { %178 = vmatpush.bf16.msra.mxu2 %v315_v38  ;;  %191 = vmatpush.bf16.msra.mxu3 %v319_v39  ;;  %v256_v48 = vld [vmem:[%s535_s4] sm:$0xff] }
  0x13   :  { %153 = vmatpush.bf16.msra.mxu0 %v291_v46  ;;  %166 = vmatpush.bf16.msra.mxu1 %v295_v47 }
  0x14   :  { %179 = vmatpush.bf16.msra.mxu2 %v299_v50  ;;  %192 = vmatpush.bf16.msra.mxu3 %v303_v51  ;;  %v258_v50 = vld [vmem:[%s535_s4 + $0x10] sm:$0xff]  ;;  %v259_v51 = vld [vmem:[%s535_s4 + $0x18] sm:$0xff] }
  0x17   :  { %154 = vmatpush.bf16.msra.mxu0 %v275_v58  ;;  %167 = vmatpush.bf16.msra.mxu1 %v279_v59 }
  0x18   :  { %180 = vmatpush.bf16.msra.mxu2 %v283_v60  ;;  %193 = vmatpush.bf16.msra.mxu3 %v287_v61 }
  0x1a   :  { %336 = vmatmul.msk.bf16.vlgmr.msra.gmra.mxu0 %vm130_vm1, %v21_v62  ;;  %337 = vmatmul.msk.bf16.vlgmr.msra.gmra.mxu1 %vm130_vm1, %v21_v62 }
  0x1b   :  { %338 = vmatmul.msk.bf16.vlgmr.msra.gmra.mxu2 %vm130_vm1, %v21_v62  ;;  %339 = vmatmul.msk.bf16.vlgmr.msra.gmra.mxu3 %vm130_vm1, %v21_v62 }
  0x97   :  { %v156_v63 = vpop.f32.mrf.mxu0  ;;  %v169_v0 = vpop.f32.mrf.mxu1 }
  0x98   :  { %v201_v1 = vadd.f32 %v169_v0, %v156_v63  ;;  %v207_v2 = vmul.f32 %v156_v63, %v156_v63  ;;  %v208_v3 = vmul.f32 %v169_v0, %v169_v0 }
  0x9a   :  { %v211_v11 = vadd.f32 %v208_v3, %v207_v2 }
  0x9e   :  { %v182_v4 = vpop.f32.mrf.mxu2  ;;  %v195_v5 = vpop.f32.mrf.mxu3 }
  0x9f   :  { %v158_v6 = vpop.f32.mrf.mxu0  ;;  %v171_v7 = vpop.f32.mrf.mxu1  ;;  %v202_v8 = vadd.f32 %v201_v1, %v182_v4  ;;  %v209_v9 = vmul.f32 %v182_v4, %v182_v4  ;;  %v210_v12 = vmul.f32 %v195_v5, %v195_v5 }
  0xa1   :  { %v203_v10 = vadd.f32 %v202_v8, %v195_v5  ;;  %v212_v13 = vadd.f32 %v211_v11, %v209_v9 }
  0xa3   :  { %204 = vadd.xlane.f32.xlu0 %v203_v10  ;;  %v213_v16 = vadd.f32 %v212_v13, %v210_v12 }
  0xa6   :  { %v184_v14 = vpop.f32.mrf.mxu2  ;;  %v197_v15 = vpop.f32.mrf.mxu3 }
  0xab   :  { %214 = vadd.xlane.f32.xlu0 %v213_v16 }
 0x116   :  { %v205_v18 = vpop.xlane.xlu0 %204 }
 0x117   :  { %v206_v19 = vmul.f32 0.001953125, %v205_v18 }
 0x119   :  { %v217_v21 = vmul.f32 %v206_v19, %v206_v19 }
 0x11e   :  { %v215_v20 = vpop.xlane.xlu0 %214 }
 0x11f   :  { %v216_v22 = vmul.f32 0.001953125, %v215_v20 }
 0x121   :  { %v218_v23 = vsub.f32 %v216_v22, %v217_v21 }
 0x123   :  { %v219_v24 = vmax.f32 %v218_v23, 0.0 }
 0x125   :  { %v220_v25 = vadd.f32 1e-05, %v219_v24 }
 0x127   :  { %359 = vrsqrt.f32 %v220_v25  ;;  %vm227_vm3 = vweird.f32 %v220_v25 }
 0x12d   :  { %v360_v26 = vpop.eup %359 }
 0x12e   :  { %v222_v27 = vmul.f32 %v360_v26, %v220_v25  ;;  %vm228_vm2 = vweird.f32 %v360_v26 }
 0x12f   :  { %vm229_vm4 = vmor %vm227_vm3, %vm228_vm2 }
 0x130   :  { %v223_v28 = vmul.f32 %v360_v26, %v222_v27 }
 0x132   :  { %v224_v29 = vmul.f32 0.5, %v223_v28 }
 0x134   :  { %v225_v30 = vsub.f32 1.5, %v224_v29 }
 0x136   :  { %v226_v32 = vmul.f32 %v360_v26, %v225_v30 }
 0x138   :  { %v230_v33 = vsel %vm229_vm4, %v360_v26, %v226_v32 }
 0x139   :  { %v231_v34 = vmul.f32 %v230_v33, %v199_v31 }
 0x13b   :  { %234 = vperm.xlu1 %357, %v231_v34   ;;  %v241_v35 = vmul.f32 %v231_v34, %v206_v19 }
 0x13d   :  { %v242_v37 = vsub.f32 %v200_v36, %v241_v35 }
 0x143   :  { %245 = vperm.xlu1 %357, %v242_v37  }
 0x1ad   :  { %v235_v38 = vpop.permute.xlu1 %234 }
 0x1ae   :  { %v237_v39 = vmul.f32 %v235_v38, %v156_v63  ;;  %v238_v40 = vmul.f32 %v235_v38, %v169_v0  ;;  %v239_v41 = vmul.f32 %v235_v38, %v182_v4  ;;  %v240_v42 = vmul.f32 %v235_v38, %v195_v5 }
 0x1b5   :  { %v246_v43 = vpop.permute.xlu1 %245 }
 0x1b6   :  { %v248_v44 = vadd.f32 %v246_v43, %v237_v39  ;;  %v249_v45 = vadd.f32 %v246_v43, %v238_v40  ;;  %v250_v46 = vadd.f32 %v246_v43, %v239_v41  ;;  %v251_v47 = vadd.f32 %v246_v43, %v240_v42 }
 0x1b8   :  { %v252_v52 = vmax.f32 %v248_v44, 0.0  ;;  %v253_v53 = vmax.f32 %v249_v45, 0.0  ;;  %v254_v54 = vmax.f32 %v250_v46, 0.0  ;;  %v255_v55 = vmax.f32 %v251_v47, 0.0 }
 0x1ba   :  { %v260_v56 = vadd.f32 %v256_v48, %v252_v52  ;;  %v261_v57 = vadd.f32 %v257_v49, %v253_v53  ;;  %v262_v58 = vadd.f32 %v258_v50, %v254_v54  ;;  %v263_v59 = vadd.f32 %v259_v51, %v255_v55 }
 0x1bc   :  { %264 = vst [vmem:[%s536_s5] sm:$0xff] %v260_v56 }
 0x1bd   :  { %265 = vst [vmem:[%s536_s5 + $0x8] sm:$0xff] %v261_v57 }
 0x1be   :  { %266 = vst [vmem:[%s536_s5 + $0x10] sm:$0xff] %v262_v58 }
 0x1bf   :  { %267 = vst [vmem:[%s536_s5 + $0x18] sm:$0xff] %v263_v59 }

// kernel: _lambda_.13
= control target key start
LH: loop header
LB: loop body
LE: loop exit
PB: predicated region body
PF: predicated region fallthrough
CT: control target
= control target key end

     0   :  { %vm134_vm0 = vcmask 1043456   ;;  %vm130_vm1 = vcmask 588800   ;;  %s531_s0 = inlined_call_operand.vmem [shape: bf16[72,512], index: 0, kind: input, shape index: {}]   ;;  %s532_s1 = inlined_call_operand.vmem [shape: bf16[8,72], index: 1, kind: input, shape index: {}]   ;;  %s533_s2 = inlined_call_operand.vmem [shape: f32[8,1], index: 2, kind: input, shape index: {}]   ;;  %s534_s3 = inlined_call_operand.vmem [shape: f32[8,1], index: 3, kind: input, shape index: {}]   ;;  %s535_s4 = inlined_call_operand.vmem [shape: f32[8,512], index: 4, kind: input, shape index: {}]   ;;  %s536_s5 = inlined_call_operand.vmem [shape: f32[8,512], index: 5, kind: output, shape index: {}]  }
   0x1   :  { %v38_v0 = vld [vmem:[%s531_s0 + $0x80] sm:$0xff]  ;;  %v39_v1 = vld [vmem:[%s531_s0 + $0x88] sm:$0xff]  ;;  %v354_v7 = vld [vmem:[%s531_s0 + $0x6c] sm:$0xf0] }
   0x2   :  { %v90_v2 = vunpack.c.l.b16 %v38_v0  ;;  %v91_v3 = vunpack.c.h.b16 %v38_v0  ;;  %v92_v4 = vunpack.c.l.b16 %v39_v1  ;;  %v93_v5 = vunpack.c.h.b16 %v39_v1  ;;  %v322_v6 = vld [vmem:[%s531_s0 + $0x60] sm:$0xf]  ;;  %v352_v12 = vld [vmem:[%s531_s0 + $0x64] sm:$0xf]  ;;  %v324_v13 = vld [vmem:[%s531_s0 + $0x70] sm:$0xf0] }
   0x3   :  { %v330_v14 = vld [vmem:[%s531_s0 + $0x68] sm:$0xf]  ;;  %v355_v15 = vld [vmem:[%s531_s0 + $0x74] sm:$0xf0]  ;;  %v353_v16 = vld [vmem:[%s531_s0 + $0x6c] sm:$0xf]  ;;  %v323_v22 = vor.u32 %v354_v7, %v322_v6  ;;  %v327_v23 = vor.u32 %v352_v12, %v324_v13 }
   0x4   :  { %v110_v8 = vpack.c.b16 %v90_v2, %v90_v2  ;;  %v111_v9 = vpack.c.b16 %v91_v3, %v91_v3  ;;  %v112_v10 = vpack.c.b16 %v92_v4, %v92_v4  ;;  %v113_v11 = vpack.c.b16 %v93_v5, %v93_v5  ;;  %v332_v17 = vld [vmem:[%s531_s0 + $0x78] sm:$0xf0]  ;;  %v306_v24 = vld [vmem:[%s531_s0 + $0x40] sm:$0xf]  ;;  %v350_v25 = vld [vmem:[%s531_s0 + $0x4c] sm:$0xf0] }
   0x5   :  { %v331_v26 = vor.u32 %v355_v15, %v330_v14  ;;  %v335_v27 = vor.u32 %v353_v16, %v332_v17  ;;  %v348_v28 = vld [vmem:[%s531_s0 + $0x44] sm:$0xf]  ;;  %v308_v29 = vld [vmem:[%s531_s0 + $0x50] sm:$0xf0]  ;;  %v314_v30 = vld [vmem:[%s531_s0 + $0x48] sm:$0xf]  ;;  %v307_v34 = vor.u32 %v350_v25, %v306_v24 }
   0x6   :  { %v136_v18 = vsel %vm134_vm0, %v110_v8, 0  ;;  %v139_v19 = vsel %vm134_vm0, %v111_v9, 0  ;;  %v142_v20 = vsel %vm134_vm0, %v112_v10, 0  ;;  %v145_v21 = vsel %vm134_vm0, %v113_v11, 0  ;;  %v351_v31 = vld [vmem:[%s531_s0 + $0x54] sm:$0xf0] }
   0x7   :  { %150 = vmatpush.bf16.msra.mxu0 %v136_v18  ;;  %163 = vmatpush.bf16.msra.mxu1 %v139_v19  ;;  %v349_v32 = vld [vmem:[%s531_s0 + $0x4c] sm:$0xf]  ;;  %v316_v33 = vld [vmem:[%s531_s0 + $0x58] sm:$0xf0]  ;;  %v311_v35 = vor.u32 %v348_v28, %v308_v29  ;;  %v290_v36 = vld [vmem:[%s531_s0 + $0x20] sm:$0xf]  ;;  %v315_v38 = vor.u32 %v351_v31, %v314_v30 }
   0x8   :  { %176 = vmatpush.bf16.msra.mxu2 %v142_v20  ;;  %189 = vmatpush.bf16.msra.mxu3 %v145_v21  ;;  %v346_v37 = vld [vmem:[%s531_s0 + $0x2c] sm:$0xf0]  ;;  %v319_v39 = vor.u32 %v349_v32, %v316_v33  ;;  %v344_v40 = vld [vmem:[%s531_s0 + $0x24] sm:$0xf]  ;;  %v292_v41 = vld [vmem:[%s531_s0 + $0x30] sm:$0xf0] }
   0x9   :  { %v298_v42 = vld [vmem:[%s531_s0 + $0x28] sm:$0xf]  ;;  %v347_v43 = vld [vmem:[%s531_s0 + $0x34] sm:$0xf0]  ;;  %v345_v44 = vld [vmem:[%s531_s0 + $0x2c] sm:$0xf]  ;;  %v291_v46 = vor.u32 %v346_v37, %v290_v36  ;;  %v295_v47 = vor.u32 %v344_v40, %v292_v41 }
   0xa   :  { %v300_v45 = vld [vmem:[%s531_s0 + $0x38] sm:$0xf0]  ;;  %v274_v48 = vld [vmem:[%s531_s0] sm:$0xf]  ;;  %v342_v49 = vld [vmem:[%s531_s0 + $0xc] sm:$0xf0]  ;;  %v299_v50 = vor.u32 %v347_v43, %v298_v42 }
   0xb   :  { %151 = vmatpush.bf16.msra.mxu0 %v323_v22  ;;  %164 = vmatpush.bf16.msra.mxu1 %v327_v23  ;;  %v303_v51 = vor.u32 %v345_v44, %v300_v45  ;;  %v340_v52 = vld [vmem:[%s531_s0 + $0x4] sm:$0xf]  ;;  %v276_v53 = vld [vmem:[%s531_s0 + $0x10] sm:$0xf0]  ;;  %v282_v54 = vld [vmem:[%s531_s0 + $0x8] sm:$0xf]  ;;  %v275_v58 = vor.u32 %v342_v49, %v274_v48 }
   0xc   :  { %177 = vmatpush.bf16.msra.mxu2 %v331_v26  ;;  %190 = vmatpush.bf16.msra.mxu3 %v335_v27  ;;  %v343_v55 = vld [vmem:[%s531_s0 + $0x14] sm:$0xf0]  ;;  %v341_v56 = vld [vmem:[%s531_s0 + $0xc] sm:$0xf]  ;;  %v284_v57 = vld [vmem:[%s531_s0 + $0x18] sm:$0xf0]  ;;  %v279_v59 = vor.u32 %v340_v52, %v276_v53 }
   0xd   :  { %v283_v60 = vor.u32 %v343_v55, %v282_v54  ;;  %v287_v61 = vor.u32 %v341_v56, %v284_v57  ;;  %v21_v62 = vld [vmem:[%s532_s1] sm:$0xf]  ;;  %v361_v17 = vmov 0   ;;  %v253_v44 = vld [vmem:[%s535_s4 + $0x8] sm:$0xff]  ;;  %v254_v45 = vld [vmem:[%s535_s4 + $0x10] sm:$0xff] }
   0xe   :  { %357 = vset.pattern.permute.xlu1 %v361_v17  ;;  %358 = vset.pattern.permute.xlu0 %v361_v17  ;;  %v199_v31 = vld [vmem:[%s533_s2] sm:$0xff] }
   0xf   :  { %152 = vmatpush.bf16.msra.mxu0 %v307_v34  ;;  %165 = vmatpush.bf16.msra.mxu1 %v311_v35  ;;  %v200_v36 = vld [vmem:[%s534_s3] sm:$0xff] }
  0x10   :  { %178 = vmatpush.bf16.msra.mxu2 %v315_v38  ;;  %191 = vmatpush.bf16.msra.mxu3 %v319_v39  ;;  %v252_v43 = vld [vmem:[%s535_s4] sm:$0xff] }
  0x13   :  { %153 = vmatpush.bf16.msra.mxu0 %v291_v46  ;;  %166 = vmatpush.bf16.msra.mxu1 %v295_v47  ;;  %v255_v46 = vld [vmem:[%s535_s4 + $0x18] sm:$0xff] }
  0x14   :  { %179 = vmatpush.bf16.msra.mxu2 %v299_v50  ;;  %192 = vmatpush.bf16.msra.mxu3 %v303_v51 }
  0x17   :  { %154 = vmatpush.bf16.msra.mxu0 %v275_v58  ;;  %167 = vmatpush.bf16.msra.mxu1 %v279_v59 }
  0x18   :  { %180 = vmatpush.bf16.msra.mxu2 %v283_v60  ;;  %193 = vmatpush.bf16.msra.mxu3 %v287_v61 }
  0x1a   :  { %336 = vmatmul.msk.bf16.vlgmr.msra.gmra.mxu0 %vm130_vm1, %v21_v62  ;;  %337 = vmatmul.msk.bf16.vlgmr.msra.gmra.mxu1 %vm130_vm1, %v21_v62 }
  0x1b   :  { %338 = vmatmul.msk.bf16.vlgmr.msra.gmra.mxu2 %vm130_vm1, %v21_v62  ;;  %339 = vmatmul.msk.bf16.vlgmr.msra.gmra.mxu3 %vm130_vm1, %v21_v62 }
  0x97   :  { %v156_v63 = vpop.f32.mrf.mxu0  ;;  %v169_v0 = vpop.f32.mrf.mxu1 }
  0x98   :  { %v201_v1 = vadd.f32 %v169_v0, %v156_v63  ;;  %v207_v2 = vmul.f32 %v156_v63, %v156_v63  ;;  %v208_v3 = vmul.f32 %v169_v0, %v169_v0 }
  0x9a   :  { %v211_v11 = vadd.f32 %v208_v3, %v207_v2 }
  0x9e   :  { %v182_v4 = vpop.f32.mrf.mxu2  ;;  %v195_v5 = vpop.f32.mrf.mxu3 }
  0x9f   :  { %v158_v6 = vpop.f32.mrf.mxu0  ;;  %v171_v7 = vpop.f32.mrf.mxu1  ;;  %v202_v8 = vadd.f32 %v201_v1, %v182_v4  ;;  %v209_v9 = vmul.f32 %v182_v4, %v182_v4  ;;  %v210_v12 = vmul.f32 %v195_v5, %v195_v5 }
  0xa1   :  { %v203_v10 = vadd.f32 %v202_v8, %v195_v5  ;;  %v212_v13 = vadd.f32 %v211_v11, %v209_v9 }
  0xa3   :  { %204 = vadd.xlane.f32.xlu0 %v203_v10  ;;  %v213_v16 = vadd.f32 %v212_v13, %v210_v12 }
  0xa6   :  { %v184_v14 = vpop.f32.mrf.mxu2  ;;  %v197_v15 = vpop.f32.mrf.mxu3 }
  0xab   :  { %214 = vadd.xlane.f32.xlu0 %v213_v16 }
 0x116   :  { %v205_v18 = vpop.xlane.xlu0 %204 }
 0x117   :  { %v206_v19 = vmul.f32 0.001953125, %v205_v18 }
 0x119   :  { %v217_v21 = vmul.f32 %v206_v19, %v206_v19 }
 0x11e   :  { %v215_v20 = vpop.xlane.xlu0 %214 }
 0x11f   :  { %v216_v22 = vmul.f32 0.001953125, %v215_v20 }
 0x121   :  { %v218_v23 = vsub.f32 %v216_v22, %v217_v21 }
 0x123   :  { %v219_v24 = vmax.f32 %v218_v23, 0.0 }
 0x125   :  { %v220_v25 = vadd.f32 1e-05, %v219_v24 }
 0x127   :  { %359 = vrsqrt.f32 %v220_v25  ;;  %vm227_vm3 = vweird.f32 %v220_v25 }
 0x12d   :  { %v360_v26 = vpop.eup %359 }
 0x12e   :  { %v222_v27 = vmul.f32 %v360_v26, %v220_v25  ;;  %vm228_vm2 = vweird.f32 %v360_v26 }
 0x12f   :  { %vm229_vm4 = vmor %vm227_vm3, %vm228_vm2 }
 0x130   :  { %v223_v28 = vmul.f32 %v360_v26, %v222_v27 }
 0x132   :  { %v224_v29 = vmul.f32 0.5, %v223_v28 }
 0x134   :  { %v225_v30 = vsub.f32 1.5, %v224_v29 }
 0x136   :  { %v226_v32 = vmul.f32 %v360_v26, %v225_v30 }
 0x138   :  { %v230_v33 = vsel %vm229_vm4, %v360_v26, %v226_v32 }
 0x139   :  { %v231_v34 = vmul.f32 %v230_v33, %v199_v31 }
 0x13b   :  { %234 = vperm.xlu1 %357, %v231_v34   ;;  %v241_v35 = vmul.f32 %v231_v34, %v206_v19 }
 0x13d   :  { %v242_v37 = vsub.f32 %v200_v36, %v241_v35 }
 0x143   :  { %245 = vperm.xlu1 %357, %v242_v37  }
 0x1ad   :  { %v235_v38 = vpop.permute.xlu1 %234 }
 0x1ae   :  { %v237_v39 = vmul.f32 %v235_v38, %v156_v63  ;;  %v238_v40 = vmul.f32 %v235_v38, %v169_v0  ;;  %v239_v41 = vmul.f32 %v235_v38, %v182_v4  ;;  %v240_v42 = vmul.f32 %v235_v38, %v195_v5 }
 0x1b5   :  { %v246_v47 = vpop.permute.xlu1 %245 }
 0x1b6   :  { %v248_v48 = vadd.f32 %v246_v47, %v237_v39  ;;  %v249_v49 = vadd.f32 %v246_v47, %v238_v40  ;;  %v250_v50 = vadd.f32 %v246_v47, %v239_v41  ;;  %v251_v51 = vadd.f32 %v246_v47, %v240_v42 }
 0x1b8   :  { %v256_v52 = vadd.f32 %v252_v43, %v248_v48  ;;  %v257_v53 = vadd.f32 %v253_v44, %v249_v49  ;;  %v258_v54 = vadd.f32 %v254_v45, %v250_v50  ;;  %v259_v55 = vadd.f32 %v255_v46, %v251_v51 }
 0x1ba   :  { %v260_v56 = vmax.f32 %v256_v52, 0.0  ;;  %v261_v57 = vmax.f32 %v257_v53, 0.0  ;;  %v262_v58 = vmax.f32 %v258_v54, 0.0  ;;  %v263_v59 = vmax.f32 %v259_v55, 0.0 }
 0x1bc   :  { %264 = vst [vmem:[%s536_s5] sm:$0xff] %v260_v56 }
 0x1bd   :  { %265 = vst [vmem:[%s536_s5 + $0x8] sm:$0xff] %v261_v57 }
 0x1be   :  { %266 = vst [vmem:[%s536_s5 + $0x10] sm:$0xff] %v262_v58 }
 0x1bf   :  { %267 = vst [vmem:[%s536_s5 + $0x18] sm:$0xff] %v263_v59 }

// kernel: _lambda_.14
= control target key start
LH: loop header
LB: loop body
LE: loop exit
PB: predicated region body
PF: predicated region fallthrough
CT: control target
= control target key end

     0   :  { %vm68_vm0 = vcmask 1043456   ;;  %vm64_vm1 = vcmask 588800   ;;  %v208_v13 = vmov 0   ;;  %s293_s0 = inlined_call_operand.vmem [shape: bf16[72,128], index: 0, kind: input, shape index: {}]   ;;  %s294_s1 = inlined_call_operand.vmem [shape: bf16[16,72], index: 1, kind: input, shape index: {}]   ;;  %s295_s2 = inlined_call_operand.vmem [shape: f32[16,1], index: 2, kind: input, shape index: {}]   ;;  %s296_s3 = inlined_call_operand.vmem [shape: f32[16,1], index: 3, kind: input, shape index: {}]   ;;  %s297_s4 = inlined_call_operand.vmem [shape: f32[16,128], index: 4, kind: input, shape index: {}]   ;;  %s298_s5 = inlined_call_operand.vmem [shape: f32[16,128], index: 5, kind: output, shape index: {}]  }
   0x1   :  { %v31_v0 = vld [vmem:[%s293_s0 + $0x20] sm:$0xf]  ;;  %v199_v4 = vld [vmem:[%s293_s0 + $0x18] sm:$0xff]  ;;  %v198_v5 = vld [vmem:[%s293_s0 + $0x10] sm:$0xff]  ;;  %201 = vset.pattern.permute.xlu2 %v208_v13  ;;  %202 = vset.pattern.permute.xlu0 %v208_v13 }
   0x2   :  { %v54_v1 = vunpack.c.l.b16 %v31_v0  ;;  %v197_v6 = vld [vmem:[%s293_s0 + $0x8] sm:$0xff]  ;;  %v196_v7 = vld [vmem:[%s293_s0] sm:$0xff]  ;;  %203 = vset.pattern.permute.xlu1 %v208_v13 }
   0x3   :  { %v195_v8 = vld [vmem:[%s294_s1] sm:$0xff]  ;;  %v87_v47 = vld [vmem:[%s295_s2 + $0x8] sm:$0xff] }
   0x4   :  { %v59_v2 = vpack.c.b16 %v54_v1, %v54_v1  ;;  %v86_v37 = vld [vmem:[%s295_s2] sm:$0xff]  ;;  %v89_v51 = vld [vmem:[%s296_s3 + $0x8] sm:$0xff] }
   0x5   :  { %v88_v43 = vld [vmem:[%s296_s3] sm:$0xff]  ;;  %v165_v1 = vld [vmem:[%s297_s4 + $0x8] sm:$0xff] }
   0x6   :  { %v70_v3 = vsel %vm68_vm0, %v59_v2, 0  ;;  %v164_v58 = vld [vmem:[%s297_s4] sm:$0xff] }
   0x7   :  { %75 = vmatpush.bf16.msra.mxu0 %v70_v3 }
   0xb   :  { %76 = vmatpush.bf16.msra.mxu0 %v199_v4 }
   0xf   :  { %77 = vmatpush.bf16.msra.mxu0 %v198_v5 }
  0x13   :  { %78 = vmatpush.bf16.msra.mxu0 %v197_v6 }
  0x17   :  { %79 = vmatpush.bf16.msra.mxu0 %v196_v7 }
  0x1a   :  { %194 = vmatmul.msk.bf16.vlgmr.msra.gmra.mxu0 %vm64_vm1, %v195_v8 }
  0x97   :  { %v257_v9 = vpop.f32.mrf.mxu0 }
  0x98   :  { %90 = vadd.xlane.f32.xlu0 %v257_v9  ;;  %v96_v10 = vmul.f32 %v257_v9, %v257_v9 }
  0x9a   :  { %98 = vadd.xlane.f32.xlu1 %v96_v10 }
  0x9f   :  { %v262_v11 = vpop.f32.mrf.mxu0 }
  0xa0   :  { %92 = vadd.xlane.f32.xlu0 %v262_v11  ;;  %v97_v12 = vmul.f32 %v262_v11, %v262_v11 }
  0xa2   :  { %100 = vadd.xlane.f32.xlu1 %v97_v12 }
 0x10b   :  { %v91_v14 = vpop.xlane.xlu0 %90 }
 0x10c   :  { %v94_v15 = vmul.f32 0.0078125, %v91_v14 }
 0x10d   :  { %v99_v16 = vpop.xlane.xlu1 %98 }
 0x10e   :  { %v104_v17 = vmul.f32 %v94_v15, %v94_v15  ;;  %v102_v18 = vmul.f32 0.0078125, %v99_v16 }
 0x110   :  { %v106_v19 = vsub.f32 %v102_v18, %v104_v17 }
 0x112   :  { %v108_v20 = vmax.f32 %v106_v19, 0.0 }
 0x113   :  { %v93_v21 = vpop.xlane.xlu0 %92 }
 0x114   :  { %v110_v22 = vadd.f32 1e-05, %v108_v20  ;;  %v95_v23 = vmul.f32 0.0078125, %v93_v21 }
 0x115   :  { %v101_v24 = vpop.xlane.xlu1 %100 }
 0x116   :  { %204 = vrsqrt.f32 %v110_v22  ;;  %v105_v25 = vmul.f32 %v95_v23, %v95_v23  ;;  %v103_v26 = vmul.f32 0.0078125, %v101_v24  ;;  %vm118_vm3 = vweird.f32 %v110_v22 }
 0x118   :  { %v107_v27 = vsub.f32 %v103_v26, %v105_v25 }
 0x11a   :  { %v109_v28 = vmax.f32 %v107_v27, 0.0 }
 0x11c   :  { %v205_v29 = vpop.eup %204  ;;  %v111_v30 = vadd.f32 1e-05, %v109_v28 }
 0x11d   :  { %v113_v31 = vmul.f32 %v205_v29, %v110_v22  ;;  %vm119_vm2 = vweird.f32 %v205_v29 }
 0x11e   :  { %206 = vrsqrt.f32 %v111_v30  ;;  %vm120_vm4 = vmor %vm118_vm3, %vm119_vm2  ;;  %vm128_vm6 = vweird.f32 %v111_v30 }
 0x11f   :  { %v114_v32 = vmul.f32 %v205_v29, %v113_v31 }
 0x121   :  { %v115_v33 = vmul.f32 0.5, %v114_v32 }
 0x123   :  { %v116_v34 = vsub.f32 1.5, %v115_v33 }
 0x124   :  { %v207_v35 = vpop.eup %206 }
 0x125   :  { %v123_v36 = vmul.f32 %v207_v35, %v111_v30  ;;  %v117_v38 = vmul.f32 %v205_v29, %v116_v34  ;;  %vm129_vm5 = vweird.f32 %v207_v35 }
 0x126   :  { %vm130_vm7 = vmor %vm128_vm6, %vm129_vm5 }
 0x127   :  { %v124_v39 = vmul.f32 %v207_v35, %v123_v36  ;;  %v121_v40 = vsel %vm120_vm4, %v205_v29, %v117_v38 }
 0x128   :  { %v132_v41 = vmul.f32 %v121_v40, %v86_v37 }
 0x129   :  { %v125_v42 = vmul.f32 0.5, %v124_v39 }
 0x12a   :  { %136 = vperm.xlu2 %201, %v132_v41   ;;  %v146_v44 = vmul.f32 %v132_v41, %v94_v15 }
 0x12b   :  { %v126_v45 = vsub.f32 1.5, %v125_v42 }
 0x12c   :  { %v148_v46 = vsub.f32 %v88_v43, %v146_v44 }
 0x12d   :  { %v127_v48 = vmul.f32 %v207_v35, %v126_v45 }
 0x12e   :  { %152 = vperm.xlu0 %202, %v148_v46  }
 0x12f   :  { %v131_v49 = vsel %vm130_vm7, %v207_v35, %v127_v48 }
 0x130   :  { %v133_v50 = vmul.f32 %v131_v49, %v87_v47 }
 0x132   :  { %141 = vperm.xlu2 %201, %v133_v50   ;;  %v147_v52 = vmul.f32 %v133_v50, %v95_v23 }
 0x134   :  { %v149_v53 = vsub.f32 %v89_v51, %v147_v52 }
 0x136   :  { %157 = vperm.xlu1 %203, %v149_v53  }
 0x184   :  { %v137_v54 = vpop.permute.xlu2 %136 }
 0x185   :  { %v144_v55 = vmul.f32 %v137_v54, %v257_v9 }
 0x18c   :  { %v142_v60 = vpop.permute.xlu2 %141 }
 0x18d   :  { %v145_v62 = vmul.f32 %v142_v60, %v262_v11 }
 0x1a0   :  { %v153_v56 = vpop.permute.xlu0 %152 }
 0x1a1   :  { %v160_v57 = vadd.f32 %v153_v56, %v144_v55 }
 0x1a3   :  { %v162_v59 = vmax.f32 %v160_v57, 0.0 }
 0x1a5   :  { %v166_v61 = vadd.f32 %v164_v58, %v162_v59 }
 0x1a7   :  { %168 = vst [vmem:[%s298_s5] sm:$0xff] %v166_v61 }
 0x1a8   :  { %v158_v63 = vpop.permute.xlu1 %157 }
 0x1a9   :  { %v161_v0 = vadd.f32 %v158_v63, %v145_v62 }
 0x1ab   :  { %v163_v2 = vmax.f32 %v161_v0, 0.0 }
 0x1ad   :  { %v167_v3 = vadd.f32 %v165_v1, %v163_v2 }
 0x1af   :  { %169 = vst [vmem:[%s298_s5 + $0x8] sm:$0xff] %v167_v3 }

// kernel: _lambda_.15
= control target key start
LH: loop header
LB: loop body
LE: loop exit
PB: predicated region body
PF: predicated region fallthrough
CT: control target
= control target key end

     0   :  { %vm233_vm0 = vcmask 1043456   ;;  %vm229_vm1 = vcmask 64512   ;;  %vm113_vm2 = vcmask 130048   ;;  %v411_v37 = vmov 0   ;;  %s583_s4 = inlined_call_operand.vmem [shape: bf16[8,128], index: 4, kind: input, shape index: {}]   ;;  %s584_s0 = inlined_call_operand.vmem [shape: bf16[144,128], index: 0, kind: input, shape index: {}]   ;;  %s585_s5 = inlined_call_operand.vmem [shape: bf16[16,8], index: 5, kind: input, shape index: {}]   ;;  %s586_s1 = inlined_call_operand.vmem [shape: bf16[16,144], index: 1, kind: input, shape index: {}]   ;;  %s587_s2 = inlined_call_operand.vmem [shape: f32[16,1], index: 2, kind: input, shape index: {}, may-alias: {2,6}]   ;;  %s588_s3 = inlined_call_operand.vmem [shape: f32[16,1], index: 3, kind: input, shape index: {}, may-alias: {3,7}]   ;;  %s589_s6 = inlined_call_operand.vmem [shape: f32[16,1], index: 6, kind: input, shape index: {}, may-alias: {2,6}]   ;;  %s590_s7 = inlined_call_operand.vmem [shape: f32[16,1], index: 7, kind: input, shape index: {}, may-alias: {3,7}]   ;;  %s591_s8 = inlined_call_operand.vmem [shape: f32[16,128], index: 8, kind: output, shape index: {}]  }
   0x1   :  { %v223_v0 = vld [vmem:[%s583_s4] sm:$0xf]  ;;  %v396_v1 = vld [vmem:[%s584_s0 + $0x38] sm:$0xff]  ;;  %v395_v4 = vld [vmem:[%s584_s0 + $0x30] sm:$0xff]  ;;  %400 = vset.pattern.permute.xlu2 %v411_v37  ;;  %402 = vset.pattern.permute.xlu1 %v411_v37 }
   0x2   :  { %v235_v2 = vsel %vm233_vm0, %v223_v0, 0  ;;  %v398_v3 = vld [vmem:[%s585_s5] sm:$0xff]  ;;  %117 = vmatpush.bf16.msra.mxu0 %v396_v1  ;;  %v341_v7 = vld [vmem:[%s586_s1 + $0x8] sm:$0xf0]  ;;  %v392_v11 = vld [vmem:[%s584_s0 + $0x18] sm:$0xff]  ;;  %401 = vset.pattern.permute.xlu0 %v411_v37 }
   0x3   :  { %244 = vmatpush.bf16.msra.mxu2 %v235_v2  ;;  %v397_v5 = vld [vmem:[%s584_s0 + $0x40] sm:$0xff]  ;;  %v394_v9 = vld [vmem:[%s584_s0 + $0x28] sm:$0xff]  ;;  %v391_v12 = vld [vmem:[%s584_s0 + $0x10] sm:$0xff] }
   0x4   :  { %v387_v6 = vld [vmem:[%s586_s1 + $0x4] sm:$0xf]  ;;  %138 = vmatpush.bf16.msra.mxu1 %v397_v5  ;;  %v390_v13 = vld [vmem:[%s584_s0 + $0x8] sm:$0xff]  ;;  %v339_v15 = vld [vmem:[%s586_s1] sm:$0xf] }
   0x5   :  { %v344_v8 = vor.u32 %v387_v6, %v341_v7  ;;  %v393_v10 = vld [vmem:[%s584_s0 + $0x20] sm:$0xff]  ;;  %v388_v16 = vld [vmem:[%s586_s1 + $0x4] sm:$0xf0] }
   0x6   :  { %386 = vmatmul.msk.bf16.vlgmr.msra.gmra.mxu2 %vm229_vm1, %v398_v3  ;;  %118 = vmatpush.bf16.msra.mxu0 %v395_v4  ;;  %v389_v14 = vld [vmem:[%s584_s0] sm:$0xff]  ;;  %v340_v17 = vor.u32 %v388_v16, %v339_v15 }
   0x7   :  { %381 = vmatmul.msk.bf16.vlgmr.msra.gmra.mxu1 %vm113_vm2, %v344_v8 }
   0xa   :  { %119 = vmatpush.bf16.msra.mxu0 %v394_v9 }
   0xe   :  { %120 = vmatpush.bf16.msra.mxu0 %v393_v10  ;;  %v145_v10 = vld [vmem:[%s587_s2] sm:$0xff] }
  0x12   :  { %121 = vmatpush.bf16.msra.mxu0 %v392_v11 }
  0x16   :  { %122 = vmatpush.bf16.msra.mxu0 %v391_v12 }
  0x1a   :  { %123 = vmatpush.bf16.msra.mxu0 %v390_v13 }
  0x1e   :  { %124 = vmatpush.bf16.msra.mxu0 %v389_v14 }
  0x21   :  { %125 = vmatmul.bf16.vlgmr.msra.gmra.mxu0 %v340_v17  ;;  %v147_v17 = vld [vmem:[%s588_s3] sm:$0xff] }
  0x84   :  { %v140_v21 = vpop.f32.mrf.mxu1 }
  0x89   :  { %v502_v18 = vpop.f32.mrf.mxu2 }
  0x8a   :  { %255 = vadd.xlane.f32.xlu1 %v502_v18  ;;  %v261_v29 = vmul.f32 %v502_v18, %v502_v18 }
  0x8c   :  { %v142_v25 = vpop.f32.mrf.mxu1 }
  0x91   :  { %v505_v19 = vpop.f32.mrf.mxu2 }
  0x92   :  { %257 = vadd.xlane.f32.xlu1 %v505_v19  ;;  %v262_v20 = vmul.f32 %v505_v19, %v505_v19 }
  0x9a   :  { %265 = vadd.xlane.f32.xlu1 %v262_v20 }
  0x9e   :  { %v126_v22 = vpop.f32.mrf.mxu0 }
  0x9f   :  { %v510_v23 = vadd.f32 %v140_v21, %v126_v22 }
  0xa1   :  { %149 = vadd.xlane.f32.xlu0 %v510_v23  ;;  %v155_v24 = vmul.f32 %v510_v23, %v510_v23 }
  0xa3   :  { %157 = vadd.xlane.f32.xlu2 %v155_v24 }
  0xa6   :  { %v128_v26 = vpop.f32.mrf.mxu0 }
  0xa7   :  { %v515_v27 = vadd.f32 %v142_v25, %v128_v26 }
  0xa9   :  { %151 = vadd.xlane.f32.xlu0 %v515_v27  ;;  %v156_v28 = vmul.f32 %v515_v27, %v515_v27 }
  0xab   :  { %159 = vadd.xlane.f32.xlu2 %v156_v28  ;;  %v146_v28 = vld [vmem:[%s587_s2 + $0x8] sm:$0xff] }
  0xb1   :  { %263 = vadd.xlane.f32.xlu0 %v261_v29 }
  0xfd   :  { %v256_v30 = vpop.xlane.xlu1 %255 }
  0xfe   :  { %v533_v53 = vmul.f32 0.0078125, %v256_v30 }
 0x100   :  { %v269_v59 = vmul.f32 %v533_v53, %v533_v53 }
 0x105   :  { %v258_v31 = vpop.xlane.xlu1 %257 }
 0x106   :  { %v522_v32 = vmul.f32 0.0078125, %v258_v31 }
 0x108   :  { %v270_v34 = vmul.f32 %v522_v32, %v522_v32 }
 0x10d   :  { %v266_v33 = vpop.xlane.xlu1 %265 }
 0x10e   :  { %v268_v35 = vmul.f32 0.0078125, %v266_v33 }
 0x110   :  { %v272_v36 = vsub.f32 %v268_v35, %v270_v34 }
 0x112   :  { %v274_v39 = vmax.f32 %v272_v36, 0.0  ;;  %v252_v36 = vld [vmem:[%s589_s6 + $0x8] sm:$0xff] }
 0x114   :  { %v150_v38 = vpop.xlane.xlu0 %149  ;;  %v526_v44 = vadd.f32 1e-05, %v274_v39 }
 0x115   :  { %v153_v40 = vmul.f32 0.0078125, %v150_v38  ;;  %v251_v38 = vld [vmem:[%s589_s6] sm:$0xff] }
 0x116   :  { %v158_v41 = vpop.xlane.xlu2 %157  ;;  %403 = vrsqrt.f32 %v526_v44  ;;  %vm293_vm7 = vweird.f32 %v526_v44 }
 0x117   :  { %v163_v42 = vmul.f32 %v153_v40, %v153_v40  ;;  %v161_v43 = vmul.f32 0.0078125, %v158_v41 }
 0x119   :  { %v165_v45 = vsub.f32 %v161_v43, %v163_v42 }
 0x11b   :  { %v167_v46 = vmax.f32 %v165_v45, 0.0 }
 0x11c   :  { %v152_v47 = vpop.xlane.xlu0 %151  ;;  %v535_v55 = vpop.eup %403 }
 0x11d   :  { %v169_v48 = vadd.f32 1e-05, %v167_v46  ;;  %v529_v49 = vmul.f32 0.0078125, %v152_v47  ;;  %v288_v62 = vmul.f32 %v535_v55, %v526_v44  ;;  %vm294_vm8 = vweird.f32 %v535_v55  ;;  %v254_v44 = vld [vmem:[%s590_s7 + $0x8] sm:$0xff] }
 0x11e   :  { %v160_v50 = vpop.xlane.xlu2 %159  ;;  %vm295_vm11 = vmor %vm293_vm7, %vm294_vm8  ;;  %v148_v46 = vld [vmem:[%s588_s3 + $0x8] sm:$0xff] }
 0x11f   :  { %405 = vrsqrt.f32 %v169_v48  ;;  %v164_v51 = vmul.f32 %v529_v49, %v529_v49  ;;  %v162_v52 = vmul.f32 0.0078125, %v160_v50  ;;  %v289_v3 = vmul.f32 %v535_v55, %v288_v62 }
 0x120   :  { %vm177_vm4 = vweird.f32 %v169_v48 }
 0x121   :  { %v166_v54 = vsub.f32 %v162_v52, %v164_v51  ;;  %v290_v8 = vmul.f32 0.5, %v289_v3 }
 0x123   :  { %v168_v56 = vmax.f32 %v166_v54, 0.0  ;;  %v291_v15 = vsub.f32 1.5, %v290_v8 }
 0x124   :  { %v264_v57 = vpop.xlane.xlu0 %263 }
 0x125   :  { %v406_v58 = vpop.eup %405  ;;  %v170_v60 = vadd.f32 1e-05, %v168_v56  ;;  %v267_v61 = vmul.f32 0.0078125, %v264_v57  ;;  %v292_v30 = vmul.f32 %v535_v55, %v291_v15 }
 0x126   :  { %v172_v63 = vmul.f32 %v406_v58, %v169_v48  ;;  %vm178_vm3 = vweird.f32 %v406_v58 }
 0x127   :  { %407 = vrsqrt.f32 %v170_v60  ;;  %v271_v0 = vsub.f32 %v267_v61, %v269_v59  ;;  %vm179_vm5 = vmor %vm177_vm4, %vm178_vm3  ;;  %vm187_vm9 = vweird.f32 %v170_v60  ;;  %v296_v37 = vsel %vm295_vm11, %v535_v55, %v292_v30 }
 0x128   :  { %v173_v1 = vmul.f32 %v406_v58, %v172_v63 }
 0x129   :  { %v273_v2 = vmax.f32 %v271_v0, 0.0 }
 0x12a   :  { %v174_v4 = vmul.f32 0.5, %v173_v1 }
 0x12b   :  { %v275_v5 = vadd.f32 1e-05, %v273_v2 }
 0x12c   :  { %v175_v6 = vsub.f32 1.5, %v174_v4 }
 0x12d   :  { %v408_v7 = vpop.eup %407  ;;  %409 = vrsqrt.f32 %v275_v5  ;;  %vm283_vm13 = vweird.f32 %v275_v5 }
 0x12e   :  { %v182_v9 = vmul.f32 %v408_v7, %v170_v60  ;;  %v176_v11 = vmul.f32 %v406_v58, %v175_v6  ;;  %vm188_vm6 = vweird.f32 %v408_v7 }
 0x12f   :  { %vm189_vm10 = vmor %vm187_vm9, %vm188_vm6 }
 0x130   :  { %v183_v12 = vmul.f32 %v408_v7, %v182_v9  ;;  %v180_v13 = vsel %vm179_vm5, %v406_v58, %v176_v11 }
 0x131   :  { %v191_v14 = vmul.f32 %v180_v13, %v145_v10 }
 0x132   :  { %v184_v16 = vmul.f32 0.5, %v183_v12 }
 0x133   :  { %v410_v20 = vpop.eup %409  ;;  %195 = vperm.xlu2 %400, %v191_v14   ;;  %v205_v21 = vmul.f32 %v191_v14, %v153_v40  ;;  %v298_v40 = vmul.f32 %v296_v37, %v252_v36 }
 0x134   :  { %v185_v22 = vsub.f32 1.5, %v184_v16  ;;  %v278_v24 = vmul.f32 %v410_v20, %v275_v5  ;;  %vm284_vm12 = vweird.f32 %v410_v20 }
 0x135   :  { %v207_v25 = vsub.f32 %v147_v17, %v205_v21  ;;  %vm285_vm14 = vmor %vm283_vm13, %vm284_vm12  ;;  %v312_v43 = vmul.f32 %v298_v40, %v522_v32  ;;  %v253_v32 = vld [vmem:[%s590_s7] sm:$0xff] }
 0x136   :  { %v279_v26 = vmul.f32 %v410_v20, %v278_v24  ;;  %v186_v29 = vmul.f32 %v408_v7, %v185_v22 }
 0x137   :  { %211 = vperm.xlu1 %402, %v207_v25   ;;  %v314_v47 = vsub.f32 %v254_v44, %v312_v43 }
 0x138   :  { %v280_v31 = vmul.f32 0.5, %v279_v26  ;;  %v190_v33 = vsel %vm189_vm10, %v408_v7, %v186_v29 }
 0x139   :  { %v192_v34 = vmul.f32 %v190_v33, %v146_v28 }
 0x13a   :  { %v281_v35 = vsub.f32 1.5, %v280_v31 }
 0x13b   :  { %200 = vperm.xlu0 %401, %v192_v34   ;;  %v206_v45 = vmul.f32 %v192_v34, %v529_v49 }
 0x13c   :  { %v282_v39 = vmul.f32 %v410_v20, %v281_v35 }
 0x13d   :  { %v208_v48 = vsub.f32 %v148_v46, %v206_v45 }
 0x13e   :  { %v286_v41 = vsel %vm285_vm14, %v410_v20, %v282_v39 }
 0x13f   :  { %306 = vperm.xlu1 %402, %v298_v40   ;;  %v297_v42 = vmul.f32 %v286_v41, %v251_v38 }
 0x141   :  { %301 = vperm.xlu2 %400, %v297_v42   ;;  %v311_v50 = vmul.f32 %v297_v42, %v533_v53 }
 0x143   :  { %v313_v51 = vsub.f32 %v253_v32, %v311_v50 }
 0x147   :  { %322 = vperm.xlu1 %402, %v314_v47  }
 0x149   :  { %216 = vperm.xlu2 %400, %v208_v48  }
 0x151   :  { %317 = vperm.xlu2 %400, %v313_v51  }
 0x18d   :  { %v196_v52 = vpop.permute.xlu2 %195 }
 0x18e   :  { %v203_v56 = vmul.f32 %v196_v52, %v510_v23 }
 0x19b   :  { %v302_v54 = vpop.permute.xlu2 %301 }
 0x19c   :  { %v309_v57 = vmul.f32 %v302_v54, %v502_v18 }
 0x1a3   :  { %v217_v55 = vpop.permute.xlu2 %216 }
 0x1a9   :  { %v212_v49 = vpop.permute.xlu1 %211 }
 0x1aa   :  { %v219_v59 = vadd.f32 %v212_v49, %v203_v56 }
 0x1ab   :  { %v318_v58 = vpop.permute.xlu2 %317 }
 0x1ac   :  { %v325_v60 = vadd.f32 %v318_v58, %v309_v57 }
 0x1ad   :  { %v201_v63 = vpop.permute.xlu0 %200 }
 0x1ae   :  { %v327_v61 = vadd.f32 %v325_v60, %v219_v59  ;;  %v204_v0 = vmul.f32 %v201_v63, %v515_v27 }
 0x1b0   :  { %v329_v62 = vmax.f32 %v327_v61, 0.0  ;;  %v220_v3 = vadd.f32 %v217_v55, %v204_v0 }
 0x1b1   :  { %v307_v53 = vpop.permute.xlu1 %306 }
 0x1b2   :  { %331 = vst [vmem:[%s591_s8] sm:$0xff] %v329_v62  ;;  %v310_v1 = vmul.f32 %v307_v53, %v505_v19 }
 0x1b9   :  { %v323_v2 = vpop.permute.xlu1 %322 }
 0x1ba   :  { %v326_v23 = vadd.f32 %v323_v2, %v310_v1 }
 0x1bc   :  { %v328_v4 = vadd.f32 %v326_v23, %v220_v3 }
 0x1be   :  { %v330_v18 = vmax.f32 %v328_v4, 0.0 }
 0x1c0   :  { %332 = vst [vmem:[%s591_s8 + $0x8] sm:$0xff] %v330_v18 }

// kernel: _lambda_.16
= control target key start
LH: loop header
LB: loop body
LE: loop exit
PB: predicated region body
PF: predicated region fallthrough
CT: control target
= control target key end

     0   :  { %vm115_vm0 = vcmask 130048   ;;  %vm168_vm1 = vcmask 261120   ;;  %v428_v45 = vmov 0   ;;  %s611_s0 = inlined_call_operand.vmem [shape: bf16[144,32], index: 0, kind: input, shape index: {}]   ;;  %s612_s1 = inlined_call_operand.vmem [shape: bf16[32,144], index: 1, kind: input, shape index: {}]   ;;  %s613_s2 = inlined_call_operand.vmem [shape: f32[32,1], index: 2, kind: input, shape index: {}]   ;;  %s614_s3 = inlined_call_operand.vmem [shape: f32[32,1], index: 3, kind: input, shape index: {}]   ;;  %s615_s4 = inlined_call_operand.vmem [shape: f32[32,32], index: 4, kind: input, shape index: {}]   ;;  %s616_s5 = inlined_call_operand.vmem [shape: f32[32,32], index: 5, kind: output, shape index: {}]  }
   0x1   :  { %v406_v0 = vld [vmem:[%s611_s0 + $0x38] sm:$0xff]  ;;  %v407_v1 = vld [vmem:[%s611_s0 + $0x40] sm:$0xff]  ;;  %v405_v2 = vld [vmem:[%s611_s0 + $0x30] sm:$0xff]  ;;  %417 = vset.pattern.permute.xlu2 %v428_v45  ;;  %418 = vset.pattern.permute.xlu0 %v428_v45 }
   0x2   :  { %122 = vmatpush.bf16.msra.mxu0 %v406_v0  ;;  %408 = vmatpush.bf16.msra.mxu2 %v406_v0  ;;  %v395_v3 = vld [vmem:[%s612_s1 + $0x4] sm:$0xf]  ;;  %v345_v4 = vld [vmem:[%s612_s1 + $0x8] sm:$0xf0]  ;;  %v402_v8 = vld [vmem:[%s611_s0 + $0x18] sm:$0xff] }
   0x3   :  { %148 = vmatpush.bf16.msra.mxu1 %v407_v1  ;;  %v348_v5 = vor.u32 %v395_v3, %v345_v4  ;;  %v404_v6 = vld [vmem:[%s611_s0 + $0x28] sm:$0xff]  ;;  %v403_v7 = vld [vmem:[%s611_s0 + $0x20] sm:$0xff]  ;;  %v397_v9 = vld [vmem:[%s612_s1 + $0x14] sm:$0xf]  ;;  %419 = vset.pattern.permute.xlu1 %v428_v45 }
   0x4   :  { %v353_v10 = vld [vmem:[%s612_s1 + $0x18] sm:$0xf0]  ;;  %v401_v11 = vld [vmem:[%s611_s0 + $0x10] sm:$0xff]  ;;  %v400_v13 = vld [vmem:[%s611_s0 + $0x8] sm:$0xff] }
   0x5   :  { %v356_v12 = vor.u32 %v397_v9, %v353_v10  ;;  %v399_v14 = vld [vmem:[%s611_s0] sm:$0xff]  ;;  %v396_v16 = vld [vmem:[%s612_s1 + $0x4] sm:$0xf0]  ;;  %v351_v17 = vld [vmem:[%s612_s1 + $0x10] sm:$0xf] }
   0x6   :  { %123 = vmatpush.bf16.msra.mxu0 %v405_v2  ;;  %409 = vmatpush.bf16.msra.mxu2 %v405_v2  ;;  %v343_v15 = vld [vmem:[%s612_s1] sm:$0xf]  ;;  %v398_v18 = vld [vmem:[%s612_s1 + $0x14] sm:$0xf0] }
   0x7   :  { %393 = vmatmul.msk.bf16.vlgmr.msra.gmra.mxu1 %vm115_vm0, %v348_v5  ;;  %v344_v19 = vor.u32 %v396_v16, %v343_v15  ;;  %v352_v20 = vor.u32 %v398_v18, %v351_v17 }
   0xa   :  { %124 = vmatpush.bf16.msra.mxu0 %v404_v6  ;;  %410 = vmatpush.bf16.msra.mxu2 %v404_v6 }
   0xe   :  { %125 = vmatpush.bf16.msra.mxu0 %v403_v7  ;;  %411 = vmatpush.bf16.msra.mxu2 %v403_v7 }
  0x12   :  { %126 = vmatpush.bf16.msra.mxu0 %v402_v8  ;;  %412 = vmatpush.bf16.msra.mxu2 %v402_v8 }
  0x16   :  { %127 = vmatpush.bf16.msra.mxu0 %v401_v11  ;;  %413 = vmatpush.bf16.msra.mxu2 %v401_v11 }
  0x17   :  { %394 = vmatmul.msk.bf16.gmra.mxu1 %vm115_vm0, %v356_v12 }
  0x1a   :  { %128 = vmatpush.bf16.msra.mxu0 %v400_v13  ;;  %414 = vmatpush.bf16.msra.mxu2 %v400_v13 }
  0x1e   :  { %129 = vmatpush.bf16.msra.mxu0 %v399_v14  ;;  %415 = vmatpush.bf16.msra.mxu2 %v399_v14 }
  0x21   :  { %130 = vmatmul.bf16.vlgmr.msra.gmra.mxu0 %v344_v19  ;;  %135 = vmatmul.bf16.vlgmr.msra.gmra.mxu2 %v352_v20  ;;  %v160_v19 = vld [vmem:[%s613_s2] sm:$0xff] }
  0x84   :  { %v150_v21 = vpop.f32.mrf.mxu1 }
  0x8c   :  { %v152_v22 = vpop.f32.mrf.mxu1 }
  0x94   :  { %v155_v27 = vpop.f32.mrf.mxu1 }
  0x9c   :  { %v157_v37 = vpop.f32.mrf.mxu1 }
  0x9e   :  { %v131_v23 = vpop.f32.mrf.mxu0 }
  0x9f   :  { %v512_v24 = vadd.f32 %v150_v21, %v131_v23 }
  0xa1   :  { %v169_v25 = vsel %vm168_vm1, %v512_v24, 0.0  ;;  %v185_v26 = vmul.f32 %v512_v24, %v512_v24 }
  0xa2   :  { %170 = vadd.xlane.f32.xlu0 %v169_v25 }
  0xa3   :  { %v189_v28 = vsel %vm168_vm1, %v185_v26, 0.0 }
  0xa4   :  { %v136_v29 = vpop.f32.mrf.mxu2  ;;  %190 = vadd.xlane.f32.xlu2 %v189_v28 }
  0xa5   :  { %v519_v30 = vadd.f32 %v155_v27, %v136_v29 }
  0xa6   :  { %v133_v31 = vpop.f32.mrf.mxu0 }
  0xa7   :  { %v521_v32 = vadd.f32 %v152_v22, %v133_v31  ;;  %v175_v33 = vsel %vm168_vm1, %v519_v30, 0.0  ;;  %v187_v40 = vmul.f32 %v519_v30, %v519_v30 }
  0xa8   :  { %176 = vadd.xlane.f32.xlu1 %v175_v33 }
  0xa9   :  { %v172_v34 = vsel %vm168_vm1, %v521_v32, 0.0  ;;  %v186_v35 = vmul.f32 %v521_v32, %v521_v32  ;;  %v195_v42 = vsel %vm168_vm1, %v187_v40, 0.0 }
  0xaa   :  { %173 = vadd.xlane.f32.xlu0 %v172_v34 }
  0xab   :  { %v192_v36 = vsel %vm168_vm1, %v186_v35, 0.0  ;;  %v164_v35 = vld [vmem:[%s614_s3] sm:$0xff] }
  0xac   :  { %v138_v38 = vpop.f32.mrf.mxu2  ;;  %193 = vadd.xlane.f32.xlu2 %v192_v36  ;;  %v161_v36 = vld [vmem:[%s613_s2 + $0x8] sm:$0xff] }
  0xad   :  { %v530_v39 = vadd.f32 %v157_v37, %v138_v38 }
  0xaf   :  { %v178_v41 = vsel %vm168_vm1, %v530_v39, 0.0  ;;  %v188_v43 = vmul.f32 %v530_v39, %v530_v39 }
  0xb0   :  { %179 = vadd.xlane.f32.xlu1 %v178_v41 }
  0xb1   :  { %v198_v44 = vsel %vm168_vm1, %v188_v43, 0.0 }
  0xb2   :  { %196 = vadd.xlane.f32.xlu0 %v195_v42 }
  0xb8   :  { %199 = vadd.xlane.f32.xlu1 %v198_v44 }
 0x115   :  { %v171_v46 = vpop.xlane.xlu0 %170 }
 0x116   :  { %v181_v47 = vmul.f32 0.03125, %v171_v46 }
 0x117   :  { %v191_v48 = vpop.xlane.xlu2 %190 }
 0x118   :  { %v205_v49 = vmul.f32 %v181_v47, %v181_v47  ;;  %v201_v50 = vmul.f32 0.03125, %v191_v48 }
 0x11a   :  { %v209_v51 = vsub.f32 %v201_v50, %v205_v49 }
 0x11b   :  { %v177_v52 = vpop.xlane.xlu1 %176 }
 0x11c   :  { %v213_v53 = vmax.f32 %v209_v51, 0.0  ;;  %v544_v60 = vmul.f32 0.03125, %v177_v52 }
 0x11d   :  { %v174_v54 = vpop.xlane.xlu0 %173 }
 0x11e   :  { %v217_v55 = vadd.f32 1e-05, %v213_v53  ;;  %v540_v56 = vmul.f32 0.03125, %v174_v54  ;;  %v207_v2 = vmul.f32 %v544_v60, %v544_v60  ;;  %v163_v53 = vld [vmem:[%s613_s2 + $0x18] sm:$0xff] }
 0x11f   :  { %v194_v57 = vpop.xlane.xlu2 %193 }
 0x120   :  { %420 = vrsqrt.f32 %v217_v55  ;;  %v206_v58 = vmul.f32 %v540_v56, %v540_v56  ;;  %v202_v59 = vmul.f32 0.03125, %v194_v57  ;;  %vm227_vm3 = vweird.f32 %v217_v55 }
 0x122   :  { %v210_v61 = vsub.f32 %v202_v59, %v206_v58  ;;  %v165_v58 = vld [vmem:[%s614_s3 + $0x8] sm:$0xff] }
 0x123   :  { %v180_v62 = vpop.xlane.xlu1 %179 }
 0x124   :  { %v214_v63 = vmax.f32 %v210_v61, 0.0  ;;  %v548_v6 = vmul.f32 0.03125, %v180_v62 }
 0x125   :  { %v197_v0 = vpop.xlane.xlu0 %196 }
 0x126   :  { %v421_v1 = vpop.eup %420  ;;  %v218_v3 = vadd.f32 1e-05, %v214_v63  ;;  %v203_v4 = vmul.f32 0.03125, %v197_v0  ;;  %v208_v12 = vmul.f32 %v548_v6, %v548_v6  ;;  %v166_v63 = vld [vmem:[%s614_s3 + $0x10] sm:$0xff] }
 0x127   :  { %v222_v5 = vmul.f32 %v421_v1, %v217_v55  ;;  %vm228_vm2 = vweird.f32 %v421_v1 }
 0x128   :  { %422 = vrsqrt.f32 %v218_v3  ;;  %v211_v7 = vsub.f32 %v203_v4, %v207_v2  ;;  %vm229_vm4 = vmor %vm227_vm3, %vm228_vm2  ;;  %vm237_vm6 = vweird.f32 %v218_v3 }
 0x129   :  { %v223_v8 = vmul.f32 %v421_v1, %v222_v5 }
 0x12a   :  { %v215_v9 = vmax.f32 %v211_v7, 0.0 }
 0x12b   :  { %v224_v10 = vmul.f32 0.5, %v223_v8  ;;  %v200_v11 = vpop.xlane.xlu1 %199 }
 0x12c   :  { %v219_v13 = vadd.f32 1e-05, %v215_v9  ;;  %v204_v14 = vmul.f32 0.03125, %v200_v11 }
 0x12d   :  { %v225_v15 = vsub.f32 1.5, %v224_v10 }
 0x12e   :  { %v423_v16 = vpop.eup %422  ;;  %424 = vrsqrt.f32 %v219_v13  ;;  %v212_v17 = vsub.f32 %v204_v14, %v208_v12  ;;  %vm247_vm9 = vweird.f32 %v219_v13  ;;  %v327_v14 = vld [vmem:[%s615_s4 + $0x10] sm:$0xff] }
 0x12f   :  { %v232_v18 = vmul.f32 %v423_v16, %v218_v3  ;;  %v226_v20 = vmul.f32 %v421_v1, %v225_v15  ;;  %vm238_vm5 = vweird.f32 %v423_v16 }
 0x130   :  { %v216_v21 = vmax.f32 %v212_v17, 0.0  ;;  %vm239_vm7 = vmor %vm237_vm6, %vm238_vm5 }
 0x131   :  { %v233_v22 = vmul.f32 %v423_v16, %v232_v18  ;;  %v230_v23 = vsel %vm229_vm4, %v421_v1, %v226_v20 }
 0x132   :  { %v220_v25 = vadd.f32 1e-05, %v216_v21  ;;  %v261_v26 = vmul.f32 %v230_v23, %v160_v19 }
 0x133   :  { %v234_v27 = vmul.f32 0.5, %v233_v22 }
 0x134   :  { %v425_v28 = vpop.eup %424  ;;  %426 = vrsqrt.f32 %v220_v25  ;;  %267 = vperm.xlu2 %417, %v261_v26   ;;  %v289_v33 = vmul.f32 %v261_v26, %v181_v47  ;;  %v162_v47 = vld [vmem:[%s613_s2 + $0x10] sm:$0xff]  ;;  %vm257_vm12 = vweird.f32 %v220_v25 }
 0x135   :  { %v235_v29 = vsub.f32 1.5, %v234_v27  ;;  %v242_v31 = vmul.f32 %v425_v28, %v219_v13  ;;  %vm248_vm8 = vweird.f32 %v425_v28 }
 0x136   :  { %v293_v42 = vsub.f32 %v164_v35, %v289_v33  ;;  %vm249_vm10 = vmor %vm247_vm9, %vm248_vm8 }
 0x137   :  { %v243_v34 = vmul.f32 %v425_v28, %v242_v31  ;;  %v236_v37 = vmul.f32 %v423_v16, %v235_v29 }
 0x139   :  { %v244_v38 = vmul.f32 0.5, %v243_v34  ;;  %v240_v40 = vsel %vm239_vm7, %v423_v16, %v236_v37 }
 0x13a   :  { %v427_v41 = vpop.eup %426  ;;  %v262_v43 = vmul.f32 %v240_v40, %v161_v36 }
 0x13b   :  { %v245_v44 = vsub.f32 1.5, %v244_v38  ;;  %v252_v45 = vmul.f32 %v427_v41, %v220_v25  ;;  %vm258_vm11 = vweird.f32 %v427_v41  ;;  %v328_v25 = vld [vmem:[%s615_s4 + $0x18] sm:$0xff] }
 0x13c   :  { %299 = vperm.xlu2 %417, %v293_v42   ;;  %272 = vperm.xlu0 %418, %v262_v43   ;;  %vm259_vm13 = vmor %vm257_vm12, %vm258_vm11  ;;  %v290_v55 = vmul.f32 %v262_v43, %v540_v56  ;;  %v167_v56 = vld [vmem:[%s614_s3 + $0x18] sm:$0xff] }
 0x13d   :  { %v253_v46 = vmul.f32 %v427_v41, %v252_v45  ;;  %v246_v48 = vmul.f32 %v425_v28, %v245_v44 }
 0x13e   :  { %v294_v61 = vsub.f32 %v165_v58, %v290_v55 }
 0x13f   :  { %v254_v49 = vmul.f32 0.5, %v253_v46  ;;  %v250_v50 = vsel %vm249_vm10, %v425_v28, %v246_v48 }
 0x140   :  { %v263_v51 = vmul.f32 %v250_v50, %v162_v47 }
 0x141   :  { %v255_v52 = vsub.f32 1.5, %v254_v49 }
 0x142   :  { %277 = vperm.xlu1 %419, %v263_v51   ;;  %v291_v62 = vmul.f32 %v263_v51, %v544_v60  ;;  %v325_v60 = vld [vmem:[%s615_s4] sm:$0xff] }
 0x143   :  { %v256_v54 = vmul.f32 %v427_v41, %v255_v52 }
 0x144   :  { %v295_v1 = vsub.f32 %v166_v63, %v291_v62 }
 0x145   :  { %v260_v57 = vsel %vm259_vm13, %v427_v41, %v256_v54 }
 0x146   :  { %v264_v59 = vmul.f32 %v260_v57, %v163_v53 }
 0x148   :  { %282 = vperm.xlu2 %417, %v264_v59   ;;  %v292_v0 = vmul.f32 %v264_v59, %v548_v6 }
 0x14a   :  { %304 = vperm.xlu1 %419, %v294_v61   ;;  %v296_v2 = vsub.f32 %v167_v56, %v292_v0 }
 0x150   :  { %309 = vperm.xlu2 %417, %v295_v1  }
 0x152   :  { %314 = vperm.xlu1 %419, %v296_v2  }
 0x18e   :  { %v268_v3 = vpop.permute.xlu2 %267 }
 0x18f   :  { %v285_v4 = vmul.f32 %v268_v3, %v512_v24 }
 0x196   :  { %v300_v5 = vpop.permute.xlu2 %299 }
 0x197   :  { %v317_v7 = vadd.f32 %v300_v5, %v285_v4 }
 0x199   :  { %v321_v8 = vmax.f32 %v317_v7, 0.0 }
 0x19b   :  { %v329_v9 = vadd.f32 %v325_v60, %v321_v8 }
 0x19d   :  { %333 = vst.msk [vmem:[%s616_s5] sm:$0xff] %vm168_vm1, %v329_v9 }
 0x1a2   :  { %v283_v6 = vpop.permute.xlu2 %282 }
 0x1a3   :  { %v288_v22 = vmul.f32 %v283_v6, %v530_v39 }
 0x1aa   :  { %v310_v12 = vpop.permute.xlu2 %309 }
 0x1ae   :  { %v273_v24 = vpop.permute.xlu0 %272 }
 0x1af   :  { %v286_v16 = vmul.f32 %v273_v24, %v521_v32 }
 0x1b4   :  { %v278_v10 = vpop.permute.xlu1 %277 }
 0x1b5   :  { %v287_v11 = vmul.f32 %v278_v10, %v519_v30  ;;  %v326_v30 = vld [vmem:[%s615_s4 + $0x8] sm:$0xff] }
 0x1b7   :  { %v319_v13 = vadd.f32 %v310_v12, %v287_v11 }
 0x1b9   :  { %v323_v15 = vmax.f32 %v319_v13, 0.0 }
 0x1bb   :  { %v331_v17 = vadd.f32 %v327_v14, %v323_v15 }
 0x1bc   :  { %v305_v18 = vpop.permute.xlu1 %304 }
 0x1bd   :  { %335 = vst.msk [vmem:[%s616_s5 + $0x10] sm:$0xff] %vm168_vm1, %v331_v17  ;;  %v318_v19 = vadd.f32 %v305_v18, %v286_v16 }
 0x1bf   :  { %v322_v20 = vmax.f32 %v318_v19, 0.0 }
 0x1c1   :  { %v330_v21 = vadd.f32 %v326_v30, %v322_v20 }
 0x1c3   :  { %334 = vst.msk [vmem:[%s616_s5 + $0x8] sm:$0xff] %vm168_vm1, %v330_v21 }
 0x1c4   :  { %v315_v32 = vpop.permute.xlu1 %314 }
 0x1c5   :  { %v320_v23 = vadd.f32 %v315_v32, %v288_v22 }
 0x1c7   :  { %v324_v26 = vmax.f32 %v320_v23, 0.0 }
 0x1c9   :  { %v332_v27 = vadd.f32 %v328_v25, %v324_v26 }
 0x1cb   :  { %336 = vst.msk [vmem:[%s616_s5 + $0x18] sm:$0xff] %vm168_vm1, %v332_v27 }

// kernel: _lambda_.17
= control target key start
LH: loop header
LB: loop body
LE: loop exit
PB: predicated region body
PF: predicated region fallthrough
CT: control target
= control target key end

     0   :  { %vm458_vm0 = vcmask 130048   ;;  %vm212_vm1 = vcmask 261120   ;;  %s1143_s0 = inlined_call_operand.vmem [shape: bf16[288,32], index: 0, kind: input, shape index: {}]   ;;  %s1144_s4 = inlined_call_operand.vmem [shape: bf16[16,32], index: 4, kind: input, shape index: {}]   ;;  %s1145_s5 = inlined_call_operand.vmem [shape: bf16[32,16], index: 5, kind: input, shape index: {}]   ;;  %s1146_s1 = inlined_call_operand.vmem [shape: bf16[32,288], index: 1, kind: input, shape index: {}]   ;;  %s1147_s6 = inlined_call_operand.vmem [shape: f32[32,1], index: 6, kind: input, shape index: {}, may-alias: {2,6}]   ;;  %s1148_s7 = inlined_call_operand.vmem [shape: f32[32,1], index: 7, kind: input, shape index: {}, may-alias: {3,7}]   ;;  %s1149_s2 = inlined_call_operand.vmem [shape: f32[32,1], index: 2, kind: input, shape index: {}, may-alias: {2,6}]   ;;  %s1150_s3 = inlined_call_operand.vmem [shape: f32[32,1], index: 3, kind: input, shape index: {}, may-alias: {3,7}]   ;;  %s1151_s8 = inlined_call_operand.vmem [shape: f32[32,32], index: 8, kind: output, shape index: {}]  }
   0x1   :  { %v785_v0 = vld [vmem:[%s1143_s0 + $0x38] sm:$0xff]  ;;  %v798_v2 = vld [vmem:[%s1144_s4] sm:$0xff]  ;;  %v784_v4 = vld [vmem:[%s1143_s0 + $0x30] sm:$0xff] }
   0x2   :  { %v793_v1 = vld [vmem:[%s1143_s0 + $0x78] sm:$0xff]  ;;  %219 = vmatpush.bf16.msra.mxu0 %v785_v0  ;;  %v796_v3 = vld [vmem:[%s1145_s5] sm:$0xff]  ;;  %472 = vmatpush.bf16.msra.mxu3 %v798_v2  ;;  %v792_v5 = vld [vmem:[%s1143_s0 + $0x70] sm:$0xff] }
   0x3   :  { %238 = vmatpush.bf16.msra.mxu1 %v793_v1  ;;  %v795_v6 = vld [vmem:[%s1143_s0 + $0x88] sm:$0xff]  ;;  %v794_v7 = vld [vmem:[%s1143_s0 + $0x80] sm:$0xff]  ;;  %v774_v9 = vld [vmem:[%s1146_s1 + $0x10] sm:$0xf0] }
   0x4   :  { %263 = vmatpush.bf16.msra.mxu2 %v795_v6  ;;  %v670_v8 = vld [vmem:[%s1146_s1 + $0x8] sm:$0xf]  ;;  %v782_v13 = vld [vmem:[%s1143_s0 + $0x20] sm:$0xff]  ;;  %v781_v15 = vld [vmem:[%s1143_s0 + $0x18] sm:$0xff] }
   0x5   :  { %770 = vmatmul.msk.bf16.vlgmr.msra.gmra.mxu3 %vm458_vm0, %v796_v3  ;;  %v783_v10 = vld [vmem:[%s1143_s0 + $0x28] sm:$0xff]  ;;  %v671_v12 = vor.u32 %v774_v9, %v670_v8  ;;  %v790_v14 = vld [vmem:[%s1143_s0 + $0x60] sm:$0xff]  ;;  %v789_v16 = vld [vmem:[%s1143_s0 + $0x58] sm:$0xff] }
   0x6   :  { %220 = vmatpush.bf16.msra.mxu0 %v784_v4  ;;  %v791_v11 = vld [vmem:[%s1143_s0 + $0x68] sm:$0xff]  ;;  %v780_v18 = vld [vmem:[%s1143_s0 + $0x10] sm:$0xff]  ;;  %v682_v20 = vld [vmem:[%s1146_s1 + $0x20] sm:$0xf] }
   0x7   :  { %239 = vmatpush.bf16.msra.mxu1 %v792_v5  ;;  %v797_v17 = vld [vmem:[%s1145_s5 + $0x8] sm:$0xff]  ;;  %v788_v19 = vld [vmem:[%s1143_s0 + $0x50] sm:$0xff]  ;;  %v778_v25 = vld [vmem:[%s1143_s0] sm:$0xff] }
   0x8   :  { %264 = vmatpush.bf16.msra.mxu2 %v794_v7  ;;  %v777_v21 = vld [vmem:[%s1146_s1 + $0x28] sm:$0xf0]  ;;  %v662_v26 = vld [vmem:[%s1146_s1] sm:$0xf]  ;;  %v772_v29 = vld [vmem:[%s1146_s1 + $0x4] sm:$0xf] }
   0x9   :  { %v779_v22 = vld [vmem:[%s1143_s0 + $0x8] sm:$0xff]  ;;  %v683_v24 = vor.u32 %v777_v21, %v682_v20  ;;  %v786_v28 = vld [vmem:[%s1143_s0 + $0x40] sm:$0xff]  ;;  %v664_v30 = vld [vmem:[%s1146_s1 + $0xc] sm:$0xf0] }
   0xa   :  { %221 = vmatpush.bf16.msra.mxu0 %v783_v10  ;;  %v787_v23 = vld [vmem:[%s1143_s0 + $0x48] sm:$0xff]  ;;  %v667_v32 = vor.u32 %v772_v29, %v664_v30  ;;  %v674_v33 = vld [vmem:[%s1146_s1 + $0x18] sm:$0xf]  ;;  %v776_v34 = vld [vmem:[%s1146_s1 + $0x20] sm:$0xf0] }
   0xb   :  { %240 = vmatpush.bf16.msra.mxu1 %v791_v11  ;;  %756 = vmatmul.msk.bf16.vlgmr.msra.gmra.mxu2 %vm212_vm1, %v671_v12  ;;  %v773_v27 = vld [vmem:[%s1146_s1 + $0x8] sm:$0xf0]  ;;  %v775_v35 = vld [vmem:[%s1146_s1 + $0x1c] sm:$0xf]  ;;  %v676_v36 = vld [vmem:[%s1146_s1 + $0x24] sm:$0xf0]  ;;  %v675_v37 = vor.u32 %v776_v34, %v674_v33 }
   0xc   :  { %v663_v31 = vor.u32 %v773_v27, %v662_v26  ;;  %v679_v38 = vor.u32 %v775_v35, %v676_v36 }
   0xe   :  { %222 = vmatpush.bf16.msra.mxu0 %v782_v13 }
   0xf   :  { %241 = vmatpush.bf16.msra.mxu1 %v790_v14 }
  0x12   :  { %223 = vmatpush.bf16.msra.mxu0 %v781_v15 }
  0x13   :  { %242 = vmatpush.bf16.msra.mxu1 %v789_v16 }
  0x15   :  { %771 = vmatmul.msk.bf16.gmra.mxu3 %vm458_vm0, %v797_v17 }
  0x16   :  { %224 = vmatpush.bf16.msra.mxu0 %v780_v18 }
  0x17   :  { %243 = vmatpush.bf16.msra.mxu1 %v788_v19 }
  0x1a   :  { %225 = vmatpush.bf16.msra.mxu0 %v779_v22 }
  0x1b   :  { %244 = vmatpush.bf16.msra.mxu1 %v787_v23  ;;  %757 = vmatmul.msk.bf16.gmra.mxu2 %vm212_vm1, %v683_v24  ;;  %v819_v23 = vmov 0  }
  0x1c   :  { %800 = vset.pattern.permute.xlu1 %v819_v23  ;;  %801 = vset.pattern.permute.xlu0 %v819_v23 }
  0x1d   :  { %802 = vset.pattern.permute.xlu2 %v819_v23  ;;  %v485_v23 = vld [vmem:[%s1147_s6 + $0x8] sm:$0xff] }
  0x1e   :  { %226 = vmatpush.bf16.msra.mxu0 %v778_v25 }
  0x1f   :  { %245 = vmatpush.bf16.msra.mxu1 %v786_v28 }
  0x21   :  { %227 = vmatmul.bf16.vlgmr.msra.gmra.mxu0 %v663_v31 }
  0x22   :  { %246 = vmatmul.bf16.vlgmr.msra.gmra.mxu1 %v667_v32 }
  0x31   :  { %232 = vmatmul.bf16.gmra.mxu0 %v675_v37 }
  0x32   :  { %251 = vmatmul.bf16.gmra.mxu1 %v679_v38 }
  0x88   :  { %v968_v39 = vpop.f32.mrf.mxu3 }
  0x89   :  { %v492_v40 = vsel %vm212_vm1, %v968_v39, 0.0  ;;  %v508_v41 = vmul.f32 %v968_v39, %v968_v39 }
  0x8a   :  { %493 = vadd.xlane.f32.xlu2 %v492_v40 }
  0x8b   :  { %v512_v42 = vsel %vm212_vm1, %v508_v41, 0.0 }
  0x8c   :  { %513 = vadd.xlane.f32.xlu1 %v512_v42 }
  0x8e   :  { %v266_v50 = vpop.f32.mrf.mxu2 }
  0x90   :  { %v975_v43 = vpop.f32.mrf.mxu3 }
  0x91   :  { %v509_v44 = vmul.f32 %v975_v43, %v975_v43  ;;  %v495_v46 = vsel %vm212_vm1, %v975_v43, 0.0 }
  0x93   :  { %v515_v45 = vsel %vm212_vm1, %v509_v44, 0.0 }
  0x94   :  { %516 = vadd.xlane.f32.xlu2 %v515_v45  ;;  %496 = vadd.xlane.f32.xlu1 %v495_v46 }
  0x96   :  { %v268_v59 = vpop.f32.mrf.mxu2 }
  0x98   :  { %v982_v47 = vpop.f32.mrf.mxu3 }
  0x99   :  { %v498_v48 = vsel %vm212_vm1, %v982_v47, 0.0  ;;  %v510_v49 = vmul.f32 %v982_v47, %v982_v47 }
  0x9a   :  { %499 = vadd.xlane.f32.xlu0 %v498_v48 }
  0x9b   :  { %v518_v51 = vsel %vm212_vm1, %v510_v49, 0.0 }
  0x9c   :  { %519 = vadd.xlane.f32.xlu1 %v518_v51 }
  0x9e   :  { %v228_v52 = vpop.f32.mrf.mxu0  ;;  %v271_v5 = vpop.f32.mrf.mxu2 }
  0x9f   :  { %v247_v53 = vpop.f32.mrf.mxu1 }
  0xa0   :  { %v248_v54 = vadd.f32 %v247_v53, %v228_v52  ;;  %v989_v55 = vpop.f32.mrf.mxu3 }
  0xa1   :  { %v501_v57 = vsel %vm212_vm1, %v989_v55, 0.0  ;;  %v511_v60 = vmul.f32 %v989_v55, %v989_v55 }
  0xa2   :  { %v991_v56 = vadd.f32 %v266_v50, %v248_v54  ;;  %502 = vadd.xlane.f32.xlu2 %v501_v57 }
  0xa3   :  { %v521_v1 = vsel %vm212_vm1, %v511_v60, 0.0  ;;  %v484_v60 = vld [vmem:[%s1147_s6] sm:$0xff] }
  0xa4   :  { %v284_v58 = vsel %vm212_vm1, %v991_v56, 0.0  ;;  %v300_v4 = vmul.f32 %v991_v56, %v991_v56 }
  0xa5   :  { %285 = vadd.xlane.f32.xlu0 %v284_v58 }
  0xa6   :  { %v230_v61 = vpop.f32.mrf.mxu0  ;;  %v304_v9 = vsel %vm212_vm1, %v300_v4, 0.0  ;;  %v273_v17 = vpop.f32.mrf.mxu2 }
  0xa7   :  { %v249_v62 = vpop.f32.mrf.mxu1 }
  0xa8   :  { %v250_v63 = vadd.f32 %v249_v62, %v230_v61 }
  0xaa   :  { %v999_v0 = vadd.f32 %v268_v59, %v250_v63  ;;  %522 = vadd.xlane.f32.xlu2 %v521_v1 }
  0xac   :  { %v287_v2 = vsel %vm212_vm1, %v999_v0, 0.0  ;;  %v301_v14 = vmul.f32 %v999_v0, %v999_v0 }
  0xad   :  { %288 = vadd.xlane.f32.xlu0 %v287_v2 }
  0xae   :  { %v233_v3 = vpop.f32.mrf.mxu0  ;;  %v307_v19 = vsel %vm212_vm1, %v301_v14, 0.0 }
  0xaf   :  { %v252_v6 = vpop.f32.mrf.mxu1 }
  0xb0   :  { %v253_v7 = vadd.f32 %v252_v6, %v233_v3 }
  0xb2   :  { %v1006_v8 = vadd.f32 %v271_v5, %v253_v7  ;;  %305 = vadd.xlane.f32.xlu2 %v304_v9  ;;  %v488_v5 = vld [vmem:[%s1148_s7] sm:$0xff] }
  0xb4   :  { %v290_v10 = vsel %vm212_vm1, %v1006_v8, 0.0  ;;  %v302_v11 = vmul.f32 %v1006_v8, %v1006_v8 }
  0xb5   :  { %291 = vadd.xlane.f32.xlu1 %v290_v10 }
  0xb6   :  { %v310_v12 = vsel %vm212_vm1, %v302_v11, 0.0  ;;  %v235_v13 = vpop.f32.mrf.mxu0 }
  0xb7   :  { %v254_v15 = vpop.f32.mrf.mxu1  ;;  %311 = vadd.xlane.f32.xlu0 %v310_v12 }
  0xb8   :  { %v255_v16 = vadd.f32 %v254_v15, %v235_v13 }
  0xba   :  { %v1016_v18 = vadd.f32 %v273_v17, %v255_v16  ;;  %308 = vadd.xlane.f32.xlu2 %v307_v19 }
  0xbc   :  { %v293_v20 = vsel %vm212_vm1, %v1016_v18, 0.0  ;;  %v303_v21 = vmul.f32 %v1016_v18, %v1016_v18 }
  0xbd   :  { %294 = vadd.xlane.f32.xlu1 %v293_v20 }
  0xbe   :  { %v313_v22 = vsel %vm212_vm1, %v303_v21, 0.0 }
  0xc5   :  { %314 = vadd.xlane.f32.xlu1 %v313_v22 }
  0xfd   :  { %v494_v24 = vpop.xlane.xlu2 %493 }
  0xfe   :  { %v504_v25 = vmul.f32 0.03125, %v494_v24 }
  0xff   :  { %v514_v26 = vpop.xlane.xlu1 %513 }
 0x100   :  { %v528_v27 = vmul.f32 %v504_v25, %v504_v25  ;;  %v524_v28 = vmul.f32 0.03125, %v514_v26 }
 0x102   :  { %v532_v29 = vsub.f32 %v524_v28, %v528_v27 }
 0x104   :  { %v536_v30 = vmax.f32 %v532_v29, 0.0 }
 0x106   :  { %v540_v31 = vadd.f32 1e-05, %v536_v30 }
 0x107   :  { %v517_v32 = vpop.xlane.xlu2 %516  ;;  %v497_v33 = vpop.xlane.xlu1 %496 }
 0x108   :  { %803 = vrsqrt.f32 %v540_v31  ;;  %v1024_v34 = vmul.f32 0.03125, %v497_v33  ;;  %v525_v35 = vmul.f32 0.03125, %v517_v32  ;;  %vm550_vm3 = vweird.f32 %v540_v31  ;;  %v486_v33 = vld [vmem:[%s1147_s6 + $0x10] sm:$0xff] }
 0x10a   :  { %v529_v36 = vmul.f32 %v1024_v34, %v1024_v34 }
 0x10c   :  { %v533_v37 = vsub.f32 %v525_v35, %v529_v36 }
 0x10d   :  { %v500_v38 = vpop.xlane.xlu0 %499 }
 0x10e   :  { %v804_v40 = vpop.eup %803  ;;  %v537_v41 = vmax.f32 %v533_v37, 0.0  ;;  %v1028_v42 = vmul.f32 0.03125, %v500_v38 }
 0x10f   :  { %v545_v44 = vmul.f32 %v804_v40, %v540_v31  ;;  %v520_v45 = vpop.xlane.xlu1 %519  ;;  %vm551_vm2 = vweird.f32 %v804_v40 }
 0x110   :  { %v541_v46 = vadd.f32 1e-05, %v537_v41  ;;  %v530_v48 = vmul.f32 %v1028_v42, %v1028_v42  ;;  %v526_v49 = vmul.f32 0.03125, %v520_v45  ;;  %vm552_vm4 = vmor %vm550_vm3, %vm551_vm2 }
 0x111   :  { %v546_v50 = vmul.f32 %v804_v40, %v545_v44 }
 0x112   :  { %805 = vrsqrt.f32 %v541_v46  ;;  %v534_v51 = vsub.f32 %v526_v49, %v530_v48  ;;  %vm560_vm6 = vweird.f32 %v541_v46 }
 0x113   :  { %v547_v52 = vmul.f32 0.5, %v546_v50 }
 0x114   :  { %v538_v53 = vmax.f32 %v534_v51, 0.0 }
 0x115   :  { %v548_v54 = vsub.f32 1.5, %v547_v52  ;;  %v503_v57 = vpop.xlane.xlu2 %502 }
 0x116   :  { %v542_v58 = vadd.f32 1e-05, %v538_v53  ;;  %v1035_v2 = vmul.f32 0.03125, %v503_v57 }
 0x117   :  { %v549_v61 = vmul.f32 %v804_v40, %v548_v54 }
 0x118   :  { %v286_v59 = vpop.xlane.xlu0 %285  ;;  %v806_v62 = vpop.eup %805  ;;  %807 = vrsqrt.f32 %v542_v58  ;;  %v531_v11 = vmul.f32 %v1035_v2, %v1035_v2  ;;  %vm570_vm9 = vweird.f32 %v542_v58 }
 0x119   :  { %v555_v63 = vmul.f32 %v806_v62, %v541_v46  ;;  %v553_v1 = vsel %vm552_vm4, %v804_v40, %v549_v61  ;;  %vm561_vm5 = vweird.f32 %v806_v62  ;;  %v1042_v21 = vmul.f32 0.03125, %v286_v59 }
 0x11a   :  { %v584_v3 = vmul.f32 %v553_v1, %v484_v60  ;;  %vm562_vm7 = vmor %vm560_vm6, %vm561_vm5 }
 0x11b   :  { %v556_v4 = vmul.f32 %v806_v62, %v555_v63  ;;  %v320_v30 = vmul.f32 %v1042_v21, %v1042_v21 }
 0x11c   :  { %590 = vperm.xlu1 %800, %v584_v3   ;;  %v612_v6 = vmul.f32 %v584_v3, %v504_v25 }
 0x11d   :  { %v557_v7 = vmul.f32 0.5, %v556_v4  ;;  %v523_v9 = vpop.xlane.xlu2 %522 }
 0x11e   :  { %v808_v10 = vpop.eup %807  ;;  %v527_v12 = vmul.f32 0.03125, %v523_v9  ;;  %v616_v13 = vsub.f32 %v488_v5, %v612_v6  ;;  %v487_v9 = vld [vmem:[%s1147_s6 + $0x18] sm:$0xff] }
 0x11f   :  { %v558_v14 = vsub.f32 1.5, %v557_v7  ;;  %v565_v15 = vmul.f32 %v808_v10, %v542_v58  ;;  %vm571_vm8 = vweird.f32 %v808_v10 }
 0x120   :  { %v535_v16 = vsub.f32 %v527_v12, %v531_v11  ;;  %622 = vperm.xlu0 %801, %v616_v13   ;;  %v289_v20 = vpop.xlane.xlu0 %288  ;;  %vm572_vm10 = vmor %vm570_vm9, %vm571_vm8 }
 0x121   :  { %v559_v17 = vmul.f32 %v806_v62, %v558_v14  ;;  %v566_v19 = vmul.f32 %v808_v10, %v565_v15  ;;  %v1057_v38 = vmul.f32 0.03125, %v289_v20 }
 0x122   :  { %v539_v22 = vmax.f32 %v535_v16, 0.0 }
 0x123   :  { %v563_v24 = vsel %vm562_vm7, %v806_v62, %v559_v17  ;;  %v567_v25 = vmul.f32 0.5, %v566_v19  ;;  %v321_v54 = vmul.f32 %v1057_v38, %v1057_v38 }
 0x124   :  { %v543_v26 = vadd.f32 1e-05, %v539_v22  ;;  %v1047_v29 = vmul.f32 %v563_v24, %v485_v23 }
 0x125   :  { %v568_v27 = vsub.f32 1.5, %v567_v25  ;;  %v306_v28 = vpop.xlane.xlu2 %305 }
 0x126   :  { %809 = vrsqrt.f32 %v543_v26  ;;  %v316_v31 = vmul.f32 0.03125, %v306_v28  ;;  %vm580_vm12 = vweird.f32 %v543_v26 }
 0x127   :  { %v569_v35 = vmul.f32 %v808_v10, %v568_v27 }
 0x128   :  { %v292_v32 = vpop.xlane.xlu1 %291  ;;  %v324_v36 = vsub.f32 %v316_v31, %v320_v30  ;;  %595 = vperm.xlu0 %801, %v1047_v29   ;;  %v276_v30 = vld [vmem:[%s1149_s2] sm:$0xff] }
 0x129   :  { %v1054_v37 = vmul.f32 0.03125, %v292_v32  ;;  %v573_v41 = vsel %vm572_vm10, %v808_v10, %v569_v35 }
 0x12a   :  { %v312_v40 = vpop.xlane.xlu0 %311  ;;  %v328_v44 = vmax.f32 %v324_v36, 0.0  ;;  %v1061_v48 = vmul.f32 %v573_v41, %v486_v33 }
 0x12b   :  { %v322_v45 = vmul.f32 %v1054_v37, %v1054_v37  ;;  %v318_v46 = vmul.f32 0.03125, %v312_v40 }
 0x12c   :  { %v810_v49 = vpop.eup %809  ;;  %v332_v50 = vadd.f32 1e-05, %v328_v44  ;;  %600 = vperm.xlu2 %802, %v1061_v48  }
 0x12d   :  { %v326_v51 = vsub.f32 %v318_v46, %v322_v45  ;;  %v575_v52 = vmul.f32 %v810_v49, %v543_v26  ;;  %v309_v53 = vpop.xlane.xlu2 %308  ;;  %vm581_vm11 = vweird.f32 %v810_v49  ;;  %v280_v45 = vld [vmem:[%s1150_s3] sm:$0xff]  ;;  %v278_v46 = vld [vmem:[%s1149_s2 + $0x10] sm:$0xff] }
 0x12e   :  { %811 = vrsqrt.f32 %v332_v50  ;;  %v317_v58 = vmul.f32 0.03125, %v309_v53  ;;  %vm582_vm13 = vmor %vm580_vm12, %vm581_vm11  ;;  %vm342_vm15 = vweird.f32 %v332_v50 }
 0x12f   :  { %v330_v57 = vmax.f32 %v326_v51, 0.0  ;;  %v576_v59 = vmul.f32 %v810_v49, %v575_v52 }
 0x130   :  { %v295_v60 = vpop.xlane.xlu1 %294  ;;  %v325_v62 = vsub.f32 %v317_v58, %v321_v54  ;;  %v282_v54 = vld [vmem:[%s1150_s3 + $0x10] sm:$0xff] }
 0x131   :  { %v334_v61 = vadd.f32 1e-05, %v330_v57  ;;  %v577_v63 = vmul.f32 0.5, %v576_v59  ;;  %v1066_v6 = vmul.f32 0.03125, %v295_v60  ;;  %v277_v57 = vld [vmem:[%s1149_s2 + $0x8] sm:$0xff] }
 0x132   :  { %v329_v1 = vmax.f32 %v325_v62, 0.0 }
 0x133   :  { %813 = vrsqrt.f32 %v334_v61  ;;  %v578_v3 = vsub.f32 1.5, %v577_v63  ;;  %v323_v15 = vmul.f32 %v1066_v6, %v1066_v6  ;;  %vm362_vm3 = vweird.f32 %v334_v61 }
 0x134   :  { %v812_v4 = vpop.eup %811  ;;  %v333_v5 = vadd.f32 1e-05, %v329_v1 }
 0x135   :  { %v337_v7 = vmul.f32 %v812_v4, %v332_v50  ;;  %v579_v10 = vmul.f32 %v810_v49, %v578_v3  ;;  %vm343_vm14 = vweird.f32 %v812_v4  ;;  %v281_v3 = vld [vmem:[%s1150_s3 + $0x8] sm:$0xff] }
 0x136   :  { %815 = vrsqrt.f32 %v333_v5  ;;  %vm344_vm0 = vmor %vm342_vm15, %vm343_vm14  ;;  %vm352_vm6 = vweird.f32 %v333_v5 }
 0x137   :  { %v338_v11 = vmul.f32 %v812_v4, %v337_v7  ;;  %v583_v13 = vsel %vm582_vm13, %v810_v49, %v579_v10 }
 0x138   :  { %v315_v12 = vpop.xlane.xlu1 %314  ;;  %v1073_v17 = vmul.f32 %v583_v13, %v487_v9  ;;  %v283_v13 = vld [vmem:[%s1150_s3 + $0x18] sm:$0xff] }
 0x139   :  { %v814_v14 = vpop.eup %813  ;;  %v319_v16 = vmul.f32 0.03125, %v315_v12  ;;  %v339_v19 = vmul.f32 0.5, %v338_v11 }
 0x13a   :  { %v357_v20 = vmul.f32 %v814_v14, %v334_v61  ;;  %605 = vperm.xlu1 %800, %v1073_v17   ;;  %vm363_vm2 = vweird.f32 %v814_v14 }
 0x13b   :  { %v327_v22 = vsub.f32 %v319_v16, %v323_v15  ;;  %v340_v23 = vsub.f32 1.5, %v339_v19  ;;  %vm364_vm4 = vmor %vm362_vm3, %vm363_vm2  ;;  %v489_v16 = vld [vmem:[%s1148_s7 + $0x8] sm:$0xff]  ;;  %v614_v19 = vmul.f32 %v1061_v48, %v1028_v42 }
 0x13c   :  { %v358_v24 = vmul.f32 %v814_v14, %v357_v20  ;;  %v816_v25 = vpop.eup %815  ;;  %v490_v20 = vld [vmem:[%s1148_s7 + $0x10] sm:$0xff] }
 0x13d   :  { %v331_v26 = vmax.f32 %v327_v22, 0.0  ;;  %v347_v28 = vmul.f32 %v816_v25, %v333_v5  ;;  %v341_v31 = vmul.f32 %v812_v4, %v340_v23  ;;  %vm353_vm5 = vweird.f32 %v816_v25 }
 0x13e   :  { %v359_v27 = vmul.f32 0.5, %v358_v24  ;;  %vm354_vm7 = vmor %vm352_vm6, %vm353_vm5 }
 0x13f   :  { %v335_v32 = vadd.f32 1e-05, %v331_v26  ;;  %v348_v35 = vmul.f32 %v816_v25, %v347_v28  ;;  %v345_v36 = vsel %vm344_vm0, %v812_v4, %v341_v31 }
 0x140   :  { %v360_v33 = vsub.f32 1.5, %v359_v27  ;;  %v376_v40 = vmul.f32 %v345_v36, %v276_v30 }
 0x141   :  { %817 = vrsqrt.f32 %v335_v32  ;;  %v349_v44 = vmul.f32 0.5, %v348_v35  ;;  %vm372_vm9 = vweird.f32 %v335_v32 }
 0x142   :  { %v361_v41 = vmul.f32 %v814_v14, %v360_v33  ;;  %382 = vperm.xlu2 %802, %v376_v40   ;;  %v404_v49 = vmul.f32 %v376_v40, %v1042_v21 }
 0x143   :  { %v350_v50 = vsub.f32 1.5, %v349_v44 }
 0x144   :  { %v365_v51 = vsel %vm364_vm4, %v814_v14, %v361_v41  ;;  %v408_v52 = vsub.f32 %v280_v45, %v404_v49  ;;  %v613_v14 = vmul.f32 %v1047_v29, %v1024_v34  ;;  %v491_v34 = vld [vmem:[%s1148_s7 + $0x18] sm:$0xff]  ;;  %v618_v29 = vsub.f32 %v490_v20, %v614_v19 }
 0x145   :  { %v378_v53 = vmul.f32 %v365_v51, %v278_v46  ;;  %v351_v58 = vmul.f32 %v816_v25, %v350_v50 }
 0x146   :  { %414 = vperm.xlu0 %801, %v408_v52   ;;  %v617_v22 = vsub.f32 %v489_v16, %v613_v14 }
 0x147   :  { %v818_v59 = vpop.eup %817  ;;  %v406_v60 = vmul.f32 %v378_v53, %v1054_v37  ;;  %v355_v61 = vsel %vm354_vm7, %v816_v25, %v351_v58  ;;  %v279_v37 = vld [vmem:[%s1149_s2 + $0x18] sm:$0xff] }
 0x148   :  { %v367_v21 = vmul.f32 %v818_v59, %v335_v32  ;;  %v377_v63 = vmul.f32 %v355_v61, %v277_v57  ;;  %vm373_vm8 = vweird.f32 %v818_v59 }
 0x149   :  { %v410_v62 = vsub.f32 %v282_v54, %v406_v60  ;;  %vm374_vm10 = vmor %vm372_vm9, %vm373_vm8 }
 0x14a   :  { %v368_v1 = vmul.f32 %v818_v59, %v367_v21  ;;  %v405_v4 = vmul.f32 %v377_v63, %v1057_v38 }
 0x14b   :  { %424 = vperm.xlu2 %802, %v410_v62  }
 0x14c   :  { %v369_v5 = vmul.f32 0.5, %v368_v1  ;;  %v409_v7 = vsub.f32 %v281_v3, %v405_v4 }
 0x14e   :  { %v370_v9 = vsub.f32 1.5, %v369_v5  ;;  %387 = vperm.xlu0 %801, %v377_v63   ;;  %419 = vperm.xlu1 %800, %v409_v7  }
 0x150   :  { %v371_v10 = vmul.f32 %v818_v59, %v370_v9 }
 0x152   :  { %v375_v11 = vsel %vm374_vm10, %v818_v59, %v371_v10 }
 0x153   :  { %v379_v12 = vmul.f32 %v375_v11, %v279_v37 }
 0x155   :  { %397 = vperm.xlu2 %802, %v379_v12   ;;  %v407_v38 = vmul.f32 %v379_v12, %v1066_v6  ;;  %v615_v6 = vmul.f32 %v1073_v17, %v1035_v2 }
 0x156   :  { %392 = vperm.xlu1 %800, %v378_v53  }
 0x157   :  { %v411_v15 = vsub.f32 %v283_v13, %v407_v38  ;;  %v619_v23 = vsub.f32 %v491_v34, %v615_v6 }
 0x159   :  { %429 = vperm.xlu0 %801, %v411_v15  }
 0x15d   :  { %627 = vperm.xlu2 %802, %v617_v22  }
 0x15e   :  { %632 = vperm.xlu1 %800, %v618_v29  }
 0x161   :  { %637 = vperm.xlu0 %801, %v619_v23  }
 0x186   :  { %v601_v24 = vpop.permute.xlu2 %600 }
 0x187   :  { %v610_v54 = vmul.f32 %v601_v24, %v982_v47 }
 0x18e   :  { %v591_v26 = vpop.permute.xlu1 %590 }
 0x18f   :  { %v608_v30 = vmul.f32 %v591_v26, %v968_v39 }
 0x192   :  { %v623_v42 = vpop.permute.xlu0 %622 }
 0x193   :  { %v640_v32 = vadd.f32 %v623_v42, %v608_v30 }
 0x19a   :  { %v596_v27 = vpop.permute.xlu0 %595 }
 0x19b   :  { %v609_v45 = vmul.f32 %v596_v27, %v975_v43 }
 0x19c   :  { %v383_v25 = vpop.permute.xlu2 %382 }
 0x19d   :  { %v400_v2 = vmul.f32 %v383_v25, %v991_v56 }
 0x1a5   :  { %v425_v48 = vpop.permute.xlu2 %424 }
 0x1ac   :  { %v606_v17 = vpop.permute.xlu1 %605 }
 0x1ad   :  { %v611_v43 = vmul.f32 %v606_v17, %v989_v55 }
 0x1af   :  { %v398_v28 = vpop.permute.xlu2 %397 }
 0x1b7   :  { %v628_v40 = vpop.permute.xlu2 %627 }
 0x1b8   :  { %v415_v31 = vpop.permute.xlu0 %414  ;;  %v641_v46 = vadd.f32 %v628_v40, %v609_v45 }
 0x1b9   :  { %v432_v33 = vadd.f32 %v415_v31, %v400_v2 }
 0x1bb   :  { %v644_v35 = vadd.f32 %v640_v32, %v432_v33 }
 0x1bd   :  { %v648_v36 = vmax.f32 %v644_v35, 0.0 }
 0x1bf   :  { %652 = vst.msk [vmem:[%s1151_s8] sm:$0xff] %vm212_vm1, %v648_v36 }
 0x1c0   :  { %v388_v41 = vpop.permute.xlu0 %387  ;;  %v420_v44 = vpop.permute.xlu1 %419 }
 0x1c1   :  { %v401_v39 = vmul.f32 %v388_v41, %v999_v0  ;;  %v403_v0 = vmul.f32 %v398_v28, %v1016_v18 }
 0x1c3   :  { %v433_v56 = vadd.f32 %v420_v44, %v401_v39 }
 0x1c5   :  { %v645_v49 = vadd.f32 %v641_v46, %v433_v56 }
 0x1c7   :  { %v649_v50 = vmax.f32 %v645_v49, 0.0 }
 0x1c8   :  { %v393_v51 = vpop.permute.xlu1 %392 }
 0x1c9   :  { %653 = vst.msk [vmem:[%s1151_s8 + $0x8] sm:$0xff] %vm212_vm1, %v649_v50  ;;  %v402_v53 = vmul.f32 %v393_v51, %v1006_v8 }
 0x1cb   :  { %v430_v52 = vpop.permute.xlu0 %429  ;;  %v434_v58 = vadd.f32 %v425_v48, %v402_v53 }
 0x1cc   :  { %v435_v21 = vadd.f32 %v430_v52, %v403_v0 }
 0x1d0   :  { %v633_v57 = vpop.permute.xlu1 %632 }
 0x1d1   :  { %v642_v59 = vadd.f32 %v633_v57, %v610_v54 }
 0x1d3   :  { %v638_v60 = vpop.permute.xlu0 %637  ;;  %v646_v61 = vadd.f32 %v642_v59, %v434_v58 }
 0x1d4   :  { %v643_v62 = vadd.f32 %v638_v60, %v611_v43 }
 0x1d5   :  { %v650_v63 = vmax.f32 %v646_v61, 0.0 }
 0x1d6   :  { %v647_v1 = vadd.f32 %v643_v62, %v435_v21 }
 0x1d7   :  { %654 = vst.msk [vmem:[%s1151_s8 + $0x10] sm:$0xff] %vm212_vm1, %v650_v63 }
 0x1d8   :  { %v651_v8 = vmax.f32 %v647_v1, 0.0 }
 0x1da   :  { %655 = vst.msk [vmem:[%s1151_s8 + $0x18] sm:$0xff] %vm212_vm1, %v651_v8 }

// kernel: _lambda_.18
= control target key start
LH: loop header
LB: loop body
LE: loop exit
PB: predicated region body
PF: predicated region fallthrough
CT: control target
= control target key end

     0   :  { %vm241_vm0 = vcmask 261120   ;;  %vm357_vm1 = vcmask 64512   ;;  %s1264_s0 = inlined_call_operand.vmem [shape: bf16[288,8], index: 0, kind: input, shape index: {}]   ;;  %s1265_s1 = inlined_call_operand.vmem [shape: bf16[64,288], index: 1, kind: input, shape index: {}]   ;;  %s1266_s2 = inlined_call_operand.vmem [shape: f32[64,1], index: 2, kind: input, shape index: {}]   ;;  %s1267_s3 = inlined_call_operand.vmem [shape: f32[64,1], index: 3, kind: input, shape index: {}]   ;;  %s1268_s4 = inlined_call_operand.vmem [shape: f32[64,8], index: 4, kind: input, shape index: {}]   ;;  %s1269_s5 = inlined_call_operand.vmem [shape: f32[64,8], index: 5, kind: output, shape index: {}]  }
   0x1   :  { %v841_v0 = vld [vmem:[%s1264_s0 + $0x38] sm:$0xff]  ;;  %v851_v2 = vld [vmem:[%s1264_s0 + $0x88] sm:$0xff]  ;;  %v840_v3 = vld [vmem:[%s1264_s0 + $0x30] sm:$0xff] }
   0x2   :  { %v849_v1 = vld [vmem:[%s1264_s0 + $0x78] sm:$0xff]  ;;  %254 = vmatpush.bf16.msra.mxu0 %v841_v0  ;;  %852 = vmatpush.bf16.msra.mxu3 %v841_v0  ;;  %v848_v4 = vld [vmem:[%s1264_s0 + $0x70] sm:$0xff]  ;;  %v850_v5 = vld [vmem:[%s1264_s0 + $0x80] sm:$0xff] }
   0x3   :  { %860 = vmatpush.bf16.msra.mxu1 %v849_v1  ;;  %318 = vmatpush.bf16.msra.mxu2 %v851_v2  ;;  %v708_v6 = vld [vmem:[%s1265_s1 + $0x8] sm:$0xf]  ;;  %v824_v7 = vld [vmem:[%s1265_s1 + $0x10] sm:$0xf0]  ;;  %v838_v11 = vld [vmem:[%s1264_s0 + $0x20] sm:$0xff] }
   0x4   :  { %v839_v8 = vld [vmem:[%s1264_s0 + $0x28] sm:$0xff]  ;;  %v709_v10 = vor.u32 %v824_v7, %v708_v6  ;;  %v846_v12 = vld [vmem:[%s1264_s0 + $0x60] sm:$0xff]  ;;  %v837_v13 = vld [vmem:[%s1264_s0 + $0x18] sm:$0xff] }
   0x5   :  { %v847_v9 = vld [vmem:[%s1264_s0 + $0x68] sm:$0xff]  ;;  %v845_v14 = vld [vmem:[%s1264_s0 + $0x58] sm:$0xff]  ;;  %v836_v15 = vld [vmem:[%s1264_s0 + $0x10] sm:$0xff] }
   0x6   :  { %255 = vmatpush.bf16.msra.mxu0 %v840_v3  ;;  %853 = vmatpush.bf16.msra.mxu3 %v840_v3  ;;  %v844_v16 = vld [vmem:[%s1264_s0 + $0x50] sm:$0xff]  ;;  %v720_v17 = vld [vmem:[%s1265_s1 + $0x20] sm:$0xf]  ;;  %v827_v18 = vld [vmem:[%s1265_s1 + $0x28] sm:$0xf0] }
   0x7   :  { %861 = vmatpush.bf16.msra.mxu1 %v848_v4  ;;  %319 = vmatpush.bf16.msra.mxu2 %v850_v5  ;;  %v835_v19 = vld [vmem:[%s1264_s0 + $0x8] sm:$0xff]  ;;  %v721_v21 = vor.u32 %v827_v18, %v720_v17  ;;  %v834_v22 = vld [vmem:[%s1264_s0] sm:$0xff]  ;;  %v712_v23 = vld [vmem:[%s1265_s1 + $0x18] sm:$0xf] }
   0x8   :  { %v843_v20 = vld [vmem:[%s1264_s0 + $0x48] sm:$0xff]  ;;  %v826_v24 = vld [vmem:[%s1265_s1 + $0x20] sm:$0xf0]  ;;  %v700_v25 = vld [vmem:[%s1265_s1] sm:$0xf] }
   0x9   :  { %v823_v26 = vld [vmem:[%s1265_s1 + $0x8] sm:$0xf0]  ;;  %v842_v27 = vld [vmem:[%s1264_s0 + $0x40] sm:$0xff]  ;;  %v825_v28 = vld [vmem:[%s1265_s1 + $0x1c] sm:$0xf]  ;;  %v713_v30 = vor.u32 %v826_v24, %v712_v23 }
   0xa   :  { %256 = vmatpush.bf16.msra.mxu0 %v839_v8  ;;  %854 = vmatpush.bf16.msra.mxu3 %v839_v8  ;;  %v714_v29 = vld [vmem:[%s1265_s1 + $0x24] sm:$0xf0]  ;;  %v701_v31 = vor.u32 %v823_v26, %v700_v25  ;;  %v732_v33 = vld [vmem:[%s1265_s1 + $0x38] sm:$0xf]  ;;  %v830_v34 = vld [vmem:[%s1265_s1 + $0x40] sm:$0xf0] }
   0xb   :  { %862 = vmatpush.bf16.msra.mxu1 %v847_v9  ;;  %818 = vmatmul.msk.bf16.vlgmr.msra.gmra.mxu2 %vm241_vm0, %v709_v10  ;;  %v717_v32 = vor.u32 %v825_v28, %v714_v29  ;;  %v733_v35 = vor.u32 %v830_v34, %v732_v33  ;;  %v724_v36 = vld [vmem:[%s1265_s1 + $0x30] sm:$0xf]  ;;  %v829_v37 = vld [vmem:[%s1265_s1 + $0x38] sm:$0xf0]  ;;  %v828_v38 = vld [vmem:[%s1265_s1 + $0x34] sm:$0xf] }
   0xc   :  { %v726_v39 = vld [vmem:[%s1265_s1 + $0x3c] sm:$0xf0]  ;;  %v725_v40 = vor.u32 %v829_v37, %v724_v36  ;;  %v744_v42 = vld [vmem:[%s1265_s1 + $0x50] sm:$0xf]  ;;  %v833_v43 = vld [vmem:[%s1265_s1 + $0x58] sm:$0xf0] }
   0xd   :  { %v729_v41 = vor.u32 %v828_v38, %v726_v39  ;;  %v822_v44 = vld [vmem:[%s1265_s1 + $0x4] sm:$0xf]  ;;  %v702_v45 = vld [vmem:[%s1265_s1 + $0xc] sm:$0xf0]  ;;  %v745_v46 = vor.u32 %v833_v43, %v744_v42  ;;  %v736_v48 = vld [vmem:[%s1265_s1 + $0x48] sm:$0xf] }
   0xe   :  { %257 = vmatpush.bf16.msra.mxu0 %v838_v11  ;;  %855 = vmatpush.bf16.msra.mxu3 %v838_v11  ;;  %v705_v47 = vor.u32 %v822_v44, %v702_v45  ;;  %v832_v49 = vld [vmem:[%s1265_s1 + $0x50] sm:$0xf0]  ;;  %v831_v50 = vld [vmem:[%s1265_s1 + $0x4c] sm:$0xf]  ;;  %v738_v51 = vld [vmem:[%s1265_s1 + $0x54] sm:$0xf0] }
   0xf   :  { %863 = vmatpush.bf16.msra.mxu1 %v846_v12  ;;  %v737_v52 = vor.u32 %v832_v49, %v736_v48  ;;  %v741_v53 = vor.u32 %v831_v50, %v738_v51 }
  0x12   :  { %258 = vmatpush.bf16.msra.mxu0 %v837_v13  ;;  %856 = vmatpush.bf16.msra.mxu3 %v837_v13 }
  0x13   :  { %864 = vmatpush.bf16.msra.mxu1 %v845_v14 }
  0x16   :  { %259 = vmatpush.bf16.msra.mxu0 %v836_v15  ;;  %857 = vmatpush.bf16.msra.mxu3 %v836_v15 }
  0x17   :  { %865 = vmatpush.bf16.msra.mxu1 %v844_v16 }
  0x1a   :  { %260 = vmatpush.bf16.msra.mxu0 %v835_v19  ;;  %858 = vmatpush.bf16.msra.mxu3 %v835_v19 }
  0x1b   :  { %866 = vmatpush.bf16.msra.mxu1 %v843_v20  ;;  %819 = vmatmul.msk.bf16.gmra.mxu2 %vm241_vm0, %v721_v21 }
  0x1e   :  { %261 = vmatpush.bf16.msra.mxu0 %v834_v22  ;;  %859 = vmatpush.bf16.msra.mxu3 %v834_v22 }
  0x1f   :  { %867 = vmatpush.bf16.msra.mxu1 %v842_v27 }
  0x21   :  { %267 = vmatmul.bf16.vlgmr.msra.gmra.mxu3 %v713_v30  ;;  %262 = vmatmul.bf16.vlgmr.msra.gmra.mxu0 %v701_v31 }
  0x22   :  { %283 = vmatpush.bf16.msrb.mxu0 %v849_v1  ;;  %296 = vmatmul.bf16.vlgmr.msra.gmra.mxu1 %v717_v32 }
  0x26   :  { %284 = vmatpush.bf16.msrb.mxu0 %v848_v4 }
  0x2a   :  { %285 = vmatpush.bf16.msrb.mxu0 %v847_v9 }
  0x2b   :  { %820 = vmatmul.msk.bf16.gmra.mxu2 %vm241_vm0, %v733_v35 }
  0x2e   :  { %286 = vmatpush.bf16.msrb.mxu0 %v846_v12 }
  0x31   :  { %272 = vmatmul.bf16.gmra.mxu3 %v725_v40 }
  0x32   :  { %287 = vmatpush.bf16.msrb.mxu0 %v845_v14  ;;  %301 = vmatmul.bf16.gmra.mxu1 %v729_v41 }
  0x36   :  { %288 = vmatpush.bf16.msrb.mxu0 %v844_v16 }
  0x3a   :  { %289 = vmatpush.bf16.msrb.mxu0 %v843_v20 }
  0x3b   :  { %821 = vmatmul.msk.bf16.gmra.mxu2 %vm241_vm0, %v745_v46 }
  0x3e   :  { %290 = vmatpush.bf16.msrb.mxu0 %v842_v27 }
  0x41   :  { %291 = vmatmul.bf16.vlgmr.msrb.gmra.mxu0 %v705_v47  ;;  %277 = vmatmul.bf16.gmra.mxu3 %v737_v52 }
  0x42   :  { %306 = vmatmul.bf16.gmra.mxu1 %v741_v53 }
  0x8e   :  { %v321_v54 = vpop.f32.mrf.mxu2 }
  0x96   :  { %v323_v55 = vpop.f32.mrf.mxu2 }
  0x9e   :  { %v326_v56 = vpop.f32.mrf.mxu2  ;;  %v263_v63 = vpop.f32.mrf.mxu0 }
  0x9f   :  { %v297_v57 = vpop.f32.mrf.mxu1 }
  0xa4   :  { %v268_v58 = vpop.f32.mrf.mxu3 }
  0xa5   :  { %v298_v59 = vadd.f32 %v297_v57, %v268_v58 }
  0xa6   :  { %v328_v60 = vpop.f32.mrf.mxu2  ;;  %v265_v9 = vpop.f32.mrf.mxu0 }
  0xa7   :  { %v1049_v61 = vadd.f32 %v326_v56, %v298_v59  ;;  %v299_v62 = vpop.f32.mrf.mxu1  ;;  %v888_v56 = vmov 0  }
  0xa8   :  { %869 = vset.pattern.permute.xlu0 %v888_v56  ;;  %870 = vset.pattern.permute.xlu2 %v888_v56 }
  0xa9   :  { %v364_v0 = vsel %vm357_vm1, %v1049_v61, 0.0  ;;  %v392_v1 = vmul.f32 %v1049_v61, %v1049_v61  ;;  %871 = vset.pattern.permute.xlu1 %v888_v56 }
  0xaa   :  { %365 = vadd.xlane.f32.xlu1 %v364_v0 }
  0xab   :  { %v404_v6 = vsel %vm357_vm1, %v392_v1, 0.0 }
  0xac   :  { %v270_v2 = vpop.f32.mrf.mxu3 }
  0xad   :  { %v300_v3 = vadd.f32 %v299_v62, %v270_v2 }
  0xae   :  { %v331_v4 = vpop.f32.mrf.mxu2 }
  0xaf   :  { %v1055_v5 = vadd.f32 %v328_v60, %v300_v3  ;;  %v302_v7 = vpop.f32.mrf.mxu1 }
  0xb1   :  { %v393_v8 = vmul.f32 %v1055_v5, %v1055_v5  ;;  %v367_v14 = vsel %vm357_vm1, %v1055_v5, 0.0 }
  0xb2   :  { %405 = vadd.xlane.f32.xlu1 %v404_v6 }
  0xb3   :  { %v407_v10 = vsel %vm357_vm1, %v393_v8, 0.0 }
  0xb4   :  { %408 = vadd.xlane.f32.xlu2 %v407_v10  ;;  %v273_v11 = vpop.f32.mrf.mxu3 }
  0xb5   :  { %v303_v21 = vadd.f32 %v302_v7, %v273_v11 }
  0xb6   :  { %v333_v13 = vpop.f32.mrf.mxu2 }
  0xb7   :  { %v304_v12 = vpop.f32.mrf.mxu1  ;;  %v1075_v31 = vadd.f32 %v331_v4, %v303_v21 }
  0xb9   :  { %v370_v35 = vsel %vm357_vm1, %v1075_v31, 0.0  ;;  %v394_v36 = vmul.f32 %v1075_v31, %v1075_v31 }
  0xba   :  { %368 = vadd.xlane.f32.xlu1 %v367_v14 }
  0xbb   :  { %v410_v42 = vsel %vm357_vm1, %v394_v36, 0.0  ;;  %v351_v36 = vld [vmem:[%s1267_s3 + $0x10] sm:$0xff] }
  0xbc   :  { %v275_v17 = vpop.f32.mrf.mxu3 }
  0xbd   :  { %v305_v18 = vadd.f32 %v304_v12, %v275_v17 }
  0xbe   :  { %v292_v15 = vpop.f32.mrf.mxu0  ;;  %v336_v27 = vpop.f32.mrf.mxu2 }
  0xbf   :  { %v293_v16 = vadd.f32 %v292_v15, %v263_v63  ;;  %v1065_v20 = vadd.f32 %v333_v13, %v305_v18  ;;  %v307_v24 = vpop.f32.mrf.mxu1 }
  0xc1   :  { %v1063_v19 = vadd.f32 %v321_v54, %v293_v16  ;;  %v395_v25 = vmul.f32 %v1065_v20, %v1065_v20  ;;  %v373_v46 = vsel %vm357_vm1, %v1065_v20, 0.0 }
  0xc3   :  { %v358_v22 = vsel %vm357_vm1, %v1063_v19, 0.0  ;;  %v390_v23 = vmul.f32 %v1063_v19, %v1063_v19  ;;  %v413_v29 = vsel %vm357_vm1, %v395_v25, 0.0 }
  0xc4   :  { %359 = vadd.xlane.f32.xlu0 %v358_v22  ;;  %414 = vadd.xlane.f32.xlu1 %v413_v29  ;;  %v278_v32 = vpop.f32.mrf.mxu3 }
  0xc5   :  { %v398_v26 = vsel %vm357_vm1, %v390_v23, 0.0  ;;  %v308_v38 = vadd.f32 %v307_v24, %v278_v32 }
  0xc6   :  { %v294_v28 = vpop.f32.mrf.mxu0  ;;  %399 = vadd.xlane.f32.xlu2 %v398_v26  ;;  %v338_v40 = vpop.f32.mrf.mxu2 }
  0xc7   :  { %v295_v30 = vadd.f32 %v294_v28, %v265_v9  ;;  %v309_v37 = vpop.f32.mrf.mxu1  ;;  %v1088_v44 = vadd.f32 %v336_v27, %v308_v38  ;;  %v343_v28 = vld [vmem:[%s1266_s2 + $0x10] sm:$0xff] }
  0xc9   :  { %v1077_v33 = vadd.f32 %v323_v55, %v295_v30  ;;  %v396_v48 = vmul.f32 %v1088_v44, %v1088_v44  ;;  %v376_v51 = vsel %vm357_vm1, %v1088_v44, 0.0 }
  0xcb   :  { %v361_v34 = vsel %vm357_vm1, %v1077_v33, 0.0  ;;  %v391_v47 = vmul.f32 %v1077_v33, %v1077_v33  ;;  %v416_v50 = vsel %vm357_vm1, %v396_v48, 0.0 }
  0xcc   :  { %362 = vadd.xlane.f32.xlu0 %v361_v34  ;;  %v280_v39 = vpop.f32.mrf.mxu3 }
  0xcd   :  { %v310_v41 = vadd.f32 %v309_v37, %v280_v39  ;;  %v401_v49 = vsel %vm357_vm1, %v391_v47, 0.0 }
  0xce   :  { %371 = vadd.xlane.f32.xlu2 %v370_v35 }
  0xcf   :  { %v1086_v43 = vadd.f32 %v338_v40, %v310_v41 }
  0xd1   :  { %v379_v45 = vsel %vm357_vm1, %v1086_v43, 0.0  ;;  %v397_v52 = vmul.f32 %v1086_v43, %v1086_v43 }
  0xd2   :  { %380 = vadd.xlane.f32.xlu1 %v379_v45 }
  0xd3   :  { %v419_v53 = vsel %vm357_vm1, %v397_v52, 0.0 }
  0xd4   :  { %411 = vadd.xlane.f32.xlu0 %v410_v42 }
  0xd6   :  { %374 = vadd.xlane.f32.xlu2 %v373_v46 }
  0xdc   :  { %402 = vadd.xlane.f32.xlu0 %v401_v49 }
  0xde   :  { %417 = vadd.xlane.f32.xlu2 %v416_v50 }
  0xe4   :  { %377 = vadd.xlane.f32.xlu0 %v376_v51 }
  0xec   :  { %420 = vadd.xlane.f32.xlu0 %v419_v53 }
 0x11d   :  { %v366_v54 = vpop.xlane.xlu1 %365 }
 0x11e   :  { %v384_v55 = vmul.f32 0.125, %v366_v54 }
 0x120   :  { %v432_v57 = vmul.f32 %v384_v55, %v384_v55 }
 0x125   :  { %v406_v58 = vpop.xlane.xlu1 %405 }
 0x126   :  { %v424_v59 = vmul.f32 0.125, %v406_v58  ;;  %v344_v58 = vld [vmem:[%s1266_s2 + $0x18] sm:$0xff] }
 0x127   :  { %v409_v0 = vpop.xlane.xlu2 %408 }
 0x128   :  { %v440_v60 = vsub.f32 %v424_v59, %v432_v57  ;;  %v425_v3 = vmul.f32 0.125, %v409_v0 }
 0x12a   :  { %v448_v62 = vmax.f32 %v440_v60, 0.0 }
 0x12c   :  { %v456_v63 = vadd.f32 1e-05, %v448_v62 }
 0x12d   :  { %v369_v1 = vpop.xlane.xlu1 %368 }
 0x12e   :  { %872 = vrsqrt.f32 %v456_v63  ;;  %v1105_v2 = vmul.f32 0.125, %v369_v1  ;;  %vm488_vm3 = vweird.f32 %v456_v63 }
 0x130   :  { %v433_v4 = vmul.f32 %v1105_v2, %v1105_v2 }
 0x132   :  { %v441_v6 = vsub.f32 %v425_v3, %v433_v4 }
 0x134   :  { %v873_v7 = vpop.eup %872  ;;  %v449_v8 = vmax.f32 %v441_v6, 0.0 }
 0x135   :  { %v483_v10 = vmul.f32 %v873_v7, %v456_v63  ;;  %vm489_vm2 = vweird.f32 %v873_v7 }
 0x136   :  { %v457_v12 = vadd.f32 1e-05, %v449_v8  ;;  %vm490_vm4 = vmor %vm488_vm3, %vm489_vm2  ;;  %v341_v8 = vld [vmem:[%s1266_s2] sm:$0xff] }
 0x137   :  { %v360_v9 = vpop.xlane.xlu0 %359  ;;  %v484_v14 = vmul.f32 %v873_v7, %v483_v10  ;;  %v415_v48 = vpop.xlane.xlu1 %414 }
 0x138   :  { %v1109_v11 = vmul.f32 0.125, %v360_v9  ;;  %874 = vrsqrt.f32 %v457_v12  ;;  %vm498_vm6 = vweird.f32 %v457_v12 }
 0x139   :  { %v400_v13 = vpop.xlane.xlu2 %399  ;;  %v485_v17 = vmul.f32 0.5, %v484_v14 }
 0x13a   :  { %v430_v15 = vmul.f32 %v1109_v11, %v1109_v11  ;;  %v422_v16 = vmul.f32 0.125, %v400_v13 }
 0x13b   :  { %v486_v21 = vsub.f32 1.5, %v485_v17 }
 0x13c   :  { %v438_v18 = vsub.f32 %v422_v16, %v430_v15 }
 0x13d   :  { %v487_v25 = vmul.f32 %v873_v7, %v486_v21 }
 0x13e   :  { %v446_v22 = vmax.f32 %v438_v18, 0.0  ;;  %v875_v26 = vpop.eup %874 }
 0x13f   :  { %v363_v23 = vpop.xlane.xlu0 %362  ;;  %v493_v29 = vmul.f32 %v875_v26, %v457_v12  ;;  %v491_v32 = vsel %vm490_vm4, %v873_v7, %v487_v25  ;;  %vm499_vm5 = vweird.f32 %v875_v26 }
 0x140   :  { %v454_v24 = vadd.f32 1e-05, %v446_v22  ;;  %v544_v35 = vmul.f32 %v491_v32, %v343_v28  ;;  %v1125_v54 = vmul.f32 0.125, %v363_v23  ;;  %vm500_vm7 = vmor %vm498_vm6, %vm499_vm5 }
 0x141   :  { %v372_v27 = vpop.xlane.xlu2 %371  ;;  %v494_v34 = vmul.f32 %v875_v26, %v493_v29 }
 0x142   :  { %876 = vrsqrt.f32 %v454_v24  ;;  %v1116_v30 = vmul.f32 0.125, %v372_v27  ;;  %562 = vperm.xlu0 %869, %v544_v35   ;;  %v600_v39 = vmul.f32 %v544_v35, %v384_v55  ;;  %v427_v55 = vmul.f32 0.125, %v415_v48  ;;  %v352_v27 = vld [vmem:[%s1267_s3 + $0x18] sm:$0xff] }
 0x143   :  { %v495_v37 = vmul.f32 0.5, %v494_v34  ;;  %v431_v1 = vmul.f32 %v1125_v54, %v1125_v54  ;;  %vm468_vm9 = vweird.f32 %v454_v24 }
 0x144   :  { %v434_v38 = vmul.f32 %v1116_v30, %v1116_v30  ;;  %v608_v46 = vsub.f32 %v351_v36, %v600_v39 }
 0x145   :  { %v496_v42 = vsub.f32 1.5, %v495_v37 }
 0x146   :  { %626 = vperm.xlu2 %870, %v608_v46  }
 0x147   :  { %v412_v40 = vpop.xlane.xlu0 %411  ;;  %v497_v50 = vmul.f32 %v875_v26, %v496_v42 }
 0x148   :  { %v877_v41 = vpop.eup %876  ;;  %v426_v45 = vmul.f32 0.125, %v412_v40 }
 0x149   :  { %v463_v47 = vmul.f32 %v877_v41, %v454_v24  ;;  %v375_v49 = vpop.xlane.xlu2 %374  ;;  %v501_v59 = vsel %vm500_vm7, %v875_v26, %v497_v50  ;;  %vm469_vm8 = vweird.f32 %v877_v41  ;;  %v381_v26 = vpop.xlane.xlu1 %380 }
 0x14a   :  { %v442_v51 = vsub.f32 %v426_v45, %v434_v38  ;;  %v1123_v52 = vmul.f32 0.125, %v375_v49  ;;  %v545_v4 = vmul.f32 %v501_v59, %v344_v58  ;;  %vm470_vm10 = vmor %vm468_vm9, %vm469_vm8 }
 0x14b   :  { %v464_v53 = vmul.f32 %v877_v41, %v463_v47  ;;  %v345_v47 = vld [vmem:[%s1266_s2 + $0x20] sm:$0xff] }
 0x14c   :  { %v450_v56 = vmax.f32 %v442_v51, 0.0  ;;  %v435_v57 = vmul.f32 %v1123_v52, %v1123_v52  ;;  %v601_v23 = vmul.f32 %v545_v4, %v1105_v2  ;;  %v1152_v2 = vmul.f32 0.125, %v381_v26 }
 0x14d   :  { %v465_v60 = vmul.f32 0.5, %v464_v53 }
 0x14e   :  { %v458_v62 = vadd.f32 1e-05, %v450_v56  ;;  %v443_v63 = vsub.f32 %v427_v55, %v435_v57  ;;  %567 = vperm.xlu2 %870, %v545_v4   ;;  %v609_v37 = vsub.f32 %v352_v27, %v601_v23  ;;  %v437_v48 = vmul.f32 %v1152_v2, %v1152_v2  ;;  %v349_v55 = vld [vmem:[%s1267_s3] sm:$0xff]  ;;  %v346_v23 = vld [vmem:[%s1266_s2 + $0x28] sm:$0xff] }
 0x14f   :  { %v466_v0 = vsub.f32 1.5, %v465_v60  ;;  %v403_v3 = vpop.xlane.xlu0 %402 }
 0x150   :  { %878 = vrsqrt.f32 %v458_v62  ;;  %v451_v6 = vmax.f32 %v443_v63, 0.0  ;;  %v423_v7 = vmul.f32 0.125, %v403_v3  ;;  %vm508_vm12 = vweird.f32 %v458_v62 }
 0x151   :  { %v467_v9 = vmul.f32 %v877_v41, %v466_v0  ;;  %v418_v21 = vpop.xlane.xlu2 %417 }
 0x152   :  { %v1137_v10 = vadd.f32 1e-05, %v451_v6  ;;  %v439_v12 = vsub.f32 %v423_v7, %v431_v1  ;;  %v428_v29 = vmul.f32 0.125, %v418_v21  ;;  %v342_v7 = vld [vmem:[%s1266_s2 + $0x8] sm:$0xff] }
 0x153   :  { %v471_v13 = vsel %vm470_vm10, %v877_v41, %v467_v9 }
 0x154   :  { %880 = vrsqrt.f32 %v1137_v10  ;;  %v447_v14 = vmax.f32 %v439_v12, 0.0  ;;  %v542_v15 = vmul.f32 %v471_v13, %v341_v8  ;;  %vm518_vm3 = vweird.f32 %v1137_v10 }
 0x156   :  { %v879_v16 = vpop.eup %878  ;;  %v455_v17 = vadd.f32 1e-05, %v447_v14  ;;  %552 = vperm.xlu1 %871, %v542_v15   ;;  %v598_v51 = vmul.f32 %v542_v15, %v1109_v11 }
 0x157   :  { %v503_v18 = vmul.f32 %v879_v16, %v458_v62  ;;  %v378_v22 = vpop.xlane.xlu0 %377  ;;  %vm509_vm11 = vweird.f32 %v879_v16  ;;  %v353_v62 = vld [vmem:[%s1267_s3 + $0x20] sm:$0xff] }
 0x158   :  { %882 = vrsqrt.f32 %v455_v17  ;;  %v1141_v24 = vmul.f32 0.125, %v378_v22  ;;  %vm510_vm13 = vmor %vm508_vm12, %vm509_vm11  ;;  %v606_v0 = vsub.f32 %v349_v55, %v598_v51  ;;  %vm478_vm15 = vweird.f32 %v455_v17 }
 0x159   :  { %v504_v25 = vmul.f32 %v879_v16, %v503_v18 }
 0x15a   :  { %v1146_v28 = vpop.eup %880  ;;  %v436_v32 = vmul.f32 %v1141_v24, %v1141_v24 }
 0x15b   :  { %v505_v34 = vmul.f32 0.5, %v504_v25  ;;  %v513_v35 = vmul.f32 %v1146_v28, %v1137_v10  ;;  %vm519_vm2 = vweird.f32 %v1146_v28 }
 0x15c   :  { %v444_v36 = vsub.f32 %v428_v29, %v436_v32  ;;  %vm520_vm4 = vmor %vm518_vm3, %vm519_vm2 }
 0x15d   :  { %v506_v38 = vsub.f32 1.5, %v505_v34  ;;  %v514_v42 = vmul.f32 %v1146_v28, %v513_v35 }
 0x15e   :  { %v883_v39 = vpop.eup %882  ;;  %v452_v40 = vmax.f32 %v444_v36, 0.0  ;;  %631 = vperm.xlu1 %871, %v609_v37  }
 0x15f   :  { %v507_v41 = vmul.f32 %v879_v16, %v506_v38  ;;  %v473_v45 = vmul.f32 %v883_v39, %v455_v17  ;;  %v421_v46 = vpop.xlane.xlu0 %420  ;;  %v515_v59 = vmul.f32 0.5, %v514_v42  ;;  %vm479_vm14 = vweird.f32 %v883_v39 }
 0x160   :  { %v460_v49 = vadd.f32 1e-05, %v452_v40  ;;  %v429_v50 = vmul.f32 0.125, %v421_v46  ;;  %vm480_vm0 = vmor %vm478_vm15, %vm479_vm14 }
 0x161   :  { %v474_v53 = vmul.f32 %v883_v39, %v473_v45  ;;  %v511_v56 = vsel %vm510_vm13, %v879_v16, %v507_v41  ;;  %v516_v6 = vsub.f32 1.5, %v515_v59  ;;  %v350_v16 = vld [vmem:[%s1267_s3 + $0x8] sm:$0xff]  ;;  %v355_v41 = vld [vmem:[%s1267_s3 + $0x30] sm:$0xff]  ;;  %v356_v45 = vld [vmem:[%s1267_s3 + $0x38] sm:$0xff] }
 0x162   :  { %884 = vrsqrt.f32 %v460_v49  ;;  %v445_v57 = vsub.f32 %v429_v50, %v437_v48  ;;  %v546_v58 = vmul.f32 %v511_v56, %v345_v47  ;;  %vm528_vm6 = vweird.f32 %v460_v49 }
 0x163   :  { %v475_v60 = vmul.f32 0.5, %v474_v53 }
 0x164   :  { %v453_v63 = vmax.f32 %v445_v57, 0.0  ;;  %v602_v1 = vmul.f32 %v546_v58, %v1116_v30  ;;  %v517_v30 = vmul.f32 %v1146_v28, %v516_v6 }
 0x165   :  { %v476_v11 = vsub.f32 1.5, %v475_v60 }
 0x166   :  { %v461_v3 = vadd.f32 1e-05, %v453_v63  ;;  %616 = vperm.xlu1 %871, %v606_v0   ;;  %v610_v4 = vsub.f32 %v353_v62, %v602_v1  ;;  %v521_v25 = vsel %vm520_vm4, %v1146_v28, %v517_v30  ;;  %v348_v28 = vld [vmem:[%s1266_s2 + $0x38] sm:$0xff] }
 0x167   :  { %v477_v8 = vmul.f32 %v883_v39, %v476_v11  ;;  %v547_v32 = vmul.f32 %v521_v25, %v346_v23  ;;  %v673_v1 = vld [vmem:[%s1268_s4 + $0x18] sm:$0xff] }
 0x168   :  { %v885_v9 = vpop.eup %884  ;;  %886 = vrsqrt.f32 %v461_v3  ;;  %636 = vperm.xlu0 %869, %v610_v4   ;;  %vm538_vm9 = vweird.f32 %v461_v3 }
 0x169   :  { %v523_v12 = vmul.f32 %v885_v9, %v460_v49  ;;  %v481_v13 = vsel %vm480_vm0, %v883_v39, %v477_v8  ;;  %vm529_vm5 = vweird.f32 %v885_v9  ;;  %v603_v48 = vmul.f32 %v547_v32, %v1123_v52 }
 0x16a   :  { %v543_v14 = vmul.f32 %v481_v13, %v342_v7  ;;  %vm530_vm7 = vmor %vm528_vm6, %vm529_vm5 }
 0x16b   :  { %v524_v15 = vmul.f32 %v885_v9, %v523_v12 }
 0x16c   :  { %557 = vperm.xlu2 %870, %v543_v14   ;;  %v599_v17 = vmul.f32 %v543_v14, %v1125_v54  ;;  %v347_v54 = vld [vmem:[%s1266_s2 + $0x30] sm:$0xff] }
 0x16d   :  { %v525_v18 = vmul.f32 0.5, %v524_v15  ;;  %v675_v15 = vld [vmem:[%s1268_s4 + $0x28] sm:$0xff] }
 0x16e   :  { %v887_v21 = vpop.eup %886  ;;  %572 = vperm.xlu1 %871, %v546_v58   ;;  %v607_v22 = vsub.f32 %v350_v16, %v599_v17 }
 0x16f   :  { %v526_v26 = vsub.f32 1.5, %v525_v18  ;;  %v533_v27 = vmul.f32 %v887_v21, %v461_v3  ;;  %vm539_vm8 = vweird.f32 %v887_v21 }
 0x170   :  { %621 = vperm.xlu0 %869, %v607_v22   ;;  %vm540_vm10 = vmor %vm538_vm9, %vm539_vm8 }
 0x171   :  { %v527_v10 = vmul.f32 %v885_v9, %v526_v26  ;;  %v534_v29 = vmul.f32 %v887_v21, %v533_v27  ;;  %v674_v26 = vld [vmem:[%s1268_s4 + $0x20] sm:$0xff]  ;;  %v671_v27 = vld [vmem:[%s1268_s4 + $0x8] sm:$0xff] }
 0x173   :  { %v531_v34 = vsel %vm530_vm7, %v885_v9, %v527_v10  ;;  %v535_v35 = vmul.f32 0.5, %v534_v29 }
 0x174   :  { %v548_v36 = vmul.f32 %v531_v34, %v347_v54  ;;  %577 = vperm.xlu2 %870, %v547_v32  }
 0x175   :  { %v536_v37 = vsub.f32 1.5, %v535_v35 }
 0x176   :  { %582 = vperm.xlu1 %871, %v548_v36   ;;  %v604_v39 = vmul.f32 %v548_v36, %v1141_v24  ;;  %v354_v24 = vld [vmem:[%s1267_s3 + $0x28] sm:$0xff] }
 0x177   :  { %v537_v38 = vmul.f32 %v887_v21, %v536_v37  ;;  %v611_v50 = vsub.f32 %v354_v24, %v603_v48  ;;  %v676_v37 = vld [vmem:[%s1268_s4 + $0x30] sm:$0xff] }
 0x178   :  { %v612_v46 = vsub.f32 %v355_v41, %v604_v39 }
 0x179   :  { %v541_v40 = vsel %vm540_vm10, %v887_v21, %v537_v38 }
 0x17a   :  { %v549_v42 = vmul.f32 %v541_v40, %v348_v28  ;;  %v677_v40 = vld [vmem:[%s1268_s4 + $0x38] sm:$0xff] }
 0x17c   :  { %587 = vperm.xlu2 %870, %v549_v42   ;;  %v605_v47 = vmul.f32 %v549_v42, %v1152_v2  ;;  %v672_v2 = vld [vmem:[%s1268_s4 + $0x10] sm:$0xff] }
 0x17e   :  { %646 = vperm.xlu1 %871, %v612_v46   ;;  %v613_v49 = vsub.f32 %v356_v45, %v605_v47 }
 0x180   :  { %651 = vperm.xlu0 %869, %v613_v49  }
 0x184   :  { %641 = vperm.xlu2 %870, %v611_v50  }
 0x1a0   :  { %v627_v51 = vpop.permute.xlu2 %626 }
 0x1a8   :  { %v568_v52 = vpop.permute.xlu2 %567 }
 0x1a9   :  { %v593_v63 = vmul.f32 %v568_v52, %v1055_v5  ;;  %v670_v5 = vld [vmem:[%s1268_s4] sm:$0xff] }
 0x1b4   :  { %v563_v53 = vpop.permute.xlu0 %562 }
 0x1b5   :  { %v592_v55 = vmul.f32 %v563_v53, %v1049_v61 }
 0x1b7   :  { %v656_v56 = vadd.f32 %v627_v51, %v592_v55 }
 0x1b9   :  { %v664_v57 = vmax.f32 %v656_v56, 0.0 }
 0x1bb   :  { %v680_v58 = vadd.f32 %v672_v2, %v664_v57 }
 0x1bd   :  { %688 = vst.msk [vmem:[%s1269_s5 + $0x10] sm:$0xff] %vm357_vm1, %v680_v58 }
 0x1c6   :  { %v558_v59 = vpop.permute.xlu2 %557 }
 0x1c7   :  { %v591_v17 = vmul.f32 %v558_v59, %v1077_v33 }
 0x1c8   :  { %v553_v60 = vpop.permute.xlu1 %552 }
 0x1c9   :  { %v590_v6 = vmul.f32 %v553_v60, %v1063_v19 }
 0x1ce   :  { %v578_v62 = vpop.permute.xlu2 %577 }
 0x1cf   :  { %v595_v13 = vmul.f32 %v578_v62, %v1065_v20 }
 0x1d0   :  { %v632_v0 = vpop.permute.xlu1 %631 }
 0x1d1   :  { %v657_v61 = vadd.f32 %v632_v0, %v593_v63 }
 0x1d3   :  { %v665_v11 = vmax.f32 %v657_v61, 0.0 }
 0x1d5   :  { %v681_v3 = vadd.f32 %v673_v1, %v665_v11 }
 0x1d6   :  { %v588_v4 = vpop.permute.xlu2 %587 }
 0x1d7   :  { %689 = vst.msk [vmem:[%s1269_s5 + $0x18] sm:$0xff] %vm357_vm1, %v681_v3  ;;  %v597_v35 = vmul.f32 %v588_v4, %v1086_v43 }
 0x1d8   :  { %v617_v7 = vpop.permute.xlu1 %616 }
 0x1d9   :  { %v654_v8 = vadd.f32 %v617_v7, %v590_v6 }
 0x1da   :  { %v637_v9 = vpop.permute.xlu0 %636 }
 0x1db   :  { %v662_v12 = vmax.f32 %v654_v8, 0.0 }
 0x1dd   :  { %v678_v14 = vadd.f32 %v670_v5, %v662_v12 }
 0x1de   :  { %v642_v30 = vpop.permute.xlu2 %641 }
 0x1df   :  { %686 = vst.msk [vmem:[%s1269_s5] sm:$0xff] %vm357_vm1, %v678_v14  ;;  %v659_v19 = vadd.f32 %v642_v30, %v595_v13 }
 0x1e0   :  { %v573_v16 = vpop.permute.xlu1 %572 }
 0x1e1   :  { %v667_v18 = vmax.f32 %v659_v19, 0.0  ;;  %v594_v21 = vmul.f32 %v573_v16, %v1075_v31 }
 0x1e2   :  { %v622_v22 = vpop.permute.xlu0 %621 }
 0x1e3   :  { %v683_v20 = vadd.f32 %v675_v15, %v667_v18  ;;  %v658_v23 = vadd.f32 %v637_v9, %v594_v21  ;;  %v655_v25 = vadd.f32 %v622_v22, %v591_v17 }
 0x1e5   :  { %691 = vst.msk [vmem:[%s1269_s5 + $0x28] sm:$0xff] %vm357_vm1, %v683_v20  ;;  %v666_v33 = vmax.f32 %v658_v23, 0.0  ;;  %v663_v54 = vmax.f32 %v655_v25, 0.0 }
 0x1e7   :  { %v682_v31 = vadd.f32 %v674_v26, %v666_v33  ;;  %v679_v10 = vadd.f32 %v671_v27, %v663_v54 }
 0x1e8   :  { %v583_v29 = vpop.permute.xlu1 %582 }
 0x1e9   :  { %690 = vst.msk [vmem:[%s1269_s5 + $0x20] sm:$0xff] %vm357_vm1, %v682_v31  ;;  %v596_v32 = vmul.f32 %v583_v29, %v1088_v44 }
 0x1ea   :  { %687 = vst.msk [vmem:[%s1269_s5 + $0x8] sm:$0xff] %vm357_vm1, %v679_v10 }
 0x1f0   :  { %v647_v34 = vpop.permute.xlu1 %646 }
 0x1f1   :  { %v660_v36 = vadd.f32 %v647_v34, %v596_v32 }
 0x1f2   :  { %v652_v28 = vpop.permute.xlu0 %651 }
 0x1f3   :  { %v668_v38 = vmax.f32 %v660_v36, 0.0  ;;  %v661_v39 = vadd.f32 %v652_v28, %v597_v35 }
 0x1f5   :  { %v684_v41 = vadd.f32 %v676_v37, %v668_v38  ;;  %v669_v42 = vmax.f32 %v661_v39, 0.0 }
 0x1f7   :  { %692 = vst.msk [vmem:[%s1269_s5 + $0x30] sm:$0xff] %vm357_vm1, %v684_v41  ;;  %v685_v43 = vadd.f32 %v677_v40, %v669_v42 }
 0x1f9   :  { %693 = vst.msk [vmem:[%s1269_s5 + $0x38] sm:$0xff] %vm357_vm1, %v685_v43 }

// kernel: _lambda_.19
= control target key start
LH: loop header
LB: loop body
LE: loop exit
PB: predicated region body
PF: predicated region fallthrough
CT: control target
= control target key end

     0   :  { %s2669_s0 = inlined_call_operand.vmem [shape: bf16[576,8], index: 0, kind: input, shape index: {}]   ;;  %s2670_s1 = inlined_call_operand.vmem [shape: bf16[64,576], index: 1, kind: input, shape index: {}]   ;;  %s2671_s2 = inlined_call_operand.vmem [shape: f32[64,1], index: 2, kind: input, shape index: {}, may-alias: {2,6}]   ;;  %s2672_s3 = inlined_call_operand.vmem [shape: f32[64,1], index: 3, kind: input, shape index: {}, may-alias: {3,7}]   ;;  %s2673_s4 = inlined_call_operand.vmem [shape: bf16[32,8], index: 4, kind: input, shape index: {}]   ;;  %s2674_s5 = inlined_call_operand.vmem [shape: bf16[64,32], index: 5, kind: input, shape index: {}]   ;;  %s2675_s6 = inlined_call_operand.vmem [shape: f32[64,1], index: 6, kind: input, shape index: {}, may-alias: {2,6}]   ;;  %s2676_s7 = inlined_call_operand.vmem [shape: f32[64,1], index: 7, kind: input, shape index: {}, may-alias: {3,7}]   ;;  %s2677_s8 = inlined_call_operand.vmem [shape: f32[8,2], index: 8, kind: input, shape index: {}]   ;;  %s2678_s9 = inlined_call_operand.vmem [shape: f32[1,64], index: 9, kind: input, shape index: {}]   ;;  %s2679_s10 = inlined_call_operand.<no memory space> [shape: f32[1,1], index: 10, kind: input, shape index: {}]   ;;  %s2680_s11 = inlined_call_operand.hbm [shape: f32[1,2], index: 11, kind: output, shape index: {}]  }
   0x1   :  { %v16_v0 = vstv %s2679_s10 }
   0x2   :  { %17 = vst [vmem:[#allocation2] sm:$0x1] %v16_v0 }
   0x3   :  { %v1782_v1 = vld [vmem:[%s2669_s0 + $0x38] sm:$0xff]  ;;  %v1781_v4 = vld [vmem:[%s2669_s0 + $0x30] sm:$0xff]  ;;  %v1780_v7 = vld [vmem:[%s2669_s0 + $0x28] sm:$0xff] }
   0x4   :  { %v1790_v2 = vld [vmem:[%s2669_s0 + $0x78] sm:$0xff]  ;;  %467 = vmatpush.bf16.msra.mxu0 %v1782_v1  ;;  %1817 = vmatpush.bf16.msra.mxu3 %v1782_v1  ;;  %v1789_v5 = vld [vmem:[%s2669_s0 + $0x70] sm:$0xff]  ;;  %v1788_v8 = vld [vmem:[%s2669_s0 + $0x68] sm:$0xff] }
   0x5   :  { %v1798_v3 = vld [vmem:[%s2669_s0 + $0xb8] sm:$0xff]  ;;  %496 = vmatpush.bf16.msra.mxu1 %v1790_v2  ;;  %v1797_v6 = vld [vmem:[%s2669_s0 + $0xb0] sm:$0xff]  ;;  %v1796_v9 = vld [vmem:[%s2669_s0 + $0xa8] sm:$0xff] }
   0x6   :  { %525 = vmatpush.bf16.msra.mxu2 %v1798_v3  ;;  %v1779_v10 = vld [vmem:[%s2669_s0 + $0x20] sm:$0xff] }
   0x7   :  { %v1787_v11 = vld [vmem:[%s2669_s0 + $0x60] sm:$0xff] }
   0x8   :  { %468 = vmatpush.bf16.msra.mxu0 %v1781_v4  ;;  %1818 = vmatpush.bf16.msra.mxu3 %v1781_v4  ;;  %v1795_v12 = vld [vmem:[%s2669_s0 + $0xa0] sm:$0xff] }
   0x9   :  { %497 = vmatpush.bf16.msra.mxu1 %v1789_v5 }
   0xa   :  { %526 = vmatpush.bf16.msra.mxu2 %v1797_v6 }
   0xc   :  { %469 = vmatpush.bf16.msra.mxu0 %v1780_v7  ;;  %1819 = vmatpush.bf16.msra.mxu3 %v1780_v7 }
   0xd   :  { %498 = vmatpush.bf16.msra.mxu1 %v1788_v8 }
   0xe   :  { %527 = vmatpush.bf16.msra.mxu2 %v1796_v9 }
   0xf   :  { %18 = vsyncpa [#allocation4], 0  ;;  %v1778_v13 = vld [vmem:[%s2669_s0 + $0x18] sm:$0xff]  ;;  %v1777_v16 = vld [vmem:[%s2669_s0 + $0x10] sm:$0xff]  ;;  %vm454_vm0 = vcmask 523264   ;;  %vm977_vm1 = vcmask 261120  }
  0x10   :  { %470 = vmatpush.bf16.msra.mxu0 %v1779_v10  ;;  %1820 = vmatpush.bf16.msra.mxu3 %v1779_v10  ;;  %v1786_v14 = vld [vmem:[%s2669_s0 + $0x58] sm:$0xff]  ;;  %v1785_v17 = vld [vmem:[%s2669_s0 + $0x50] sm:$0xff]  ;;  %v1776_v19 = vld [vmem:[%s2669_s0 + $0x8] sm:$0xff]  ;;  %vm628_vm2 = vcmask 64512   ;;  %s1480_s13 = sshll.u32 %s2680_s11, 4  ;;  %s1481_s13 = int_to_ptr.hbm [resolvable:$true] %s1480_s13 }
  0x11   :  { %499 = vmatpush.bf16.msra.mxu1 %v1787_v11  ;;  %v1794_v15 = vld [vmem:[%s2669_s0 + $0x98] sm:$0xff]  ;;  %v1793_v18 = vld [vmem:[%s2669_s0 + $0x90] sm:$0xff]  ;;  %v1784_v20 = vld [vmem:[%s2669_s0 + $0x48] sm:$0xff] }
  0x12   :  { %528 = vmatpush.bf16.msra.mxu2 %v1795_v12  ;;  %v1792_v21 = vld [vmem:[%s2669_s0 + $0x88] sm:$0xff]  ;;  %v1775_v22 = vld [vmem:[%s2669_s0] sm:$0xff]  ;;  %v1757_v26 = vld [vmem:[%s2670_s1 + $0x10] sm:$0xf0] }
  0x13   :  { %v1783_v23 = vld [vmem:[%s2669_s0 + $0x40] sm:$0xff]  ;;  %v1511_v27 = vld [vmem:[%s2670_s1 + $0x28] sm:$0xf]  ;;  %v1762_v28 = vld [vmem:[%s2670_s1 + $0x38] sm:$0xf0] }
  0x14   :  { %471 = vmatpush.bf16.msra.mxu0 %v1778_v13  ;;  %1821 = vmatpush.bf16.msra.mxu3 %v1778_v13  ;;  %v1791_v24 = vld [vmem:[%s2669_s0 + $0x80] sm:$0xff]  ;;  %v1493_v30 = vld [vmem:[%s2670_s1 + $0x14] sm:$0xf0]  ;;  %v1499_v31 = vld [vmem:[%s2670_s1 + $0x8] sm:$0xf]  ;;  %v1512_v35 = vor.u32 %v1762_v28, %v1511_v27 }
  0x15   :  { %500 = vmatpush.bf16.msra.mxu1 %v1786_v14  ;;  %v1491_v25 = vld [vmem:[%s2670_s1] sm:$0xf]  ;;  %v1755_v29 = vld [vmem:[%s2670_s1 + $0x4] sm:$0xf]  ;;  %v1758_v32 = vld [vmem:[%s2670_s1 + $0x18] sm:$0xf0] }
  0x16   :  { %529 = vmatpush.bf16.msra.mxu2 %v1794_v15  ;;  %v1806_v33 = vld [vmem:[%s2669_s0 + $0xf8] sm:$0xff]  ;;  %v1492_v34 = vor.u32 %v1757_v26, %v1491_v25  ;;  %v1496_v36 = vor.u32 %v1755_v29, %v1493_v30  ;;  %v1500_v37 = vor.u32 %v1758_v32, %v1499_v31  ;;  %v1805_v38 = vld [vmem:[%s2669_s0 + $0xf0] sm:$0xff]  ;;  %v1804_v41 = vld [vmem:[%s2669_s0 + $0xe8] sm:$0xff] }
  0x17   :  { %v1810_v39 = vld [vmem:[%s2669_s0 + $0x118] sm:$0xff]  ;;  %v1809_v40 = vld [vmem:[%s2669_s0 + $0x110] sm:$0xff]  ;;  %v1808_v42 = vld [vmem:[%s2669_s0 + $0x108] sm:$0xff] }
  0x18   :  { %472 = vmatpush.bf16.msra.mxu0 %v1777_v16  ;;  %1822 = vmatpush.bf16.msra.mxu3 %v1777_v16  ;;  %v1803_v43 = vld [vmem:[%s2669_s0 + $0xe0] sm:$0xff]  ;;  %v1531_v44 = vld [vmem:[%s2670_s1 + $0x50] sm:$0xf]  ;;  %v1760_v46 = vld [vmem:[%s2670_s1 + $0x2c] sm:$0xf] }
  0x19   :  { %501 = vmatpush.bf16.msra.mxu1 %v1785_v17  ;;  %v1767_v45 = vld [vmem:[%s2670_s1 + $0x60] sm:$0xf0]  ;;  %v1513_v47 = vld [vmem:[%s2670_s1 + $0x3c] sm:$0xf0]  ;;  %v1519_v48 = vld [vmem:[%s2670_s1 + $0x30] sm:$0xf] }
  0x1a   :  { %530 = vmatpush.bf16.msra.mxu2 %v1793_v18  ;;  %v1763_v49 = vld [vmem:[%s2670_s1 + $0x40] sm:$0xf0]  ;;  %v1802_v51 = vld [vmem:[%s2669_s0 + $0xd8] sm:$0xff]  ;;  %v1532_v52 = vor.u32 %v1767_v45, %v1531_v44  ;;  %v1516_v53 = vor.u32 %v1760_v46, %v1513_v47  ;;  %v1801_v55 = vld [vmem:[%s2669_s0 + $0xd0] sm:$0xff] }
  0x1b   :  { %v1807_v50 = vld [vmem:[%s2669_s0 + $0x100] sm:$0xff]  ;;  %v1520_v54 = vor.u32 %v1763_v49, %v1519_v48  ;;  %v1507_v56 = vld [vmem:[%s2670_s1 + $0x10] sm:$0xf]  ;;  %v1816_v59 = vld [vmem:[%s2673_s4 + $0x8] sm:$0xff] }
  0x1c   :  { %473 = vmatpush.bf16.msra.mxu0 %v1776_v19  ;;  %1823 = vmatpush.bf16.msra.mxu3 %v1776_v19  ;;  %v1759_v57 = vld [vmem:[%s2670_s1 + $0x20] sm:$0xf0]  ;;  %v1800_v60 = vld [vmem:[%s2669_s0 + $0xc8] sm:$0xff]  ;;  %v1551_v63 = vld [vmem:[%s2670_s1 + $0x78] sm:$0xf] }
  0x1d   :  { %502 = vmatpush.bf16.msra.mxu1 %v1784_v20  ;;  %v1508_v58 = vor.u32 %v1759_v57, %v1507_v56  ;;  %v1815_v61 = vld [vmem:[%s2673_s4] sm:$0xff]  ;;  %v1772_v0 = vld [vmem:[%s2670_s1 + $0x88] sm:$0xf0]  ;;  %v1765_v1 = vld [vmem:[%s2670_s1 + $0x54] sm:$0xf] }
  0x1e   :  { %531 = vmatpush.bf16.msra.mxu2 %v1792_v21  ;;  %v1799_v62 = vld [vmem:[%s2669_s0 + $0xc0] sm:$0xff]  ;;  %v1533_v2 = vld [vmem:[%s2670_s1 + $0x64] sm:$0xf0]  ;;  %v1539_v3 = vld [vmem:[%s2670_s1 + $0x58] sm:$0xf]  ;;  %v1552_v5 = vor.u32 %v1772_v0, %v1551_v63 }
  0x1f   :  { %v1768_v4 = vld [vmem:[%s2670_s1 + $0x68] sm:$0xf0]  ;;  %v1536_v6 = vor.u32 %v1765_v1, %v1533_v2  ;;  %v1527_v8 = vld [vmem:[%s2670_s1 + $0x38] sm:$0xf]  ;;  %v1770_v11 = vld [vmem:[%s2670_s1 + $0x7c] sm:$0xf] }
  0x20   :  { %474 = vmatpush.bf16.msra.mxu0 %v1775_v22  ;;  %1824 = vmatpush.bf16.msra.mxu3 %v1775_v22  ;;  %v1540_v7 = vor.u32 %v1768_v4, %v1539_v3  ;;  %v1764_v9 = vld [vmem:[%s2670_s1 + $0x48] sm:$0xf0]  ;;  %v1501_v13 = vld [vmem:[%s2670_s1 + $0x1c] sm:$0xf0]  ;;  %v1553_v14 = vld [vmem:[%s2670_s1 + $0x8c] sm:$0xf0] }
  0x21   :  { %503 = vmatpush.bf16.msra.mxu1 %v1783_v23  ;;  %v1528_v10 = vor.u32 %v1764_v9, %v1527_v8  ;;  %v1756_v12 = vld [vmem:[%s2670_s1 + $0xc] sm:$0xf]  ;;  %v1559_v15 = vld [vmem:[%s2670_s1 + $0x80] sm:$0xf]  ;;  %v1773_v16 = vld [vmem:[%s2670_s1 + $0x90] sm:$0xf0]  ;;  %v1556_v18 = vor.u32 %v1770_v11, %v1553_v14 }
  0x22   :  { %532 = vmatpush.bf16.msra.mxu2 %v1791_v24  ;;  %v1504_v17 = vor.u32 %v1756_v12, %v1501_v13  ;;  %v1560_v19 = vor.u32 %v1773_v16, %v1559_v15  ;;  %v1547_v20 = vld [vmem:[%s2670_s1 + $0x60] sm:$0xf]  ;;  %v1769_v21 = vld [vmem:[%s2670_s1 + $0x70] sm:$0xf0]  ;;  %v1521_v24 = vld [vmem:[%s2670_s1 + $0x44] sm:$0xf0] }
  0x23   :  { %475 = vmatmul.bf16.vlgmr.msra.gmra.mxu0 %v1492_v34  ;;  %480 = vmatmul.bf16.vlgmr.msra.gmra.mxu3 %v1512_v35  ;;  %v1548_v22 = vor.u32 %v1769_v21, %v1547_v20  ;;  %v1761_v23 = vld [vmem:[%s2670_s1 + $0x34] sm:$0xf]  ;;  %v1811_v26 = vld [vmem:[%s2674_s5] sm:$0xff]  ;;  %v1567_v27 = vld [vmem:[%s2670_s1 + $0x88] sm:$0xf] }
  0x24   :  { %554 = vmatpush.bf16.msrb.mxu3 %v1806_v33  ;;  %504 = vmatmul.bf16.vlgmr.msra.gmra.mxu1 %v1496_v36  ;;  %v1524_v25 = vor.u32 %v1761_v23, %v1521_v24  ;;  %v1774_v28 = vld [vmem:[%s2670_s1 + $0x98] sm:$0xf0]  ;;  %v1541_v31 = vld [vmem:[%s2670_s1 + $0x6c] sm:$0xf0]  ;;  %v1812_v33 = vld [vmem:[%s2674_s5 + $0x8] sm:$0xff] }
  0x25   :  { %533 = vmatmul.bf16.vlgmr.msra.gmra.mxu2 %v1500_v37  ;;  %587 = vmatpush.bf16.msrb.mxu0 %v1810_v39  ;;  %v1568_v29 = vor.u32 %v1774_v28, %v1567_v27  ;;  %v1766_v30 = vld [vmem:[%s2670_s1 + $0x5c] sm:$0xf]  ;;  %v1771_v34 = vld [vmem:[%s2670_s1 + $0x84] sm:$0xf]  ;;  %v1561_v35 = vld [vmem:[%s2670_s1 + $0x94] sm:$0xf0] }
  0x26   :  { %996 = vmatpush.bf16.msrb.mxu1 %v1816_v59  ;;  %v1544_v32 = vor.u32 %v1766_v30, %v1541_v31  ;;  %v1564_v36 = vor.u32 %v1771_v34, %v1561_v35  ;;  %v1813_v37 = vld [vmem:[%s2674_s5 + $0x10] sm:$0xff] }
  0x28   :  { %555 = vmatpush.bf16.msrb.mxu3 %v1805_v38  ;;  %v1814_v38 = vld [vmem:[%s2674_s5 + $0x18] sm:$0xff] }
  0x29   :  { %588 = vmatpush.bf16.msrb.mxu0 %v1809_v40 }
  0x2a   :  { %997 = vmatpush.bf16.msrb.mxu1 %v1815_v61 }
  0x2c   :  { %556 = vmatpush.bf16.msrb.mxu3 %v1804_v41 }
  0x2d   :  { %589 = vmatpush.bf16.msrb.mxu0 %v1808_v42 }
  0x30   :  { %557 = vmatpush.bf16.msrb.mxu3 %v1803_v43 }
  0x31   :  { %590 = vmatpush.bf16.msrb.mxu0 %v1807_v50 }
  0x33   :  { %485 = vmatmul.bf16.gmra.mxu3 %v1532_v52 }
  0x34   :  { %558 = vmatpush.bf16.msrb.mxu3 %v1802_v51  ;;  %509 = vmatmul.bf16.gmra.mxu1 %v1516_v53 }
  0x35   :  { %538 = vmatmul.bf16.gmra.mxu2 %v1520_v54  ;;  %1713 = vmatmul.msk.bf16.vlgmr.msrb.gmra.mxu0 %vm454_vm0, %v1508_v58 }
  0x38   :  { %559 = vmatpush.bf16.msrb.mxu3 %v1801_v55 }
  0x3c   :  { %560 = vmatpush.bf16.msrb.mxu3 %v1800_v60 }
  0x40   :  { %561 = vmatpush.bf16.msrb.mxu3 %v1799_v62 }
  0x43   :  { %490 = vmatmul.bf16.gmra.mxu3 %v1552_v5 }
  0x44   :  { %514 = vmatmul.bf16.gmra.mxu1 %v1536_v6 }
  0x45   :  { %543 = vmatmul.bf16.gmra.mxu2 %v1540_v7  ;;  %1714 = vmatmul.msk.bf16.gmra.mxu0 %vm454_vm0, %v1528_v10 }
  0x53   :  { %562 = vmatmul.bf16.vlgmr.msrb.gmra.mxu3 %v1504_v17 }
  0x54   :  { %519 = vmatmul.bf16.gmra.mxu1 %v1556_v18 }
  0x55   :  { %548 = vmatmul.bf16.gmra.mxu2 %v1560_v19  ;;  %1715 = vmatmul.msk.bf16.gmra.mxu0 %vm454_vm0, %v1548_v22 }
  0x63   :  { %567 = vmatmul.bf16.gmra.mxu3 %v1524_v25 }
  0x64   :  { %1741 = vmatmul.msk.bf16.vlgmr.msrb.gmra.mxu1 %vm977_vm1, %v1811_v26 }
  0x65   :  { %1716 = vmatmul.msk.bf16.gmra.mxu0 %vm454_vm0, %v1568_v29 }
  0x73   :  { %572 = vmatmul.bf16.gmra.mxu3 %v1544_v32 }
  0x74   :  { %1742 = vmatmul.msk.bf16.gmra.mxu1 %vm977_vm1, %v1812_v33 }
  0x83   :  { %577 = vmatmul.bf16.gmra.mxu3 %v1564_v36 }
  0x84   :  { %1743 = vmatmul.msk.bf16.gmra.mxu1 %vm977_vm1, %v1813_v37 }
  0x94   :  { %1744 = vmatmul.msk.bf16.gmra.mxu1 %vm977_vm1, %v1814_v38 }
  0xa0   :  { %v476_v48 = vpop.f32.mrf.mxu0 }
  0xa1   :  { %v505_v39 = vpop.f32.mrf.mxu1 }
  0xa2   :  { %v506_v57 = vadd.f32 %v505_v39, %v476_v48 }
  0xa6   :  { %v481_v40 = vpop.f32.mrf.mxu3 }
  0xa8   :  { %v478_v52 = vpop.f32.mrf.mxu0  ;;  %v534_v54 = vpop.f32.mrf.mxu2 }
  0xa9   :  { %v507_v41 = vpop.f32.mrf.mxu1  ;;  %v535_v58 = vadd.f32 %v534_v54, %v506_v57 }
  0xaa   :  { %v508_v2 = vadd.f32 %v507_v41, %v478_v52 }
  0xae   :  { %v483_v42 = vpop.f32.mrf.mxu3 }
  0xb0   :  { %v536_v0 = vpop.f32.mrf.mxu2 }
  0xb1   :  { %v510_v43 = vpop.f32.mrf.mxu1  ;;  %v537_v5 = vadd.f32 %v536_v0, %v508_v2 }
  0xb2   :  { %v592_v59 = vpop.f32.mrf.mxu0  ;;  %v511_v17 = vadd.f32 %v510_v43, %v481_v40 }
  0xb6   :  { %v2211_v44 = vpop.f32.mrf.mxu3 }
  0xb8   :  { %v539_v15 = vpop.f32.mrf.mxu2 }
  0xb9   :  { %v512_v45 = vpop.f32.mrf.mxu1  ;;  %v540_v19 = vadd.f32 %v539_v15, %v511_v17 }
  0xba   :  { %v594_v9 = vpop.f32.mrf.mxu0  ;;  %v513_v30 = vadd.f32 %v512_v45, %v483_v42 }
  0xbe   :  { %v488_v46 = vpop.f32.mrf.mxu3 }
  0xc0   :  { %v541_v29 = vpop.f32.mrf.mxu2 }
  0xc1   :  { %v2213_v47 = vpop.f32.mrf.mxu1  ;;  %v542_v32 = vadd.f32 %v541_v29, %v513_v30 }
  0xc2   :  { %v597_v23 = vpop.f32.mrf.mxu0  ;;  %v516_v43 = vadd.f32 %v2213_v47, %v2211_v44 }
  0xc6   :  { %v491_v49 = vpop.f32.mrf.mxu3 }
  0xc8   :  { %v544_v42 = vpop.f32.mrf.mxu2 }
  0xc9   :  { %v517_v50 = vpop.f32.mrf.mxu1  ;;  %v545_v48 = vadd.f32 %v544_v42, %v516_v43 }
  0xca   :  { %v2215_v51 = vadd.f32 %v517_v50, %v488_v46  ;;  %v599_v38 = vpop.f32.mrf.mxu0 }
  0xce   :  { %v493_v53 = vpop.f32.mrf.mxu3 }
  0xd1   :  { %v520_v55 = vpop.f32.mrf.mxu1 }
  0xd2   :  { %v2217_v56 = vadd.f32 %v520_v55, %v491_v49  ;;  %v602_v54 = vpop.f32.mrf.mxu0 }
  0xd6   :  { %v563_v60 = vpop.f32.mrf.mxu3 }
  0xd7   :  { %v564_v61 = vadd.f32 %v563_v60, %v535_v58 }
  0xd9   :  { %v2219_v62 = vadd.f32 %v592_v59, %v564_v61  ;;  %v522_v63 = vpop.f32.mrf.mxu1  ;;  %v546_v59 = vpop.f32.mrf.mxu2 }
  0xda   :  { %v2221_v1 = vadd.f32 %v522_v63, %v493_v53  ;;  %v547_v0 = vadd.f32 %v546_v59, %v2215_v51 }
  0xdb   :  { %v629_v3 = vsel %vm628_vm2, %v2219_v62, 0.0  ;;  %v661_v4 = vmul.f32 %v2219_v62, %v2219_v62 }
  0xdc   :  { %630 = vadd.xlane.f32.xlu0 %v629_v3 }
  0xdd   :  { %v669_v6 = vsel %vm628_vm2, %v661_v4, 0.0 }
  0xde   :  { %v565_v7 = vpop.f32.mrf.mxu3  ;;  %670 = vadd.xlane.f32.xlu1 %v669_v6  ;;  %v604_v6 = vpop.f32.mrf.mxu0 }
  0xdf   :  { %v566_v8 = vadd.f32 %v565_v7, %v537_v5 }
  0xe1   :  { %v2228_v10 = vadd.f32 %v594_v9, %v566_v8  ;;  %v2230_v11 = vpop.f32.mrf.mxu1  ;;  %v549_v51 = vpop.f32.mrf.mxu2 }
  0xe2   :  { %v1035_v12 = vsel %vm628_vm2, %v2230_v11, 0.0  ;;  %v1067_v13 = vmul.f32 %v2230_v11, %v2230_v11 }
  0xe3   :  { %v632_v14 = vsel %vm628_vm2, %v2228_v10, 0.0  ;;  %v662_v20 = vmul.f32 %v2228_v10, %v2228_v10 }
  0xe4   :  { %633 = vadd.xlane.f32.xlu2 %v632_v14  ;;  %1036 = vadd.xlane.f32.xlu0 %v1035_v12  ;;  %v1075_v16 = vsel %vm628_vm2, %v1067_v13, 0.0  ;;  %v550_v14 = vadd.f32 %v549_v51, %v2217_v56 }
  0xe5   :  { %v672_v26 = vsel %vm628_vm2, %v662_v20, 0.0 }
  0xe6   :  { %v568_v18 = vpop.f32.mrf.mxu3  ;;  %1076 = vadd.xlane.f32.xlu1 %v1075_v16 }
  0xe7   :  { %v569_v21 = vadd.f32 %v568_v18, %v540_v19  ;;  %v607_v19 = vpop.f32.mrf.mxu0 }
  0xe9   :  { %v2241_v22 = vpop.f32.mrf.mxu1  ;;  %v2248_v27 = vadd.f32 %v597_v23, %v569_v21  ;;  %v551_v23 = vpop.f32.mrf.mxu2 }
  0xea   :  { %v1068_v24 = vmul.f32 %v2241_v22, %v2241_v22  ;;  %v1038_v25 = vsel %vm628_vm2, %v2241_v22, 0.0 }
  0xeb   :  { %v663_v34 = vmul.f32 %v2248_v27, %v2248_v27  ;;  %v635_v37 = vsel %vm628_vm2, %v2248_v27, 0.0 }
  0xec   :  { %1039 = vadd.xlane.f32.xlu2 %v1038_v25  ;;  %673 = vadd.xlane.f32.xlu0 %v672_v26  ;;  %v1078_v28 = vsel %vm628_vm2, %v1068_v24, 0.0  ;;  %v552_v26 = vadd.f32 %v551_v23, %v2221_v1 }
  0xed   :  { %v675_v39 = vsel %vm628_vm2, %v663_v34, 0.0 }
  0xee   :  { %1079 = vadd.xlane.f32.xlu1 %v1078_v28  ;;  %v570_v31 = vpop.f32.mrf.mxu3 }
  0xef   :  { %v571_v36 = vadd.f32 %v570_v31, %v542_v32  ;;  %v609_v34 = vpop.f32.mrf.mxu0 }
  0xf1   :  { %v2251_v33 = vpop.f32.mrf.mxu1  ;;  %v2260_v40 = vadd.f32 %v599_v38, %v571_v36 }
  0xf2   :  { %v1041_v35 = vsel %vm628_vm2, %v2251_v33, 0.0  ;;  %v1069_v41 = vmul.f32 %v2251_v33, %v2251_v33 }
  0xf3   :  { %v638_v50 = vsel %vm628_vm2, %v2260_v40, 0.0  ;;  %v664_v44 = vmul.f32 %v2260_v40, %v2260_v40 }
  0xf4   :  { %636 = vadd.xlane.f32.xlu2 %v635_v37  ;;  %1042 = vadd.xlane.f32.xlu0 %v1041_v35  ;;  %v1081_v49 = vsel %vm628_vm2, %v1069_v41, 0.0 }
  0xf5   :  { %v678_v57 = vsel %vm628_vm2, %v664_v44, 0.0 }
  0xf6   :  { %676 = vadd.xlane.f32.xlu1 %v675_v39  ;;  %v573_v45 = vpop.f32.mrf.mxu3 }
  0xf7   :  { %v574_v52 = vadd.f32 %v573_v45, %v545_v48 }
  0xf9   :  { %v2266_v46 = vpop.f32.mrf.mxu1  ;;  %v2277_v55 = vadd.f32 %v602_v54, %v574_v52 }
  0xfa   :  { %v1044_v53 = vsel %vm628_vm2, %v2266_v46, 0.0  ;;  %v1070_v47 = vmul.f32 %v2266_v46, %v2266_v46 }
  0xfb   :  { %v641_v60 = vsel %vm628_vm2, %v2277_v55, 0.0  ;;  %v665_v2 = vmul.f32 %v2277_v55, %v2277_v55 }
  0xfc   :  { %1082 = vadd.xlane.f32.xlu2 %v1081_v49  ;;  %639 = vadd.xlane.f32.xlu0 %v638_v50  ;;  %v1084_v58 = vsel %vm628_vm2, %v1070_v47, 0.0  ;;  %v1892_v49 = vmov 0  }
  0xfd   :  { %v681_v7 = vsel %vm628_vm2, %v665_v2, 0.0  ;;  %1827 = vset.pattern.permute.xlu2 %v1892_v49  ;;  %1828 = vset.pattern.permute.xlu1 %v1892_v49 }
  0xfe   :  { %1045 = vadd.xlane.f32.xlu1 %v1044_v53  ;;  %v575_v61 = vpop.f32.mrf.mxu3  ;;  %1829 = vset.pattern.permute.xlu0 %v1892_v49 }
  0xff   :  { %v576_v4 = vadd.f32 %v575_v61, %v547_v0 }
 0x101   :  { %v2283_v63 = vpop.f32.mrf.mxu1  ;;  %v2294_v9 = vadd.f32 %v604_v6, %v576_v4 }
 0x102   :  { %v1071_v3 = vmul.f32 %v2283_v63, %v2283_v63  ;;  %v1047_v5 = vsel %vm628_vm2, %v2283_v63, 0.0 }
 0x103   :  { %v666_v15 = vmul.f32 %v2294_v9, %v2294_v9  ;;  %v644_v17 = vsel %vm628_vm2, %v2294_v9, 0.0 }
 0x104   :  { %679 = vadd.xlane.f32.xlu2 %v678_v57  ;;  %1085 = vadd.xlane.f32.xlu0 %v1084_v58  ;;  %v1087_v8 = vsel %vm628_vm2, %v1071_v3, 0.0 }
 0x105   :  { %v684_v20 = vsel %vm628_vm2, %v666_v15, 0.0 }
 0x106   :  { %642 = vadd.xlane.f32.xlu1 %v641_v60  ;;  %v578_v12 = vpop.f32.mrf.mxu3 }
 0x107   :  { %v579_v16 = vadd.f32 %v578_v12, %v550_v14 }
 0x109   :  { %v2296_v13 = vpop.f32.mrf.mxu1  ;;  %v2306_v21 = vadd.f32 %v607_v19, %v579_v16 }
 0x10a   :  { %v1050_v18 = vsel %vm628_vm2, %v2296_v13, 0.0  ;;  %v1072_v56 = vmul.f32 %v2296_v13, %v2296_v13 }
 0x10b   :  { %v647_v29 = vsel %vm628_vm2, %v2306_v21, 0.0  ;;  %v667_v35 = vmul.f32 %v2306_v21, %v2306_v21 }
 0x10c   :  { %1048 = vadd.xlane.f32.xlu2 %v1047_v5  ;;  %682 = vadd.xlane.f32.xlu0 %v681_v7  ;;  %v1090_v28 = vsel %vm628_vm2, %v1072_v56, 0.0 }
 0x10d   :  { %v687_v37 = vsel %vm628_vm2, %v667_v35, 0.0 }
 0x10e   :  { %1088 = vadd.xlane.f32.xlu1 %v1087_v8  ;;  %v580_v24 = vpop.f32.mrf.mxu3 }
 0x10f   :  { %v581_v31 = vadd.f32 %v580_v24, %v552_v26 }
 0x111   :  { %v2310_v25 = vpop.f32.mrf.mxu1  ;;  %v2322_v1 = vadd.f32 %v609_v34, %v581_v31 }
 0x112   :  { %v1053_v30 = vsel %vm628_vm2, %v2310_v25, 0.0  ;;  %v1073_v32 = vmul.f32 %v2310_v25, %v2310_v25 }
 0x113   :  { %v650_v38 = vsel %vm628_vm2, %v2322_v1, 0.0  ;;  %v668_v41 = vmul.f32 %v2322_v1, %v2322_v1 }
 0x114   :  { %645 = vadd.xlane.f32.xlu2 %v644_v17  ;;  %1051 = vadd.xlane.f32.xlu0 %v1050_v18  ;;  %v1093_v36 = vsel %vm628_vm2, %v1073_v32, 0.0 }
 0x115   :  { %v690_v45 = vsel %vm628_vm2, %v668_v41, 0.0  ;;  %v612_v41 = vld [vmem:[%s2671_s2] sm:$0xff] }
 0x116   :  { %685 = vadd.xlane.f32.xlu1 %v684_v20 }
 0x119   :  { %v2328_v39 = vpop.f32.mrf.mxu1 }
 0x11a   :  { %v1074_v42 = vmul.f32 %v2328_v39, %v2328_v39  ;;  %v1056_v43 = vsel %vm628_vm2, %v2328_v39, 0.0 }
 0x11c   :  { %1091 = vadd.xlane.f32.xlu2 %v1090_v28  ;;  %648 = vadd.xlane.f32.xlu0 %v647_v29  ;;  %v1096_v48 = vsel %vm628_vm2, %v1074_v42, 0.0 }
 0x11e   :  { %1054 = vadd.xlane.f32.xlu1 %v1053_v30 }
 0x124   :  { %688 = vadd.xlane.f32.xlu2 %v687_v37  ;;  %1094 = vadd.xlane.f32.xlu0 %v1093_v36 }
 0x126   :  { %651 = vadd.xlane.f32.xlu1 %v650_v38 }
 0x12c   :  { %1057 = vadd.xlane.f32.xlu2 %v1056_v43  ;;  %691 = vadd.xlane.f32.xlu0 %v690_v45 }
 0x12e   :  { %1097 = vadd.xlane.f32.xlu1 %v1096_v48 }
 0x14f   :  { %v631_v50 = vpop.xlane.xlu0 %630 }
 0x150   :  { %v653_v52 = vmul.f32 0.125, %v631_v50 }
 0x151   :  { %v671_v53 = vpop.xlane.xlu1 %670 }
 0x152   :  { %v701_v54 = vmul.f32 %v653_v52, %v653_v52  ;;  %v693_v44 = vmul.f32 0.125, %v671_v53 }
 0x154   :  { %v709_v47 = vsub.f32 %v693_v44, %v701_v54 }
 0x156   :  { %v717_v57 = vmax.f32 %v709_v47, 0.0  ;;  %v620_v47 = vld [vmem:[%s2672_s3] sm:$0xff] }
 0x157   :  { %v634_v58 = vpop.xlane.xlu2 %633  ;;  %v1037_v59 = vpop.xlane.xlu0 %1036 }
 0x158   :  { %v725_v60 = vadd.f32 1e-05, %v717_v57  ;;  %v2338_v61 = vmul.f32 0.125, %v1037_v59  ;;  %v2342_v4 = vmul.f32 0.125, %v634_v58 }
 0x159   :  { %v1077_v0 = vpop.xlane.xlu1 %1076 }
 0x15a   :  { %1830 = vrsqrt.f32 %v725_v60  ;;  %v1107_v2 = vmul.f32 %v2338_v61, %v2338_v61  ;;  %v1099_v3 = vmul.f32 0.125, %v1077_v0  ;;  %v702_v12 = vmul.f32 %v2342_v4, %v2342_v4 }
 0x15b   :  { %vm739_vm4 = vweird.f32 %v725_v60 }
 0x15c   :  { %v1115_v5 = vsub.f32 %v1099_v3, %v1107_v2 }
 0x15e   :  { %v1123_v6 = vmax.f32 %v1115_v5, 0.0 }
 0x15f   :  { %v1040_v7 = vpop.xlane.xlu2 %1039  ;;  %v674_v8 = vpop.xlane.xlu0 %673 }
 0x160   :  { %v1831_v51 = vpop.eup %1830  ;;  %v2346_v14 = vmul.f32 0.125, %v1040_v7  ;;  %v694_v15 = vmul.f32 0.125, %v674_v8  ;;  %v1131_v17 = vadd.f32 1e-05, %v1123_v6 }
 0x161   :  { %v734_v16 = vmul.f32 %v1831_v51, %v725_v60  ;;  %v1080_v18 = vpop.xlane.xlu1 %1079  ;;  %vm740_vm3 = vweird.f32 %v1831_v51 }
 0x162   :  { %v1108_v19 = vmul.f32 %v2346_v14, %v2346_v14  ;;  %v710_v20 = vsub.f32 %v694_v15, %v702_v12  ;;  %v1100_v56 = vmul.f32 0.125, %v1080_v18  ;;  %1832 = vrsqrt.f32 %v1131_v17  ;;  %vm741_vm5 = vmor %vm739_vm4, %vm740_vm3 }
 0x163   :  { %v735_v23 = vmul.f32 %v1831_v51, %v734_v16  ;;  %vm1145_vm7 = vweird.f32 %v1131_v17 }
 0x164   :  { %v718_v24 = vmax.f32 %v710_v20, 0.0  ;;  %v1116_v26 = vsub.f32 %v1100_v56, %v1108_v19  ;;  %v1019_v19 = vld [vmem:[%s2675_s6] sm:$0xff] }
 0x165   :  { %v736_v28 = vmul.f32 0.5, %v735_v23 }
 0x166   :  { %v2350_v29 = vadd.f32 1e-05, %v718_v24  ;;  %v1124_v30 = vmax.f32 %v1116_v26, 0.0 }
 0x167   :  { %v737_v31 = vsub.f32 1.5, %v736_v28  ;;  %v637_v32 = vpop.xlane.xlu2 %636  ;;  %v1043_v34 = vpop.xlane.xlu0 %1042 }
 0x168   :  { %1834 = vrsqrt.f32 %v2350_v29  ;;  %v2353_v35 = vadd.f32 1e-05, %v1124_v30  ;;  %v2355_v36 = vmul.f32 0.125, %v637_v32  ;;  %v1833_v37 = vpop.eup %1832  ;;  %v2363_v48 = vmul.f32 0.125, %v1043_v34 }
 0x169   :  { %v677_v38 = vpop.xlane.xlu1 %676  ;;  %v738_v42 = vmul.f32 %v1831_v51, %v737_v31  ;;  %v1140_v43 = vmul.f32 %v1833_v37, %v1131_v17  ;;  %vm1146_vm6 = vweird.f32 %v1833_v37  ;;  %vm749_vm10 = vweird.f32 %v2350_v29 }
 0x16a   :  { %1836 = vrsqrt.f32 %v2353_v35  ;;  %v703_v45 = vmul.f32 %v2355_v36, %v2355_v36  ;;  %v695_v49 = vmul.f32 0.125, %v677_v38  ;;  %v1109_v0 = vmul.f32 %v2363_v48, %v2363_v48  ;;  %vm1147_vm8 = vmor %vm1145_vm7, %vm1146_vm6 }
 0x16b   :  { %v742_v50 = vsel %vm741_vm5, %v1831_v51, %v738_v42  ;;  %v1141_v53 = vmul.f32 %v1833_v37, %v1140_v43  ;;  %vm1155_vm13 = vweird.f32 %v2353_v35 }
 0x16c   :  { %v813_v54 = vmul.f32 %v742_v50, %v612_v41  ;;  %v711_v44 = vsub.f32 %v695_v49, %v703_v45 }
 0x16d   :  { %v1142_v58 = vmul.f32 0.5, %v1141_v53 }
 0x16e   :  { %v1835_v57 = vpop.eup %1834  ;;  %823 = vperm.xlu2 %1827, %v813_v54   ;;  %v869_v59 = vmul.f32 %v813_v54, %v653_v52  ;;  %v719_v2 = vmax.f32 %v711_v44, 0.0 }
 0x16f   :  { %v744_v60 = vmul.f32 %v1835_v57, %v2350_v29  ;;  %v1083_v3 = vpop.xlane.xlu2 %1082  ;;  %v640_v5 = vpop.xlane.xlu0 %639  ;;  %v1143_v7 = vsub.f32 1.5, %v1142_v58  ;;  %vm750_vm9 = vweird.f32 %v1835_v57  ;;  %v613_v29 = vld [vmem:[%s2671_s2 + $0x8] sm:$0xff] }
 0x170   :  { %v1837_v6 = vpop.eup %1836  ;;  %v1101_v8 = vmul.f32 0.125, %v1083_v3  ;;  %v877_v51 = vsub.f32 %v620_v47, %v869_v59  ;;  %v2372_v16 = vadd.f32 1e-05, %v719_v2  ;;  %v2378_v24 = vmul.f32 0.125, %v640_v5  ;;  %vm751_vm12 = vmor %vm749_vm10, %vm750_vm9 }
 0x171   :  { %v745_v12 = vmul.f32 %v1835_v57, %v744_v60  ;;  %v1150_v15 = vmul.f32 %v1837_v6, %v2353_v35  ;;  %v1046_v18 = vpop.xlane.xlu1 %1045  ;;  %v1144_v20 = vmul.f32 %v1833_v37, %v1143_v7  ;;  %vm1156_vm11 = vweird.f32 %v1837_v6 }
 0x172   :  { %v1117_v52 = vsub.f32 %v1101_v8, %v1109_v0  ;;  %887 = vperm.xlu1 %1828, %v877_v51   ;;  %1838 = vrsqrt.f32 %v2372_v16  ;;  %v2380_v28 = vmul.f32 0.125, %v1046_v18  ;;  %v704_v41 = vmul.f32 %v2378_v24, %v2378_v24  ;;  %v1020_v0 = vld [vmem:[%s2675_s6 + $0x8] sm:$0xff]  ;;  %vm1157_vm14 = vmor %vm1155_vm13, %vm1156_vm11 }
 0x173   :  { %v746_v56 = vmul.f32 0.5, %v745_v12  ;;  %v1151_v23 = vmul.f32 %v1837_v6, %v1150_v15  ;;  %v1148_v30 = vsel %vm1147_vm8, %v1833_v37, %v1144_v20  ;;  %vm759_vm1 = vweird.f32 %v2372_v16 }
 0x174   :  { %v1125_v26 = vmax.f32 %v1117_v52, 0.0  ;;  %v1219_v32 = vmul.f32 %v1148_v30, %v1019_v19  ;;  %v1110_v37 = vmul.f32 %v2380_v28, %v2380_v28 }
 0x175   :  { %v747_v31 = vsub.f32 1.5, %v746_v56  ;;  %v1152_v17 = vmul.f32 0.5, %v1151_v23 }
 0x176   :  { %v2383_v34 = vadd.f32 1e-05, %v1125_v26  ;;  %1229 = vperm.xlu0 %1829, %v1219_v32   ;;  %v1275_v20 = vmul.f32 %v1219_v32, %v2338_v61  ;;  %v1027_v26 = vld [vmem:[%s2676_s7] sm:$0xff] }
 0x177   :  { %v1153_v38 = vsub.f32 1.5, %v1152_v17  ;;  %v680_v42 = vpop.xlane.xlu2 %679  ;;  %v1086_v43 = vpop.xlane.xlu0 %1085  ;;  %v748_v45 = vmul.f32 %v1835_v57, %v747_v31 }
 0x178   :  { %1840 = vrsqrt.f32 %v2383_v34  ;;  %v696_v49 = vmul.f32 0.125, %v680_v42  ;;  %v1102_v50 = vmul.f32 0.125, %v1086_v43  ;;  %v1839_v53 = vpop.eup %1838  ;;  %v614_v42 = vld [vmem:[%s2671_s2 + $0x10] sm:$0xff]  ;;  %vm1165_vm5 = vweird.f32 %v2383_v34 }
 0x179   :  { %v643_v54 = vpop.xlane.xlu1 %642  ;;  %v752_v44 = vsel %vm751_vm12, %v1835_v57, %v748_v45  ;;  %v1154_v47 = vmul.f32 %v1837_v6, %v1153_v38  ;;  %v754_v58 = vmul.f32 %v1839_v53, %v2372_v16  ;;  %vm760_vm15 = vweird.f32 %v1839_v53  ;;  %v1028_v38 = vld [vmem:[%s2676_s7 + $0x8] sm:$0xff] }
 0x17a   :  { %v712_v59 = vsub.f32 %v696_v49, %v704_v41  ;;  %v1118_v60 = vsub.f32 %v1102_v50, %v1110_v37  ;;  %v814_v2 = vmul.f32 %v752_v44, %v613_v29  ;;  %v2400_v51 = vmul.f32 0.125, %v643_v54  ;;  %vm761_vm3 = vmor %vm759_vm1, %vm760_vm15 }
 0x17b   :  { %v1158_v3 = vsel %vm1157_vm14, %v1837_v6, %v1154_v47  ;;  %v755_v5 = vmul.f32 %v1839_v53, %v754_v58  ;;  %v1283_v49 = vsub.f32 %v1027_v26, %v1275_v20 }
 0x17c   :  { %v720_v7 = vmax.f32 %v712_v59, 0.0  ;;  %v1126_v8 = vmax.f32 %v1118_v60, 0.0  ;;  %828 = vperm.xlu2 %1827, %v814_v2   ;;  %v1220_v35 = vmul.f32 %v1158_v3, %v1020_v0  ;;  %v705_v23 = vmul.f32 %v2400_v51, %v2400_v51 }
 0x17d   :  { %v756_v12 = vmul.f32 0.5, %v755_v5  ;;  %v870_v59 = vmul.f32 %v814_v2, %v2342_v4  ;;  %v621_v2 = vld [vmem:[%s2672_s3 + $0x8] sm:$0xff] }
 0x17e   :  { %v2402_v57 = vpop.eup %1840  ;;  %v2404_v15 = vadd.f32 1e-05, %v720_v7  ;;  %v2406_v18 = vadd.f32 1e-05, %v1126_v8  ;;  %1234 = vperm.xlu1 %1828, %v1220_v35   ;;  %v1276_v30 = vmul.f32 %v1220_v35, %v2346_v14 }
 0x17f   :  { %v1160_v52 = vmul.f32 %v2402_v57, %v2383_v34  ;;  %v1049_v19 = vpop.xlane.xlu2 %1048  ;;  %v683_v6 = vpop.xlane.xlu0 %682  ;;  %v757_v56 = vsub.f32 1.5, %v756_v12  ;;  %vm1166_vm4 = vweird.f32 %v2402_v57 }
 0x180   :  { %1842 = vrsqrt.f32 %v2404_v15  ;;  %v2420_v17 = vmul.f32 0.125, %v1049_v19  ;;  %v697_v61 = vmul.f32 0.125, %v683_v6  ;;  %v1284_v50 = vsub.f32 %v1028_v38, %v1276_v30  ;;  %v1021_v6 = vld [vmem:[%s2675_s6 + $0x10] sm:$0xff]  ;;  %vm1167_vm6 = vmor %vm1165_vm5, %vm1166_vm4 }
 0x181   :  { %v1161_v31 = vmul.f32 %v2402_v57, %v1160_v52  ;;  %1844 = vrsqrt.f32 %v2406_v18  ;;  %v1089_v32 = vpop.xlane.xlu1 %1088  ;;  %v758_v14 = vmul.f32 %v1839_v53, %v757_v56  ;;  %v878_v30 = vsub.f32 %v621_v2, %v870_v59  ;;  %v1022_v2 = vld [vmem:[%s2675_s6 + $0x18] sm:$0xff]  ;;  %v1023_v59 = vld [vmem:[%s2675_s6 + $0x20] sm:$0xff] }
 0x182   :  { %v1103_v41 = vmul.f32 0.125, %v1089_v32  ;;  %v1111_v45 = vmul.f32 %v2420_v17, %v2420_v17  ;;  %v713_v37 = vsub.f32 %v697_v61, %v705_v23  ;;  %v622_v23 = vld [vmem:[%s2672_s3 + $0x10] sm:$0xff]  ;;  %vm769_vm8 = vweird.f32 %v2404_v15 }
 0x183   :  { %v1162_v43 = vmul.f32 0.5, %v1161_v31  ;;  %v762_v29 = vsel %vm761_vm3, %v1839_v53, %v758_v14  ;;  %vm1175_vm11 = vweird.f32 %v2406_v18 }
 0x184   :  { %v721_v44 = vmax.f32 %v713_v37, 0.0  ;;  %v1119_v47 = vsub.f32 %v1103_v41, %v1111_v45  ;;  %1293 = vperm.xlu2 %1827, %v1283_v49   ;;  %v815_v16 = vmul.f32 %v762_v29, %v614_v42 }
 0x185   :  { %v1163_v54 = vsub.f32 1.5, %v1162_v43  ;;  %v1029_v43 = vld [vmem:[%s2676_s7 + $0x10] sm:$0xff] }
 0x186   :  { %v2432_v58 = vpop.eup %1842  ;;  %v2441_v5 = vadd.f32 1e-05, %v721_v44  ;;  %1298 = vperm.xlu1 %1828, %v1284_v50   ;;  %833 = vperm.xlu0 %1829, %v815_v16   ;;  %v1127_v35 = vmax.f32 %v1119_v47, 0.0  ;;  %v871_v19 = vmul.f32 %v815_v16, %v2355_v36 }
 0x187   :  { %v2435_v60 = vpop.eup %1844  ;;  %v1164_v0 = vmul.f32 %v2402_v57, %v1163_v54  ;;  %v764_v3 = vmul.f32 %v2432_v58, %v2404_v15  ;;  %v646_v53 = vpop.xlane.xlu2 %645  ;;  %vm770_vm7 = vweird.f32 %v2432_v58 }
 0x188   :  { %v1052_v7 = vpop.xlane.xlu0 %1051  ;;  %v1170_v8 = vmul.f32 %v2435_v60, %v2406_v18  ;;  %v2445_v4 = vmul.f32 0.125, %v646_v53  ;;  %1846 = vrsqrt.f32 %v2441_v5  ;;  %v2460_v56 = vadd.f32 1e-05, %v1127_v35  ;;  %vm2487_vm10 = vmor %vm769_vm8, %vm770_vm7  ;;  %v615_v18 = vld [vmem:[%s2671_s2 + $0x18] sm:$0xff] }
 0x189   :  { %v765_v12 = vmul.f32 %v2432_v58, %v764_v3  ;;  %v686_v52 = vpop.xlane.xlu1 %685  ;;  %v1168_v31 = vsel %vm1167_vm6, %v2402_v57, %v1164_v0  ;;  %v2469_v32 = vmul.f32 0.125, %v1052_v7  ;;  %v879_v14 = vsub.f32 %v622_v23, %v871_v19 }
 0x18a   :  { %v1171_v20 = vmul.f32 %v2435_v60, %v1170_v8  ;;  %v706_v34 = vmul.f32 %v2445_v4, %v2445_v4  ;;  %v698_v36 = vmul.f32 0.125, %v686_v52  ;;  %1848 = vrsqrt.f32 %v2460_v56 }
 0x18b   :  { %v766_v26 = vmul.f32 0.5, %v765_v12  ;;  %v1221_v38 = vmul.f32 %v1168_v31, %v1021_v6  ;;  %vm1176_vm9 = vweird.f32 %v2435_v60  ;;  %v1112_v47 = vmul.f32 %v2469_v32, %v2469_v32 }
 0x18c   :  { %v1172_v61 = vmul.f32 0.5, %v1171_v20  ;;  %v714_v42 = vsub.f32 %v698_v36, %v706_v34  ;;  %892 = vperm.xlu2 %1827, %v878_v30   ;;  %vm1177_vm12 = vmor %vm1175_vm11, %vm1176_vm9  ;;  %vm779_vm13 = vweird.f32 %v2441_v5  ;;  %vm1185_vm3 = vweird.f32 %v2460_v56 }
 0x18d   :  { %v767_v41 = vsub.f32 1.5, %v766_v26  ;;  %v1277_v37 = vmul.f32 %v1221_v38, %v2363_v48 }
 0x18e   :  { %v1173_v45 = vsub.f32 1.5, %v1172_v61  ;;  %v2476_v57 = vpop.eup %1846  ;;  %v722_v50 = vmax.f32 %v714_v42, 0.0  ;;  %897 = vperm.xlu1 %1828, %v879_v14   ;;  %v623_v61 = vld [vmem:[%s2672_s3 + $0x18] sm:$0xff] }
 0x18f   :  { %v768_v49 = vmul.f32 %v2432_v58, %v767_v41  ;;  %v1092_v29 = vpop.xlane.xlu2 %1091  ;;  %v774_v44 = vmul.f32 %v2476_v57, %v2441_v5  ;;  %v1285_v48 = vsub.f32 %v1029_v43, %v1277_v37  ;;  %vm780_vm14 = vweird.f32 %v2476_v57 }
 0x190   :  { %v649_v54 = vpop.xlane.xlu0 %648  ;;  %v1104_v16 = vmul.f32 0.125, %v1092_v29  ;;  %v2492_v15 = vadd.f32 1e-05, %v722_v50  ;;  %v1174_v3 = vmul.f32 %v2435_v60, %v1173_v45  ;;  %v2495_v53 = vpop.eup %1848  ;;  %vm781_vm1 = vmor %vm779_vm13, %vm780_vm14 }
 0x191   :  { %v1055_v0 = vpop.xlane.xlu1 %1054  ;;  %v775_v7 = vmul.f32 %v2476_v57, %v774_v44  ;;  %1303 = vperm.xlu0 %1829, %v1285_v48   ;;  %v772_v12 = vsel %vm2487_vm10, %v2432_v58, %v768_v49  ;;  %v1180_v52 = vmul.f32 %v2495_v53, %v2460_v56  ;;  %v2515_v34 = vmul.f32 0.125, %v649_v54 }
 0x192   :  { %v1120_v8 = vsub.f32 %v1104_v16, %v1112_v47  ;;  %v2498_v35 = vmul.f32 0.125, %v1055_v0  ;;  %1850 = vrsqrt.f32 %v2492_v15  ;;  %v1178_v19 = vsel %vm1177_vm12, %v2435_v60, %v1174_v3  ;;  %v616_v16 = vld [vmem:[%s2671_s2 + $0x20] sm:$0xff] }
 0x193   :  { %v776_v6 = vmul.f32 0.5, %v775_v7  ;;  %v1181_v23 = vmul.f32 %v2495_v53, %v1180_v52  ;;  %v1222_v26 = vmul.f32 %v1178_v19, %v1022_v2  ;;  %v816_v36 = vmul.f32 %v772_v12, %v615_v18 }
 0x194   :  { %v1128_v20 = vmax.f32 %v1120_v8, 0.0  ;;  %1239 = vperm.xlu2 %1827, %v1221_v38   ;;  %v1113_v58 = vmul.f32 %v2498_v35, %v2498_v35  ;;  %v707_v14 = vmul.f32 %v2515_v34, %v2515_v34  ;;  %vm1186_vm15 = vweird.f32 %v2495_v53 }
 0x195   :  { %v777_v30 = vsub.f32 1.5, %v776_v6  ;;  %v1182_v60 = vmul.f32 0.5, %v1181_v23  ;;  %v872_v38 = vmul.f32 %v816_v36, %v2378_v24  ;;  %vm1187_vm4 = vmor %vm1185_vm3, %vm1186_vm15  ;;  %vm789_vm6 = vweird.f32 %v2492_v15 }
 0x196   :  { %v2518_v31 = vadd.f32 1e-05, %v1128_v20  ;;  %1244 = vperm.xlu1 %1828, %v1222_v26  }
 0x197   :  { %v689_v41 = vpop.xlane.xlu2 %688  ;;  %v1183_v49 = vsub.f32 1.5, %v1182_v60  ;;  %v880_v50 = vsub.f32 %v623_v61, %v872_v38  ;;  %v778_v54 = vmul.f32 %v2476_v57, %v777_v30  ;;  %v1278_v30 = vmul.f32 %v1222_v26, %v2380_v28  ;;  %v1031_v28 = vld [vmem:[%s2676_s7 + $0x20] sm:$0xff] }
 0x198   :  { %v1095_v42 = vpop.xlane.xlu0 %1094  ;;  %1852 = vrsqrt.f32 %v2518_v31  ;;  %v699_v43 = vmul.f32 0.125, %v689_v41  ;;  %v2531_v37 = vpop.eup %1850  ;;  %vm1195_vm9 = vweird.f32 %v2518_v31 }
 0x199   :  { %v1105_v45 = vmul.f32 0.125, %v1095_v42  ;;  %v652_v29 = vpop.xlane.xlu1 %651  ;;  %v784_v24 = vmul.f32 %v2531_v37, %v2492_v15  ;;  %902 = vperm.xlu0 %1829, %v880_v50   ;;  %v782_v48 = vsel %vm781_vm1, %v2476_v57, %v778_v54  ;;  %v1184_v0 = vmul.f32 %v2495_v53, %v1183_v49 }
 0x19a   :  { %v715_v44 = vsub.f32 %v699_v43, %v707_v14  ;;  %v2551_v2 = vmul.f32 0.125, %v652_v29  ;;  %v817_v5 = vmul.f32 %v782_v48, %v616_v16  ;;  %vm790_vm5 = vweird.f32 %v2531_v37  ;;  %v617_v14 = vld [vmem:[%s2671_s2 + $0x28] sm:$0xff] }
 0x19b   :  { %v1121_v47 = vsub.f32 %v1105_v45, %v1113_v58  ;;  %v785_v3 = vmul.f32 %v2531_v37, %v784_v24  ;;  %v1188_v56 = vsel %vm1187_vm4, %v2495_v53, %v1184_v0  ;;  %vm791_vm7 = vmor %vm789_vm6, %vm790_vm5 }
 0x19c   :  { %v723_v7 = vmax.f32 %v715_v44, 0.0  ;;  %838 = vperm.xlu2 %1827, %v816_v36   ;;  %v1223_v19 = vmul.f32 %v1188_v56, %v1023_v59  ;;  %v708_v53 = vmul.f32 %v2551_v2, %v2551_v2  ;;  %v1030_v36 = vld [vmem:[%s2676_s7 + $0x18] sm:$0xff] }
 0x19d   :  { %v1129_v8 = vmax.f32 %v1121_v47, 0.0  ;;  %v786_v18 = vmul.f32 0.5, %v785_v3  ;;  %v1286_v29 = vsub.f32 %v1030_v36, %v1278_v30  ;;  %v1032_v36 = vld [vmem:[%s2676_s7 + $0x28] sm:$0xff] }
 0x19e   :  { %v1853_v57 = vpop.eup %1852  ;;  %v2556_v12 = vadd.f32 1e-05, %v723_v7  ;;  %843 = vperm.xlu1 %1828, %v817_v5   ;;  %v1279_v38 = vmul.f32 %v1223_v19, %v2420_v17  ;;  %v873_v7 = vmul.f32 %v817_v5, %v2400_v51  ;;  %v625_v5 = vld [vmem:[%s2672_s3 + $0x28] sm:$0xff] }
 0x19f   :  { %v2558_v52 = vadd.f32 1e-05, %v1129_v8  ;;  %v1190_v6 = vmul.f32 %v1853_v57, %v2518_v31  ;;  %v1058_v20 = vpop.xlane.xlu2 %1057  ;;  %v787_v58 = vsub.f32 1.5, %v786_v18  ;;  %vm1196_vm8 = vweird.f32 %v1853_v57  ;;  %v624_v31 = vld [vmem:[%s2672_s3 + $0x20] sm:$0xff] }
 0x1a0   :  { %v692_v23 = vpop.xlane.xlu0 %691  ;;  %1854 = vrsqrt.f32 %v2556_v12  ;;  %v2570_v60 = vmul.f32 0.125, %v1058_v20  ;;  %v1287_v15 = vsub.f32 %v1031_v28, %v1279_v38  ;;  %vm1197_vm10 = vmor %vm1195_vm9, %vm1196_vm8  ;;  %vm799_vm13 = vweird.f32 %v2556_v12  ;;  %v618_v38 = vld [vmem:[%s2671_s2 + $0x30] sm:$0xff] }
 0x1a1   :  { %v1191_v61 = vmul.f32 %v1853_v57, %v1190_v6  ;;  %1856 = vrsqrt.f32 %v2558_v52  ;;  %v700_v41 = vmul.f32 0.125, %v692_v23  ;;  %v1098_v42 = vpop.xlane.xlu1 %1097  ;;  %v788_v43 = vmul.f32 %v2531_v37, %v787_v58  ;;  %1249 = vperm.xlu0 %1829, %v1223_v19  }
 0x1a2   :  { %v1106_v26 = vmul.f32 0.125, %v1098_v42  ;;  %v1114_v49 = vmul.f32 %v2570_v60, %v2570_v60  ;;  %v881_v58 = vsub.f32 %v624_v31, %v873_v7  ;;  %vm1205_vm15 = vweird.f32 %v2558_v52  ;;  %v619_v7 = vld [vmem:[%s2671_s2 + $0x38] sm:$0xff] }
 0x1a3   :  { %v1192_v45 = vmul.f32 0.5, %v1191_v61  ;;  %v716_v50 = vsub.f32 %v700_v41, %v708_v53  ;;  %v792_v17 = vsel %vm791_vm7, %v2531_v37, %v788_v43  ;;  %v1024_v37 = vld [vmem:[%s2675_s6 + $0x28] sm:$0xff] }
 0x1a4   :  { %v1122_v44 = vsub.f32 %v1106_v26, %v1114_v49  ;;  %1308 = vperm.xlu2 %1827, %v1286_v29   ;;  %v818_v47 = vmul.f32 %v792_v17, %v617_v14 }
 0x1a5   :  { %v1193_v54 = vsub.f32 1.5, %v1192_v45  ;;  %v724_v24 = vmax.f32 %v716_v50, 0.0  ;;  %v1025_v50 = vld [vmem:[%s2675_s6 + $0x30] sm:$0xff] }
 0x1a6   :  { %v1855_v16 = vpop.eup %1854  ;;  %1313 = vperm.xlu1 %1828, %v1287_v15   ;;  %v1130_v56 = vmax.f32 %v1122_v44, 0.0  ;;  %v874_v19 = vmul.f32 %v818_v47, %v2445_v4 }
 0x1a7   :  { %v1857_v48 = vpop.eup %1856  ;;  %v1194_v59 = vmul.f32 %v1853_v57, %v1193_v54  ;;  %v794_v0 = vmul.f32 %v1855_v16, %v2556_v12  ;;  %v732_v3 = vadd.f32 1e-05, %v724_v24  ;;  %vm800_vm11 = vweird.f32 %v1855_v16  ;;  %v626_v54 = vld [vmem:[%s2672_s3 + $0x30] sm:$0xff] }
 0x1a8   :  { %v1200_v8 = vmul.f32 %v1857_v48, %v2558_v52  ;;  %v1138_v51 = vadd.f32 1e-05, %v1130_v56  ;;  %vm1206_vm12 = vweird.f32 %v1857_v48  ;;  %vm801_vm14 = vmor %vm799_vm13, %vm800_vm11 }
 0x1a9   :  { %v795_v18 = vmul.f32 %v1855_v16, %v794_v0  ;;  %1858 = vrsqrt.f32 %v732_v3  ;;  %v1198_v6 = vsel %vm1197_vm10, %v1853_v57, %v1194_v59  ;;  %848 = vperm.xlu0 %1829, %v818_v47   ;;  %v882_v57 = vsub.f32 %v625_v5, %v874_v19  ;;  %vm1207_vm1 = vmor %vm1205_vm15, %vm1206_vm12  ;;  %v1033_v19 = vld [vmem:[%s2676_s7 + $0x30] sm:$0xff] }
 0x1aa   :  { %v1201_v20 = vmul.f32 %v1857_v48, %v1200_v8  ;;  %v1224_v23 = vmul.f32 %v1198_v6, %v1024_v37  ;;  %1860 = vrsqrt.f32 %v1138_v51  ;;  %vm809_vm4 = vweird.f32 %v732_v3 }
 0x1ab   :  { %v796_v30 = vmul.f32 0.5, %v795_v18  ;;  %vm1215_vm7 = vweird.f32 %v1138_v51  ;;  %vm1471_vm10 = vcmask 8192  }
 0x1ac   :  { %v1202_v53 = vmul.f32 0.5, %v1201_v20  ;;  %v1280_v61 = vmul.f32 %v1224_v23, %v2469_v32  ;;  %907 = vperm.xlu2 %1827, %v881_v58   ;;  %v1034_v20 = vld [vmem:[%s2676_s7 + $0x38] sm:$0xff] }
 0x1ad   :  { %v797_v4 = vsub.f32 1.5, %v796_v30  ;;  %v1422_v30 = vld [vmem:[#allocation2] sm:$0x1] }
 0x1ae   :  { %v1203_v41 = vsub.f32 1.5, %v1202_v53  ;;  %912 = vperm.xlu1 %1828, %v882_v57   ;;  %v1288_v26 = vsub.f32 %v1032_v36, %v1280_v61  ;;  %v1355_v53 = vld [vmem:[%s2677_s8] sm:$0xff]  ;;  %s1893_s8 = smov [#allocation3]  }
 0x1af   :  { %v1859_v42 = vpop.eup %1858  ;;  %v798_v28 = vmul.f32 %v1855_v16, %v797_v4  ;;  %1395 = vmatpush.msrb.mxu2 %v1355_v53 }
 0x1b0   :  { %v804_v32 = vmul.f32 %v1859_v42, %v732_v3  ;;  %v1204_v14 = vmul.f32 %v1857_v48, %v1203_v41  ;;  %v1861_v45 = vpop.eup %1860  ;;  %vm810_vm3 = vweird.f32 %v1859_v42 }
 0x1b1   :  { %v802_v43 = vsel %vm801_vm14, %v1855_v16, %v798_v28  ;;  %v1210_v15 = vmul.f32 %v1861_v45, %v1138_v51  ;;  %1318 = vperm.xlu0 %1829, %v1288_v26   ;;  %vm811_vm5 = vmor %vm809_vm4, %vm810_vm3  ;;  %vm1216_vm6 = vweird.f32 %v1861_v45 }
 0x1b2   :  { %v805_v49 = vmul.f32 %v1859_v42, %v804_v32  ;;  %v1208_v12 = vsel %vm1207_vm1, %v1857_v48, %v1204_v14  ;;  %v819_v29 = vmul.f32 %v802_v43, %v618_v38  ;;  %vm1217_vm8 = vmor %vm1215_vm7, %vm1216_vm6 }
 0x1b3   :  { %v1211_v24 = vmul.f32 %v1861_v45, %v1210_v15  ;;  %v1225_v44 = vmul.f32 %v1208_v12, %v1025_v50 }
 0x1b4   :  { %v806_v17 = vmul.f32 0.5, %v805_v49  ;;  %v875_v52 = vmul.f32 %v819_v29, %v2515_v34  ;;  %1254 = vperm.xlu2 %1827, %v1224_v23   ;;  %v1026_v34 = vld [vmem:[%s2675_s6 + $0x38] sm:$0xff] }
 0x1b5   :  { %v1212_v16 = vmul.f32 0.5, %v1211_v24  ;;  %v1281_v18 = vmul.f32 %v1225_v44, %v2498_v35  ;;  %v627_v35 = vld [vmem:[%s2672_s3 + $0x38] sm:$0xff] }
 0x1b6   :  { %v807_v47 = vsub.f32 1.5, %v806_v17  ;;  %1259 = vperm.xlu1 %1828, %v1225_v44   ;;  %v883_v59 = vsub.f32 %v626_v54, %v875_v52 }
 0x1b7   :  { %v1213_v0 = vsub.f32 1.5, %v1212_v16  ;;  %v1289_v51 = vsub.f32 %v1033_v19, %v1281_v18 }
 0x1b8   :  { %v808_v48 = vmul.f32 %v1859_v42, %v807_v47 }
 0x1b9   :  { %917 = vperm.xlu0 %1829, %v883_v59   ;;  %v1214_v8 = vmul.f32 %v1861_v45, %v1213_v0 }
 0x1ba   :  { %v812_v37 = vsel %vm811_vm5, %v1859_v42, %v808_v48 }
 0x1bb   :  { %v820_v56 = vmul.f32 %v812_v37, %v619_v7  ;;  %v1218_v3 = vsel %vm1217_vm8, %v1861_v45, %v1214_v8 }
 0x1bc   :  { %853 = vperm.xlu2 %1827, %v819_v29   ;;  %v1226_v31 = vmul.f32 %v1218_v3, %v1026_v34 }
 0x1bd   :  { %v876_v23 = vmul.f32 %v820_v56, %v2551_v2 }
 0x1be   :  { %858 = vperm.xlu1 %1828, %v820_v56   ;;  %v1282_v6 = vmul.f32 %v1226_v31, %v2570_v60 }
 0x1bf   :  { %v884_v58 = vsub.f32 %v627_v35, %v876_v23 }
 0x1c0   :  { %v1290_v5 = vsub.f32 %v1034_v20, %v1282_v6 }
 0x1c1   :  { %1264 = vperm.xlu0 %1829, %v1226_v31  }
 0x1c4   :  { %1323 = vperm.xlu2 %1827, %v1289_v51  }
 0x1c6   :  { %1328 = vperm.xlu1 %1828, %v1290_v5  }
 0x1c8   :  { %v824_v60 = vpop.permute.xlu2 %823 }
 0x1c9   :  { %1425 = vperm.xlu0 %1829, %v1422_v30   ;;  %v861_v2 = vmul.f32 %v824_v60, %v2219_v62 }
 0x1cc   :  { %922 = vperm.xlu2 %1827, %v884_v58  }
 0x1d6   :  { %v829_v36 = vpop.permute.xlu2 %828 }
 0x1d7   :  { %v862_v45 = vmul.f32 %v829_v36, %v2228_v10 }
 0x1de   :  { %v1294_v61 = vpop.permute.xlu2 %1293 }
 0x1e4   :  { %v888_v57 = vpop.permute.xlu1 %887 }
 0x1e5   :  { %v925_v28 = vadd.f32 %v888_v57, %v861_v2 }
 0x1e6   :  { %v893_v4 = vpop.permute.xlu2 %892 }
 0x1e7   :  { %v926_v29 = vadd.f32 %v893_v4, %v862_v45 }
 0x1e8   :  { %v1230_v41 = vpop.permute.xlu0 %1229 }
 0x1e9   :  { %v1267_v42 = vmul.f32 %v1230_v41, %v2230_v11 }
 0x1eb   :  { %v1331_v26 = vadd.f32 %v1294_v61, %v1267_v42 }
 0x1ed   :  { %v1339_v38 = vadd.f32 %v1331_v26, %v925_v28 }
 0x1ee   :  { %v1240_v32 = vpop.permute.xlu2 %1239 }
 0x1ef   :  { %v1347_v14 = vmax.f32 %v1339_v38, 0.0  ;;  %v1269_v52 = vmul.f32 %v1240_v32, %v2251_v33 }
 0x1f0   :  { %v1235_v43 = vpop.permute.xlu1 %1234 }
 0x1f1   :  { %1745 = vmatmul.msk.f32.vlgmr.msrb.gmra.mxu2 %vm628_vm2, %v1347_v14  ;;  %v1268_v49 = vmul.f32 %v1235_v43, %v2241_v22 }
 0x1f6   :  { %v839_v50 = vpop.permute.xlu2 %838 }
 0x1f7   :  { %v864_v7 = vmul.f32 %v839_v50, %v2260_v40 }
 0x1f8   :  { %v1299_v12 = vpop.permute.xlu1 %1298  ;;  %v834_v62 = vpop.permute.xlu0 %833 }
 0x1f9   :  { %v1332_v15 = vadd.f32 %v1299_v12, %v1268_v49  ;;  %v863_v24 = vmul.f32 %v834_v62, %v2248_v27 }
 0x1fb   :  { %v1340_v17 = vadd.f32 %v1332_v15, %v926_v29 }
 0x1fd   :  { %v1348_v54 = vmax.f32 %v1340_v17, 0.0 }
 0x1fe   :  { %v1309_v44 = vpop.permute.xlu2 %1308 }
 0x1ff   :  { %1746 = vmatmul.msk.f32.gmra.mxu2 %vm628_vm2, %v1348_v54 }
 0x200   :  { %v898_v11 = vpop.permute.xlu1 %897 }
 0x201   :  { %v927_v16 = vadd.f32 %v898_v11, %v863_v24 }
 0x203   :  { %v1304_v47 = vpop.permute.xlu0 %1303 }
 0x204   :  { %v1333_v10 = vadd.f32 %v1304_v47, %v1269_v52 }
 0x206   :  { %v1341_v59 = vadd.f32 %v1333_v10, %v927_v16  ;;  %v908_v34 = vpop.permute.xlu2 %907 }
 0x208   :  { %v1349_v22 = vmax.f32 %v1341_v59, 0.0  ;;  %v1245_v48 = vpop.permute.xlu1 %1244 }
 0x209   :  { %v1270_v0 = vmul.f32 %v1245_v48, %v2266_v46 }
 0x20a   :  { %1747 = vmatmul.msk.f32.gmra.mxu2 %vm628_vm2, %v1349_v22 }
 0x20b   :  { %v1334_v37 = vadd.f32 %v1309_v44, %v1270_v0  ;;  %v903_v8 = vpop.permute.xlu0 %902 }
 0x20c   :  { %v928_v56 = vadd.f32 %v903_v8, %v864_v7 }
 0x20e   :  { %v1342_v33 = vadd.f32 %v1334_v37, %v928_v56  ;;  %v1255_v19 = vpop.permute.xlu2 %1254 }
 0x20f   :  { %v1272_v58 = vmul.f32 %v1255_v19, %v2296_v13 }
 0x210   :  { %v844_v3 = vpop.permute.xlu1 %843  ;;  %v1350_v27 = vmax.f32 %v1342_v33, 0.0 }
 0x211   :  { %v865_v18 = vmul.f32 %v844_v3, %v2277_v55 }
 0x212   :  { %1748 = vmatmul.msk.f32.gmra.mxu2 %vm628_vm2, %v1350_v27 }
 0x213   :  { %v1250_v31 = vpop.permute.xlu0 %1249  ;;  %v929_v20 = vadd.f32 %v908_v34, %v865_v18 }
 0x214   :  { %v1271_v6 = vmul.f32 %v1250_v31, %v2283_v63 }
 0x216   :  { %v854_v30 = vpop.permute.xlu2 %853 }
 0x217   :  { %v867_v2 = vmul.f32 %v854_v30, %v2306_v21 }
 0x218   :  { %v1314_v46 = vpop.permute.xlu1 %1313 }
 0x219   :  { %v1335_v51 = vadd.f32 %v1314_v46, %v1271_v6 }
 0x21b   :  { %v1343_v5 = vadd.f32 %v1335_v51, %v929_v20  ;;  %v849_v40 = vpop.permute.xlu0 %848 }
 0x21c   :  { %v866_v60 = vmul.f32 %v849_v40, %v2294_v9 }
 0x21d   :  { %v1351_v23 = vmax.f32 %v1343_v5, 0.0 }
 0x21e   :  { %v1324_v41 = vpop.permute.xlu2 %1323 }
 0x21f   :  { %1749 = vmatmul.msk.f32.gmra.mxu2 %vm628_vm2, %v1351_v23 }
 0x220   :  { %v913_v35 = vpop.permute.xlu1 %912 }
 0x221   :  { %v930_v36 = vadd.f32 %v913_v35, %v866_v60 }
 0x223   :  { %v1319_v53 = vpop.permute.xlu0 %1318 }
 0x224   :  { %v1336_v55 = vadd.f32 %v1319_v53, %v1272_v58 }
 0x226   :  { %v1344_v61 = vadd.f32 %v1336_v55, %v930_v36  ;;  %v923_v45 = vpop.permute.xlu2 %922 }
 0x228   :  { %v1260_v4 = vpop.permute.xlu1 %1259  ;;  %v1352_v63 = vmax.f32 %v1344_v61, 0.0 }
 0x229   :  { %v1273_v57 = vmul.f32 %v1260_v4, %v2310_v25 }
 0x22a   :  { %1750 = vmatmul.msk.f32.gmra.mxu2 %vm628_vm2, %v1352_v63 }
 0x22b   :  { %v1337_v42 = vadd.f32 %v1324_v41, %v1273_v57  ;;  %v918_v28 = vpop.permute.xlu0 %917 }
 0x22c   :  { %v931_v26 = vadd.f32 %v918_v28, %v867_v2 }
 0x22e   :  { %v1345_v38 = vadd.f32 %v1337_v42, %v931_v26 }
 0x230   :  { %v859_v13 = vpop.permute.xlu1 %858  ;;  %v1353_v32 = vmax.f32 %v1345_v38, 0.0 }
 0x231   :  { %v868_v14 = vmul.f32 %v859_v13, %v2322_v1  ;;  %v1421_v1 = vld [vmem:[%s2678_s9] sm:$0x1]  ;;  %s1478_s9 = sshll.u32 %s1893_s8, 4  ;;  %s1479_s9 = int_to_ptr.vmem [resolvable:$true] %s1478_s9 }
 0x232   :  { %1751 = vmatmul.msk.f32.gmra.mxu2 %vm628_vm2, %v1353_v32 }
 0x233   :  { %v1265_v9 = vpop.permute.xlu0 %1264  ;;  %v932_v49 = vadd.f32 %v923_v45, %v868_v14 }
 0x234   :  { %v1274_v43 = vmul.f32 %v1265_v9, %v2328_v39 }
 0x238   :  { %v1329_v25 = vpop.permute.xlu1 %1328 }
 0x239   :  { %v1338_v50 = vadd.f32 %v1329_v25, %v1274_v43 }
 0x23b   :  { %v1346_v21 = vadd.f32 %v1338_v50, %v932_v49  ;;  %v1426_v39 = vpop.permute.xlu0 %1425 }
 0x23c   :  { %v1428_v44 = vperm.slane %v1426_v39, 0 }
 0x23d   :  { %v1354_v12 = vmax.f32 %v1346_v21, 0.0 }
 0x23f   :  { %1752 = vmatmul.msk.f32.gmra.mxu2 %vm628_vm2, %v1354_v12 }
 0x274   :  { %v1397_v29 = vpop.f32.mrf.mxu2 }
 0x282   :  { %v1400_v15 = vpop.f32.mrf.mxu2 }
 0x28d   :  { %v1403_v17 = vpop.f32.mrf.mxu2 }
 0x295   :  { %v1406_v62 = vpop.f32.mrf.mxu2 }
 0x2a2   :  { %v1409_v54 = vpop.f32.mrf.mxu2 }
 0x2ad   :  { %v1412_v11 = vpop.f32.mrf.mxu2 }
 0x2b5   :  { %v1415_v52 = vpop.f32.mrf.mxu2 }
 0x2c2   :  { %v1418_v24 = vpop.f32.mrf.mxu2 }
 0x2c3   :  { %1440 = vmatpush.msra.mxu3 %v1418_v24 }
 0x2c5   :  { %1441 = vmatpush.msra.mxu3 %v1415_v52 }
 0x2c7   :  { %1442 = vmatpush.msra.mxu3 %v1412_v11 }
 0x2c9   :  { %1443 = vmatpush.msra.mxu3 %v1409_v54 }
 0x2cb   :  { %1444 = vmatpush.msra.mxu3 %v1406_v62 }
 0x2cd   :  { %1445 = vmatpush.msra.mxu3 %v1403_v17 }
 0x2cf   :  { %1446 = vmatpush.msra.mxu3 %v1400_v15 }
 0x2d1   :  { %1447 = vmatpush.msra.mxu3 %v1397_v29 }
 0x2d2   :  { %1753 = vmatmul.msk.f32.vlgmr.msra.gmra.mxu3 %vm454_vm0, %v1421_v1 }
 0x355   :  { %v1449_v47 = vpop.f32.mrf.mxu3 }
 0x356   :  { %v1450_v16 = vadd.f32 %v1449_v47, %v1428_v44 }
 0x358   :  { %v1754_v10 = vmul.f32 -1.442695, %v1450_v16 }
 0x35a   :  { %1862 = vpow2.f32 %v1754_v10 }
 0x360   :  { %v1863_v59 = vpop.eup %1862 }
 0x361   :  { %v1455_v22 = vadd.f32 1.0, %v1863_v59 }
 0x363   :  { %1864 = vrcp.f32 %v1455_v22  ;;  %v1467_v37 = vand.u32 2147483648, %v1455_v22  ;;  %v1465_v8 = vand.u32 2147483647, %v1455_v22  ;;  %vm1461_vm0 = vweird.f32 %v1455_v22 }
 0x365   :  { %v1468_v33 = vor.u32 1.1754944e-38, %v1467_v37  ;;  %vm1466_vm11 = vcmp.eq.f32.partialorder %v1465_v8, 8.507059e+37 }
 0x369   :  { %v1865_v48 = vpop.eup %1864 }
 0x36a   :  { %v1457_v0 = vmul.f32 %v1865_v48, %v1455_v22  ;;  %vm1462_vm2 = vweird.f32 %v1865_v48 }
 0x36b   :  { %vm1463_vm9 = vmor %vm1461_vm0, %vm1462_vm2 }
 0x36c   :  { %v1458_v7 = vsub.f32 1.0, %v1457_v0 }
 0x36e   :  { %v1459_v34 = vmul.f32 %v1865_v48, %v1458_v7 }
 0x370   :  { %v1460_v56 = vadd.f32 %v1865_v48, %v1459_v34 }
 0x372   :  { %v1464_v3 = vsel %vm1463_vm9, %v1865_v48, %v1460_v56 }
 0x373   :  { %v1469_v27 = vsel %vm1466_vm11, %v1468_v33, %v1464_v3 }
 0x374   :  { %1472 = vst.msk [vmem:[#allocation3] sm:$0x1] %vm1471_vm10, %v1469_v27 }
 0x375   :  { %1483 = dma.vmem_to_hbm [thread:$0]  %s1479_s9, 16, %s1481_s13, [#allocation4]  }
 0x376   :  { %1890 = dma.done.wait [#allocation4], 16  }
 0x377   :  { %1891 = vsyncadd [#allocation4], 4294967280 }
 0x378   :  { %1488 = vsyncpa [#allocation4], 1 }

</bundles_post_ra>
